<compile_context>
chip_gen: v5e
topology: v5e:2x2
jax: 0.10.0
libtpu: 0.0.40
codegen_flags: <defaults>
</compile_context>

<pallas_src>
import functools

import jax
import jax.numpy as jnp
from jax.experimental import pallas as pl
from jax.experimental.pallas import tpu as pltpu


def _round_up(v, m):
    return (v + m - 1) // m * m


# ----------------------------------------------------------------------------
# Fused RNet kernel.
#
# Packed activation layout inside the kernel (per batch tile of `tn` images):
#     buffer[(h * tn + n), (w * C + c)]  ==  activation[n, h, w, c]
# ----------------------------------------------------------------------------
def _rnet_kernel(x_ref, b1w_ref, b2w_ref, b3w_ref,
                 bias1_ref, bias2_ref, bias3_ref,
                 w4_ref, bias4_ref, w5_ref, bias5_ref,
                 alpha_ref,
                 out_ref,
                 y1_s, p1_s, y2_s, p2_s, *, tn):
    f32 = jnp.float32

    def prelu(y, a):
        return jnp.where(y > 0, y, a * y)

    def conv_banded(src_ref, bw_ref, bias_ref, alpha, kh, oh):
        # y[(oh*tn+n), :] = sum_di src[((oh+di)*tn+n), :] @ B_di   (+ bias, PReLU)
        acc = jnp.dot(src_ref[0:oh * tn, :], bw_ref[0],
                      preferred_element_type=f32)
        for di in range(1, kh):
            acc = acc + jnp.dot(src_ref[di * tn:(di + oh) * tn, :], bw_ref[di],
                                preferred_element_type=f32)
        return prelu(acc + bias_ref[...], alpha)

    a1 = alpha_ref[0, 0]
    a2 = alpha_ref[0, 1]
    a3 = alpha_ref[0, 2]
    a4 = alpha_ref[0, 3]

    # ---- conv1 (3->28, k3) + PReLU : (24,24,3) -> (22,22,28) -----------------
    y1_s[...] = conv_banded(x_ref, b1w_ref, bias1_ref, a1, kh=3, oh=22)

    # ---- maxpool 3x3 / stride 2 (floor) : (22,22,28) -> (10,10,28) -----------
    c1 = 28
    for ph in range(10):
        r = jnp.maximum(
            jnp.maximum(y1_s[(2 * ph) * tn:(2 * ph + 1) * tn, :],
                        y1_s[(2 * ph + 1) * tn:(2 * ph + 2) * tn, :]),
            y1_s[(2 * ph + 2) * tn:(2 * ph + 3) * tn, :])
        m = jnp.maximum(jnp.maximum(r[:, 0:20 * c1], r[:, c1:21 * c1]),
                        r[:, 2 * c1:22 * c1])
        for pw in range(10):
            p1_s[ph * tn:(ph + 1) * tn, pw * c1:(pw + 1) * c1] = (
                m[:, 2 * pw * c1:(2 * pw + 1) * c1])

    # ---- conv2 (28->48, k3) + PReLU : (10,10,28) -> (8,8,48) -----------------
    y2_s[...] = conv_banded(p1_s, b2w_ref, bias2_ref, a2, kh=3, oh=8)

    # ---- maxpool 3x3 / stride 2 (floor) : (8,8,48) -> (3,3,48) ---------------
    c2 = 48
    for ph in range(3):
        r = jnp.maximum(
            jnp.maximum(y2_s[(2 * ph) * tn:(2 * ph + 1) * tn, :],
                        y2_s[(2 * ph + 1) * tn:(2 * ph + 2) * tn, :]),
            y2_s[(2 * ph + 2) * tn:(2 * ph + 3) * tn, :])
        m = jnp.maximum(jnp.maximum(r[:, 0:5 * c2], r[:, c2:6 * c2]),
                        r[:, 2 * c2:7 * c2])
        for pw in range(3):
            p2_s[ph * tn:(ph + 1) * tn, pw * c2:(pw + 1) * c2] = (
                m[:, 2 * pw * c2:(2 * pw + 1) * c2])

    # ---- conv3 (48->64, k2) + PReLU : (3,3,48) -> (2,2,64) -------------------
    y3 = conv_banded(p2_s, b3w_ref, bias3_ref, a3, kh=2, oh=2)   # (2*tn, 128)

    # ---- fc1 (256->128) + PReLU  (flatten permutation folded into w4) --------
    z4 = (jnp.dot(y3[0:tn, :], w4_ref[0:128, :], preferred_element_type=f32)
          + jnp.dot(y3[tn:2 * tn, :], w4_ref[128:256, :],
                    preferred_element_type=f32)
          + bias4_ref[...])
    z4 = prelu(z4, a4)

    # ---- merged heads: [det(1) | box(4)], sigmoid on column 0 only -----------
    z5 = jnp.dot(z4, w5_ref[...], preferred_element_type=f32) + bias5_ref[...]
    col = jax.lax.broadcasted_iota(jnp.int32, z5.shape, 1)
    out_ref[...] = jnp.where(col == 0, jax.nn.sigmoid(z5), z5)


# ----------------------------------------------------------------------------
# Wrapper-side weight preparation (tiny, traced once per call)
# ----------------------------------------------------------------------------
def _banded_weights(w, out_w):
    """(kh, kw, Cin, Cout) conv kernel -> (kh, W*Cin, OW*Cout) banded matrices.

    B_di[w*Cin + ci, ow*Cout + co] = w[di, w-ow, ci, co]  if 0 <= w-ow < kw.
    """
    kh, kw, cin, cout = w.shape
    in_w = out_w + kw - 1
    sel = (jnp.arange(in_w)[None, None, :]
           == (jnp.arange(out_w)[None, :, None]
               + jnp.arange(kw)[:, None, None])).astype(w.dtype)  # (kw,OW,W)
    b = jnp.einsum('jow,djcf->dwcof', sel, w)        # (kh, W, Cin, OW, Cout)
    return b.reshape(kh, in_w * cin, out_w * cout)


# ----------------------------------------------------------------------------
# Deterministic parameter init (xavier_uniform weights, bias=0.1, PReLU=0.25)
# ----------------------------------------------------------------------------
def xavier_uniform(key, shape, fan_in, fan_out):
    limit = (6.0 / (fan_in + fan_out)) ** 0.5
    return jax.random.uniform(key, shape, jnp.float32, -limit, limit)


def init_params(key):
    ks = jax.random.split(key, 7)
    p = {}
    # conv weights stored as [kh, kw, Cin, Cout]
    p["w1"] = xavier_uniform(ks[0], (3, 3, 3, 28), 3 * 9, 28 * 9)
    p["b1"] = jnp.full((28,), 0.1, jnp.float32)
    p["w2"] = xavier_uniform(ks[1], (3, 3, 28, 48), 28 * 9, 48 * 9)
    p["b2"] = jnp.full((48,), 0.1, jnp.float32)
    p["w3"] = xavier_uniform(ks[2], (2, 2, 48, 64), 48 * 4, 64 * 4)
    p["b3"] = jnp.full((64,), 0.1, jnp.float32)
    # fc weights stored as [in, out]; w4 rows follow PyTorch's NCHW flatten.
    p["w4"] = xavier_uniform(ks[3], (256, 128), 256, 128)
    p["b4"] = jnp.full((128,), 0.1, jnp.float32)
    p["w5_1"] = xavier_uniform(ks[4], (128, 1), 128, 1)
    p["b5_1"] = jnp.full((1,), 0.1, jnp.float32)
    p["w5_2"] = xavier_uniform(ks[5], (128, 4), 128, 4)
    p["b5_2"] = jnp.full((4,), 0.1, jnp.float32)
    # conv5_3 (landmark head) exists in the module but is unused in forward().
    p["w5_3"] = xavier_uniform(ks[6], (128, 10), 128, 10)
    p["b5_3"] = jnp.full((10,), 0.1, jnp.float32)
    # PReLU slopes (nn.PReLU default: single parameter = 0.25)
    p["a1"] = 0.25
    p["a2"] = 0.25
    p["a3"] = 0.25
    p["a4"] = 0.25
    return p


# ----------------------------------------------------------------------------
# Forward pass
# ----------------------------------------------------------------------------
def rnet_forward(params, x_nchw, *, tile_n=32):
    N, C, H, W = x_nchw.shape
    assert (C, H, W) == (3, 24, 24), "RNet expects (N, 3, 24, 24) inputs"

    x = jnp.transpose(x_nchw, (0, 2, 3, 1)).astype(jnp.float32)   # NHWC

    tn = min(tile_n, _round_up(N, 8))
    n_pad = _round_up(N, tn)
    nb = n_pad // tn
    if n_pad != N:
        x = jnp.pad(x, ((0, n_pad - N), (0, 0), (0, 0), (0, 0)))

    # packed layout per batch tile: rows = h*tn + n, lanes = w*3 + c
    x_l = (x.reshape(nb, tn, 24, 24 * 3)
            .transpose(0, 2, 1, 3)
            .reshape(nb * 24 * tn, 24 * 3))

    # banded conv weights + tiled biases (lane layout ow*Cout + co)
    b1w = _banded_weights(params["w1"], 22)            # (3,  72, 616)
    b2w = _banded_weights(params["w2"], 8)             # (3, 280, 384)
    b3w = _banded_weights(params["w3"], 2)             # (2, 144, 128)
    bias1 = jnp.tile(params["b1"], 22).reshape(1, 22 * 28)
    bias2 = jnp.tile(params["b2"], 8).reshape(1, 8 * 48)
    bias3 = jnp.tile(params["b3"], 2).reshape(1, 2 * 64)

    # fold PyTorch's NCHW flatten (x.view(-1, 256)) into a row perm of w4:
    # kernel fc input lane l = oh*128 + ow*64 + co  <->  torch index co*4+oh*2+ow
    l = jnp.arange(256)
    perm = (l % 64) * 4 + (l // 128) * 2 + ((l // 64) % 2)
    w4p = params["w4"][perm, :]                        # (256, 128)
    bias4 = params["b4"].reshape(1, 128)

    # merged det/box heads (landmark head is unused in forward -> dropped)
    w5 = jnp.concatenate([params["w5_1"], params["w5_2"]], axis=1)   # (128, 5)
    bias5 = jnp.concatenate([params["b5_1"], params["b5_2"]]).reshape(1, 5)

    alphas = jnp.asarray(
        [params["a1"], params["a2"], params["a3"], params["a4"]],
        dtype=jnp.float32).reshape(1, 4)

    macs = (22 * 72 * 616 * 3 + 8 * 280 * 384 * 3 + 2 * 144 * 128 * 2
            + 256 * 128 + 128 * 5)
    flops = 2 * n_pad * macs
    bytes_accessed = 4 * (x_l.size + b1w.size + b2w.size + b3w.size
                          + bias1.size + bias2.size + bias3.size
                          + w4p.size + bias4.size + w5.size + bias5.size
                          + n_pad * 5)

    kernel = functools.partial(_rnet_kernel, tn=tn)

    out = pl.pallas_call(
        kernel,
        out_shape=jax.ShapeDtypeStruct((n_pad, 5), jnp.float32),
        grid_spec=pltpu.PrefetchScalarGridSpec(
            num_scalar_prefetch=0,
            grid=(nb,),
            in_specs=[
                pl.BlockSpec((24 * tn, 72), lambda i: (i, 0)),      # input tile
                pl.BlockSpec(b1w.shape, lambda i: (0, 0, 0)),
                pl.BlockSpec(b2w.shape, lambda i: (0, 0, 0)),
                pl.BlockSpec(b3w.shape, lambda i: (0, 0, 0)),
                pl.BlockSpec(bias1.shape, lambda i: (0, 0)),
                pl.BlockSpec(bias2.shape, lambda i: (0, 0)),
                pl.BlockSpec(bias3.shape, lambda i: (0, 0)),
                pl.BlockSpec(w4p.shape, lambda i: (0, 0)),
                pl.BlockSpec(bias4.shape, lambda i: (0, 0)),
                pl.BlockSpec(w5.shape, lambda i: (0, 0)),
                pl.BlockSpec(bias5.shape, lambda i: (0, 0)),
                pl.BlockSpec((1, 4), lambda i: (0, 0),
                             memory_space=pltpu.SMEM),
            ],
            out_specs=pl.BlockSpec((tn, 5), lambda i: (i, 0)),
            scratch_shapes=[
                pltpu.VMEM((22 * tn, 22 * 28), jnp.float32),   # conv1 out
                pltpu.VMEM((10 * tn, 10 * 28), jnp.float32),   # pool1 out
                pltpu.VMEM((8 * tn, 8 * 48), jnp.float32),     # conv2 out
                pltpu.VMEM((3 * tn, 3 * 48), jnp.float32),     # pool2 out
            ]),
        compiler_params=pltpu.CompilerParams(
            dimension_semantics=("parallel",),
            vmem_limit_bytes=32 * 1024 * 1024),
        cost_estimate=pl.CostEstimate(
            flops=flops, transcendentals=n_pad, bytes_accessed=bytes_accessed),
    )(x_l, b1w, b2w, b3w, bias1, bias2, bias3, w4p, bias4, w5, bias5, alphas)

    det = out[:N, 0:1]
    box = out[:N, 1:5]
    return det, box


if __name__ == "__main__":
    key = jax.random.PRNGKey(0)
    pkey, xkey = jax.random.split(key)
    params = init_params(pkey)

    # RNet expects 24x24 RGB crops (required so the 64*2*2 flatten matches).
    x = jax.random.normal(xkey, (2, 3, 24, 24), dtype=jnp.float32)

    fwd = jax.jit(rnet_forward)
    det, box = fwd(params, x)
    det, box = jax.block_until_ready((det, box))

    assert det.shape == (2, 1) and box.shape == (2, 4)
    assert bool(jnp.all((det >= 0.0) & (det <= 1.0)))
    assert bool(jnp.all(jnp.isfinite(det))) and bool(jnp.all(jnp.isfinite(box)))
    print("KERNEL_OK")
</pallas_src>

<mosaic_0001>
module attributes {stable_mosaic.version = 11 : i64} {
  func.func @_rnet_kernel(%arg0: i32, %arg1: memref<192x72xf32, #tpu.memory_space<vmem>>, %arg2: memref<3x72x616xf32, #tpu.memory_space<vmem>>, %arg3: memref<3x280x384xf32, #tpu.memory_space<vmem>>, %arg4: memref<2x144x128xf32, #tpu.memory_space<vmem>>, %arg5: memref<1x616xf32, #tpu.memory_space<vmem>>, %arg6: memref<1x384xf32, #tpu.memory_space<vmem>>, %arg7: memref<1x128xf32, #tpu.memory_space<vmem>>, %arg8: memref<256x128xf32, #tpu.memory_space<vmem>>, %arg9: memref<1x128xf32, #tpu.memory_space<vmem>>, %arg10: memref<128x5xf32, #tpu.memory_space<vmem>>, %arg11: memref<1x5xf32, #tpu.memory_space<vmem>>, %arg12: memref<1x4xf32, #tpu.memory_space<smem>>, %arg13: memref<8x5xf32, #tpu.memory_space<vmem>>, %arg14: memref<176x616xf32, #tpu.memory_space<vmem>>, %arg15: memref<80x280xf32, #tpu.memory_space<vmem>>, %arg16: memref<64x384xf32, #tpu.memory_space<vmem>>, %arg17: memref<24x144xf32, #tpu.memory_space<vmem>>) attributes {dimension_semantics = [#tpu.dimension_semantics<parallel>], iteration_bounds = array<i64: 1>, scalar_prefetch = 0 : i64, scratch_operands = 4 : i64, tpu.core_type = #tpu.core_type<tc>, window_params = [{transform_indices = @transform_0, window_bounds = array<i64: 192, 72>}, {pipeline_mode = #tpu.pipeline_mode<synchronous>, transform_indices = @transform_1, window_bounds = array<i64: 3, 72, 616>}, {pipeline_mode = #tpu.pipeline_mode<synchronous>, transform_indices = @transform_2, window_bounds = array<i64: 3, 280, 384>}, {pipeline_mode = #tpu.pipeline_mode<synchronous>, transform_indices = @transform_3, window_bounds = array<i64: 2, 144, 128>}, {pipeline_mode = #tpu.pipeline_mode<synchronous>, transform_indices = @transform_4, window_bounds = array<i64: 1, 616>}, {pipeline_mode = #tpu.pipeline_mode<synchronous>, transform_indices = @transform_5, window_bounds = array<i64: 1, 384>}, {pipeline_mode = #tpu.pipeline_mode<synchronous>, transform_indices = @transform_6, window_bounds = array<i64: 1, 128>}, {pipeline_mode = #tpu.pipeline_mode<synchronous>, transform_indices = @transform_7, window_bounds = array<i64: 256, 128>}, {pipeline_mode = #tpu.pipeline_mode<synchronous>, transform_indices = @transform_8, window_bounds = array<i64: 1, 128>}, {pipeline_mode = #tpu.pipeline_mode<synchronous>, transform_indices = @transform_9, window_bounds = array<i64: 128, 5>}, {pipeline_mode = #tpu.pipeline_mode<synchronous>, transform_indices = @transform_10, window_bounds = array<i64: 1, 5>}, {transform_indices = @transform_11, window_bounds = array<i64: 1, 4>}, {transform_indices = @transform_12, window_bounds = array<i64: 8, 5>}]} {
    %c0 = arith.constant 0 : index
    %c0_0 = arith.constant 0 : index
    %0 = memref.load %arg12[%c0, %c0_0] : memref<1x4xf32, #tpu.memory_space<smem>>
    %c0_1 = arith.constant 0 : index
    %c1 = arith.constant 1 : index
    %1 = memref.load %arg12[%c0_1, %c1] : memref<1x4xf32, #tpu.memory_space<smem>>
    %c0_2 = arith.constant 0 : index
    %c2 = arith.constant 2 : index
    %2 = memref.load %arg12[%c0_2, %c2] : memref<1x4xf32, #tpu.memory_space<smem>>
    %c0_3 = arith.constant 0 : index
    %c3 = arith.constant 3 : index
    %3 = memref.load %arg12[%c0_3, %c3] : memref<1x4xf32, #tpu.memory_space<smem>>
    %c0_4 = arith.constant 0 : index
    %c0_5 = arith.constant 0 : index
    %4 = vector.load %arg1[%c0_4, %c0_5] : memref<192x72xf32, #tpu.memory_space<vmem>>, vector<176x72xf32>
    %c0_6 = arith.constant 0 : index
    %c0_7 = arith.constant 0 : index
    %c0_8 = arith.constant 0 : index
    %5 = vector.load %arg2[%c0_6, %c0_7, %c0_8] : memref<3x72x616xf32, #tpu.memory_space<vmem>>, vector<1x72x616xf32>
    %6 = vector.shape_cast %5 : vector<1x72x616xf32> to vector<72x616xf32>
    %cst = arith.constant dense<0.000000e+00> : vector<176x616xf32>
    %7 = tpu.matmul %4, %6, %cst {dimension_numbers = #tpu.dot_dimension_numbers<[1], [0], [0], [1], [0, 0, 1, 1], [], []>} : vector<176x72xf32>, vector<72x616xf32>, vector<176x616xf32> -> vector<176x616xf32>
    %c8 = arith.constant 8 : index
    %c0_9 = arith.constant 0 : index
    %8 = vector.load %arg1[%c8, %c0_9] : memref<192x72xf32, #tpu.memory_space<vmem>>, vector<176x72xf32>
    %c1_10 = arith.constant 1 : index
    %c0_11 = arith.constant 0 : index
    %c0_12 = arith.constant 0 : index
    %9 = vector.load %arg2[%c1_10, %c0_11, %c0_12] : memref<3x72x616xf32, #tpu.memory_space<vmem>>, vector<1x72x616xf32>
    %10 = vector.shape_cast %9 : vector<1x72x616xf32> to vector<72x616xf32>
    %cst_13 = arith.constant dense<0.000000e+00> : vector<176x616xf32>
    %11 = tpu.matmul %8, %10, %cst_13 {dimension_numbers = #tpu.dot_dimension_numbers<[1], [0], [0], [1], [0, 0, 1, 1], [], []>} : vector<176x72xf32>, vector<72x616xf32>, vector<176x616xf32> -> vector<176x616xf32>
    %12 = arith.addf %7, %11 : vector<176x616xf32>
    %c16 = arith.constant 16 : index
    %c0_14 = arith.constant 0 : index
    %13 = vector.load %arg1[%c16, %c0_14] : memref<192x72xf32, #tpu.memory_space<vmem>>, vector<176x72xf32>
    %c2_15 = arith.constant 2 : index
    %c0_16 = arith.constant 0 : index
    %c0_17 = arith.constant 0 : index
    %14 = vector.load %arg2[%c2_15, %c0_16, %c0_17] : memref<3x72x616xf32, #tpu.memory_space<vmem>>, vector<1x72x616xf32>
    %15 = vector.shape_cast %14 : vector<1x72x616xf32> to vector<72x616xf32>
    %cst_18 = arith.constant dense<0.000000e+00> : vector<176x616xf32>
    %16 = tpu.matmul %13, %15, %cst_18 {dimension_numbers = #tpu.dot_dimension_numbers<[1], [0], [0], [1], [0, 0, 1, 1], [], []>} : vector<176x72xf32>, vector<72x616xf32>, vector<176x616xf32> -> vector<176x616xf32>
    %17 = arith.addf %12, %16 : vector<176x616xf32>
    %c0_19 = arith.constant 0 : index
    %c0_20 = arith.constant 0 : index
    %18 = vector.load %arg5[%c0_19, %c0_20] : memref<1x616xf32, #tpu.memory_space<vmem>>, vector<1x616xf32>
    %19 = vector.broadcast %18 : vector<1x616xf32> to vector<176x616xf32>
    %20 = arith.addf %17, %19 : vector<176x616xf32>
    %cst_21 = arith.constant 0.000000e+00 : f32
    %21 = vector.broadcast %cst_21 : f32 to vector<176x616xf32>
    %22 = arith.cmpf ogt, %20, %21 : vector<176x616xf32>
    %23 = vector.broadcast %0 : f32 to vector<176x616xf32>
    %24 = arith.mulf %23, %20 : vector<176x616xf32>
    %25 = arith.select %22, %20, %24 : vector<176x616xi1>, vector<176x616xf32>
    %c0_22 = arith.constant 0 : index
    %c0_23 = arith.constant 0 : index
    %26 = vector.load %arg14[%c0_22, %c0_23] : memref<176x616xf32, #tpu.memory_space<vmem>>, vector<176x616xf32>
    tpu.vector_store %arg14[%c0_22, %c0_23], %25 {strides = array<i32>} : memref<176x616xf32, #tpu.memory_space<vmem>>, vector<176x616xf32>,
    %c0_24 = arith.constant 0 : index
    %c0_25 = arith.constant 0 : index
    %27 = vector.load %arg14[%c0_24, %c0_25] : memref<176x616xf32, #tpu.memory_space<vmem>>, vector<8x616xf32>
    %c8_26 = arith.constant 8 : index
    %c0_27 = arith.constant 0 : index
    %28 = vector.load %arg14[%c8_26, %c0_27] : memref<176x616xf32, #tpu.memory_space<vmem>>, vector<8x616xf32>
    %29 = arith.maximumf %27, %28 : vector<8x616xf32>
    %c16_28 = arith.constant 16 : index
    %c0_29 = arith.constant 0 : index
    %30 = vector.load %arg14[%c16_28, %c0_29] : memref<176x616xf32, #tpu.memory_space<vmem>>, vector<8x616xf32>
    %31 = arith.maximumf %29, %30 : vector<8x616xf32>
    %32 = vector.extract_strided_slice %31 {offsets = [0, 0], sizes = [8, 560], strides = [1, 1]} : vector<8x616xf32> to vector<8x560xf32>
    %33 = vector.extract_strided_slice %31 {offsets = [0, 28], sizes = [8, 560], strides = [1, 1]} : vector<8x616xf32> to vector<8x560xf32>
    %34 = arith.maximumf %32, %33 : vector<8x560xf32>
    %35 = vector.extract_strided_slice %31 {offsets = [0, 56], sizes = [8, 560], strides = [1, 1]} : vector<8x616xf32> to vector<8x560xf32>
    %36 = arith.maximumf %34, %35 : vector<8x560xf32>
    %37 = vector.extract_strided_slice %36 {offsets = [0, 0], sizes = [8, 28], strides = [1, 1]} : vector<8x560xf32> to vector<8x28xf32>
    %c0_30 = arith.constant 0 : index
    %c0_31 = arith.constant 0 : index
    %38 = vector.load %arg15[%c0_30, %c0_31] : memref<80x280xf32, #tpu.memory_space<vmem>>, vector<8x28xf32>
    tpu.vector_store %arg15[%c0_30, %c0_31], %37 {strides = array<i32>} : memref<80x280xf32, #tpu.memory_space<vmem>>, vector<8x28xf32>,
    %39 = vector.extract_strided_slice %36 {offsets = [0, 56], sizes = [8, 28], strides = [1, 1]} : vector<8x560xf32> to vector<8x28xf32>
    %c0_32 = arith.constant 0 : index
    %c28 = arith.constant 28 : index
    %40 = vector.load %arg15[%c0_32, %c28] : memref<80x280xf32, #tpu.memory_space<vmem>>, vector<8x28xf32>
    tpu.vector_store %arg15[%c0_32, %c28], %39 {strides = array<i32>} : memref<80x280xf32, #tpu.memory_space<vmem>>, vector<8x28xf32>,
    %41 = vector.extract_strided_slice %36 {offsets = [0, 112], sizes = [8, 28], strides = [1, 1]} : vector<8x560xf32> to vector<8x28xf32>
    %c0_33 = arith.constant 0 : index
    %c56 = arith.constant 56 : index
    %42 = vector.load %arg15[%c0_33, %c56] : memref<80x280xf32, #tpu.memory_space<vmem>>, vector<8x28xf32>
    tpu.vector_store %arg15[%c0_33, %c56], %41 {strides = array<i32>} : memref<80x280xf32, #tpu.memory_space<vmem>>, vector<8x28xf32>,
    %43 = vector.extract_strided_slice %36 {offsets = [0, 168], sizes = [8, 28], strides = [1, 1]} : vector<8x560xf32> to vector<8x28xf32>
    %c0_34 = arith.constant 0 : index
    %c84 = arith.constant 84 : index
    %44 = vector.load %arg15[%c0_34, %c84] : memref<80x280xf32, #tpu.memory_space<vmem>>, vector<8x28xf32>
    tpu.vector_store %arg15[%c0_34, %c84], %43 {strides = array<i32>} : memref<80x280xf32, #tpu.memory_space<vmem>>, vector<8x28xf32>,
    %45 = vector.extract_strided_slice %36 {offsets = [0, 224], sizes = [8, 28], strides = [1, 1]} : vector<8x560xf32> to vector<8x28xf32>
    %c0_35 = arith.constant 0 : index
    %c112 = arith.constant 112 : index
    %46 = vector.load %arg15[%c0_35, %c112] : memref<80x280xf32, #tpu.memory_space<vmem>>, vector<8x28xf32>
    tpu.vector_store %arg15[%c0_35, %c112], %45 {strides = array<i32>} : memref<80x280xf32, #tpu.memory_space<vmem>>, vector<8x28xf32>,
    %47 = vector.extract_strided_slice %36 {offsets = [0, 280], sizes = [8, 28], strides = [1, 1]} : vector<8x560xf32> to vector<8x28xf32>
    %c0_36 = arith.constant 0 : index
    %c140 = arith.constant 140 : index
    %48 = vector.load %arg15[%c0_36, %c140] : memref<80x280xf32, #tpu.memory_space<vmem>>, vector<8x28xf32>
    tpu.vector_store %arg15[%c0_36, %c140], %47 {strides = array<i32>} : memref<80x280xf32, #tpu.memory_space<vmem>>, vector<8x28xf32>,
    %49 = vector.extract_strided_slice %36 {offsets = [0, 336], sizes = [8, 28], strides = [1, 1]} : vector<8x560xf32> to vector<8x28xf32>
    %c0_37 = arith.constant 0 : index
    %c168 = arith.constant 168 : index
    %50 = vector.load %arg15[%c0_37, %c168] : memref<80x280xf32, #tpu.memory_space<vmem>>, vector<8x28xf32>
    tpu.vector_store %arg15[%c0_37, %c168], %49 {strides = array<i32>} : memref<80x280xf32, #tpu.memory_space<vmem>>, vector<8x28xf32>,
    %51 = vector.extract_strided_slice %36 {offsets = [0, 392], sizes = [8, 28], strides = [1, 1]} : vector<8x560xf32> to vector<8x28xf32>
    %c0_38 = arith.constant 0 : index
    %c196 = arith.constant 196 : index
    %52 = vector.load %arg15[%c0_38, %c196] : memref<80x280xf32, #tpu.memory_space<vmem>>, vector<8x28xf32>
    tpu.vector_store %arg15[%c0_38, %c196], %51 {strides = array<i32>} : memref<80x280xf32, #tpu.memory_space<vmem>>, vector<8x28xf32>,
    %53 = vector.extract_strided_slice %36 {offsets = [0, 448], sizes = [8, 28], strides = [1, 1]} : vector<8x560xf32> to vector<8x28xf32>
    %c0_39 = arith.constant 0 : index
    %c224 = arith.constant 224 : index
    %54 = vector.load %arg15[%c0_39, %c224] : memref<80x280xf32, #tpu.memory_space<vmem>>, vector<8x28xf32>
    tpu.vector_store %arg15[%c0_39, %c224], %53 {strides = array<i32>} : memref<80x280xf32, #tpu.memory_space<vmem>>, vector<8x28xf32>,
    %55 = vector.extract_strided_slice %36 {offsets = [0, 504], sizes = [8, 28], strides = [1, 1]} : vector<8x560xf32> to vector<8x28xf32>
    %c0_40 = arith.constant 0 : index
    %c252 = arith.constant 252 : index
    %56 = vector.load %arg15[%c0_40, %c252] : memref<80x280xf32, #tpu.memory_space<vmem>>, vector<8x28xf32>
    tpu.vector_store %arg15[%c0_40, %c252], %55 {strides = array<i32>} : memref<80x280xf32, #tpu.memory_space<vmem>>, vector<8x28xf32>,
    %c16_41 = arith.constant 16 : index
    %c0_42 = arith.constant 0 : index
    %57 = vector.load %arg14[%c16_41, %c0_42] : memref<176x616xf32, #tpu.memory_space<vmem>>, vector<8x616xf32>
    %c24 = arith.constant 24 : index
    %c0_43 = arith.constant 0 : index
    %58 = vector.load %arg14[%c24, %c0_43] : memref<176x616xf32, #tpu.memory_space<vmem>>, vector<8x616xf32>
    %59 = arith.maximumf %57, %58 : vector<8x616xf32>
    %c32 = arith.constant 32 : index
    %c0_44 = arith.constant 0 : index
    %60 = vector.load %arg14[%c32, %c0_44] : memref<176x616xf32, #tpu.memory_space<vmem>>, vector<8x616xf32>
    %61 = arith.maximumf %59, %60 : vector<8x616xf32>
    %62 = vector.extract_strided_slice %61 {offsets = [0, 0], sizes = [8, 560], strides = [1, 1]} : vector<8x616xf32> to vector<8x560xf32>
    %63 = vector.extract_strided_slice %61 {offsets = [0, 28], sizes = [8, 560], strides = [1, 1]} : vector<8x616xf32> to vector<8x560xf32>
    %64 = arith.maximumf %62, %63 : vector<8x560xf32>
    %65 = vector.extract_strided_slice %61 {offsets = [0, 56], sizes = [8, 560], strides = [1, 1]} : vector<8x616xf32> to vector<8x560xf32>
    %66 = arith.maximumf %64, %65 : vector<8x560xf32>
    %67 = vector.extract_strided_slice %66 {offsets = [0, 0], sizes = [8, 28], strides = [1, 1]} : vector<8x560xf32> to vector<8x28xf32>
    %c8_45 = arith.constant 8 : index
    %c0_46 = arith.constant 0 : index
    %68 = vector.load %arg15[%c8_45, %c0_46] : memref<80x280xf32, #tpu.memory_space<vmem>>, vector<8x28xf32>
    tpu.vector_store %arg15[%c8_45, %c0_46], %67 {strides = array<i32>} : memref<80x280xf32, #tpu.memory_space<vmem>>, vector<8x28xf32>,
    %69 = vector.extract_strided_slice %66 {offsets = [0, 56], sizes = [8, 28], strides = [1, 1]} : vector<8x560xf32> to vector<8x28xf32>
    %c8_47 = arith.constant 8 : index
    %c28_48 = arith.constant 28 : index
    %70 = vector.load %arg15[%c8_47, %c28_48] : memref<80x280xf32, #tpu.memory_space<vmem>>, vector<8x28xf32>
    tpu.vector_store %arg15[%c8_47, %c28_48], %69 {strides = array<i32>} : memref<80x280xf32, #tpu.memory_space<vmem>>, vector<8x28xf32>,
    %71 = vector.extract_strided_slice %66 {offsets = [0, 112], sizes = [8, 28], strides = [1, 1]} : vector<8x560xf32> to vector<8x28xf32>
    %c8_49 = arith.constant 8 : index
    %c56_50 = arith.constant 56 : index
    %72 = vector.load %arg15[%c8_49, %c56_50] : memref<80x280xf32, #tpu.memory_space<vmem>>, vector<8x28xf32>
    tpu.vector_store %arg15[%c8_49, %c56_50], %71 {strides = array<i32>} : memref<80x280xf32, #tpu.memory_space<vmem>>, vector<8x28xf32>,
    %73 = vector.extract_strided_slice %66 {offsets = [0, 168], sizes = [8, 28], strides = [1, 1]} : vector<8x560xf32> to vector<8x28xf32>
    %c8_51 = arith.constant 8 : index
    %c84_52 = arith.constant 84 : index
    %74 = vector.load %arg15[%c8_51, %c84_52] : memref<80x280xf32, #tpu.memory_space<vmem>>, vector<8x28xf32>
    tpu.vector_store %arg15[%c8_51, %c84_52], %73 {strides = array<i32>} : memref<80x280xf32, #tpu.memory_space<vmem>>, vector<8x28xf32>,
    %75 = vector.extract_strided_slice %66 {offsets = [0, 224], sizes = [8, 28], strides = [1, 1]} : vector<8x560xf32> to vector<8x28xf32>
    %c8_53 = arith.constant 8 : index
    %c112_54 = arith.constant 112 : index
    %76 = vector.load %arg15[%c8_53, %c112_54] : memref<80x280xf32, #tpu.memory_space<vmem>>, vector<8x28xf32>
    tpu.vector_store %arg15[%c8_53, %c112_54], %75 {strides = array<i32>} : memref<80x280xf32, #tpu.memory_space<vmem>>, vector<8x28xf32>,
    %77 = vector.extract_strided_slice %66 {offsets = [0, 280], sizes = [8, 28], strides = [1, 1]} : vector<8x560xf32> to vector<8x28xf32>
    %c8_55 = arith.constant 8 : index
    %c140_56 = arith.constant 140 : index
    %78 = vector.load %arg15[%c8_55, %c140_56] : memref<80x280xf32, #tpu.memory_space<vmem>>, vector<8x28xf32>
    tpu.vector_store %arg15[%c8_55, %c140_56], %77 {strides = array<i32>} : memref<80x280xf32, #tpu.memory_space<vmem>>, vector<8x28xf32>,
    %79 = vector.extract_strided_slice %66 {offsets = [0, 336], sizes = [8, 28], strides = [1, 1]} : vector<8x560xf32> to vector<8x28xf32>
    %c8_57 = arith.constant 8 : index
    %c168_58 = arith.constant 168 : index
    %80 = vector.load %arg15[%c8_57, %c168_58] : memref<80x280xf32, #tpu.memory_space<vmem>>, vector<8x28xf32>
    tpu.vector_store %arg15[%c8_57, %c168_58], %79 {strides = array<i32>} : memref<80x280xf32, #tpu.memory_space<vmem>>, vector<8x28xf32>,
    %81 = vector.extract_strided_slice %66 {offsets = [0, 392], sizes = [8, 28], strides = [1, 1]} : vector<8x560xf32> to vector<8x28xf32>
    %c8_59 = arith.constant 8 : index
    %c196_60 = arith.constant 196 : index
    %82 = vector.load %arg15[%c8_59, %c196_60] : memref<80x280xf32, #tpu.memory_space<vmem>>, vector<8x28xf32>
    tpu.vector_store %arg15[%c8_59, %c196_60], %81 {strides = array<i32>} : memref<80x280xf32, #tpu.memory_space<vmem>>, vector<8x28xf32>,
    %83 = vector.extract_strided_slice %66 {offsets = [0, 448], sizes = [8, 28], strides = [1, 1]} : vector<8x560xf32> to vector<8x28xf32>
    %c8_61 = arith.constant 8 : index
    %c224_62 = arith.constant 224 : index
    %84 = vector.load %arg15[%c8_61, %c224_62] : memref<80x280xf32, #tpu.memory_space<vmem>>, vector<8x28xf32>
    tpu.vector_store %arg15[%c8_61, %c224_62], %83 {strides = array<i32>} : memref<80x280xf32, #tpu.memory_space<vmem>>, vector<8x28xf32>,
    %85 = vector.extract_strided_slice %66 {offsets = [0, 504], sizes = [8, 28], strides = [1, 1]} : vector<8x560xf32> to vector<8x28xf32>
    %c8_63 = arith.constant 8 : index
    %c252_64 = arith.constant 252 : index
    %86 = vector.load %arg15[%c8_63, %c252_64] : memref<80x280xf32, #tpu.memory_space<vmem>>, vector<8x28xf32>
    tpu.vector_store %arg15[%c8_63, %c252_64], %85 {strides = array<i32>} : memref<80x280xf32, #tpu.memory_space<vmem>>, vector<8x28xf32>,
    %c32_65 = arith.constant 32 : index
    %c0_66 = arith.constant 0 : index
    %87 = vector.load %arg14[%c32_65, %c0_66] : memref<176x616xf32, #tpu.memory_space<vmem>>, vector<8x616xf32>
    %c40 = arith.constant 40 : index
    %c0_67 = arith.constant 0 : index
    %88 = vector.load %arg14[%c40, %c0_67] : memref<176x616xf32, #tpu.memory_space<vmem>>, vector<8x616xf32>
    %89 = arith.maximumf %87, %88 : vector<8x616xf32>
    %c48 = arith.constant 48 : index
    %c0_68 = arith.constant 0 : index
    %90 = vector.load %arg14[%c48, %c0_68] : memref<176x616xf32, #tpu.memory_space<vmem>>, vector<8x616xf32>
    %91 = arith.maximumf %89, %90 : vector<8x616xf32>
    %92 = vector.extract_strided_slice %91 {offsets = [0, 0], sizes = [8, 560], strides = [1, 1]} : vector<8x616xf32> to vector<8x560xf32>
    %93 = vector.extract_strided_slice %91 {offsets = [0, 28], sizes = [8, 560], strides = [1, 1]} : vector<8x616xf32> to vector<8x560xf32>
    %94 = arith.maximumf %92, %93 : vector<8x560xf32>
    %95 = vector.extract_strided_slice %91 {offsets = [0, 56], sizes = [8, 560], strides = [1, 1]} : vector<8x616xf32> to vector<8x560xf32>
    %96 = arith.maximumf %94, %95 : vector<8x560xf32>
    %97 = vector.extract_strided_slice %96 {offsets = [0, 0], sizes = [8, 28], strides = [1, 1]} : vector<8x560xf32> to vector<8x28xf32>
    %c16_69 = arith.constant 16 : index
    %c0_70 = arith.constant 0 : index
    %98 = vector.load %arg15[%c16_69, %c0_70] : memref<80x280xf32, #tpu.memory_space<vmem>>, vector<8x28xf32>
    tpu.vector_store %arg15[%c16_69, %c0_70], %97 {strides = array<i32>} : memref<80x280xf32, #tpu.memory_space<vmem>>, vector<8x28xf32>,
    %99 = vector.extract_strided_slice %96 {offsets = [0, 56], sizes = [8, 28], strides = [1, 1]} : vector<8x560xf32> to vector<8x28xf32>
    %c16_71 = arith.constant 16 : index
    %c28_72 = arith.constant 28 : index
    %100 = vector.load %arg15[%c16_71, %c28_72] : memref<80x280xf32, #tpu.memory_space<vmem>>, vector<8x28xf32>
    tpu.vector_store %arg15[%c16_71, %c28_72], %99 {strides = array<i32>} : memref<80x280xf32, #tpu.memory_space<vmem>>, vector<8x28xf32>,
    %101 = vector.extract_strided_slice %96 {offsets = [0, 112], sizes = [8, 28], strides = [1, 1]} : vector<8x560xf32> to vector<8x28xf32>
    %c16_73 = arith.constant 16 : index
    %c56_74 = arith.constant 56 : index
    %102 = vector.load %arg15[%c16_73, %c56_74] : memref<80x280xf32, #tpu.memory_space<vmem>>, vector<8x28xf32>
    tpu.vector_store %arg15[%c16_73, %c56_74], %101 {strides = array<i32>} : memref<80x280xf32, #tpu.memory_space<vmem>>, vector<8x28xf32>,
    %103 = vector.extract_strided_slice %96 {offsets = [0, 168], sizes = [8, 28], strides = [1, 1]} : vector<8x560xf32> to vector<8x28xf32>
    %c16_75 = arith.constant 16 : index
    %c84_76 = arith.constant 84 : index
    %104 = vector.load %arg15[%c16_75, %c84_76] : memref<80x280xf32, #tpu.memory_space<vmem>>, vector<8x28xf32>
    tpu.vector_store %arg15[%c16_75, %c84_76], %103 {strides = array<i32>} : memref<80x280xf32, #tpu.memory_space<vmem>>, vector<8x28xf32>,
    %105 = vector.extract_strided_slice %96 {offsets = [0, 224], sizes = [8, 28], strides = [1, 1]} : vector<8x560xf32> to vector<8x28xf32>
    %c16_77 = arith.constant 16 : index
    %c112_78 = arith.constant 112 : index
    %106 = vector.load %arg15[%c16_77, %c112_78] : memref<80x280xf32, #tpu.memory_space<vmem>>, vector<8x28xf32>
    tpu.vector_store %arg15[%c16_77, %c112_78], %105 {strides = array<i32>} : memref<80x280xf32, #tpu.memory_space<vmem>>, vector<8x28xf32>,
    %107 = vector.extract_strided_slice %96 {offsets = [0, 280], sizes = [8, 28], strides = [1, 1]} : vector<8x560xf32> to vector<8x28xf32>
    %c16_79 = arith.constant 16 : index
    %c140_80 = arith.constant 140 : index
    %108 = vector.load %arg15[%c16_79, %c140_80] : memref<80x280xf32, #tpu.memory_space<vmem>>, vector<8x28xf32>
    tpu.vector_store %arg15[%c16_79, %c140_80], %107 {strides = array<i32>} : memref<80x280xf32, #tpu.memory_space<vmem>>, vector<8x28xf32>,
    %109 = vector.extract_strided_slice %96 {offsets = [0, 336], sizes = [8, 28], strides = [1, 1]} : vector<8x560xf32> to vector<8x28xf32>
    %c16_81 = arith.constant 16 : index
    %c168_82 = arith.constant 168 : index
    %110 = vector.load %arg15[%c16_81, %c168_82] : memref<80x280xf32, #tpu.memory_space<vmem>>, vector<8x28xf32>
    tpu.vector_store %arg15[%c16_81, %c168_82], %109 {strides = array<i32>} : memref<80x280xf32, #tpu.memory_space<vmem>>, vector<8x28xf32>,
    %111 = vector.extract_strided_slice %96 {offsets = [0, 392], sizes = [8, 28], strides = [1, 1]} : vector<8x560xf32> to vector<8x28xf32>
    %c16_83 = arith.constant 16 : index
    %c196_84 = arith.constant 196 : index
    %112 = vector.load %arg15[%c16_83, %c196_84] : memref<80x280xf32, #tpu.memory_space<vmem>>, vector<8x28xf32>
    tpu.vector_store %arg15[%c16_83, %c196_84], %111 {strides = array<i32>} : memref<80x280xf32, #tpu.memory_space<vmem>>, vector<8x28xf32>,
    %113 = vector.extract_strided_slice %96 {offsets = [0, 448], sizes = [8, 28], strides = [1, 1]} : vector<8x560xf32> to vector<8x28xf32>
    %c16_85 = arith.constant 16 : index
    %c224_86 = arith.constant 224 : index
    %114 = vector.load %arg15[%c16_85, %c224_86] : memref<80x280xf32, #tpu.memory_space<vmem>>, vector<8x28xf32>
    tpu.vector_store %arg15[%c16_85, %c224_86], %113 {strides = array<i32>} : memref<80x280xf32, #tpu.memory_space<vmem>>, vector<8x28xf32>,
    %115 = vector.extract_strided_slice %96 {offsets = [0, 504], sizes = [8, 28], strides = [1, 1]} : vector<8x560xf32> to vector<8x28xf32>
    %c16_87 = arith.constant 16 : index
    %c252_88 = arith.constant 252 : index
    %116 = vector.load %arg15[%c16_87, %c252_88] : memref<80x280xf32, #tpu.memory_space<vmem>>, vector<8x28xf32>
    tpu.vector_store %arg15[%c16_87, %c252_88], %115 {strides = array<i32>} : memref<80x280xf32, #tpu.memory_space<vmem>>, vector<8x28xf32>,
    %c48_89 = arith.constant 48 : index
    %c0_90 = arith.constant 0 : index
    %117 = vector.load %arg14[%c48_89, %c0_90] : memref<176x616xf32, #tpu.memory_space<vmem>>, vector<8x616xf32>
    %c56_91 = arith.constant 56 : index
    %c0_92 = arith.constant 0 : index
    %118 = vector.load %arg14[%c56_91, %c0_92] : memref<176x616xf32, #tpu.memory_space<vmem>>, vector<8x616xf32>
    %119 = arith.maximumf %117, %118 : vector<8x616xf32>
    %c64 = arith.constant 64 : index
    %c0_93 = arith.constant 0 : index
    %120 = vector.load %arg14[%c64, %c0_93] : memref<176x616xf32, #tpu.memory_space<vmem>>, vector<8x616xf32>
    %121 = arith.maximumf %119, %120 : vector<8x616xf32>
    %122 = vector.extract_strided_slice %121 {offsets = [0, 0], sizes = [8, 560], strides = [1, 1]} : vector<8x616xf32> to vector<8x560xf32>
    %123 = vector.extract_strided_slice %121 {offsets = [0, 28], sizes = [8, 560], strides = [1, 1]} : vector<8x616xf32> to vector<8x560xf32>
    %124 = arith.maximumf %122, %123 : vector<8x560xf32>
    %125 = vector.extract_strided_slice %121 {offsets = [0, 56], sizes = [8, 560], strides = [1, 1]} : vector<8x616xf32> to vector<8x560xf32>
    %126 = arith.maximumf %124, %125 : vector<8x560xf32>
    %127 = vector.extract_strided_slice %126 {offsets = [0, 0], sizes = [8, 28], strides = [1, 1]} : vector<8x560xf32> to vector<8x28xf32>
    %c24_94 = arith.constant 24 : index
    %c0_95 = arith.constant 0 : index
    %128 = vector.load %arg15[%c24_94, %c0_95] : memref<80x280xf32, #tpu.memory_space<vmem>>, vector<8x28xf32>
    tpu.vector_store %arg15[%c24_94, %c0_95], %127 {strides = array<i32>} : memref<80x280xf32, #tpu.memory_space<vmem>>, vector<8x28xf32>,
    %129 = vector.extract_strided_slice %126 {offsets = [0, 56], sizes = [8, 28], strides = [1, 1]} : vector<8x560xf32> to vector<8x28xf32>
    %c24_96 = arith.constant 24 : index
    %c28_97 = arith.constant 28 : index
    %130 = vector.load %arg15[%c24_96, %c28_97] : memref<80x280xf32, #tpu.memory_space<vmem>>, vector<8x28xf32>
    tpu.vector_store %arg15[%c24_96, %c28_97], %129 {strides = array<i32>} : memref<80x280xf32, #tpu.memory_space<vmem>>, vector<8x28xf32>,
    %131 = vector.extract_strided_slice %126 {offsets = [0, 112], sizes = [8, 28], strides = [1, 1]} : vector<8x560xf32> to vector<8x28xf32>
    %c24_98 = arith.constant 24 : index
    %c56_99 = arith.constant 56 : index
    %132 = vector.load %arg15[%c24_98, %c56_99] : memref<80x280xf32, #tpu.memory_space<vmem>>, vector<8x28xf32>
    tpu.vector_store %arg15[%c24_98, %c56_99], %131 {strides = array<i32>} : memref<80x280xf32, #tpu.memory_space<vmem>>, vector<8x28xf32>,
    %133 = vector.extract_strided_slice %126 {offsets = [0, 168], sizes = [8, 28], strides = [1, 1]} : vector<8x560xf32> to vector<8x28xf32>
    %c24_100 = arith.constant 24 : index
    %c84_101 = arith.constant 84 : index
    %134 = vector.load %arg15[%c24_100, %c84_101] : memref<80x280xf32, #tpu.memory_space<vmem>>, vector<8x28xf32>
    tpu.vector_store %arg15[%c24_100, %c84_101], %133 {strides = array<i32>} : memref<80x280xf32, #tpu.memory_space<vmem>>, vector<8x28xf32>,
    %135 = vector.extract_strided_slice %126 {offsets = [0, 224], sizes = [8, 28], strides = [1, 1]} : vector<8x560xf32> to vector<8x28xf32>
    %c24_102 = arith.constant 24 : index
    %c112_103 = arith.constant 112 : index
    %136 = vector.load %arg15[%c24_102, %c112_103] : memref<80x280xf32, #tpu.memory_space<vmem>>, vector<8x28xf32>
    tpu.vector_store %arg15[%c24_102, %c112_103], %135 {strides = array<i32>} : memref<80x280xf32, #tpu.memory_space<vmem>>, vector<8x28xf32>,
    %137 = vector.extract_strided_slice %126 {offsets = [0, 280], sizes = [8, 28], strides = [1, 1]} : vector<8x560xf32> to vector<8x28xf32>
    %c24_104 = arith.constant 24 : index
    %c140_105 = arith.constant 140 : index
    %138 = vector.load %arg15[%c24_104, %c140_105] : memref<80x280xf32, #tpu.memory_space<vmem>>, vector<8x28xf32>
    tpu.vector_store %arg15[%c24_104, %c140_105], %137 {strides = array<i32>} : memref<80x280xf32, #tpu.memory_space<vmem>>, vector<8x28xf32>,
    %139 = vector.extract_strided_slice %126 {offsets = [0, 336], sizes = [8, 28], strides = [1, 1]} : vector<8x560xf32> to vector<8x28xf32>
    %c24_106 = arith.constant 24 : index
    %c168_107 = arith.constant 168 : index
    %140 = vector.load %arg15[%c24_106, %c168_107] : memref<80x280xf32, #tpu.memory_space<vmem>>, vector<8x28xf32>
    tpu.vector_store %arg15[%c24_106, %c168_107], %139 {strides = array<i32>} : memref<80x280xf32, #tpu.memory_space<vmem>>, vector<8x28xf32>,
    %141 = vector.extract_strided_slice %126 {offsets = [0, 392], sizes = [8, 28], strides = [1, 1]} : vector<8x560xf32> to vector<8x28xf32>
    %c24_108 = arith.constant 24 : index
    %c196_109 = arith.constant 196 : index
    %142 = vector.load %arg15[%c24_108, %c196_109] : memref<80x280xf32, #tpu.memory_space<vmem>>, vector<8x28xf32>
    tpu.vector_store %arg15[%c24_108, %c196_109], %141 {strides = array<i32>} : memref<80x280xf32, #tpu.memory_space<vmem>>, vector<8x28xf32>,
    %143 = vector.extract_strided_slice %126 {offsets = [0, 448], sizes = [8, 28], strides = [1, 1]} : vector<8x560xf32> to vector<8x28xf32>
    %c24_110 = arith.constant 24 : index
    %c224_111 = arith.constant 224 : index
    %144 = vector.load %arg15[%c24_110, %c224_111] : memref<80x280xf32, #tpu.memory_space<vmem>>, vector<8x28xf32>
    tpu.vector_store %arg15[%c24_110, %c224_111], %143 {strides = array<i32>} : memref<80x280xf32, #tpu.memory_space<vmem>>, vector<8x28xf32>,
    %145 = vector.extract_strided_slice %126 {offsets = [0, 504], sizes = [8, 28], strides = [1, 1]} : vector<8x560xf32> to vector<8x28xf32>
    %c24_112 = arith.constant 24 : index
    %c252_113 = arith.constant 252 : index
    %146 = vector.load %arg15[%c24_112, %c252_113] : memref<80x280xf32, #tpu.memory_space<vmem>>, vector<8x28xf32>
    tpu.vector_store %arg15[%c24_112, %c252_113], %145 {strides = array<i32>} : memref<80x280xf32, #tpu.memory_space<vmem>>, vector<8x28xf32>,
    %c64_114 = arith.constant 64 : index
    %c0_115 = arith.constant 0 : index
    %147 = vector.load %arg14[%c64_114, %c0_115] : memref<176x616xf32, #tpu.memory_space<vmem>>, vector<8x616xf32>
    %c72 = arith.constant 72 : index
    %c0_116 = arith.constant 0 : index
    %148 = vector.load %arg14[%c72, %c0_116] : memref<176x616xf32, #tpu.memory_space<vmem>>, vector<8x616xf32>
    %149 = arith.maximumf %147, %148 : vector<8x616xf32>
    %c80 = arith.constant 80 : index
    %c0_117 = arith.constant 0 : index
    %150 = vector.load %arg14[%c80, %c0_117] : memref<176x616xf32, #tpu.memory_space<vmem>>, vector<8x616xf32>
    %151 = arith.maximumf %149, %150 : vector<8x616xf32>
    %152 = vector.extract_strided_slice %151 {offsets = [0, 0], sizes = [8, 560], strides = [1, 1]} : vector<8x616xf32> to vector<8x560xf32>
    %153 = vector.extract_strided_slice %151 {offsets = [0, 28], sizes = [8, 560], strides = [1, 1]} : vector<8x616xf32> to vector<8x560xf32>
    %154 = arith.maximumf %152, %153 : vector<8x560xf32>
    %155 = vector.extract_strided_slice %151 {offsets = [0, 56], sizes = [8, 560], strides = [1, 1]} : vector<8x616xf32> to vector<8x560xf32>
    %156 = arith.maximumf %154, %155 : vector<8x560xf32>
    %157 = vector.extract_strided_slice %156 {offsets = [0, 0], sizes = [8, 28], strides = [1, 1]} : vector<8x560xf32> to vector<8x28xf32>
    %c32_118 = arith.constant 32 : index
    %c0_119 = arith.constant 0 : index
    %158 = vector.load %arg15[%c32_118, %c0_119] : memref<80x280xf32, #tpu.memory_space<vmem>>, vector<8x28xf32>
    tpu.vector_store %arg15[%c32_118, %c0_119], %157 {strides = array<i32>} : memref<80x280xf32, #tpu.memory_space<vmem>>, vector<8x28xf32>,
    %159 = vector.extract_strided_slice %156 {offsets = [0, 56], sizes = [8, 28], strides = [1, 1]} : vector<8x560xf32> to vector<8x28xf32>
    %c32_120 = arith.constant 32 : index
    %c28_121 = arith.constant 28 : index
    %160 = vector.load %arg15[%c32_120, %c28_121] : memref<80x280xf32, #tpu.memory_space<vmem>>, vector<8x28xf32>
    tpu.vector_store %arg15[%c32_120, %c28_121], %159 {strides = array<i32>} : memref<80x280xf32, #tpu.memory_space<vmem>>, vector<8x28xf32>,
    %161 = vector.extract_strided_slice %156 {offsets = [0, 112], sizes = [8, 28], strides = [1, 1]} : vector<8x560xf32> to vector<8x28xf32>
    %c32_122 = arith.constant 32 : index
    %c56_123 = arith.constant 56 : index
    %162 = vector.load %arg15[%c32_122, %c56_123] : memref<80x280xf32, #tpu.memory_space<vmem>>, vector<8x28xf32>
    tpu.vector_store %arg15[%c32_122, %c56_123], %161 {strides = array<i32>} : memref<80x280xf32, #tpu.memory_space<vmem>>, vector<8x28xf32>,
    %163 = vector.extract_strided_slice %156 {offsets = [0, 168], sizes = [8, 28], strides = [1, 1]} : vector<8x560xf32> to vector<8x28xf32>
    %c32_124 = arith.constant 32 : index
    %c84_125 = arith.constant 84 : index
    %164 = vector.load %arg15[%c32_124, %c84_125] : memref<80x280xf32, #tpu.memory_space<vmem>>, vector<8x28xf32>
    tpu.vector_store %arg15[%c32_124, %c84_125], %163 {strides = array<i32>} : memref<80x280xf32, #tpu.memory_space<vmem>>, vector<8x28xf32>,
    %165 = vector.extract_strided_slice %156 {offsets = [0, 224], sizes = [8, 28], strides = [1, 1]} : vector<8x560xf32> to vector<8x28xf32>
    %c32_126 = arith.constant 32 : index
    %c112_127 = arith.constant 112 : index
    %166 = vector.load %arg15[%c32_126, %c112_127] : memref<80x280xf32, #tpu.memory_space<vmem>>, vector<8x28xf32>
    tpu.vector_store %arg15[%c32_126, %c112_127], %165 {strides = array<i32>} : memref<80x280xf32, #tpu.memory_space<vmem>>, vector<8x28xf32>,
    %167 = vector.extract_strided_slice %156 {offsets = [0, 280], sizes = [8, 28], strides = [1, 1]} : vector<8x560xf32> to vector<8x28xf32>
    %c32_128 = arith.constant 32 : index
    %c140_129 = arith.constant 140 : index
    %168 = vector.load %arg15[%c32_128, %c140_129] : memref<80x280xf32, #tpu.memory_space<vmem>>, vector<8x28xf32>
    tpu.vector_store %arg15[%c32_128, %c140_129], %167 {strides = array<i32>} : memref<80x280xf32, #tpu.memory_space<vmem>>, vector<8x28xf32>,
    %169 = vector.extract_strided_slice %156 {offsets = [0, 336], sizes = [8, 28], strides = [1, 1]} : vector<8x560xf32> to vector<8x28xf32>
    %c32_130 = arith.constant 32 : index
    %c168_131 = arith.constant 168 : index
    %170 = vector.load %arg15[%c32_130, %c168_131] : memref<80x280xf32, #tpu.memory_space<vmem>>, vector<8x28xf32>
    tpu.vector_store %arg15[%c32_130, %c168_131], %169 {strides = array<i32>} : memref<80x280xf32, #tpu.memory_space<vmem>>, vector<8x28xf32>,
    %171 = vector.extract_strided_slice %156 {offsets = [0, 392], sizes = [8, 28], strides = [1, 1]} : vector<8x560xf32> to vector<8x28xf32>
    %c32_132 = arith.constant 32 : index
    %c196_133 = arith.constant 196 : index
    %172 = vector.load %arg15[%c32_132, %c196_133] : memref<80x280xf32, #tpu.memory_space<vmem>>, vector<8x28xf32>
    tpu.vector_store %arg15[%c32_132, %c196_133], %171 {strides = array<i32>} : memref<80x280xf32, #tpu.memory_space<vmem>>, vector<8x28xf32>,
    %173 = vector.extract_strided_slice %156 {offsets = [0, 448], sizes = [8, 28], strides = [1, 1]} : vector<8x560xf32> to vector<8x28xf32>
    %c32_134 = arith.constant 32 : index
    %c224_135 = arith.constant 224 : index
    %174 = vector.load %arg15[%c32_134, %c224_135] : memref<80x280xf32, #tpu.memory_space<vmem>>, vector<8x28xf32>
    tpu.vector_store %arg15[%c32_134, %c224_135], %173 {strides = array<i32>} : memref<80x280xf32, #tpu.memory_space<vmem>>, vector<8x28xf32>,
    %175 = vector.extract_strided_slice %156 {offsets = [0, 504], sizes = [8, 28], strides = [1, 1]} : vector<8x560xf32> to vector<8x28xf32>
    %c32_136 = arith.constant 32 : index
    %c252_137 = arith.constant 252 : index
    %176 = vector.load %arg15[%c32_136, %c252_137] : memref<80x280xf32, #tpu.memory_space<vmem>>, vector<8x28xf32>
    tpu.vector_store %arg15[%c32_136, %c252_137], %175 {strides = array<i32>} : memref<80x280xf32, #tpu.memory_space<vmem>>, vector<8x28xf32>,
    %c80_138 = arith.constant 80 : index
    %c0_139 = arith.constant 0 : index
    %177 = vector.load %arg14[%c80_138, %c0_139] : memref<176x616xf32, #tpu.memory_space<vmem>>, vector<8x616xf32>
    %c88 = arith.constant 88 : index
    %c0_140 = arith.constant 0 : index
    %178 = vector.load %arg14[%c88, %c0_140] : memref<176x616xf32, #tpu.memory_space<vmem>>, vector<8x616xf32>
    %179 = arith.maximumf %177, %178 : vector<8x616xf32>
    %c96 = arith.constant 96 : index
    %c0_141 = arith.constant 0 : index
    %180 = vector.load %arg14[%c96, %c0_141] : memref<176x616xf32, #tpu.memory_space<vmem>>, vector<8x616xf32>
    %181 = arith.maximumf %179, %180 : vector<8x616xf32>
    %182 = vector.extract_strided_slice %181 {offsets = [0, 0], sizes = [8, 560], strides = [1, 1]} : vector<8x616xf32> to vector<8x560xf32>
    %183 = vector.extract_strided_slice %181 {offsets = [0, 28], sizes = [8, 560], strides = [1, 1]} : vector<8x616xf32> to vector<8x560xf32>
    %184 = arith.maximumf %182, %183 : vector<8x560xf32>
    %185 = vector.extract_strided_slice %181 {offsets = [0, 56], sizes = [8, 560], strides = [1, 1]} : vector<8x616xf32> to vector<8x560xf32>
    %186 = arith.maximumf %184, %185 : vector<8x560xf32>
    %187 = vector.extract_strided_slice %186 {offsets = [0, 0], sizes = [8, 28], strides = [1, 1]} : vector<8x560xf32> to vector<8x28xf32>
    %c40_142 = arith.constant 40 : index
    %c0_143 = arith.constant 0 : index
    %188 = vector.load %arg15[%c40_142, %c0_143] : memref<80x280xf32, #tpu.memory_space<vmem>>, vector<8x28xf32>
    tpu.vector_store %arg15[%c40_142, %c0_143], %187 {strides = array<i32>} : memref<80x280xf32, #tpu.memory_space<vmem>>, vector<8x28xf32>,
    %189 = vector.extract_strided_slice %186 {offsets = [0, 56], sizes = [8, 28], strides = [1, 1]} : vector<8x560xf32> to vector<8x28xf32>
    %c40_144 = arith.constant 40 : index
    %c28_145 = arith.constant 28 : index
    %190 = vector.load %arg15[%c40_144, %c28_145] : memref<80x280xf32, #tpu.memory_space<vmem>>, vector<8x28xf32>
    tpu.vector_store %arg15[%c40_144, %c28_145], %189 {strides = array<i32>} : memref<80x280xf32, #tpu.memory_space<vmem>>, vector<8x28xf32>,
    %191 = vector.extract_strided_slice %186 {offsets = [0, 112], sizes = [8, 28], strides = [1, 1]} : vector<8x560xf32> to vector<8x28xf32>
    %c40_146 = arith.constant 40 : index
    %c56_147 = arith.constant 56 : index
    %192 = vector.load %arg15[%c40_146, %c56_147] : memref<80x280xf32, #tpu.memory_space<vmem>>, vector<8x28xf32>
    tpu.vector_store %arg15[%c40_146, %c56_147], %191 {strides = array<i32>} : memref<80x280xf32, #tpu.memory_space<vmem>>, vector<8x28xf32>,
    %193 = vector.extract_strided_slice %186 {offsets = [0, 168], sizes = [8, 28], strides = [1, 1]} : vector<8x560xf32> to vector<8x28xf32>
    %c40_148 = arith.constant 40 : index
    %c84_149 = arith.constant 84 : index
    %194 = vector.load %arg15[%c40_148, %c84_149] : memref<80x280xf32, #tpu.memory_space<vmem>>, vector<8x28xf32>
    tpu.vector_store %arg15[%c40_148, %c84_149], %193 {strides = array<i32>} : memref<80x280xf32, #tpu.memory_space<vmem>>, vector<8x28xf32>,
    %195 = vector.extract_strided_slice %186 {offsets = [0, 224], sizes = [8, 28], strides = [1, 1]} : vector<8x560xf32> to vector<8x28xf32>
    %c40_150 = arith.constant 40 : index
    %c112_151 = arith.constant 112 : index
    %196 = vector.load %arg15[%c40_150, %c112_151] : memref<80x280xf32, #tpu.memory_space<vmem>>, vector<8x28xf32>
    tpu.vector_store %arg15[%c40_150, %c112_151], %195 {strides = array<i32>} : memref<80x280xf32, #tpu.memory_space<vmem>>, vector<8x28xf32>,
    %197 = vector.extract_strided_slice %186 {offsets = [0, 280], sizes = [8, 28], strides = [1, 1]} : vector<8x560xf32> to vector<8x28xf32>
    %c40_152 = arith.constant 40 : index
    %c140_153 = arith.constant 140 : index
    %198 = vector.load %arg15[%c40_152, %c140_153] : memref<80x280xf32, #tpu.memory_space<vmem>>, vector<8x28xf32>
    tpu.vector_store %arg15[%c40_152, %c140_153], %197 {strides = array<i32>} : memref<80x280xf32, #tpu.memory_space<vmem>>, vector<8x28xf32>,
    %199 = vector.extract_strided_slice %186 {offsets = [0, 336], sizes = [8, 28], strides = [1, 1]} : vector<8x560xf32> to vector<8x28xf32>
    %c40_154 = arith.constant 40 : index
    %c168_155 = arith.constant 168 : index
    %200 = vector.load %arg15[%c40_154, %c168_155] : memref<80x280xf32, #tpu.memory_space<vmem>>, vector<8x28xf32>
    tpu.vector_store %arg15[%c40_154, %c168_155], %199 {strides = array<i32>} : memref<80x280xf32, #tpu.memory_space<vmem>>, vector<8x28xf32>,
    %201 = vector.extract_strided_slice %186 {offsets = [0, 392], sizes = [8, 28], strides = [1, 1]} : vector<8x560xf32> to vector<8x28xf32>
    %c40_156 = arith.constant 40 : index
    %c196_157 = arith.constant 196 : index
    %202 = vector.load %arg15[%c40_156, %c196_157] : memref<80x280xf32, #tpu.memory_space<vmem>>, vector<8x28xf32>
    tpu.vector_store %arg15[%c40_156, %c196_157], %201 {strides = array<i32>} : memref<80x280xf32, #tpu.memory_space<vmem>>, vector<8x28xf32>,
    %203 = vector.extract_strided_slice %186 {offsets = [0, 448], sizes = [8, 28], strides = [1, 1]} : vector<8x560xf32> to vector<8x28xf32>
    %c40_158 = arith.constant 40 : index
    %c224_159 = arith.constant 224 : index
    %204 = vector.load %arg15[%c40_158, %c224_159] : memref<80x280xf32, #tpu.memory_space<vmem>>, vector<8x28xf32>
    tpu.vector_store %arg15[%c40_158, %c224_159], %203 {strides = array<i32>} : memref<80x280xf32, #tpu.memory_space<vmem>>, vector<8x28xf32>,
    %205 = vector.extract_strided_slice %186 {offsets = [0, 504], sizes = [8, 28], strides = [1, 1]} : vector<8x560xf32> to vector<8x28xf32>
    %c40_160 = arith.constant 40 : index
    %c252_161 = arith.constant 252 : index
    %206 = vector.load %arg15[%c40_160, %c252_161] : memref<80x280xf32, #tpu.memory_space<vmem>>, vector<8x28xf32>
    tpu.vector_store %arg15[%c40_160, %c252_161], %205 {strides = array<i32>} : memref<80x280xf32, #tpu.memory_space<vmem>>, vector<8x28xf32>,
    %c96_162 = arith.constant 96 : index
    %c0_163 = arith.constant 0 : index
    %207 = vector.load %arg14[%c96_162, %c0_163] : memref<176x616xf32, #tpu.memory_space<vmem>>, vector<8x616xf32>
    %c104 = arith.constant 104 : index
    %c0_164 = arith.constant 0 : index
    %208 = vector.load %arg14[%c104, %c0_164] : memref<176x616xf32, #tpu.memory_space<vmem>>, vector<8x616xf32>
    %209 = arith.maximumf %207, %208 : vector<8x616xf32>
    %c112_165 = arith.constant 112 : index
    %c0_166 = arith.constant 0 : index
    %210 = vector.load %arg14[%c112_165, %c0_166] : memref<176x616xf32, #tpu.memory_space<vmem>>, vector<8x616xf32>
    %211 = arith.maximumf %209, %210 : vector<8x616xf32>
    %212 = vector.extract_strided_slice %211 {offsets = [0, 0], sizes = [8, 560], strides = [1, 1]} : vector<8x616xf32> to vector<8x560xf32>
    %213 = vector.extract_strided_slice %211 {offsets = [0, 28], sizes = [8, 560], strides = [1, 1]} : vector<8x616xf32> to vector<8x560xf32>
    %214 = arith.maximumf %212, %213 : vector<8x560xf32>
    %215 = vector.extract_strided_slice %211 {offsets = [0, 56], sizes = [8, 560], strides = [1, 1]} : vector<8x616xf32> to vector<8x560xf32>
    %216 = arith.maximumf %214, %215 : vector<8x560xf32>
    %217 = vector.extract_strided_slice %216 {offsets = [0, 0], sizes = [8, 28], strides = [1, 1]} : vector<8x560xf32> to vector<8x28xf32>
    %c48_167 = arith.constant 48 : index
    %c0_168 = arith.constant 0 : index
    %218 = vector.load %arg15[%c48_167, %c0_168] : memref<80x280xf32, #tpu.memory_space<vmem>>, vector<8x28xf32>
    tpu.vector_store %arg15[%c48_167, %c0_168], %217 {strides = array<i32>} : memref<80x280xf32, #tpu.memory_space<vmem>>, vector<8x28xf32>,
    %219 = vector.extract_strided_slice %216 {offsets = [0, 56], sizes = [8, 28], strides = [1, 1]} : vector<8x560xf32> to vector<8x28xf32>
    %c48_169 = arith.constant 48 : index
    %c28_170 = arith.constant 28 : index
    %220 = vector.load %arg15[%c48_169, %c28_170] : memref<80x280xf32, #tpu.memory_space<vmem>>, vector<8x28xf32>
    tpu.vector_store %arg15[%c48_169, %c28_170], %219 {strides = array<i32>} : memref<80x280xf32, #tpu.memory_space<vmem>>, vector<8x28xf32>,
    %221 = vector.extract_strided_slice %216 {offsets = [0, 112], sizes = [8, 28], strides = [1, 1]} : vector<8x560xf32> to vector<8x28xf32>
    %c48_171 = arith.constant 48 : index
    %c56_172 = arith.constant 56 : index
    %222 = vector.load %arg15[%c48_171, %c56_172] : memref<80x280xf32, #tpu.memory_space<vmem>>, vector<8x28xf32>
    tpu.vector_store %arg15[%c48_171, %c56_172], %221 {strides = array<i32>} : memref<80x280xf32, #tpu.memory_space<vmem>>, vector<8x28xf32>,
    %223 = vector.extract_strided_slice %216 {offsets = [0, 168], sizes = [8, 28], strides = [1, 1]} : vector<8x560xf32> to vector<8x28xf32>
    %c48_173 = arith.constant 48 : index
    %c84_174 = arith.constant 84 : index
    %224 = vector.load %arg15[%c48_173, %c84_174] : memref<80x280xf32, #tpu.memory_space<vmem>>, vector<8x28xf32>
    tpu.vector_store %arg15[%c48_173, %c84_174], %223 {strides = array<i32>} : memref<80x280xf32, #tpu.memory_space<vmem>>, vector<8x28xf32>,
    %225 = vector.extract_strided_slice %216 {offsets = [0, 224], sizes = [8, 28], strides = [1, 1]} : vector<8x560xf32> to vector<8x28xf32>
    %c48_175 = arith.constant 48 : index
    %c112_176 = arith.constant 112 : index
    %226 = vector.load %arg15[%c48_175, %c112_176] : memref<80x280xf32, #tpu.memory_space<vmem>>, vector<8x28xf32>
    tpu.vector_store %arg15[%c48_175, %c112_176], %225 {strides = array<i32>} : memref<80x280xf32, #tpu.memory_space<vmem>>, vector<8x28xf32>,
    %227 = vector.extract_strided_slice %216 {offsets = [0, 280], sizes = [8, 28], strides = [1, 1]} : vector<8x560xf32> to vector<8x28xf32>
    %c48_177 = arith.constant 48 : index
    %c140_178 = arith.constant 140 : index
    %228 = vector.load %arg15[%c48_177, %c140_178] : memref<80x280xf32, #tpu.memory_space<vmem>>, vector<8x28xf32>
    tpu.vector_store %arg15[%c48_177, %c140_178], %227 {strides = array<i32>} : memref<80x280xf32, #tpu.memory_space<vmem>>, vector<8x28xf32>,
    %229 = vector.extract_strided_slice %216 {offsets = [0, 336], sizes = [8, 28], strides = [1, 1]} : vector<8x560xf32> to vector<8x28xf32>
    %c48_179 = arith.constant 48 : index
    %c168_180 = arith.constant 168 : index
    %230 = vector.load %arg15[%c48_179, %c168_180] : memref<80x280xf32, #tpu.memory_space<vmem>>, vector<8x28xf32>
    tpu.vector_store %arg15[%c48_179, %c168_180], %229 {strides = array<i32>} : memref<80x280xf32, #tpu.memory_space<vmem>>, vector<8x28xf32>,
    %231 = vector.extract_strided_slice %216 {offsets = [0, 392], sizes = [8, 28], strides = [1, 1]} : vector<8x560xf32> to vector<8x28xf32>
    %c48_181 = arith.constant 48 : index
    %c196_182 = arith.constant 196 : index
    %232 = vector.load %arg15[%c48_181, %c196_182] : memref<80x280xf32, #tpu.memory_space<vmem>>, vector<8x28xf32>
    tpu.vector_store %arg15[%c48_181, %c196_182], %231 {strides = array<i32>} : memref<80x280xf32, #tpu.memory_space<vmem>>, vector<8x28xf32>,
    %233 = vector.extract_strided_slice %216 {offsets = [0, 448], sizes = [8, 28], strides = [1, 1]} : vector<8x560xf32> to vector<8x28xf32>
    %c48_183 = arith.constant 48 : index
    %c224_184 = arith.constant 224 : index
    %234 = vector.load %arg15[%c48_183, %c224_184] : memref<80x280xf32, #tpu.memory_space<vmem>>, vector<8x28xf32>
    tpu.vector_store %arg15[%c48_183, %c224_184], %233 {strides = array<i32>} : memref<80x280xf32, #tpu.memory_space<vmem>>, vector<8x28xf32>,
    %235 = vector.extract_strided_slice %216 {offsets = [0, 504], sizes = [8, 28], strides = [1, 1]} : vector<8x560xf32> to vector<8x28xf32>
    %c48_185 = arith.constant 48 : index
    %c252_186 = arith.constant 252 : index
    %236 = vector.load %arg15[%c48_185, %c252_186] : memref<80x280xf32, #tpu.memory_space<vmem>>, vector<8x28xf32>
    tpu.vector_store %arg15[%c48_185, %c252_186], %235 {strides = array<i32>} : memref<80x280xf32, #tpu.memory_space<vmem>>, vector<8x28xf32>,
    %c112_187 = arith.constant 112 : index
    %c0_188 = arith.constant 0 : index
    %237 = vector.load %arg14[%c112_187, %c0_188] : memref<176x616xf32, #tpu.memory_space<vmem>>, vector<8x616xf32>
    %c120 = arith.constant 120 : index
    %c0_189 = arith.constant 0 : index
    %238 = vector.load %arg14[%c120, %c0_189] : memref<176x616xf32, #tpu.memory_space<vmem>>, vector<8x616xf32>
    %239 = arith.maximumf %237, %238 : vector<8x616xf32>
    %c128 = arith.constant 128 : index
    %c0_190 = arith.constant 0 : index
    %240 = vector.load %arg14[%c128, %c0_190] : memref<176x616xf32, #tpu.memory_space<vmem>>, vector<8x616xf32>
    %241 = arith.maximumf %239, %240 : vector<8x616xf32>
    %242 = vector.extract_strided_slice %241 {offsets = [0, 0], sizes = [8, 560], strides = [1, 1]} : vector<8x616xf32> to vector<8x560xf32>
    %243 = vector.extract_strided_slice %241 {offsets = [0, 28], sizes = [8, 560], strides = [1, 1]} : vector<8x616xf32> to vector<8x560xf32>
    %244 = arith.maximumf %242, %243 : vector<8x560xf32>
    %245 = vector.extract_strided_slice %241 {offsets = [0, 56], sizes = [8, 560], strides = [1, 1]} : vector<8x616xf32> to vector<8x560xf32>
    %246 = arith.maximumf %244, %245 : vector<8x560xf32>
    %247 = vector.extract_strided_slice %246 {offsets = [0, 0], sizes = [8, 28], strides = [1, 1]} : vector<8x560xf32> to vector<8x28xf32>
    %c56_191 = arith.constant 56 : index
    %c0_192 = arith.constant 0 : index
    %248 = vector.load %arg15[%c56_191, %c0_192] : memref<80x280xf32, #tpu.memory_space<vmem>>, vector<8x28xf32>
    tpu.vector_store %arg15[%c56_191, %c0_192], %247 {strides = array<i32>} : memref<80x280xf32, #tpu.memory_space<vmem>>, vector<8x28xf32>,
    %249 = vector.extract_strided_slice %246 {offsets = [0, 56], sizes = [8, 28], strides = [1, 1]} : vector<8x560xf32> to vector<8x28xf32>
    %c56_193 = arith.constant 56 : index
    %c28_194 = arith.constant 28 : index
    %250 = vector.load %arg15[%c56_193, %c28_194] : memref<80x280xf32, #tpu.memory_space<vmem>>, vector<8x28xf32>
    tpu.vector_store %arg15[%c56_193, %c28_194], %249 {strides = array<i32>} : memref<80x280xf32, #tpu.memory_space<vmem>>, vector<8x28xf32>,
    %251 = vector.extract_strided_slice %246 {offsets = [0, 112], sizes = [8, 28], strides = [1, 1]} : vector<8x560xf32> to vector<8x28xf32>
    %c56_195 = arith.constant 56 : index
    %c56_196 = arith.constant 56 : index
    %252 = vector.load %arg15[%c56_195, %c56_196] : memref<80x280xf32, #tpu.memory_space<vmem>>, vector<8x28xf32>
    tpu.vector_store %arg15[%c56_195, %c56_196], %251 {strides = array<i32>} : memref<80x280xf32, #tpu.memory_space<vmem>>, vector<8x28xf32>,
    %253 = vector.extract_strided_slice %246 {offsets = [0, 168], sizes = [8, 28], strides = [1, 1]} : vector<8x560xf32> to vector<8x28xf32>
    %c56_197 = arith.constant 56 : index
    %c84_198 = arith.constant 84 : index
    %254 = vector.load %arg15[%c56_197, %c84_198] : memref<80x280xf32, #tpu.memory_space<vmem>>, vector<8x28xf32>
    tpu.vector_store %arg15[%c56_197, %c84_198], %253 {strides = array<i32>} : memref<80x280xf32, #tpu.memory_space<vmem>>, vector<8x28xf32>,
    %255 = vector.extract_strided_slice %246 {offsets = [0, 224], sizes = [8, 28], strides = [1, 1]} : vector<8x560xf32> to vector<8x28xf32>
    %c56_199 = arith.constant 56 : index
    %c112_200 = arith.constant 112 : index
    %256 = vector.load %arg15[%c56_199, %c112_200] : memref<80x280xf32, #tpu.memory_space<vmem>>, vector<8x28xf32>
    tpu.vector_store %arg15[%c56_199, %c112_200], %255 {strides = array<i32>} : memref<80x280xf32, #tpu.memory_space<vmem>>, vector<8x28xf32>,
    %257 = vector.extract_strided_slice %246 {offsets = [0, 280], sizes = [8, 28], strides = [1, 1]} : vector<8x560xf32> to vector<8x28xf32>
    %c56_201 = arith.constant 56 : index
    %c140_202 = arith.constant 140 : index
    %258 = vector.load %arg15[%c56_201, %c140_202] : memref<80x280xf32, #tpu.memory_space<vmem>>, vector<8x28xf32>
    tpu.vector_store %arg15[%c56_201, %c140_202], %257 {strides = array<i32>} : memref<80x280xf32, #tpu.memory_space<vmem>>, vector<8x28xf32>,
    %259 = vector.extract_strided_slice %246 {offsets = [0, 336], sizes = [8, 28], strides = [1, 1]} : vector<8x560xf32> to vector<8x28xf32>
    %c56_203 = arith.constant 56 : index
    %c168_204 = arith.constant 168 : index
    %260 = vector.load %arg15[%c56_203, %c168_204] : memref<80x280xf32, #tpu.memory_space<vmem>>, vector<8x28xf32>
    tpu.vector_store %arg15[%c56_203, %c168_204], %259 {strides = array<i32>} : memref<80x280xf32, #tpu.memory_space<vmem>>, vector<8x28xf32>,
    %261 = vector.extract_strided_slice %246 {offsets = [0, 392], sizes = [8, 28], strides = [1, 1]} : vector<8x560xf32> to vector<8x28xf32>
    %c56_205 = arith.constant 56 : index
    %c196_206 = arith.constant 196 : index
    %262 = vector.load %arg15[%c56_205, %c196_206] : memref<80x280xf32, #tpu.memory_space<vmem>>, vector<8x28xf32>
    tpu.vector_store %arg15[%c56_205, %c196_206], %261 {strides = array<i32>} : memref<80x280xf32, #tpu.memory_space<vmem>>, vector<8x28xf32>,
    %263 = vector.extract_strided_slice %246 {offsets = [0, 448], sizes = [8, 28], strides = [1, 1]} : vector<8x560xf32> to vector<8x28xf32>
    %c56_207 = arith.constant 56 : index
    %c224_208 = arith.constant 224 : index
    %264 = vector.load %arg15[%c56_207, %c224_208] : memref<80x280xf32, #tpu.memory_space<vmem>>, vector<8x28xf32>
    tpu.vector_store %arg15[%c56_207, %c224_208], %263 {strides = array<i32>} : memref<80x280xf32, #tpu.memory_space<vmem>>, vector<8x28xf32>,
    %265 = vector.extract_strided_slice %246 {offsets = [0, 504], sizes = [8, 28], strides = [1, 1]} : vector<8x560xf32> to vector<8x28xf32>
    %c56_209 = arith.constant 56 : index
    %c252_210 = arith.constant 252 : index
    %266 = vector.load %arg15[%c56_209, %c252_210] : memref<80x280xf32, #tpu.memory_space<vmem>>, vector<8x28xf32>
    tpu.vector_store %arg15[%c56_209, %c252_210], %265 {strides = array<i32>} : memref<80x280xf32, #tpu.memory_space<vmem>>, vector<8x28xf32>,
    %c128_211 = arith.constant 128 : index
    %c0_212 = arith.constant 0 : index
    %267 = vector.load %arg14[%c128_211, %c0_212] : memref<176x616xf32, #tpu.memory_space<vmem>>, vector<8x616xf32>
    %c136 = arith.constant 136 : index
    %c0_213 = arith.constant 0 : index
    %268 = vector.load %arg14[%c136, %c0_213] : memref<176x616xf32, #tpu.memory_space<vmem>>, vector<8x616xf32>
    %269 = arith.maximumf %267, %268 : vector<8x616xf32>
    %c144 = arith.constant 144 : index
    %c0_214 = arith.constant 0 : index
    %270 = vector.load %arg14[%c144, %c0_214] : memref<176x616xf32, #tpu.memory_space<vmem>>, vector<8x616xf32>
    %271 = arith.maximumf %269, %270 : vector<8x616xf32>
    %272 = vector.extract_strided_slice %271 {offsets = [0, 0], sizes = [8, 560], strides = [1, 1]} : vector<8x616xf32> to vector<8x560xf32>
    %273 = vector.extract_strided_slice %271 {offsets = [0, 28], sizes = [8, 560], strides = [1, 1]} : vector<8x616xf32> to vector<8x560xf32>
    %274 = arith.maximumf %272, %273 : vector<8x560xf32>
    %275 = vector.extract_strided_slice %271 {offsets = [0, 56], sizes = [8, 560], strides = [1, 1]} : vector<8x616xf32> to vector<8x560xf32>
    %276 = arith.maximumf %274, %275 : vector<8x560xf32>
    %277 = vector.extract_strided_slice %276 {offsets = [0, 0], sizes = [8, 28], strides = [1, 1]} : vector<8x560xf32> to vector<8x28xf32>
    %c64_215 = arith.constant 64 : index
    %c0_216 = arith.constant 0 : index
    %278 = vector.load %arg15[%c64_215, %c0_216] : memref<80x280xf32, #tpu.memory_space<vmem>>, vector<8x28xf32>
    tpu.vector_store %arg15[%c64_215, %c0_216], %277 {strides = array<i32>} : memref<80x280xf32, #tpu.memory_space<vmem>>, vector<8x28xf32>,
    %279 = vector.extract_strided_slice %276 {offsets = [0, 56], sizes = [8, 28], strides = [1, 1]} : vector<8x560xf32> to vector<8x28xf32>
    %c64_217 = arith.constant 64 : index
    %c28_218 = arith.constant 28 : index
    %280 = vector.load %arg15[%c64_217, %c28_218] : memref<80x280xf32, #tpu.memory_space<vmem>>, vector<8x28xf32>
    tpu.vector_store %arg15[%c64_217, %c28_218], %279 {strides = array<i32>} : memref<80x280xf32, #tpu.memory_space<vmem>>, vector<8x28xf32>,
    %281 = vector.extract_strided_slice %276 {offsets = [0, 112], sizes = [8, 28], strides = [1, 1]} : vector<8x560xf32> to vector<8x28xf32>
    %c64_219 = arith.constant 64 : index
    %c56_220 = arith.constant 56 : index
    %282 = vector.load %arg15[%c64_219, %c56_220] : memref<80x280xf32, #tpu.memory_space<vmem>>, vector<8x28xf32>
    tpu.vector_store %arg15[%c64_219, %c56_220], %281 {strides = array<i32>} : memref<80x280xf32, #tpu.memory_space<vmem>>, vector<8x28xf32>,
    %283 = vector.extract_strided_slice %276 {offsets = [0, 168], sizes = [8, 28], strides = [1, 1]} : vector<8x560xf32> to vector<8x28xf32>
    %c64_221 = arith.constant 64 : index
    %c84_222 = arith.constant 84 : index
    %284 = vector.load %arg15[%c64_221, %c84_222] : memref<80x280xf32, #tpu.memory_space<vmem>>, vector<8x28xf32>
    tpu.vector_store %arg15[%c64_221, %c84_222], %283 {strides = array<i32>} : memref<80x280xf32, #tpu.memory_space<vmem>>, vector<8x28xf32>,
    %285 = vector.extract_strided_slice %276 {offsets = [0, 224], sizes = [8, 28], strides = [1, 1]} : vector<8x560xf32> to vector<8x28xf32>
    %c64_223 = arith.constant 64 : index
    %c112_224 = arith.constant 112 : index
    %286 = vector.load %arg15[%c64_223, %c112_224] : memref<80x280xf32, #tpu.memory_space<vmem>>, vector<8x28xf32>
    tpu.vector_store %arg15[%c64_223, %c112_224], %285 {strides = array<i32>} : memref<80x280xf32, #tpu.memory_space<vmem>>, vector<8x28xf32>,
    %287 = vector.extract_strided_slice %276 {offsets = [0, 280], sizes = [8, 28], strides = [1, 1]} : vector<8x560xf32> to vector<8x28xf32>
    %c64_225 = arith.constant 64 : index
    %c140_226 = arith.constant 140 : index
    %288 = vector.load %arg15[%c64_225, %c140_226] : memref<80x280xf32, #tpu.memory_space<vmem>>, vector<8x28xf32>
    tpu.vector_store %arg15[%c64_225, %c140_226], %287 {strides = array<i32>} : memref<80x280xf32, #tpu.memory_space<vmem>>, vector<8x28xf32>,
    %289 = vector.extract_strided_slice %276 {offsets = [0, 336], sizes = [8, 28], strides = [1, 1]} : vector<8x560xf32> to vector<8x28xf32>
    %c64_227 = arith.constant 64 : index
    %c168_228 = arith.constant 168 : index
    %290 = vector.load %arg15[%c64_227, %c168_228] : memref<80x280xf32, #tpu.memory_space<vmem>>, vector<8x28xf32>
    tpu.vector_store %arg15[%c64_227, %c168_228], %289 {strides = array<i32>} : memref<80x280xf32, #tpu.memory_space<vmem>>, vector<8x28xf32>,
    %291 = vector.extract_strided_slice %276 {offsets = [0, 392], sizes = [8, 28], strides = [1, 1]} : vector<8x560xf32> to vector<8x28xf32>
    %c64_229 = arith.constant 64 : index
    %c196_230 = arith.constant 196 : index
    %292 = vector.load %arg15[%c64_229, %c196_230] : memref<80x280xf32, #tpu.memory_space<vmem>>, vector<8x28xf32>
    tpu.vector_store %arg15[%c64_229, %c196_230], %291 {strides = array<i32>} : memref<80x280xf32, #tpu.memory_space<vmem>>, vector<8x28xf32>,
    %293 = vector.extract_strided_slice %276 {offsets = [0, 448], sizes = [8, 28], strides = [1, 1]} : vector<8x560xf32> to vector<8x28xf32>
    %c64_231 = arith.constant 64 : index
    %c224_232 = arith.constant 224 : index
    %294 = vector.load %arg15[%c64_231, %c224_232] : memref<80x280xf32, #tpu.memory_space<vmem>>, vector<8x28xf32>
    tpu.vector_store %arg15[%c64_231, %c224_232], %293 {strides = array<i32>} : memref<80x280xf32, #tpu.memory_space<vmem>>, vector<8x28xf32>,
    %295 = vector.extract_strided_slice %276 {offsets = [0, 504], sizes = [8, 28], strides = [1, 1]} : vector<8x560xf32> to vector<8x28xf32>
    %c64_233 = arith.constant 64 : index
    %c252_234 = arith.constant 252 : index
    %296 = vector.load %arg15[%c64_233, %c252_234] : memref<80x280xf32, #tpu.memory_space<vmem>>, vector<8x28xf32>
    tpu.vector_store %arg15[%c64_233, %c252_234], %295 {strides = array<i32>} : memref<80x280xf32, #tpu.memory_space<vmem>>, vector<8x28xf32>,
    %c144_235 = arith.constant 144 : index
    %c0_236 = arith.constant 0 : index
    %297 = vector.load %arg14[%c144_235, %c0_236] : memref<176x616xf32, #tpu.memory_space<vmem>>, vector<8x616xf32>
    %c152 = arith.constant 152 : index
    %c0_237 = arith.constant 0 : index
    %298 = vector.load %arg14[%c152, %c0_237] : memref<176x616xf32, #tpu.memory_space<vmem>>, vector<8x616xf32>
    %299 = arith.maximumf %297, %298 : vector<8x616xf32>
    %c160 = arith.constant 160 : index
    %c0_238 = arith.constant 0 : index
    %300 = vector.load %arg14[%c160, %c0_238] : memref<176x616xf32, #tpu.memory_space<vmem>>, vector<8x616xf32>
    %301 = arith.maximumf %299, %300 : vector<8x616xf32>
    %302 = vector.extract_strided_slice %301 {offsets = [0, 0], sizes = [8, 560], strides = [1, 1]} : vector<8x616xf32> to vector<8x560xf32>
    %303 = vector.extract_strided_slice %301 {offsets = [0, 28], sizes = [8, 560], strides = [1, 1]} : vector<8x616xf32> to vector<8x560xf32>
    %304 = arith.maximumf %302, %303 : vector<8x560xf32>
    %305 = vector.extract_strided_slice %301 {offsets = [0, 56], sizes = [8, 560], strides = [1, 1]} : vector<8x616xf32> to vector<8x560xf32>
    %306 = arith.maximumf %304, %305 : vector<8x560xf32>
    %307 = vector.extract_strided_slice %306 {offsets = [0, 0], sizes = [8, 28], strides = [1, 1]} : vector<8x560xf32> to vector<8x28xf32>
    %c72_239 = arith.constant 72 : index
    %c0_240 = arith.constant 0 : index
    %308 = vector.load %arg15[%c72_239, %c0_240] : memref<80x280xf32, #tpu.memory_space<vmem>>, vector<8x28xf32>
    tpu.vector_store %arg15[%c72_239, %c0_240], %307 {strides = array<i32>} : memref<80x280xf32, #tpu.memory_space<vmem>>, vector<8x28xf32>,
    %309 = vector.extract_strided_slice %306 {offsets = [0, 56], sizes = [8, 28], strides = [1, 1]} : vector<8x560xf32> to vector<8x28xf32>
    %c72_241 = arith.constant 72 : index
    %c28_242 = arith.constant 28 : index
    %310 = vector.load %arg15[%c72_241, %c28_242] : memref<80x280xf32, #tpu.memory_space<vmem>>, vector<8x28xf32>
    tpu.vector_store %arg15[%c72_241, %c28_242], %309 {strides = array<i32>} : memref<80x280xf32, #tpu.memory_space<vmem>>, vector<8x28xf32>,
    %311 = vector.extract_strided_slice %306 {offsets = [0, 112], sizes = [8, 28], strides = [1, 1]} : vector<8x560xf32> to vector<8x28xf32>
    %c72_243 = arith.constant 72 : index
    %c56_244 = arith.constant 56 : index
    %312 = vector.load %arg15[%c72_243, %c56_244] : memref<80x280xf32, #tpu.memory_space<vmem>>, vector<8x28xf32>
    tpu.vector_store %arg15[%c72_243, %c56_244], %311 {strides = array<i32>} : memref<80x280xf32, #tpu.memory_space<vmem>>, vector<8x28xf32>,
    %313 = vector.extract_strided_slice %306 {offsets = [0, 168], sizes = [8, 28], strides = [1, 1]} : vector<8x560xf32> to vector<8x28xf32>
    %c72_245 = arith.constant 72 : index
    %c84_246 = arith.constant 84 : index
    %314 = vector.load %arg15[%c72_245, %c84_246] : memref<80x280xf32, #tpu.memory_space<vmem>>, vector<8x28xf32>
    tpu.vector_store %arg15[%c72_245, %c84_246], %313 {strides = array<i32>} : memref<80x280xf32, #tpu.memory_space<vmem>>, vector<8x28xf32>,
    %315 = vector.extract_strided_slice %306 {offsets = [0, 224], sizes = [8, 28], strides = [1, 1]} : vector<8x560xf32> to vector<8x28xf32>
    %c72_247 = arith.constant 72 : index
    %c112_248 = arith.constant 112 : index
    %316 = vector.load %arg15[%c72_247, %c112_248] : memref<80x280xf32, #tpu.memory_space<vmem>>, vector<8x28xf32>
    tpu.vector_store %arg15[%c72_247, %c112_248], %315 {strides = array<i32>} : memref<80x280xf32, #tpu.memory_space<vmem>>, vector<8x28xf32>,
    %317 = vector.extract_strided_slice %306 {offsets = [0, 280], sizes = [8, 28], strides = [1, 1]} : vector<8x560xf32> to vector<8x28xf32>
    %c72_249 = arith.constant 72 : index
    %c140_250 = arith.constant 140 : index
    %318 = vector.load %arg15[%c72_249, %c140_250] : memref<80x280xf32, #tpu.memory_space<vmem>>, vector<8x28xf32>
    tpu.vector_store %arg15[%c72_249, %c140_250], %317 {strides = array<i32>} : memref<80x280xf32, #tpu.memory_space<vmem>>, vector<8x28xf32>,
    %319 = vector.extract_strided_slice %306 {offsets = [0, 336], sizes = [8, 28], strides = [1, 1]} : vector<8x560xf32> to vector<8x28xf32>
    %c72_251 = arith.constant 72 : index
    %c168_252 = arith.constant 168 : index
    %320 = vector.load %arg15[%c72_251, %c168_252] : memref<80x280xf32, #tpu.memory_space<vmem>>, vector<8x28xf32>
    tpu.vector_store %arg15[%c72_251, %c168_252], %319 {strides = array<i32>} : memref<80x280xf32, #tpu.memory_space<vmem>>, vector<8x28xf32>,
    %321 = vector.extract_strided_slice %306 {offsets = [0, 392], sizes = [8, 28], strides = [1, 1]} : vector<8x560xf32> to vector<8x28xf32>
    %c72_253 = arith.constant 72 : index
    %c196_254 = arith.constant 196 : index
    %322 = vector.load %arg15[%c72_253, %c196_254] : memref<80x280xf32, #tpu.memory_space<vmem>>, vector<8x28xf32>
    tpu.vector_store %arg15[%c72_253, %c196_254], %321 {strides = array<i32>} : memref<80x280xf32, #tpu.memory_space<vmem>>, vector<8x28xf32>,
    %323 = vector.extract_strided_slice %306 {offsets = [0, 448], sizes = [8, 28], strides = [1, 1]} : vector<8x560xf32> to vector<8x28xf32>
    %c72_255 = arith.constant 72 : index
    %c224_256 = arith.constant 224 : index
    %324 = vector.load %arg15[%c72_255, %c224_256] : memref<80x280xf32, #tpu.memory_space<vmem>>, vector<8x28xf32>
    tpu.vector_store %arg15[%c72_255, %c224_256], %323 {strides = array<i32>} : memref<80x280xf32, #tpu.memory_space<vmem>>, vector<8x28xf32>,
    %325 = vector.extract_strided_slice %306 {offsets = [0, 504], sizes = [8, 28], strides = [1, 1]} : vector<8x560xf32> to vector<8x28xf32>
    %c72_257 = arith.constant 72 : index
    %c252_258 = arith.constant 252 : index
    %326 = vector.load %arg15[%c72_257, %c252_258] : memref<80x280xf32, #tpu.memory_space<vmem>>, vector<8x28xf32>
    tpu.vector_store %arg15[%c72_257, %c252_258], %325 {strides = array<i32>} : memref<80x280xf32, #tpu.memory_space<vmem>>, vector<8x28xf32>,
    %c0_259 = arith.constant 0 : index
    %c0_260 = arith.constant 0 : index
    %327 = vector.load %arg15[%c0_259, %c0_260] : memref<80x280xf32, #tpu.memory_space<vmem>>, vector<64x280xf32>
    %c0_261 = arith.constant 0 : index
    %c0_262 = arith.constant 0 : index
    %c0_263 = arith.constant 0 : index
    %328 = vector.load %arg3[%c0_261, %c0_262, %c0_263] : memref<3x280x384xf32, #tpu.memory_space<vmem>>, vector<1x280x384xf32>
    %329 = vector.shape_cast %328 : vector<1x280x384xf32> to vector<280x384xf32>
    %cst_264 = arith.constant dense<0.000000e+00> : vector<64x384xf32>
    %330 = tpu.matmul %327, %329, %cst_264 {dimension_numbers = #tpu.dot_dimension_numbers<[1], [0], [0], [1], [0, 0, 1, 1], [], []>} : vector<64x280xf32>, vector<280x384xf32>, vector<64x384xf32> -> vector<64x384xf32>
    %c8_265 = arith.constant 8 : index
    %c0_266 = arith.constant 0 : index
    %331 = vector.load %arg15[%c8_265, %c0_266] : memref<80x280xf32, #tpu.memory_space<vmem>>, vector<64x280xf32>
    %c1_267 = arith.constant 1 : index
    %c0_268 = arith.constant 0 : index
    %c0_269 = arith.constant 0 : index
    %332 = vector.load %arg3[%c1_267, %c0_268, %c0_269] : memref<3x280x384xf32, #tpu.memory_space<vmem>>, vector<1x280x384xf32>
    %333 = vector.shape_cast %332 : vector<1x280x384xf32> to vector<280x384xf32>
    %cst_270 = arith.constant dense<0.000000e+00> : vector<64x384xf32>
    %334 = tpu.matmul %331, %333, %cst_270 {dimension_numbers = #tpu.dot_dimension_numbers<[1], [0], [0], [1], [0, 0, 1, 1], [], []>} : vector<64x280xf32>, vector<280x384xf32>, vector<64x384xf32> -> vector<64x384xf32>
    %335 = arith.addf %330, %334 : vector<64x384xf32>
    %c16_271 = arith.constant 16 : index
    %c0_272 = arith.constant 0 : index
    %336 = vector.load %arg15[%c16_271, %c0_272] : memref<80x280xf32, #tpu.memory_space<vmem>>, vector<64x280xf32>
    %c2_273 = arith.constant 2 : index
    %c0_274 = arith.constant 0 : index
    %c0_275 = arith.constant 0 : index
    %337 = vector.load %arg3[%c2_273, %c0_274, %c0_275] : memref<3x280x384xf32, #tpu.memory_space<vmem>>, vector<1x280x384xf32>
    %338 = vector.shape_cast %337 : vector<1x280x384xf32> to vector<280x384xf32>
    %cst_276 = arith.constant dense<0.000000e+00> : vector<64x384xf32>
    %339 = tpu.matmul %336, %338, %cst_276 {dimension_numbers = #tpu.dot_dimension_numbers<[1], [0], [0], [1], [0, 0, 1, 1], [], []>} : vector<64x280xf32>, vector<280x384xf32>, vector<64x384xf32> -> vector<64x384xf32>
    %340 = arith.addf %335, %339 : vector<64x384xf32>
    %c0_277 = arith.constant 0 : index
    %c0_278 = arith.constant 0 : index
    %341 = vector.load %arg6[%c0_277, %c0_278] : memref<1x384xf32, #tpu.memory_space<vmem>>, vector<1x384xf32>
    %342 = vector.broadcast %341 : vector<1x384xf32> to vector<64x384xf32>
    %343 = arith.addf %340, %342 : vector<64x384xf32>
    %cst_279 = arith.constant 0.000000e+00 : f32
    %344 = vector.broadcast %cst_279 : f32 to vector<64x384xf32>
    %345 = arith.cmpf ogt, %343, %344 : vector<64x384xf32>
    %346 = vector.broadcast %1 : f32 to vector<64x384xf32>
    %347 = arith.mulf %346, %343 : vector<64x384xf32>
    %348 = arith.select %345, %343, %347 : vector<64x384xi1>, vector<64x384xf32>
    %c0_280 = arith.constant 0 : index
    %c0_281 = arith.constant 0 : index
    %349 = vector.load %arg16[%c0_280, %c0_281] : memref<64x384xf32, #tpu.memory_space<vmem>>, vector<64x384xf32>
    tpu.vector_store %arg16[%c0_280, %c0_281], %348 {strides = array<i32>} : memref<64x384xf32, #tpu.memory_space<vmem>>, vector<64x384xf32>,
    %c0_282 = arith.constant 0 : index
    %c0_283 = arith.constant 0 : index
    %350 = vector.load %arg16[%c0_282, %c0_283] : memref<64x384xf32, #tpu.memory_space<vmem>>, vector<8x384xf32>
    %c8_284 = arith.constant 8 : index
    %c0_285 = arith.constant 0 : index
    %351 = vector.load %arg16[%c8_284, %c0_285] : memref<64x384xf32, #tpu.memory_space<vmem>>, vector<8x384xf32>
    %352 = arith.maximumf %350, %351 : vector<8x384xf32>
    %c16_286 = arith.constant 16 : index
    %c0_287 = arith.constant 0 : index
    %353 = vector.load %arg16[%c16_286, %c0_287] : memref<64x384xf32, #tpu.memory_space<vmem>>, vector<8x384xf32>
    %354 = arith.maximumf %352, %353 : vector<8x384xf32>
    %355 = vector.extract_strided_slice %354 {offsets = [0, 0], sizes = [8, 240], strides = [1, 1]} : vector<8x384xf32> to vector<8x240xf32>
    %356 = vector.extract_strided_slice %354 {offsets = [0, 48], sizes = [8, 240], strides = [1, 1]} : vector<8x384xf32> to vector<8x240xf32>
    %357 = arith.maximumf %355, %356 : vector<8x240xf32>
    %358 = vector.extract_strided_slice %354 {offsets = [0, 96], sizes = [8, 240], strides = [1, 1]} : vector<8x384xf32> to vector<8x240xf32>
    %359 = arith.maximumf %357, %358 : vector<8x240xf32>
    %360 = vector.extract_strided_slice %359 {offsets = [0, 0], sizes = [8, 48], strides = [1, 1]} : vector<8x240xf32> to vector<8x48xf32>
    %c0_288 = arith.constant 0 : index
    %c0_289 = arith.constant 0 : index
    %361 = vector.load %arg17[%c0_288, %c0_289] : memref<24x144xf32, #tpu.memory_space<vmem>>, vector<8x48xf32>
    tpu.vector_store %arg17[%c0_288, %c0_289], %360 {strides = array<i32>} : memref<24x144xf32, #tpu.memory_space<vmem>>, vector<8x48xf32>,
    %362 = vector.extract_strided_slice %359 {offsets = [0, 96], sizes = [8, 48], strides = [1, 1]} : vector<8x240xf32> to vector<8x48xf32>
    %c0_290 = arith.constant 0 : index
    %c48_291 = arith.constant 48 : index
    %363 = vector.load %arg17[%c0_290, %c48_291] : memref<24x144xf32, #tpu.memory_space<vmem>>, vector<8x48xf32>
    tpu.vector_store %arg17[%c0_290, %c48_291], %362 {strides = array<i32>} : memref<24x144xf32, #tpu.memory_space<vmem>>, vector<8x48xf32>,
    %364 = vector.extract_strided_slice %359 {offsets = [0, 192], sizes = [8, 48], strides = [1, 1]} : vector<8x240xf32> to vector<8x48xf32>
    %c0_292 = arith.constant 0 : index
    %c96_293 = arith.constant 96 : index
    %365 = vector.load %arg17[%c0_292, %c96_293] : memref<24x144xf32, #tpu.memory_space<vmem>>, vector<8x48xf32>
    tpu.vector_store %arg17[%c0_292, %c96_293], %364 {strides = array<i32>} : memref<24x144xf32, #tpu.memory_space<vmem>>, vector<8x48xf32>,
    %c16_294 = arith.constant 16 : index
    %c0_295 = arith.constant 0 : index
    %366 = vector.load %arg16[%c16_294, %c0_295] : memref<64x384xf32, #tpu.memory_space<vmem>>, vector<8x384xf32>
    %c24_296 = arith.constant 24 : index
    %c0_297 = arith.constant 0 : index
    %367 = vector.load %arg16[%c24_296, %c0_297] : memref<64x384xf32, #tpu.memory_space<vmem>>, vector<8x384xf32>
    %368 = arith.maximumf %366, %367 : vector<8x384xf32>
    %c32_298 = arith.constant 32 : index
    %c0_299 = arith.constant 0 : index
    %369 = vector.load %arg16[%c32_298, %c0_299] : memref<64x384xf32, #tpu.memory_space<vmem>>, vector<8x384xf32>
    %370 = arith.maximumf %368, %369 : vector<8x384xf32>
    %371 = vector.extract_strided_slice %370 {offsets = [0, 0], sizes = [8, 240], strides = [1, 1]} : vector<8x384xf32> to vector<8x240xf32>
    %372 = vector.extract_strided_slice %370 {offsets = [0, 48], sizes = [8, 240], strides = [1, 1]} : vector<8x384xf32> to vector<8x240xf32>
    %373 = arith.maximumf %371, %372 : vector<8x240xf32>
    %374 = vector.extract_strided_slice %370 {offsets = [0, 96], sizes = [8, 240], strides = [1, 1]} : vector<8x384xf32> to vector<8x240xf32>
    %375 = arith.maximumf %373, %374 : vector<8x240xf32>
    %376 = vector.extract_strided_slice %375 {offsets = [0, 0], sizes = [8, 48], strides = [1, 1]} : vector<8x240xf32> to vector<8x48xf32>
    %c8_300 = arith.constant 8 : index
    %c0_301 = arith.constant 0 : index
    %377 = vector.load %arg17[%c8_300, %c0_301] : memref<24x144xf32, #tpu.memory_space<vmem>>, vector<8x48xf32>
    tpu.vector_store %arg17[%c8_300, %c0_301], %376 {strides = array<i32>} : memref<24x144xf32, #tpu.memory_space<vmem>>, vector<8x48xf32>,
    %378 = vector.extract_strided_slice %375 {offsets = [0, 96], sizes = [8, 48], strides = [1, 1]} : vector<8x240xf32> to vector<8x48xf32>
    %c8_302 = arith.constant 8 : index
    %c48_303 = arith.constant 48 : index
    %379 = vector.load %arg17[%c8_302, %c48_303] : memref<24x144xf32, #tpu.memory_space<vmem>>, vector<8x48xf32>
    tpu.vector_store %arg17[%c8_302, %c48_303], %378 {strides = array<i32>} : memref<24x144xf32, #tpu.memory_space<vmem>>, vector<8x48xf32>,
    %380 = vector.extract_strided_slice %375 {offsets = [0, 192], sizes = [8, 48], strides = [1, 1]} : vector<8x240xf32> to vector<8x48xf32>
    %c8_304 = arith.constant 8 : index
    %c96_305 = arith.constant 96 : index
    %381 = vector.load %arg17[%c8_304, %c96_305] : memref<24x144xf32, #tpu.memory_space<vmem>>, vector<8x48xf32>
    tpu.vector_store %arg17[%c8_304, %c96_305], %380 {strides = array<i32>} : memref<24x144xf32, #tpu.memory_space<vmem>>, vector<8x48xf32>,
    %c32_306 = arith.constant 32 : index
    %c0_307 = arith.constant 0 : index
    %382 = vector.load %arg16[%c32_306, %c0_307] : memref<64x384xf32, #tpu.memory_space<vmem>>, vector<8x384xf32>
    %c40_308 = arith.constant 40 : index
    %c0_309 = arith.constant 0 : index
    %383 = vector.load %arg16[%c40_308, %c0_309] : memref<64x384xf32, #tpu.memory_space<vmem>>, vector<8x384xf32>
    %384 = arith.maximumf %382, %383 : vector<8x384xf32>
    %c48_310 = arith.constant 48 : index
    %c0_311 = arith.constant 0 : index
    %385 = vector.load %arg16[%c48_310, %c0_311] : memref<64x384xf32, #tpu.memory_space<vmem>>, vector<8x384xf32>
    %386 = arith.maximumf %384, %385 : vector<8x384xf32>
    %387 = vector.extract_strided_slice %386 {offsets = [0, 0], sizes = [8, 240], strides = [1, 1]} : vector<8x384xf32> to vector<8x240xf32>
    %388 = vector.extract_strided_slice %386 {offsets = [0, 48], sizes = [8, 240], strides = [1, 1]} : vector<8x384xf32> to vector<8x240xf32>
    %389 = arith.maximumf %387, %388 : vector<8x240xf32>
    %390 = vector.extract_strided_slice %386 {offsets = [0, 96], sizes = [8, 240], strides = [1, 1]} : vector<8x384xf32> to vector<8x240xf32>
    %391 = arith.maximumf %389, %390 : vector<8x240xf32>
    %392 = vector.extract_strided_slice %391 {offsets = [0, 0], sizes = [8, 48], strides = [1, 1]} : vector<8x240xf32> to vector<8x48xf32>
    %c16_312 = arith.constant 16 : index
    %c0_313 = arith.constant 0 : index
    %393 = vector.load %arg17[%c16_312, %c0_313] : memref<24x144xf32, #tpu.memory_space<vmem>>, vector<8x48xf32>
    tpu.vector_store %arg17[%c16_312, %c0_313], %392 {strides = array<i32>} : memref<24x144xf32, #tpu.memory_space<vmem>>, vector<8x48xf32>,
    %394 = vector.extract_strided_slice %391 {offsets = [0, 96], sizes = [8, 48], strides = [1, 1]} : vector<8x240xf32> to vector<8x48xf32>
    %c16_314 = arith.constant 16 : index
    %c48_315 = arith.constant 48 : index
    %395 = vector.load %arg17[%c16_314, %c48_315] : memref<24x144xf32, #tpu.memory_space<vmem>>, vector<8x48xf32>
    tpu.vector_store %arg17[%c16_314, %c48_315], %394 {strides = array<i32>} : memref<24x144xf32, #tpu.memory_space<vmem>>, vector<8x48xf32>,
    %396 = vector.extract_strided_slice %391 {offsets = [0, 192], sizes = [8, 48], strides = [1, 1]} : vector<8x240xf32> to vector<8x48xf32>
    %c16_316 = arith.constant 16 : index
    %c96_317 = arith.constant 96 : index
    %397 = vector.load %arg17[%c16_316, %c96_317] : memref<24x144xf32, #tpu.memory_space<vmem>>, vector<8x48xf32>
    tpu.vector_store %arg17[%c16_316, %c96_317], %396 {strides = array<i32>} : memref<24x144xf32, #tpu.memory_space<vmem>>, vector<8x48xf32>,
    %c0_318 = arith.constant 0 : index
    %c0_319 = arith.constant 0 : index
    %398 = vector.load %arg17[%c0_318, %c0_319] : memref<24x144xf32, #tpu.memory_space<vmem>>, vector<16x144xf32>
    %c0_320 = arith.constant 0 : index
    %c0_321 = arith.constant 0 : index
    %c0_322 = arith.constant 0 : index
    %399 = vector.load %arg4[%c0_320, %c0_321, %c0_322] : memref<2x144x128xf32, #tpu.memory_space<vmem>>, vector<1x144x128xf32>
    %400 = vector.shape_cast %399 : vector<1x144x128xf32> to vector<144x128xf32>
    %cst_323 = arith.constant dense<0.000000e+00> : vector<16x128xf32>
    %401 = tpu.matmul %398, %400, %cst_323 {dimension_numbers = #tpu.dot_dimension_numbers<[1], [0], [0], [1], [0, 0, 1, 1], [], []>} : vector<16x144xf32>, vector<144x128xf32>, vector<16x128xf32> -> vector<16x128xf32>
    %c8_324 = arith.constant 8 : index
    %c0_325 = arith.constant 0 : index
    %402 = vector.load %arg17[%c8_324, %c0_325] : memref<24x144xf32, #tpu.memory_space<vmem>>, vector<16x144xf32>
    %c1_326 = arith.constant 1 : index
    %c0_327 = arith.constant 0 : index
    %c0_328 = arith.constant 0 : index
    %403 = vector.load %arg4[%c1_326, %c0_327, %c0_328] : memref<2x144x128xf32, #tpu.memory_space<vmem>>, vector<1x144x128xf32>
    %404 = vector.shape_cast %403 : vector<1x144x128xf32> to vector<144x128xf32>
    %cst_329 = arith.constant dense<0.000000e+00> : vector<16x128xf32>
    %405 = tpu.matmul %402, %404, %cst_329 {dimension_numbers = #tpu.dot_dimension_numbers<[1], [0], [0], [1], [0, 0, 1, 1], [], []>} : vector<16x144xf32>, vector<144x128xf32>, vector<16x128xf32> -> vector<16x128xf32>
    %406 = arith.addf %401, %405 : vector<16x128xf32>
    %c0_330 = arith.constant 0 : index
    %c0_331 = arith.constant 0 : index
    %407 = vector.load %arg7[%c0_330, %c0_331] : memref<1x128xf32, #tpu.memory_space<vmem>>, vector<1x128xf32>
    %408 = vector.broadcast %407 : vector<1x128xf32> to vector<16x128xf32>
    %409 = arith.addf %406, %408 : vector<16x128xf32>
    %cst_332 = arith.constant 0.000000e+00 : f32
    %410 = vector.broadcast %cst_332 : f32 to vector<16x128xf32>
    %411 = arith.cmpf ogt, %409, %410 : vector<16x128xf32>
    %412 = vector.broadcast %2 : f32 to vector<16x128xf32>
    %413 = arith.mulf %412, %409 : vector<16x128xf32>
    %414 = arith.select %411, %409, %413 : vector<16x128xi1>, vector<16x128xf32>
    %415 = vector.extract_strided_slice %414 {offsets = [0, 0], sizes = [8, 128], strides = [1, 1]} : vector<16x128xf32> to vector<8x128xf32>
    %c0_333 = arith.constant 0 : index
    %c0_334 = arith.constant 0 : index
    %416 = vector.load %arg8[%c0_333, %c0_334] : memref<256x128xf32, #tpu.memory_space<vmem>>, vector<128x128xf32>
    %cst_335 = arith.constant dense<0.000000e+00> : vector<8x128xf32>
    %417 = tpu.matmul %415, %416, %cst_335 {dimension_numbers = #tpu.dot_dimension_numbers<[1], [0], [0], [1], [0, 0, 1, 1], [], []>} : vector<8x128xf32>, vector<128x128xf32>, vector<8x128xf32> -> vector<8x128xf32>
    %418 = vector.extract_strided_slice %414 {offsets = [8, 0], sizes = [8, 128], strides = [1, 1]} : vector<16x128xf32> to vector<8x128xf32>
    %c128_336 = arith.constant 128 : index
    %c0_337 = arith.constant 0 : index
    %419 = vector.load %arg8[%c128_336, %c0_337] : memref<256x128xf32, #tpu.memory_space<vmem>>, vector<128x128xf32>
    %cst_338 = arith.constant dense<0.000000e+00> : vector<8x128xf32>
    %420 = tpu.matmul %418, %419, %cst_338 {dimension_numbers = #tpu.dot_dimension_numbers<[1], [0], [0], [1], [0, 0, 1, 1], [], []>} : vector<8x128xf32>, vector<128x128xf32>, vector<8x128xf32> -> vector<8x128xf32>
    %421 = arith.addf %417, %420 : vector<8x128xf32>
    %c0_339 = arith.constant 0 : index
    %c0_340 = arith.constant 0 : index
    %422 = vector.load %arg9[%c0_339, %c0_340] : memref<1x128xf32, #tpu.memory_space<vmem>>, vector<1x128xf32>
    %423 = vector.broadcast %422 : vector<1x128xf32> to vector<8x128xf32>
    %424 = arith.addf %421, %423 : vector<8x128xf32>
    %cst_341 = arith.constant 0.000000e+00 : f32
    %425 = vector.broadcast %cst_341 : f32 to vector<8x128xf32>
    %426 = arith.cmpf ogt, %424, %425 : vector<8x128xf32>
    %427 = vector.broadcast %3 : f32 to vector<8x128xf32>
    %428 = arith.mulf %427, %424 : vector<8x128xf32>
    %429 = arith.select %426, %424, %428 : vector<8x128xi1>, vector<8x128xf32>
    %c0_342 = arith.constant 0 : index
    %c0_343 = arith.constant 0 : index
    %430 = vector.load %arg10[%c0_342, %c0_343] : memref<128x5xf32, #tpu.memory_space<vmem>>, vector<128x5xf32>
    %cst_344 = arith.constant dense<0.000000e+00> : vector<8x5xf32>
    %431 = tpu.matmul %429, %430, %cst_344 {dimension_numbers = #tpu.dot_dimension_numbers<[1], [0], [0], [1], [0, 0, 1, 1], [], []>} : vector<8x128xf32>, vector<128x5xf32>, vector<8x5xf32> -> vector<8x5xf32>
    %c0_345 = arith.constant 0 : index
    %c0_346 = arith.constant 0 : index
    %432 = vector.load %arg11[%c0_345, %c0_346] : memref<1x5xf32, #tpu.memory_space<vmem>>, vector<1x5xf32>
    %433 = vector.broadcast %432 : vector<1x5xf32> to vector<8x5xf32>
    %434 = arith.addf %431, %433 : vector<8x5xf32>
    %435 = tpu.iota {dimensions = array<i32: 1>} : vector<8x5xi32>
    %c0_i32 = arith.constant 0 : i32
    %436 = vector.broadcast %c0_i32 : i32 to vector<8x5xi32>
    %437 = arith.cmpi eq, %435, %436 : vector<8x5xi32>
    %438 = arith.negf %434 : vector<8x5xf32>
    %439 = math.exp %438 : vector<8x5xf32>
    %cst_347 = arith.constant 1.000000e+00 : f32
    %440 = vector.broadcast %cst_347 : f32 to vector<8x5xf32>
    %441 = arith.addf %440, %439 : vector<8x5xf32>
    %442 = arith.divf %440, %441 : vector<8x5xf32>
    %443 = arith.select %437, %442, %434 : vector<8x5xi1>, vector<8x5xf32>
    %c0_348 = arith.constant 0 : index
    %c0_349 = arith.constant 0 : index
    %444 = vector.load %arg13[%c0_348, %c0_349] : memref<8x5xf32, #tpu.memory_space<vmem>>, vector<8x5xf32>
    tpu.vector_store %arg13[%c0_348, %c0_349], %443 {strides = array<i32>} : memref<8x5xf32, #tpu.memory_space<vmem>>, vector<8x5xf32>,
    return
  }
  func.func @transform_0(%arg0: i32) -> (i32, i32) {
    %c0_i32 = arith.constant 0 : i32
    %c0_i32_0 = arith.constant 0 : i32
    return %arg0, %c0_i32 : i32, i32
  }
  func.func @transform_1(%arg0: i32) -> (i32, i32, i32) {
    %c0_i32 = arith.constant 0 : i32
    %c0_i32_0 = arith.constant 0 : i32
    %c0_i32_1 = arith.constant 0 : i32
    %c0_i32_2 = arith.constant 0 : i32
    return %c0_i32, %c0_i32_0, %c0_i32_1 : i32, i32, i32
  }
  func.func @transform_2(%arg0: i32) -> (i32, i32, i32) {
    %c0_i32 = arith.constant 0 : i32
    %c0_i32_0 = arith.constant 0 : i32
    %c0_i32_1 = arith.constant 0 : i32
    %c0_i32_2 = arith.constant 0 : i32
    return %c0_i32, %c0_i32_0, %c0_i32_1 : i32, i32, i32
  }
  func.func @transform_3(%arg0: i32) -> (i32, i32, i32) {
    %c0_i32 = arith.constant 0 : i32
    %c0_i32_0 = arith.constant 0 : i32
    %c0_i32_1 = arith.constant 0 : i32
    %c0_i32_2 = arith.constant 0 : i32
    return %c0_i32, %c0_i32_0, %c0_i32_1 : i32, i32, i32
  }
  func.func @transform_4(%arg0: i32) -> (i32, i32) {
    %c0_i32 = arith.constant 0 : i32
    %c0_i32_0 = arith.constant 0 : i32
    %c0_i32_1 = arith.constant 0 : i32
    return %c0_i32, %c0_i32_0 : i32, i32
  }
  func.func @transform_5(%arg0: i32) -> (i32, i32) {
    %c0_i32 = arith.constant 0 : i32
    %c0_i32_0 = arith.constant 0 : i32
    %c0_i32_1 = arith.constant 0 : i32
    return %c0_i32, %c0_i32_0 : i32, i32
  }
  func.func @transform_6(%arg0: i32) -> (i32, i32) {
    %c0_i32 = arith.constant 0 : i32
    %c0_i32_0 = arith.constant 0 : i32
    %c0_i32_1 = arith.constant 0 : i32
    return %c0_i32, %c0_i32_0 : i32, i32
  }
  func.func @transform_7(%arg0: i32) -> (i32, i32) {
    %c0_i32 = arith.constant 0 : i32
    %c0_i32_0 = arith.constant 0 : i32
    %c0_i32_1 = arith.constant 0 : i32
    return %c0_i32, %c0_i32_0 : i32, i32
  }
  func.func @transform_8(%arg0: i32) -> (i32, i32) {
    %c0_i32 = arith.constant 0 : i32
    %c0_i32_0 = arith.constant 0 : i32
    %c0_i32_1 = arith.constant 0 : i32
    return %c0_i32, %c0_i32_0 : i32, i32
  }
  func.func @transform_9(%arg0: i32) -> (i32, i32) {
    %c0_i32 = arith.constant 0 : i32
    %c0_i32_0 = arith.constant 0 : i32
    %c0_i32_1 = arith.constant 0 : i32
    return %c0_i32, %c0_i32_0 : i32, i32
  }
  func.func @transform_10(%arg0: i32) -> (i32, i32) {
    %c0_i32 = arith.constant 0 : i32
    %c0_i32_0 = arith.constant 0 : i32
    %c0_i32_1 = arith.constant 0 : i32
    return %c0_i32, %c0_i32_0 : i32, i32
  }
  func.func @transform_11(%arg0: i32) -> (i32, i32) {
    %c0_i32 = arith.constant 0 : i32
    %c0_i32_0 = arith.constant 0 : i32
    %c0_i32_1 = arith.constant 0 : i32
    return %c0_i32, %c0_i32_0 : i32, i32
  }
  func.func @transform_12(%arg0: i32) -> (i32, i32) {
    %c0_i32 = arith.constant 0 : i32
    %c0_i32_0 = arith.constant 0 : i32
    return %arg0, %c0_i32 : i32, i32
  }
}

</mosaic_0001>

<bundles_post_ra>
// kernel: tile.18
= control target key start
LH: loop header
LB: loop body
LE: loop exit
PB: predicated region body
PF: predicated region fallthrough
CT: control target
= control target key end

     0   :  { %s34_s0 = inlined_call_operand.vmem [shape: f32[28], index: 0, kind: input, shape index: {}]   ;;  %s35_s1 = inlined_call_operand.vmem [shape: f32[22,28], index: 1, kind: output, shape index: {}]  }
   0x1   :  { %v4_v0 = vld [vmem:[%s34_s0] ss:$0 sm:$0xff] }
   0x2   :  { %5 = vst [vmem:[%s35_s1] sm:$0xff] %v4_v0 }
   0x3   :  { %10 = vst [vmem:[%s35_s1 + $0x8] sm:$0xff] %v4_v0 }
   0x4   :  { %11 = vst [vmem:[%s35_s1 + $0x10] sm:$0xff] %v4_v0 }

// kernel: tile.19
= control target key start
LH: loop header
LB: loop body
LE: loop exit
PB: predicated region body
PF: predicated region fallthrough
CT: control target
= control target key end

     0   :  { %vm37_vm0 = vcmask 130048   ;;  %vm9_vm1 = vcmask 31744   ;;  %s256_s14 = smov 112   ;;  %s257_s15 = smov 124   ;;  %vm27_vm2 = vcmask 162816   ;;  %vm23_vm3 = vcmask 64512   ;;  %s384_s0 = inlined_call_operand.vmem [shape: f32[22,28], index: 0, kind: input, shape index: {}]   ;;  %s385_s1 = inlined_call_operand.vmem [shape: f32[1,616], index: 1, kind: output, shape index: {}]  }
   0x1   :  { %v210_v0 = vld [vmem:[%s384_s0 + $0x4] sm:$0x1]   ;;  %v206_v3 = vld [vmem:[%s384_s0 + $0x9] sm:$0x1]   ;;  %v212_v6 = vld [vmem:[%s384_s0 + $0xd] sm:$0x1]  }
   0x2   :  { %v211_v1 = vld [vmem:[%s384_s0 + $0x4] sm:$0x1]   ;;  %v207_v4 = vld [vmem:[%s384_s0 + $0x9] sm:$0x1]   ;;  %v213_v7 = vld [vmem:[%s384_s0 + $0xd] sm:$0x1]  }
   0x3   :  { %v38_v2 = vsel %vm37_vm0, %v211_v1, %v210_v0  ;;  %v10_v5 = vsel %vm9_vm1, %v207_v4, %v206_v3  ;;  %v208_v8 = vld [vmem:[%s384_s0 + $0x12] sm:$0x1]   ;;  %v214_v10 = vld [vmem:[%s384_s0 + $0x8] sm:$0x1]   ;;  %s258_s26 = smov 96   ;;  %v51_v11 = vsel %vm27_vm2, %v213_v7, %v212_v6  ;;  %s259_s27 = smov 108  }
   0x4   :  { %39 = vrot.lane.b32.xlu1 %v38_v2, %s256_s14  ;;  %11 = vrot.lane.b32.xlu0 %v10_v5, %s257_s15  ;;  %v209_v9 = vld [vmem:[%s384_s0 + $0x12] sm:$0x1]   ;;  %s260_s28 = smov 120   ;;  %v215_v13 = vld [vmem:[%s384_s0 + $0x11] sm:$0x1]   ;;  %s261_s2 = smov 92  }
   0x5   :  { %62 = vrot.lane.b32.xlu2 %v214_v10, %s258_s26  ;;  %v24_v12 = vsel %vm23_vm3, %v209_v9, %v208_v8  ;;  %v217_v14 = vld [vmem:[%s384_s0 + $0xc] sm:$0x1]   ;;  %v216_v15 = vld [vmem:[%s384_s0 + $0x3] sm:$0x1]   ;;  %s262_s7 = smov 80   ;;  %s263_s8 = smov 84  }
   0x6   :  { %v218_v16 = vld [vmem:[%s384_s0 + $0x15] sm:$0x1]   ;;  %s264_s11 = smov 76   ;;  %v220_v17 = vld [vmem:[%s384_s0 + $0x10] sm:$0x1]   ;;  %s265_s16 = smov 64  }
   0x7   :  { %v219_v18 = vld [vmem:[%s384_s0 + $0x7] sm:$0x1]   ;;  %s266_s17 = smov 68   ;;  %v221_v19 = vld [vmem:[%s384_s0 + $0x2] sm:$0x1]   ;;  %s267_s20 = smov 56  }
   0x8   :  { %v223_v20 = vld [vmem:[%s384_s0 + $0x14] sm:$0x1]   ;;  %v222_v21 = vld [vmem:[%s384_s0 + $0xb] sm:$0x1]   ;;  %s268_s25 = smov 48   ;;  %s269_s26 = smov 52  }
   0x9   :  { %v224_v22 = vld [vmem:[%s384_s0 + $0x6] sm:$0x1]   ;;  %s270_s29 = smov 40   ;;  %v226_v23 = vld [vmem:[%s384_s0 + $0x1] sm:$0x1]   ;;  %s271_s5 = smov 28  }
   0xa   :  { %v225_v24 = vld [vmem:[%s384_s0 + $0xf] sm:$0x1]   ;;  %s272_s6 = smov 36   ;;  %v227_v25 = vld [vmem:[%s384_s0 + $0xa] sm:$0x1]   ;;  %s273_s9 = smov 24  }
   0xb   :  { %v229_v26 = vld [vmem:[%s384_s0 + $0x5] sm:$0x1]   ;;  %v228_v27 = vld [vmem:[%s384_s0 + $0x13] sm:$0x1]   ;;  %s274_s14 = smov 12   ;;  %s275_s15 = smov 20  }
   0xc   :  { %52 = vrot.lane.b32.xlu1 %v51_v11, %s259_s27  ;;  %25 = vrot.lane.b32.xlu0 %v24_v12, %s260_s28  ;;  %v230_v28 = vld [vmem:[%s384_s0 + $0xe] sm:$0x1]   ;;  %s276_s18 = smov 8   ;;  %v2_v29 = vld [vmem:[%s384_s0] sm:$0x1]   ;;  %vm3_vm4 = vcmask 228352  }
   0xd   :  { %69 = vrot.lane.b32.xlu2 %v215_v13, %s261_s2  ;;  %4 = vst.msk [vmem:[#allocation0] sm:$0x1] %vm3_vm4, %v2_v29   ;;  %vm44_vm5 = vcmask 1048448   ;;  %vm13_vm6 = vcmask 195584   ;;  %vm16_vm7 = vcmask 1048544   ;;  %vm41_vm8 = vcmask 97280  }
   0xe   :  { %vm64_vm9 = vcmask 1015552   ;;  %vm57_vm10 = vcmask 1048416   ;;  %vm30_vm11 = vcmask 1048512   ;;  %vm91_vm12 = vcmask 851552  }
   0xf   :  { %vm71_vm13 = vcmask 982752   ;;  %vm84_vm14 = vcmask 884352   ;;  %vm78_vm15 = vcmask 917152   ;;  %vm112_vm0 = vcmask 687552  }
  0x10   :  { %vm105_vm1 = vcmask 753152   ;;  %vm125_vm4 = vcmask 621952  }
  0x14   :  { %82 = vrot.lane.b32.xlu1 %v217_v14, %s262_s7  ;;  %76 = vrot.lane.b32.xlu0 %v216_v15, %s263_s8 }
  0x15   :  { %89 = vrot.lane.b32.xlu2 %v218_v16, %s264_s11 }
  0x1c   :  { %103 = vrot.lane.b32.xlu1 %v220_v17, %s265_s16  ;;  %96 = vrot.lane.b32.xlu0 %v219_v18, %s266_s17 }
  0x1d   :  { %110 = vrot.lane.b32.xlu2 %v221_v19, %s267_s20 }
  0x24   :  { %123 = vrot.lane.b32.xlu1 %v223_v20, %s268_s25  ;;  %116 = vrot.lane.b32.xlu0 %v222_v21, %s269_s26 }
  0x25   :  { %130 = vrot.lane.b32.xlu2 %v224_v22, %s270_s29 }
  0x2c   :  { %144 = vrot.lane.b32.xlu1 %v226_v23, %s271_s5  ;;  %137 = vrot.lane.b32.xlu0 %v225_v24, %s272_s6 }
  0x2d   :  { %150 = vrot.lane.b32.xlu2 %v227_v25, %s273_s9 }
  0x34   :  { %164 = vrot.lane.b32.xlu1 %v229_v26, %s274_s14  ;;  %157 = vrot.lane.b32.xlu0 %v228_v27, %s275_s15 }
  0x35   :  { %171 = vrot.lane.b32.xlu2 %v230_v28, %s276_s18 }
  0x5f   :  { %v63_v30 = vpop.permute.xlu2 %62  }
  0x67   :  { %v70_v31 = vpop.permute.xlu2 %69  }
  0x6f   :  { %v90_v32 = vpop.permute.xlu2 %89  }
  0x76   :  { %v40_v33 = vpop.permute.xlu1 %39   ;;  %v12_v34 = vpop.permute.xlu0 %11  }
  0x77   :  { %45 = vst.msk [vmem:[#allocation0] sm:$0x1] %vm44_vm5, %v40_v33   ;;  %v111_v35 = vpop.permute.xlu2 %110   ;;  %vm118_vm5 = vcmask 654752  }
  0x78   :  { %15 = vst.msk [vmem:[#allocation0 + $0x10] sm:$0x1] %vm13_vm6, %v12_v34   ;;  %vm152_vm6 = vcmask 425152  }
  0x79   :  { %18 = vst.msk [vmem:[#allocation0 + $0x8] sm:$0x1] %vm16_vm7, %v12_v34   ;;  %vm146_vm7 = vcmask 457952  }
  0x7a   :  { %43 = vst.msk [vmem:[#allocation0 + $0x8] sm:$0x1] %vm41_vm8, %v40_v33   ;;  %vm139_vm8 = vcmask 523552  }
  0x7b   :  { %66 = vst.msk [vmem:[#allocation0 + $0x8] sm:$0x1] %vm64_vm9, %v63_v30   ;;  %vm173_vm9 = vcmask 293952  }
  0x7e   :  { %v53_v36 = vpop.permute.xlu1 %52   ;;  %v26_v37 = vpop.permute.xlu0 %25  }
  0x7f   :  { %59 = vst.msk [vmem:[#allocation0 + $0x10] sm:$0x1] %vm57_vm10, %v53_v36   ;;  %v131_v38 = vpop.permute.xlu2 %130   ;;  %vm166_vm10 = vcmask 326752  }
  0x80   :  { %29 = vst.msk [vmem:[#allocation0 + $0x20] sm:$0x1] %vm27_vm2, %v26_v37   ;;  %vm98_vm2 = vcmask 785952  }
  0x81   :  { %32 = vst.msk [vmem:[#allocation0 + $0x18] sm:$0x1] %vm30_vm11, %v26_v37   ;;  %vm159_vm11 = vcmask 392352  }
  0x82   :  { %56 = vst.msk [vmem:[#allocation0 + $0x18] sm:$0x1] %vm23_vm3, %v53_v36   ;;  %vm132_vm3 = vcmask 556352  }
  0x83   :  { %93 = vst.msk [vmem:[#allocation0 + $0x20] sm:$0x1] %vm91_vm12, %v90_v32  }
  0x84   :  { %73 = vst.msk [vmem:[#allocation0 + $0x18] sm:$0x1] %vm71_vm13, %v70_v31  }
  0x86   :  { %v83_v39 = vpop.permute.xlu1 %82   ;;  %v77_v40 = vpop.permute.xlu0 %76  }
  0x87   :  { %86 = vst.msk [vmem:[#allocation0 + $0x10] sm:$0x1] %vm84_vm14, %v83_v39   ;;  %v151_v41 = vpop.permute.xlu2 %150  }
  0x88   :  { %79 = vst.msk [vmem:[#allocation0] sm:$0x1] %vm78_vm15, %v77_v40  }
  0x89   :  { %113 = vst.msk [vmem:[#allocation0] sm:$0x1] %vm112_vm0, %v111_v35  }
  0x8e   :  { %v104_v42 = vpop.permute.xlu1 %103   ;;  %v97_v43 = vpop.permute.xlu0 %96  }
  0x8f   :  { %107 = vst.msk [vmem:[#allocation0 + $0x18] sm:$0x1] %vm105_vm1, %v104_v42   ;;  %v172_v44 = vpop.permute.xlu2 %171  }
  0x90   :  { %100 = vst.msk [vmem:[#allocation0 + $0x8] sm:$0x1] %vm98_vm2, %v97_v43  }
  0x91   :  { %134 = vst.msk [vmem:[#allocation0 + $0x8] sm:$0x1] %vm132_vm3, %v131_v38  }
  0x96   :  { %v124_v45 = vpop.permute.xlu1 %123   ;;  %v117_v46 = vpop.permute.xlu0 %116  }
  0x97   :  { %127 = vst.msk [vmem:[#allocation0 + $0x20] sm:$0x1] %vm125_vm4, %v124_v45  }
  0x98   :  { %120 = vst.msk [vmem:[#allocation0 + $0x10] sm:$0x1] %vm118_vm5, %v117_v46  }
  0x99   :  { %154 = vst.msk [vmem:[#allocation0 + $0x10] sm:$0x1] %vm152_vm6, %v151_v41  }
  0x9e   :  { %v145_v47 = vpop.permute.xlu1 %144   ;;  %v138_v48 = vpop.permute.xlu0 %137  }
  0x9f   :  { %147 = vst.msk [vmem:[#allocation0] sm:$0x1] %vm146_vm7, %v145_v47  }
  0xa0   :  { %v189_v49 = vld [vmem:[#allocation0 + $0x10] sm:$0x1]  ;;  %141 = vst.msk [vmem:[#allocation0 + $0x18] sm:$0x1] %vm139_vm8, %v138_v48  }
  0xa1   :  { %232 = vst [vmem:[%s385_s1 + $0x2] sm:$0x1] %v189_v49 }
  0xa2   :  { %175 = vst.msk [vmem:[#allocation0 + $0x18] sm:$0x1] %vm173_vm9, %v172_v44  }
  0xa6   :  { %v178_v50 = vld [vmem:[#allocation0] sm:$0x1]  ;;  %v165_v51 = vpop.permute.xlu1 %164   ;;  %v158_v52 = vpop.permute.xlu0 %157  }
  0xa7   :  { %181 = vst [vmem:[%s385_s1] sm:$0x1] %v178_v50 }
  0xa8   :  { %168 = vst.msk [vmem:[#allocation0 + $0x8] sm:$0x1] %vm166_vm10, %v165_v51  }
  0xa9   :  { %v195_v53 = vld [vmem:[#allocation0 + $0x18] sm:$0x1]  ;;  %161 = vst.msk [vmem:[#allocation0 + $0x20] sm:$0x1] %vm159_vm11, %v158_v52  }
  0xaa   :  { %233 = vst [vmem:[%s385_s1 + $0x3] sm:$0x1] %v195_v53 }
  0xaf   :  { %v183_v54 = vld [vmem:[#allocation0 + $0x8] sm:$0x1] }
  0xb0   :  { %231 = vst [vmem:[%s385_s1 + $0x1] sm:$0x1] %v183_v54  ;;  %v201_v55 = vld [vmem:[#allocation0 + $0x20] sm:$0x1] }
  0xb1   :  { %234 = vst [vmem:[%s385_s1 + $0x4] sm:$0x1] %v201_v55 }

// kernel: tile.23
= control target key start
LH: loop header
LB: loop body
LE: loop exit
PB: predicated region body
PF: predicated region fallthrough
CT: control target
= control target key end

     0   :  { %s22_s0 = inlined_call_operand.vmem [shape: f32[48], index: 0, kind: input, shape index: {}]   ;;  %s23_s1 = inlined_call_operand.vmem [shape: f32[8,48], index: 1, kind: output, shape index: {}]  }
   0x1   :  { %v4_v0 = vld [vmem:[%s22_s0] ss:$0 sm:$0xff] }
   0x2   :  { %5 = vst [vmem:[%s23_s1] sm:$0xff] %v4_v0 }

// kernel: tile.24
= control target key start
LH: loop header
LB: loop body
LE: loop exit
PB: predicated region body
PF: predicated region fallthrough
CT: control target
= control target key end

     0   :  { %vm9_vm0 = vcmask 130048   ;;  %s102_s12 = smov 112   ;;  %s103_s13 = smov 80   ;;  %vm13_vm1 = vcmask 261120   ;;  %vm3_vm2 = vcmask 392192   ;;  %vm16_vm3 = vcmask 1048448   ;;  %s162_s0 = inlined_call_operand.vmem [shape: f32[8,48], index: 0, kind: input, shape index: {}]   ;;  %s163_s1 = inlined_call_operand.vmem [shape: f32[1,384], index: 1, kind: output, shape index: {}]  }
   0x1   :  { %v84_v0 = vld [vmem:[%s162_s0 + $0x5] sm:$0x1]   ;;  %v88_v3 = vld [vmem:[%s162_s0 + $0x7] sm:$0x1]   ;;  %v90_v4 = vld [vmem:[%s162_s0 + $0x1] sm:$0x1]  }
   0x2   :  { %v85_v1 = vld [vmem:[%s162_s0 + $0x5] sm:$0x1]   ;;  %34 = vrot.lane.b32.xlu1 %v88_v3, %s103_s13  ;;  %v86_v5 = vld [vmem:[%s162_s0 + $0x2] sm:$0x1]   ;;  %s104_s20 = smov 48   ;;  %s105_s25 = smov 96  }
   0x3   :  { %v10_v2 = vsel %vm9_vm0, %v85_v1, %v84_v0  ;;  %v87_v6 = vld [vmem:[%s162_s0 + $0x2] sm:$0x1]   ;;  %48 = vrot.lane.b32.xlu2 %v90_v4, %s104_s20  ;;  %v89_v8 = vld [vmem:[%s162_s0 + $0x4] sm:$0x1]   ;;  %v91_v9 = vld [vmem:[%s162_s0 + $0x6] sm:$0x1]  }
   0x4   :  { %11 = vrot.lane.b32.xlu0 %v10_v2, %s102_s12  ;;  %v24_v7 = vsel %vm13_vm1, %v87_v6, %v86_v5  ;;  %s106_s26 = smov 64   ;;  %s107_s27 = smov 32   ;;  %v92_v10 = vld [vmem:[%s162_s0 + $0x3] sm:$0x1]   ;;  %v2_v11 = vld [vmem:[%s162_s0] sm:$0x1]  }
   0x5   :  { %s108_s30 = smov 16   ;;  %4 = vst.msk [vmem:[#allocation0] sm:$0x1] %vm3_vm2, %v2_v11   ;;  %vm36_vm4 = vcmask 1048192   ;;  %vm56_vm5 = vcmask 654592   ;;  %vm30_vm6 = vcmask 1048320  }
   0x6   :  { %vm50_vm7 = vcmask 785792   ;;  %vm43_vm8 = vcmask 916992   ;;  %vm63_vm9 = vcmask 523392  }
   0xa   :  { %41 = vrot.lane.b32.xlu1 %v89_v8, %s106_s26 }
   0xb   :  { %54 = vrot.lane.b32.xlu2 %v91_v9, %s107_s27 }
   0xc   :  { %25 = vrot.lane.b32.xlu0 %v24_v7, %s105_s25 }
  0x14   :  { %61 = vrot.lane.b32.xlu0 %v92_v10, %s108_s30 }
  0x5d   :  { %v49_v12 = vpop.permute.xlu2 %48  }
  0x65   :  { %v55_v13 = vpop.permute.xlu2 %54  }
  0x74   :  { %v35_v15 = vpop.permute.xlu1 %34  }
  0x76   :  { %v12_v14 = vpop.permute.xlu0 %11  }
  0x77   :  { %15 = vst.msk [vmem:[#allocation0 + $0x10] sm:$0x1] %vm13_vm1, %v12_v14  }
  0x78   :  { %18 = vst.msk [vmem:[#allocation0 + $0x8] sm:$0x1] %vm16_vm3, %v12_v14  }
  0x79   :  { %38 = vst.msk [vmem:[#allocation0 + $0x10] sm:$0x1] %vm36_vm4, %v35_v15  }
  0x7a   :  { %58 = vst.msk [vmem:[#allocation0 + $0x10] sm:$0x1] %vm56_vm5, %v55_v13  }
  0x7c   :  { %v42_v17 = vpop.permute.xlu1 %41  }
  0x7e   :  { %v26_v16 = vpop.permute.xlu0 %25  }
  0x7f   :  { %29 = vst.msk [vmem:[#allocation0 + $0x8] sm:$0x1] %vm9_vm0, %v26_v16  }
  0x80   :  { %31 = vst.msk [vmem:[#allocation0] sm:$0x1] %vm30_vm6, %v26_v16  }
  0x81   :  { %51 = vst.msk [vmem:[#allocation0] sm:$0x1] %vm50_vm7, %v49_v12   ;;  %v79_v18 = vld [vmem:[#allocation0 + $0x10] sm:$0x1] }
  0x82   :  { %45 = vst.msk [vmem:[#allocation0 + $0x8] sm:$0x1] %vm43_vm8, %v42_v17  }
  0x83   :  { %94 = vst [vmem:[%s163_s1 + $0x2] sm:$0x1] %v79_v18 }
  0x86   :  { %v62_v19 = vpop.permute.xlu0 %61  }
  0x87   :  { %65 = vst.msk [vmem:[#allocation0 + $0x8] sm:$0x1] %vm63_vm9, %v62_v19  }
  0x88   :  { %v68_v20 = vld [vmem:[#allocation0] sm:$0x1] }
  0x89   :  { %71 = vst [vmem:[%s163_s1] sm:$0x1] %v68_v20 }
  0x8e   :  { %v73_v21 = vld [vmem:[#allocation0 + $0x8] sm:$0x1] }
  0x8f   :  { %93 = vst [vmem:[%s163_s1 + $0x1] sm:$0x1] %v73_v21 }

// kernel: tile.28
= control target key start
LH: loop header
LB: loop body
LE: loop exit
PB: predicated region body
PF: predicated region fallthrough
CT: control target
= control target key end

     0   :  { %s22_s0 = inlined_call_operand.vmem [shape: f32[64], index: 0, kind: input, shape index: {}]   ;;  %s23_s1 = inlined_call_operand.vmem [shape: f32[2,64], index: 1, kind: output, shape index: {}]  }
   0x1   :  { %v4_v0 = vld [vmem:[%s22_s0] ss:$0 sm:$0xff] }
   0x2   :  { %5 = vst [vmem:[%s23_s1] sm:$0x3] %v4_v0 }

// kernel: tile.29
= control target key start
LH: loop header
LB: loop body
LE: loop exit
PB: predicated region body
PF: predicated region fallthrough
CT: control target
= control target key end

     0   :  { %vm7_vm0 = vcmask 523264   ;;  %vm13_vm1 = vcmask 1048064   ;;  %s39_s0 = inlined_call_operand.vmem [shape: f32[2,64], index: 0, kind: input, shape index: {}]   ;;  %s40_s1 = inlined_call_operand.vmem [shape: f32[1,128], index: 1, kind: output, shape index: {}]  }
   0x1   :  { %v4_v0 = vld [vmem:[%s39_s0] sm:$0x3]  ;;  %s22_s0 = smov 64  }
   0x2   :  { %5 = vst [vmem:[#allocation1] sm:$0x3] %v4_v0 }
   0x9   :  { %v10_v1 = vld [vmem:[#allocation1 + $0x1] sm:$0x1]   ;;  %v6_v2 = vld [vmem:[#allocation1] sm:$0x1]  }
   0xa   :  { %11 = vrot.lane.b32.xlu0 %v10_v1, %s22_s0  ;;  %8 = vst.msk [vmem:[#allocation0] sm:$0x1] %vm7_vm0, %v6_v2  }
  0x7c   :  { %v12_v3 = vpop.permute.xlu0 %11  }
  0x7d   :  { %14 = vst.msk [vmem:[#allocation0] sm:$0x1] %vm13_vm1, %v12_v3  }
  0x84   :  { %v17_v4 = vld [vmem:[#allocation0] sm:$0x1] }
  0x85   :  { %20 = vst [vmem:[%s40_s1] sm:$0x1] %v17_v4 }

// kernel: rnet_forward.1
= control target key start
LH: loop header
LB: loop body
LE: loop exit
PB: predicated region body
PF: predicated region fallthrough
CT: control target
= control target key end

     0   :  { %17 = vsyncpa [#allocation7], 0  ;;  %s6567_s24 = smov [#allocation6]   ;;  %s12043_s0 = inlined_call_operand.vmem [shape: f32[192,72], index: 0, kind: input, shape index: {}]   ;;  %s12044_s1 = inlined_call_operand.vmem [shape: f32[3,72,616], index: 1, kind: input, shape index: {}]   ;;  %s12045_s2 = inlined_call_operand.vmem [shape: f32[3,280,384], index: 2, kind: input, shape index: {}]   ;;  %s12046_s3 = inlined_call_operand.vmem [shape: f32[2,144,128], index: 3, kind: input, shape index: {}]   ;;  %s12047_s4 = inlined_call_operand.vmem [shape: f32[1,616], index: 4, kind: input, shape index: {}]   ;;  %s12048_s5 = inlined_call_operand.vmem [shape: f32[1,384], index: 5, kind: input, shape index: {}]   ;;  %s12049_s6 = inlined_call_operand.vmem [shape: f32[1,128], index: 6, kind: input, shape index: {}]   ;;  %s12050_s7 = inlined_call_operand.vmem [shape: f32[256,128], index: 7, kind: input, shape index: {}]   ;;  %s12051_s8 = inlined_call_operand.vmem [shape: f32[1,128], index: 8, kind: input, shape index: {}]   ;;  %s12052_s9 = inlined_call_operand.vmem [shape: f32[128,5], index: 9, kind: input, shape index: {}]   ;;  %s12053_s10 = inlined_call_operand.vmem [shape: f32[1,5], index: 10, kind: input, shape index: {}]   ;;  %s12054_s11 = inlined_call_operand.vmem [shape: f32[1,4], index: 11, kind: input, shape index: {}]   ;;  %s12055_s12 = inlined_call_operand.vmem [shape: f32[8,5], index: 12, kind: output, shape index: {}]  }
   0x1   :  { %s45_s23 = sshll.u32 %s12054_s11, 4  ;;  %s46_s23 = int_to_ptr.vmem [resolvable:$true] %s45_s23 }
   0x2   :  { %48 = dma.vmem_to_smem %s46_s23, 16, %s6567_s24, [#allocation7]  }
   0x3   :  { %6565 = dma.done.wait [#allocation7], 16  }
   0x4   :  { %6566 = vsyncadd [#allocation7], 4294967280 }
   0x5   :  { %53 = sfence }
   0x6   :  { %v5806_v0 = vld [vmem:[%s12044_s1 + $0x2a8] sm:$0xff]  ;;  %v5807_v1 = vld [vmem:[%s12044_s1 + $0x2b0] sm:$0xff]  ;;  %v5808_v2 = vld [vmem:[%s12044_s1 + $0x2b8] sm:$0xff]  ;;  %vm172_vm0 = vcmask 588800   ;;  %s54_s22 = sld [smem:[#allocation6]]  ;;  %s6568_s20 = smov 72  }
   0x7   :  { %246 = vmatpush.msra.mxu0 %v5806_v0  ;;  %329 = vmatpush.msra.mxu1 %v5807_v1  ;;  %v5809_v3 = vld [vmem:[%s12044_s1 + $0x2c0] sm:$0xff]  ;;  %v5802_v5 = vld [vmem:[%s12044_s1 + $0x288] sm:$0xff]  ;;  %v5803_v6 = vld [vmem:[%s12044_s1 + $0x290] sm:$0xff]  ;;  %s6569_s21 = smov 100   ;;  %s6571_s19 = smov 16  }
   0x8   :  { %v5801_v4 = vld [vmem:[%s12044_s1 + $0x280] sm:$0xff]  ;;  %412 = vmatpush.msra.mxu2 %v5808_v2  ;;  %495 = vmatpush.msra.mxu3 %v5809_v3  ;;  %v5804_v7 = vld [vmem:[%s12044_s1 + $0x298] sm:$0xff]  ;;  %v5798_v10 = vld [vmem:[%s12044_s1 + $0x268] sm:$0xff]  ;;  %s6573_s23 = smov 32   ;;  %s6574_s24 = smov 60  }
   0x9   :  { %v5796_v8 = vld [vmem:[%s12044_s1 + $0x258] sm:$0xff]  ;;  %247 = vmatpush.msra.mxu0 %v5801_v4  ;;  %330 = vmatpush.msra.mxu1 %v5802_v5  ;;  %v5797_v9 = vld [vmem:[%s12044_s1 + $0x260] sm:$0xff]  ;;  %v5799_v11 = vld [vmem:[%s12044_s1 + $0x270] sm:$0xff]  ;;  %s6575_s25 = smov 88   ;;  %s6576_s26 = smov 4  }
   0xa   :  { %413 = vmatpush.msra.mxu2 %v5803_v6  ;;  %496 = vmatpush.msra.mxu3 %v5804_v7  ;;  %v5791_v12 = vld [vmem:[%s12044_s1 + $0x230] sm:$0xff]  ;;  %v5792_v13 = vld [vmem:[%s12044_s1 + $0x238] sm:$0xff]  ;;  %v5793_v14 = vld [vmem:[%s12044_s1 + $0x240] sm:$0xff]  ;;  %s5764_s14 = sld [smem:[#allocation6 + $0x2]] }
   0xb   :  { %248 = vmatpush.msra.mxu0 %v5796_v8  ;;  %331 = vmatpush.msra.mxu1 %v5797_v9  ;;  %v5794_v15 = vld [vmem:[%s12044_s1 + $0x248] sm:$0xff]  ;;  %v5787_v17 = vld [vmem:[%s12044_s1 + $0x210] sm:$0xff]  ;;  %v5788_v18 = vld [vmem:[%s12044_s1 + $0x218] sm:$0xff] }
   0xc   :  { %414 = vmatpush.msra.mxu2 %v5798_v10  ;;  %497 = vmatpush.msra.mxu3 %v5799_v11  ;;  %v5786_v16 = vld [vmem:[%s12044_s1 + $0x208] sm:$0xff]  ;;  %v5789_v19 = vld [vmem:[%s12044_s1 + $0x220] sm:$0xff]  ;;  %v5783_v22 = vld [vmem:[%s12044_s1 + $0x1f0] sm:$0xff] }
   0xd   :  { %249 = vmatpush.msra.mxu0 %v5791_v12  ;;  %332 = vmatpush.msra.mxu1 %v5792_v13  ;;  %v5781_v20 = vld [vmem:[%s12044_s1 + $0x1e0] sm:$0xff]  ;;  %v5782_v21 = vld [vmem:[%s12044_s1 + $0x1e8] sm:$0xff]  ;;  %v5784_v23 = vld [vmem:[%s12044_s1 + $0x1f8] sm:$0xff] }
   0xe   :  { %415 = vmatpush.msra.mxu2 %v5793_v14  ;;  %498 = vmatpush.msra.mxu3 %v5794_v15  ;;  %v5776_v24 = vld [vmem:[%s12044_s1 + $0x1b8] sm:$0xff]  ;;  %v5777_v25 = vld [vmem:[%s12044_s1 + $0x1c0] sm:$0xff]  ;;  %v5778_v26 = vld [vmem:[%s12044_s1 + $0x1c8] sm:$0xff] }
   0xf   :  { %250 = vmatpush.msra.mxu0 %v5786_v16  ;;  %333 = vmatpush.msra.mxu1 %v5787_v17  ;;  %v5779_v27 = vld [vmem:[%s12044_s1 + $0x1d0] sm:$0xff]  ;;  %v5772_v29 = vld [vmem:[%s12044_s1 + $0x198] sm:$0xff]  ;;  %v5773_v30 = vld [vmem:[%s12044_s1 + $0x1a0] sm:$0xff] }
  0x10   :  { %416 = vmatpush.msra.mxu2 %v5788_v18  ;;  %499 = vmatpush.msra.mxu3 %v5789_v19  ;;  %v5771_v28 = vld [vmem:[%s12044_s1 + $0x190] sm:$0xff]  ;;  %v5774_v31 = vld [vmem:[%s12044_s1 + $0x1a8] sm:$0xff]  ;;  %v5768_v34 = vld [vmem:[%s12044_s1 + $0x178] sm:$0xff] }
  0x11   :  { %251 = vmatpush.msra.mxu0 %v5781_v20  ;;  %334 = vmatpush.msra.mxu1 %v5782_v21  ;;  %v5766_v32 = vld [vmem:[%s12044_s1 + $0x168] sm:$0xff]  ;;  %v5767_v33 = vld [vmem:[%s12044_s1 + $0x170] sm:$0xff]  ;;  %v5769_v35 = vld [vmem:[%s12044_s1 + $0x180] sm:$0xff] }
  0x12   :  { %417 = vmatpush.msra.mxu2 %v5783_v22  ;;  %500 = vmatpush.msra.mxu3 %v5784_v23  ;;  %v6757_v36 = vld [vmem:[%s12043_s0 + $0x8] sm:$0xff]  ;;  %v122_v38 = vld [vmem:[%s12044_s1 + $0x150] sm:$0xff]  ;;  %v120_v40 = vld [vmem:[%s12044_s1 + $0x140] sm:$0xff] }
  0x13   :  { %252 = vmatpush.msra.mxu0 %v5776_v24  ;;  %335 = vmatpush.msra.mxu1 %v5777_v25  ;;  %v121_v37 = vld [vmem:[%s12044_s1 + $0x148] sm:$0xff]  ;;  %v116_v41 = vld [vmem:[%s12044_s1 + $0x120] sm:$0xff]  ;;  %v6791_v44 = vld [vmem:[%s12043_s0 + $0x10] sm:$0xff] }
  0x14   :  { %418 = vmatpush.msra.mxu2 %v5778_v26  ;;  %501 = vmatpush.msra.mxu3 %v5779_v27  ;;  %v5810_v39 = vld [vmem:[%s12044_s1 + $0x2c8] sm:$0xff]  ;;  %v5805_v43 = vld [vmem:[%s12044_s1 + $0x2a0] sm:$0xff]  ;;  %v115_v45 = vld [vmem:[%s12044_s1 + $0x118] sm:$0xff] }
  0x15   :  { %253 = vmatpush.msra.mxu0 %v5771_v28  ;;  %336 = vmatpush.msra.mxu1 %v5772_v29  ;;  %v117_v42 = vld [vmem:[%s12044_s1 + $0x128] sm:$0xff]  ;;  %v111_v46 = vld [vmem:[%s12044_s1 + $0xf8] sm:$0xff]  ;;  %v112_v47 = vld [vmem:[%s12044_s1 + $0x100] sm:$0xff] }
  0x16   :  { %419 = vmatpush.msra.mxu2 %v5773_v30  ;;  %502 = vmatpush.msra.mxu3 %v5774_v31  ;;  %v6813_v48 = vld [vmem:[%s12043_s0 + $0x18] sm:$0xff]  ;;  %v6829_v50 = vld [vmem:[%s12043_s0 + $0x20] sm:$0xff]  ;;  %v106_v51 = vld [vmem:[%s12044_s1 + $0xd0] sm:$0xff] }
  0x17   :  { %254 = vmatpush.msra.mxu0 %v5766_v32  ;;  %337 = vmatpush.msra.mxu1 %v5767_v33  ;;  %v5800_v49 = vld [vmem:[%s12044_s1 + $0x278] sm:$0xff]  ;;  %v110_v53 = vld [vmem:[%s12044_s1 + $0xf0] sm:$0xff]  ;;  %v6851_v54 = vld [vmem:[%s12043_s0 + $0x28] sm:$0xff] }
  0x18   :  { %420 = vmatpush.msra.mxu2 %v5768_v34  ;;  %503 = vmatpush.msra.mxu3 %v5769_v35  ;;  %v107_v52 = vld [vmem:[%s12044_s1 + $0xd8] sm:$0xff]  ;;  %v5795_v55 = vld [vmem:[%s12044_s1 + $0x250] sm:$0xff]  ;;  %v105_v57 = vld [vmem:[%s12044_s1 + $0xc8] sm:$0xff] }
  0x19   :  { %5811 = vmatmul.msk.f32.vlgmr.msra.gmra.mxu0 %vm172_vm0, %v6757_v36  ;;  %5833 = vmatmul.msk.f32.vlgmr.msra.gmra.mxu1 %vm172_vm0, %v6757_v36  ;;  %v6867_v56 = vld [vmem:[%s12043_s0 + $0x30] sm:$0xff]  ;;  %v101_v58 = vld [vmem:[%s12044_s1 + $0xa8] sm:$0xff]  ;;  %v6889_v60 = vld [vmem:[%s12043_s0 + $0x38] sm:$0xff] }
  0x1a   :  { %5855 = vmatmul.msk.f32.vlgmr.msra.gmra.mxu2 %vm172_vm0, %v6757_v36  ;;  %5877 = vmatmul.msk.f32.vlgmr.msra.gmra.mxu3 %vm172_vm0, %v6757_v36  ;;  %v102_v59 = vld [vmem:[%s12044_s1 + $0xb0] sm:$0xff]  ;;  %v6902_v61 = vld [vmem:[%s12043_s0 + $0x40] sm:$0xff]  ;;  %v5790_v62 = vld [vmem:[%s12044_s1 + $0x228] sm:$0xff] }
  0x1b   :  { %747 = vmatpush.msrb.mxu2 %v121_v37  ;;  %830 = vmatpush.msrb.mxu3 %v122_v38  ;;  %v6918_v63 = vld [vmem:[%s12043_s0 + $0x48] sm:$0xff]  ;;  %v96_v0 = vld [vmem:[%s12044_s1 + $0x80] sm:$0xff]  ;;  %v6940_v3 = vld [vmem:[%s12043_s0 + $0x50] sm:$0xff] }
  0x1c   :  { %578 = vmatpush.msrb.mxu0 %v5810_v39  ;;  %664 = vmatpush.msrb.mxu1 %v120_v40  ;;  %v97_v1 = vld [vmem:[%s12044_s1 + $0x88] sm:$0xff]  ;;  %v100_v2 = vld [vmem:[%s12044_s1 + $0xa0] sm:$0xff]  ;;  %v6956_v5 = vld [vmem:[%s12043_s0 + $0x58] sm:$0xff] }
  0x1d   :  { %748 = vmatpush.msrb.mxu2 %v116_v41  ;;  %831 = vmatpush.msrb.mxu3 %v117_v42  ;;  %v5785_v4 = vld [vmem:[%s12044_s1 + $0x200] sm:$0xff]  ;;  %v95_v6 = vld [vmem:[%s12044_s1 + $0x78] sm:$0xff]  ;;  %v6991_v10 = vld [vmem:[%s12043_s0 + $0x68] sm:$0xff] }
  0x1e   :  { %579 = vmatpush.msrb.mxu0 %v5805_v43  ;;  %665 = vmatpush.msrb.mxu1 %v115_v45  ;;  %v91_v7 = vld [vmem:[%s12044_s1 + $0x58] sm:$0xff]  ;;  %v92_v8 = vld [vmem:[%s12044_s1 + $0x60] sm:$0xff]  ;;  %v7007_v12 = vld [vmem:[%s12043_s0 + $0x70] sm:$0xff] }
  0x1f   :  { %749 = vmatpush.msrb.mxu2 %v111_v46  ;;  %832 = vmatpush.msrb.mxu3 %v112_v47  ;;  %v6978_v9 = vld [vmem:[%s12043_s0 + $0x60] sm:$0xff]  ;;  %v5780_v11 = vld [vmem:[%s12044_s1 + $0x1d8] sm:$0xff]  ;;  %v86_v13 = vld [vmem:[%s12044_s1 + $0x30] sm:$0xff] }
  0x20   :  { %580 = vmatpush.msrb.mxu0 %v5800_v49  ;;  %666 = vmatpush.msrb.mxu1 %v110_v53  ;;  %v87_v14 = vld [vmem:[%s12044_s1 + $0x38] sm:$0xff]  ;;  %v90_v15 = vld [vmem:[%s12044_s1 + $0x50] sm:$0xff]  ;;  %v7042_v17 = vld [vmem:[%s12043_s0 + $0x80] sm:$0xff] }
  0x21   :  { %5812 = vmatmul.msk.f32.gmra.mxu0 %vm172_vm0, %v6791_v44  ;;  %5834 = vmatmul.msk.f32.gmra.mxu1 %vm172_vm0, %v6791_v44  ;;  %v7029_v16 = vld [vmem:[%s12043_s0 + $0x78] sm:$0xff]  ;;  %v5775_v18 = vld [vmem:[%s12044_s1 + $0x1b0] sm:$0xff]  ;;  %v7058_v19 = vld [vmem:[%s12043_s0 + $0x88] sm:$0xff] }
  0x22   :  { %5856 = vmatmul.msk.f32.gmra.mxu2 %vm172_vm0, %v6791_v44  ;;  %5878 = vmatmul.msk.f32.gmra.mxu3 %vm172_vm0, %v6791_v44  ;;  %v85_v22 = vld [vmem:[%s12044_s1 + $0x28] sm:$0xff]  ;;  %v82_v24 = vld [vmem:[%s12044_s1 + $0x10] sm:$0xff]  ;;  %v7116_v35 = vld [vmem:[%s12043_s0 + $0x98] sm:$0xff] }
  0x23   :  { %750 = vmatpush.msrb.mxu2 %v106_v51  ;;  %833 = vmatpush.msrb.mxu3 %v107_v52  ;;  %v81_v23 = vld [vmem:[%s12044_s1 + $0x8] sm:$0xff]  ;;  %v7092_v29 = vld [vmem:[%s12043_s0 + $0x90] sm:$0xff]  ;;  %v80_v37 = vld [vmem:[%s12044_s1] sm:$0xff] }
  0x24   :  { %581 = vmatpush.msrb.mxu0 %v5795_v55  ;;  %667 = vmatpush.msrb.mxu1 %v105_v57  ;;  %v5770_v30 = vld [vmem:[%s12044_s1 + $0x188] sm:$0xff]  ;;  %v6071_v38 = vld [vmem:[%s12044_s1 + $0x410] sm:$0xff]  ;;  %v6072_v39 = vld [vmem:[%s12044_s1 + $0x418] sm:$0xff] }
  0x25   :  { %751 = vmatpush.msrb.mxu2 %v101_v58  ;;  %834 = vmatpush.msrb.mxu3 %v102_v59  ;;  %v7146_v45 = vld [vmem:[%s12043_s0 + $0xa0] sm:$0xff]  ;;  %v123_v49 = vld [vmem:[%s12044_s1 + $0x158] sm:$0xff]  ;;  %v7170_v53 = vld [vmem:[%s12043_s0 + $0xa8] sm:$0xff] }
  0x26   :  { %582 = vmatpush.msrb.mxu0 %v5790_v62  ;;  %668 = vmatpush.msrb.mxu1 %v100_v2  ;;  %v124_v58 = vld [vmem:[%s12044_s1 + $0x160] sm:$0xff]  ;;  %v6066_v59 = vld [vmem:[%s12044_s1 + $0x3e8] sm:$0xff]  ;;  %v6067_v62 = vld [vmem:[%s12044_s1 + $0x3f0] sm:$0xff] }
  0x27   :  { %752 = vmatpush.msrb.mxu2 %v96_v0  ;;  %835 = vmatpush.msrb.mxu3 %v97_v1  ;;  %v7200_v2 = vld [vmem:[%s12043_s0 + $0xb0] sm:$0xff] }
  0x28   :  { %583 = vmatpush.msrb.mxu0 %v5785_v4  ;;  %669 = vmatpush.msrb.mxu1 %v95_v6 }
  0x29   :  { %5813 = vmatmul.msk.f32.gmra.mxu0 %vm172_vm0, %v6813_v48  ;;  %5835 = vmatmul.msk.f32.gmra.mxu1 %vm172_vm0, %v6813_v48 }
  0x2a   :  { %5857 = vmatmul.msk.f32.gmra.mxu2 %vm172_vm0, %v6813_v48  ;;  %5879 = vmatmul.msk.f32.gmra.mxu3 %vm172_vm0, %v6813_v48 }
  0x2b   :  { %753 = vmatpush.msrb.mxu2 %v91_v7  ;;  %836 = vmatpush.msrb.mxu3 %v92_v8 }
  0x2c   :  { %584 = vmatpush.msrb.mxu0 %v5780_v11  ;;  %670 = vmatpush.msrb.mxu1 %v90_v15  ;;  %v7221_v11 = vld [vmem:[%s12043_s0] sm:$0xff] }
  0x2d   :  { %754 = vmatpush.msrb.mxu2 %v86_v13  ;;  %837 = vmatpush.msrb.mxu3 %v87_v14  ;;  %v118_v13 = vld [vmem:[%s12044_s1 + $0x130] sm:$0xff] }
  0x2e   :  { %585 = vmatpush.msrb.mxu0 %v5775_v18  ;;  %671 = vmatpush.msrb.mxu1 %v85_v22 }
  0x2f   :  { %755 = vmatpush.msrb.mxu2 %v81_v23  ;;  %838 = vmatpush.msrb.mxu3 %v82_v24  ;;  %v119_v23 = vld [vmem:[%s12044_s1 + $0x138] sm:$0xff]  ;;  %v6061_v24 = vld [vmem:[%s12044_s1 + $0x3c0] sm:$0xff] }
  0x30   :  { %586 = vmatpush.msrb.mxu0 %v5770_v30  ;;  %672 = vmatpush.msrb.mxu1 %v80_v37  ;;  %v6062_v30 = vld [vmem:[%s12044_s1 + $0x3c8] sm:$0xff] }
  0x31   :  { %5814 = vmatmul.msk.f32.gmra.mxu0 %vm172_vm0, %v6829_v50  ;;  %5836 = vmatmul.msk.f32.gmra.mxu1 %vm172_vm0, %v6829_v50 }
  0x32   :  { %5858 = vmatmul.msk.f32.gmra.mxu2 %vm172_vm0, %v6829_v50  ;;  %5880 = vmatmul.msk.f32.gmra.mxu3 %vm172_vm0, %v6829_v50 }
  0x33   :  { %1213 = vmatpush.msra.mxu2 %v6071_v38  ;;  %1296 = vmatpush.msra.mxu3 %v6072_v39 }
  0x34   :  { %913 = vmatpush.msra.mxu0 %v123_v49  ;;  %996 = vmatpush.msra.mxu1 %v124_v58 }
  0x35   :  { %1214 = vmatpush.msra.mxu2 %v6066_v59  ;;  %1297 = vmatpush.msra.mxu3 %v6067_v62  ;;  %v113_v62 = vld [vmem:[%s12044_s1 + $0x108] sm:$0xff] }
  0x36   :  { %914 = vmatpush.msra.mxu0 %v118_v13  ;;  %997 = vmatpush.msra.mxu1 %v119_v23 }
  0x37   :  { %1215 = vmatpush.msra.mxu2 %v6061_v24  ;;  %1298 = vmatpush.msra.mxu3 %v6062_v30 }
  0x38   :  { %915 = vmatpush.msra.mxu0 %v113_v62  ;;  %v6056_v62 = vld [vmem:[%s12044_s1 + $0x398] sm:$0xff] }
  0x39   :  { %5815 = vmatmul.msk.f32.gmra.mxu0 %vm172_vm0, %v6851_v54  ;;  %5837 = vmatmul.msk.f32.gmra.mxu1 %vm172_vm0, %v6851_v54 }
  0x3a   :  { %5859 = vmatmul.msk.f32.gmra.mxu2 %vm172_vm0, %v6851_v54  ;;  %5881 = vmatmul.msk.f32.gmra.mxu3 %vm172_vm0, %v6851_v54 }
  0x3b   :  { %1216 = vmatpush.msra.mxu2 %v6056_v62 }
  0x41   :  { %5816 = vmatmul.msk.f32.gmra.mxu0 %vm172_vm0, %v6867_v56  ;;  %5838 = vmatmul.msk.f32.gmra.mxu1 %vm172_vm0, %v6867_v56 }
  0x42   :  { %5860 = vmatmul.msk.f32.gmra.mxu2 %vm172_vm0, %v6867_v56  ;;  %5882 = vmatmul.msk.f32.gmra.mxu3 %vm172_vm0, %v6867_v56 }
  0x49   :  { %5817 = vmatmul.msk.f32.gmra.mxu0 %vm172_vm0, %v6889_v60  ;;  %5839 = vmatmul.msk.f32.gmra.mxu1 %vm172_vm0, %v6889_v60 }
  0x4a   :  { %5861 = vmatmul.msk.f32.gmra.mxu2 %vm172_vm0, %v6889_v60  ;;  %5883 = vmatmul.msk.f32.gmra.mxu3 %vm172_vm0, %v6889_v60 }
  0x51   :  { %5818 = vmatmul.msk.f32.gmra.mxu0 %vm172_vm0, %v6902_v61  ;;  %5840 = vmatmul.msk.f32.gmra.mxu1 %vm172_vm0, %v6902_v61 }
  0x52   :  { %5862 = vmatmul.msk.f32.gmra.mxu2 %vm172_vm0, %v6902_v61  ;;  %5884 = vmatmul.msk.f32.gmra.mxu3 %vm172_vm0, %v6902_v61 }
  0x59   :  { %5819 = vmatmul.msk.f32.gmra.mxu0 %vm172_vm0, %v6918_v63  ;;  %5841 = vmatmul.msk.f32.gmra.mxu1 %vm172_vm0, %v6918_v63 }
  0x5a   :  { %5863 = vmatmul.msk.f32.gmra.mxu2 %vm172_vm0, %v6918_v63  ;;  %5885 = vmatmul.msk.f32.gmra.mxu3 %vm172_vm0, %v6918_v63 }
  0x61   :  { %5820 = vmatmul.msk.f32.gmra.mxu0 %vm172_vm0, %v6940_v3  ;;  %5842 = vmatmul.msk.f32.gmra.mxu1 %vm172_vm0, %v6940_v3 }
  0x62   :  { %5864 = vmatmul.msk.f32.gmra.mxu2 %vm172_vm0, %v6940_v3  ;;  %5886 = vmatmul.msk.f32.gmra.mxu3 %vm172_vm0, %v6940_v3 }
  0x69   :  { %5821 = vmatmul.msk.f32.gmra.mxu0 %vm172_vm0, %v6956_v5  ;;  %5843 = vmatmul.msk.f32.gmra.mxu1 %vm172_vm0, %v6956_v5 }
  0x6a   :  { %5865 = vmatmul.msk.f32.gmra.mxu2 %vm172_vm0, %v6956_v5  ;;  %5887 = vmatmul.msk.f32.gmra.mxu3 %vm172_vm0, %v6956_v5 }
  0x71   :  { %5822 = vmatmul.msk.f32.gmra.mxu0 %vm172_vm0, %v6978_v9  ;;  %5844 = vmatmul.msk.f32.gmra.mxu1 %vm172_vm0, %v6978_v9 }
  0x72   :  { %5866 = vmatmul.msk.f32.gmra.mxu2 %vm172_vm0, %v6978_v9  ;;  %5888 = vmatmul.msk.f32.gmra.mxu3 %vm172_vm0, %v6978_v9 }
  0x79   :  { %5823 = vmatmul.msk.f32.gmra.mxu0 %vm172_vm0, %v6991_v10  ;;  %5845 = vmatmul.msk.f32.gmra.mxu1 %vm172_vm0, %v6991_v10 }
  0x7a   :  { %5867 = vmatmul.msk.f32.gmra.mxu2 %vm172_vm0, %v6991_v10  ;;  %5889 = vmatmul.msk.f32.gmra.mxu3 %vm172_vm0, %v6991_v10 }
  0x81   :  { %5824 = vmatmul.msk.f32.gmra.mxu0 %vm172_vm0, %v7007_v12  ;;  %5846 = vmatmul.msk.f32.gmra.mxu1 %vm172_vm0, %v7007_v12 }
  0x82   :  { %5868 = vmatmul.msk.f32.gmra.mxu2 %vm172_vm0, %v7007_v12  ;;  %5890 = vmatmul.msk.f32.gmra.mxu3 %vm172_vm0, %v7007_v12 }
  0x89   :  { %5825 = vmatmul.msk.f32.gmra.mxu0 %vm172_vm0, %v7029_v16  ;;  %5847 = vmatmul.msk.f32.gmra.mxu1 %vm172_vm0, %v7029_v16 }
  0x8a   :  { %5869 = vmatmul.msk.f32.gmra.mxu2 %vm172_vm0, %v7029_v16  ;;  %5891 = vmatmul.msk.f32.gmra.mxu3 %vm172_vm0, %v7029_v16 }
  0x91   :  { %5826 = vmatmul.msk.f32.gmra.mxu0 %vm172_vm0, %v7042_v17  ;;  %5848 = vmatmul.msk.f32.gmra.mxu1 %vm172_vm0, %v7042_v17 }
  0x92   :  { %5870 = vmatmul.msk.f32.gmra.mxu2 %vm172_vm0, %v7042_v17  ;;  %5892 = vmatmul.msk.f32.gmra.mxu3 %vm172_vm0, %v7042_v17 }
  0x96   :  { %v7060_v20 = vpop.f32.mrf.mxu0  ;;  %v7062_v21 = vpop.f32.mrf.mxu1 }
  0x99   :  { %5827 = vmatmul.msk.f32.gmra.mxu0 %vm172_vm0, %v7058_v19  ;;  %5849 = vmatmul.msk.f32.gmra.mxu1 %vm172_vm0, %v7058_v19 }
  0x9a   :  { %5871 = vmatmul.msk.f32.gmra.mxu2 %vm172_vm0, %v7058_v19  ;;  %5893 = vmatmul.msk.f32.gmra.mxu3 %vm172_vm0, %v7058_v19 }
  0x9d   :  { %v7081_v25 = vpop.f32.mrf.mxu2  ;;  %v7083_v26 = vpop.f32.mrf.mxu3 }
  0x9e   :  { %12090 = vst [vmem:[#allocation9_spill] sm:$0xff] %v7081_v25  ;;  %v7085_v27 = vpop.f32.mrf.mxu0  ;;  %v7087_v28 = vpop.f32.mrf.mxu1  ;;  %v6042_v25 = vld [vmem:[%s12044_s1 + $0x328] sm:$0xff] }
  0x9f   :  { %12091 = vst [vmem:[#allocation10_spill] sm:$0xff] %v7083_v26  ;;  %v6041_v26 = vld [vmem:[%s12044_s1 + $0x320] sm:$0xff] }
  0xa1   :  { %5828 = vmatmul.msk.f32.gmra.mxu0 %vm172_vm0, %v7092_v29  ;;  %5850 = vmatmul.msk.f32.gmra.mxu1 %vm172_vm0, %v7092_v29 }
  0xa2   :  { %5872 = vmatmul.msk.f32.gmra.mxu2 %vm172_vm0, %v7092_v29  ;;  %5894 = vmatmul.msk.f32.gmra.mxu3 %vm172_vm0, %v7092_v29 }
  0xa5   :  { %v7105_v31 = vpop.f32.mrf.mxu2  ;;  %v7107_v32 = vpop.f32.mrf.mxu3 }
  0xa6   :  { %12092 = vst [vmem:[#allocation11_spill] sm:$0xff] %v7105_v31  ;;  %v7109_v33 = vpop.f32.mrf.mxu0  ;;  %v7111_v34 = vpop.f32.mrf.mxu1 }
  0xa7   :  { %12093 = vst [vmem:[#allocation12_spill] sm:$0xff] %v7107_v32 }
  0xa9   :  { %5829 = vmatmul.msk.f32.gmra.mxu0 %vm172_vm0, %v7116_v35  ;;  %5851 = vmatmul.msk.f32.gmra.mxu1 %vm172_vm0, %v7116_v35 }
  0xaa   :  { %5873 = vmatmul.msk.f32.gmra.mxu2 %vm172_vm0, %v7116_v35  ;;  %5895 = vmatmul.msk.f32.gmra.mxu3 %vm172_vm0, %v7116_v35 }
  0xad   :  { %v7135_v40 = vpop.f32.mrf.mxu2  ;;  %v7137_v41 = vpop.f32.mrf.mxu3 }
  0xae   :  { %12094 = vst [vmem:[#allocation13_spill] sm:$0xff] %v7135_v40  ;;  %v7139_v42 = vpop.f32.mrf.mxu0  ;;  %v7141_v43 = vpop.f32.mrf.mxu1 }
  0xaf   :  { %12095 = vst [vmem:[#allocation14_spill] sm:$0xff] %v7137_v41 }
  0xb1   :  { %5830 = vmatmul.msk.f32.gmra.mxu0 %vm172_vm0, %v7146_v45  ;;  %5852 = vmatmul.msk.f32.gmra.mxu1 %vm172_vm0, %v7146_v45 }
  0xb2   :  { %5874 = vmatmul.msk.f32.gmra.mxu2 %vm172_vm0, %v7146_v45  ;;  %5896 = vmatmul.msk.f32.gmra.mxu3 %vm172_vm0, %v7146_v45 }
  0xb5   :  { %v7156_v46 = vpop.f32.mrf.mxu2  ;;  %v7158_v47 = vpop.f32.mrf.mxu3 }
  0xb6   :  { %12096 = vst [vmem:[#allocation15_spill] sm:$0xff] %v7156_v46  ;;  %v7163_v51 = vpop.f32.mrf.mxu0  ;;  %v7165_v52 = vpop.f32.mrf.mxu1  ;;  %v104_v46 = vld [vmem:[%s12044_s1 + $0xc0] sm:$0xff] }
  0xb7   :  { %12097 = vst [vmem:[#allocation16_spill] sm:$0xff] %v7158_v47 }
  0xb9   :  { %5831 = vmatmul.msk.f32.gmra.mxu0 %vm172_vm0, %v7170_v53  ;;  %5853 = vmatmul.msk.f32.gmra.mxu1 %vm172_vm0, %v7170_v53 }
  0xba   :  { %5875 = vmatmul.msk.f32.gmra.mxu2 %vm172_vm0, %v7170_v53  ;;  %5897 = vmatmul.msk.f32.gmra.mxu3 %vm172_vm0, %v7170_v53 }
  0xbd   :  { %v7180_v55 = vpop.f32.mrf.mxu2  ;;  %v7182_v57 = vpop.f32.mrf.mxu3 }
  0xbe   :  { %12098 = vst [vmem:[#allocation17_spill] sm:$0xff] %v7180_v55  ;;  %v7193_v0 = vpop.f32.mrf.mxu0  ;;  %v7195_v1 = vpop.f32.mrf.mxu1 }
  0xbf   :  { %12099 = vst [vmem:[#allocation18_spill] sm:$0xff] %v7182_v57 }
  0xc1   :  { %5832 = vmatmul.msk.f32.gmra.mxu0 %vm172_vm0, %v7200_v2  ;;  %5854 = vmatmul.msk.f32.gmra.mxu1 %vm172_vm0, %v7200_v2 }
  0xc2   :  { %5876 = vmatmul.msk.f32.gmra.mxu2 %vm172_vm0, %v7200_v2  ;;  %5898 = vmatmul.msk.f32.gmra.mxu3 %vm172_vm0, %v7200_v2 }
  0xc5   :  { %v7210_v4 = vpop.f32.mrf.mxu2  ;;  %v7212_v6 = vpop.f32.mrf.mxu3 }
  0xc6   :  { %12100 = vst [vmem:[#allocation19_spill] sm:$0xff] %v7210_v4  ;;  %v7214_v7 = vpop.f32.mrf.mxu0  ;;  %v7216_v8 = vpop.f32.mrf.mxu1  ;;  %v6052_v4 = vld [vmem:[%s12044_s1 + $0x378] sm:$0xff] }
  0xc7   :  { %12101 = vst [vmem:[#allocation20_spill] sm:$0xff] %v7212_v6  ;;  %v6051_v6 = vld [vmem:[%s12044_s1 + $0x370] sm:$0xff] }
  0xc8   :  { %1217 = vmatpush.msra.mxu2 %v6051_v6 }
  0xc9   :  { %5899 = vmatmul.msk.f32.vlgmr.msrb.gmra.mxu0 %vm172_vm0, %v6757_v36  ;;  %5921 = vmatmul.msk.f32.vlgmr.msrb.gmra.mxu1 %vm172_vm0, %v7221_v11 }
  0xca   :  { %5943 = vmatmul.msk.f32.vlgmr.msrb.gmra.mxu2 %vm172_vm0, %v7221_v11  ;;  %5965 = vmatmul.msk.f32.vlgmr.msrb.gmra.mxu3 %vm172_vm0, %v7221_v11 }
  0xcd   :  { %v7234_v14 = vpop.f32.mrf.mxu2  ;;  %v7236_v15 = vpop.f32.mrf.mxu3 }
  0xce   :  { %12102 = vst [vmem:[#allocation21_spill] sm:$0xff] %v7234_v14  ;;  %v7238_v18 = vpop.f32.mrf.mxu0  ;;  %v7240_v22 = vpop.f32.mrf.mxu1 }
  0xcf   :  { %12103 = vst [vmem:[#allocation22_spill] sm:$0xff] %v7236_v15 }
  0xd1   :  { %5900 = vmatmul.msk.f32.gmra.mxu0 %vm172_vm0, %v6791_v44  ;;  %5922 = vmatmul.msk.f32.gmra.mxu1 %vm172_vm0, %v6757_v36 }
  0xd2   :  { %5944 = vmatmul.msk.f32.gmra.mxu2 %vm172_vm0, %v6757_v36  ;;  %5966 = vmatmul.msk.f32.gmra.mxu3 %vm172_vm0, %v6757_v36 }
  0xd5   :  { %v7259_v37 = vpop.f32.mrf.mxu2  ;;  %v7261_v38 = vpop.f32.mrf.mxu3 }
  0xd6   :  { %12104 = vst [vmem:[#allocation23_spill] sm:$0xff] %v7259_v37  ;;  %v7263_v39 = vpop.f32.mrf.mxu0  ;;  %v7265_v49 = vpop.f32.mrf.mxu1 }
  0xd7   :  { %12105 = vst [vmem:[#allocation24_spill] sm:$0xff] %v7261_v38 }
  0xd9   :  { %5901 = vmatmul.msk.f32.gmra.mxu0 %vm172_vm0, %v6813_v48  ;;  %5923 = vmatmul.msk.f32.gmra.mxu1 %vm172_vm0, %v6791_v44 }
  0xda   :  { %5945 = vmatmul.msk.f32.gmra.mxu2 %vm172_vm0, %v6791_v44  ;;  %5967 = vmatmul.msk.f32.gmra.mxu3 %vm172_vm0, %v6791_v44 }
  0xdd   :  { %v7275_v58 = vpop.f32.mrf.mxu2  ;;  %v7277_v59 = vpop.f32.mrf.mxu3 }
  0xde   :  { %12106 = vst [vmem:[#allocation25_spill] sm:$0xff] %v7275_v58  ;;  %v7282_v13 = vpop.f32.mrf.mxu0  ;;  %v7284_v23 = vpop.f32.mrf.mxu1  ;;  %v114_v58 = vld [vmem:[%s12044_s1 + $0x110] sm:$0xff] }
  0xdf   :  { %12107 = vst [vmem:[#allocation26_spill] sm:$0xff] %v7277_v59  ;;  %v6057_v59 = vld [vmem:[%s12044_s1 + $0x3a0] sm:$0xff]  ;;  %998 = vmatpush.msra.mxu1 %v114_v58 }
  0xe0   :  { %1299 = vmatpush.msra.mxu3 %v6057_v59  ;;  %v108_v58 = vld [vmem:[%s12044_s1 + $0xe0] sm:$0xff] }
  0xe1   :  { %5902 = vmatmul.msk.f32.gmra.mxu0 %vm172_vm0, %v6829_v50  ;;  %5924 = vmatmul.msk.f32.gmra.mxu1 %vm172_vm0, %v6813_v48 }
  0xe2   :  { %5946 = vmatmul.msk.f32.gmra.mxu2 %vm172_vm0, %v6813_v48  ;;  %5968 = vmatmul.msk.f32.gmra.mxu3 %vm172_vm0, %v6813_v48 }
  0xe3   :  { %916 = vmatpush.msra.mxu0 %v108_v58  ;;  %v109_v58 = vld [vmem:[%s12044_s1 + $0xe8] sm:$0xff]  ;;  %1300 = vmatpush.msra.mxu3 %v6052_v4 }
  0xe4   :  { %999 = vmatpush.msra.mxu1 %v109_v58 }
  0xe5   :  { %v7294_v24 = vpop.f32.mrf.mxu2  ;;  %v7296_v30 = vpop.f32.mrf.mxu3 }
  0xe6   :  { %12108 = vst [vmem:[#allocation27_spill] sm:$0xff] %v7294_v24  ;;  %v7307_v38 = vpop.f32.mrf.mxu0  ;;  %v7309_v37 = vpop.f32.mrf.mxu1  ;;  %1000 = vmatpush.msra.mxu1 %v104_v46  ;;  %v98_v46 = vld [vmem:[%s12044_s1 + $0x90] sm:$0xff] }
  0xe7   :  { %12109 = vst [vmem:[#allocation28_spill] sm:$0xff] %v7296_v30 }
  0xe9   :  { %5903 = vmatmul.msk.f32.gmra.mxu0 %vm172_vm0, %v6851_v54  ;;  %5925 = vmatmul.msk.f32.gmra.mxu1 %vm172_vm0, %v6829_v50 }
  0xea   :  { %5947 = vmatmul.msk.f32.gmra.mxu2 %vm172_vm0, %v6829_v50  ;;  %5969 = vmatmul.msk.f32.gmra.mxu3 %vm172_vm0, %v6829_v50 }
  0xed   :  { %v7319_v30 = vpop.f32.mrf.mxu2  ;;  %v7321_v24 = vpop.f32.mrf.mxu3 }
  0xee   :  { %12110 = vst [vmem:[#allocation29_spill] sm:$0xff] %v7319_v30  ;;  %v7323_v15 = vpop.f32.mrf.mxu0  ;;  %v7325_v59 = vpop.f32.mrf.mxu1 }
  0xef   :  { %12111 = vst [vmem:[#allocation30_spill] sm:$0xff] %v7321_v24 }
  0xf1   :  { %5904 = vmatmul.msk.f32.gmra.mxu0 %vm172_vm0, %v6867_v56  ;;  %5926 = vmatmul.msk.f32.gmra.mxu1 %vm172_vm0, %v6851_v54 }
  0xf2   :  { %5948 = vmatmul.msk.f32.gmra.mxu2 %vm172_vm0, %v6851_v54  ;;  %5970 = vmatmul.msk.f32.gmra.mxu3 %vm172_vm0, %v6851_v54 }
  0xf5   :  { %v7338_v62 = vpop.f32.mrf.mxu2  ;;  %v7340_v24 = vpop.f32.mrf.mxu3 }
  0xf6   :  { %12112 = vst [vmem:[#allocation31_spill] sm:$0xff] %v7338_v62  ;;  %v7342_v30 = vpop.f32.mrf.mxu0  ;;  %v7344_v14 = vpop.f32.mrf.mxu1 }
  0xf7   :  { %12113 = vst [vmem:[#allocation32_spill] sm:$0xff] %v7340_v24 }
  0xf8   :  { %12114 = vst [vmem:[#allocation33_spill] sm:$0xff] %v7342_v30 }
  0xf9   :  { %12115 = vst [vmem:[#allocation34_spill] sm:$0xff] %v7344_v14  ;;  %5905 = vmatmul.msk.f32.gmra.mxu0 %vm172_vm0, %v6889_v60  ;;  %5927 = vmatmul.msk.f32.gmra.mxu1 %vm172_vm0, %v6867_v56 }
  0xfa   :  { %5949 = vmatmul.msk.f32.gmra.mxu2 %vm172_vm0, %v6867_v56  ;;  %5971 = vmatmul.msk.f32.gmra.mxu3 %vm172_vm0, %v6867_v56 }
  0xfd   :  { %v7363_v24 = vpop.f32.mrf.mxu2  ;;  %v7365_v62 = vpop.f32.mrf.mxu3 }
  0xfe   :  { %12116 = vst [vmem:[#allocation35_spill] sm:$0xff] %v7363_v24  ;;  %v7367_v57 = vpop.f32.mrf.mxu0  ;;  %v7369_v6 = vpop.f32.mrf.mxu1 }
  0xff   :  { %12117 = vst [vmem:[#allocation36_spill] sm:$0xff] %v7365_v62  ;;  %v103_v62 = vld [vmem:[%s12044_s1 + $0xb8] sm:$0xff] }
 0x100   :  { %12118 = vst [vmem:[#allocation37_spill] sm:$0xff] %v7367_v57  ;;  %917 = vmatpush.msra.mxu0 %v103_v62  ;;  %v6047_v62 = vld [vmem:[%s12044_s1 + $0x350] sm:$0xff] }
 0x101   :  { %12119 = vst [vmem:[#allocation38_spill] sm:$0xff] %v7369_v6  ;;  %5906 = vmatmul.msk.f32.gmra.mxu0 %vm172_vm0, %v6902_v61  ;;  %5928 = vmatmul.msk.f32.gmra.mxu1 %vm172_vm0, %v6889_v60  ;;  %v6063_v6 = vld [vmem:[%s12044_s1 + $0x3d0] sm:$0xff] }
 0x102   :  { %5950 = vmatmul.msk.f32.gmra.mxu2 %vm172_vm0, %v6889_v60  ;;  %5972 = vmatmul.msk.f32.gmra.mxu3 %vm172_vm0, %v6889_v60 }
 0x103   :  { %1301 = vmatpush.msra.mxu3 %v6047_v62  ;;  %918 = vmatpush.msra.mxu0 %v98_v46  ;;  %v99_v46 = vld [vmem:[%s12044_s1 + $0x98] sm:$0xff] }
 0x104   :  { %1001 = vmatpush.msra.mxu1 %v99_v46 }
 0x105   :  { %v7379_v4 = vpop.f32.mrf.mxu2  ;;  %v7381_v58 = vpop.f32.mrf.mxu3  ;;  %1302 = vmatpush.msra.mxu3 %v6042_v25  ;;  %v93_v25 = vld [vmem:[%s12044_s1 + $0x68] sm:$0xff] }
 0x106   :  { %12120 = vst [vmem:[#allocation39_spill] sm:$0xff] %v7379_v4  ;;  %v7386_v24 = vpop.f32.mrf.mxu0  ;;  %v7388_v55 = vpop.f32.mrf.mxu1  ;;  %919 = vmatpush.msra.mxu0 %v93_v25  ;;  %v6036_v25 = vld [vmem:[%s12044_s1 + $0x2f8] sm:$0xff] }
 0x107   :  { %12121 = vst [vmem:[#allocation40_spill] sm:$0xff] %v7381_v58  ;;  %v6046_v58 = vld [vmem:[%s12044_s1 + $0x348] sm:$0xff] }
 0x108   :  { %12122 = vst [vmem:[#allocation41_spill] sm:$0xff] %v7386_v24  ;;  %1218 = vmatpush.msra.mxu2 %v6046_v58 }
 0x109   :  { %12123 = vst [vmem:[#allocation42_spill] sm:$0xff] %v7388_v55  ;;  %5907 = vmatmul.msk.f32.gmra.mxu0 %vm172_vm0, %v6918_v63  ;;  %5929 = vmatmul.msk.f32.gmra.mxu1 %vm172_vm0, %v6902_v61 }
 0x10a   :  { %5951 = vmatmul.msk.f32.gmra.mxu2 %vm172_vm0, %v6902_v61  ;;  %5973 = vmatmul.msk.f32.gmra.mxu3 %vm172_vm0, %v6902_v61 }
 0x10b   :  { %1219 = vmatpush.msra.mxu2 %v6041_v26 }
 0x10d   :  { %v7404_v4 = vpop.f32.mrf.mxu2  ;;  %v7406_v47 = vpop.f32.mrf.mxu3  ;;  %1220 = vmatpush.msra.mxu2 %v6036_v25 }
 0x10e   :  { %12124 = vst [vmem:[#allocation43_spill] sm:$0xff] %v7404_v4  ;;  %v7411_v41 = vpop.f32.mrf.mxu0  ;;  %v7413_v40 = vpop.f32.mrf.mxu1 }
 0x10f   :  { %12125 = vst [vmem:[#allocation44_spill] sm:$0xff] %v7406_v47 }
 0x110   :  { %12126 = vst [vmem:[#allocation45_spill] sm:$0xff] %v7411_v41 }
 0x111   :  { %12127 = vst [vmem:[#allocation46_spill] sm:$0xff] %v7413_v40  ;;  %5908 = vmatmul.msk.f32.gmra.mxu0 %vm172_vm0, %v6940_v3  ;;  %5930 = vmatmul.msk.f32.gmra.mxu1 %vm172_vm0, %v6918_v63  ;;  %v6073_v40 = vld [vmem:[%s12044_s1 + $0x420] sm:$0xff] }
 0x112   :  { %5952 = vmatmul.msk.f32.gmra.mxu2 %vm172_vm0, %v6918_v63  ;;  %5974 = vmatmul.msk.f32.gmra.mxu3 %vm172_vm0, %v6918_v63 }
 0x115   :  { %v7423_v58 = vpop.f32.mrf.mxu2  ;;  %v7425_v62 = vpop.f32.mrf.mxu3 }
 0x116   :  { %12128 = vst [vmem:[#allocation47_spill] sm:$0xff] %v7423_v58  ;;  %v7427_v47 = vpop.f32.mrf.mxu0  ;;  %v7429_v4 = vpop.f32.mrf.mxu1 }
 0x117   :  { %12129 = vst [vmem:[#allocation48_spill] sm:$0xff] %v7425_v62 }
 0x118   :  { %12130 = vst [vmem:[#allocation49_spill] sm:$0xff] %v7427_v47  ;;  %v84_v47 = vld [vmem:[%s12044_s1 + $0x20] sm:$0xff] }
 0x119   :  { %12131 = vst [vmem:[#allocation50_spill] sm:$0xff] %v7429_v4  ;;  %5909 = vmatmul.msk.f32.gmra.mxu0 %vm172_vm0, %v6956_v5  ;;  %5931 = vmatmul.msk.f32.gmra.mxu1 %vm172_vm0, %v6940_v3 }
 0x11a   :  { %5953 = vmatmul.msk.f32.gmra.mxu2 %vm172_vm0, %v6940_v3  ;;  %5975 = vmatmul.msk.f32.gmra.mxu3 %vm172_vm0, %v6940_v3 }
 0x11d   :  { %v7442_v62 = vpop.f32.mrf.mxu2  ;;  %v7444_v58 = vpop.f32.mrf.mxu3 }
 0x11e   :  { %12132 = vst [vmem:[#allocation51_spill] sm:$0xff] %v7442_v62  ;;  %v7446_v32 = vpop.f32.mrf.mxu0  ;;  %v7448_v31 = vpop.f32.mrf.mxu1 }
 0x11f   :  { %12133 = vst [vmem:[#allocation52_spill] sm:$0xff] %v7444_v58 }
 0x120   :  { %12134 = vst [vmem:[#allocation53_spill] sm:$0xff] %v7446_v32 }
 0x121   :  { %12135 = vst [vmem:[#allocation54_spill] sm:$0xff] %v7448_v31  ;;  %5910 = vmatmul.msk.f32.gmra.mxu0 %vm172_vm0, %v6978_v9  ;;  %5932 = vmatmul.msk.f32.gmra.mxu1 %vm172_vm0, %v6956_v5 }
 0x122   :  { %5954 = vmatmul.msk.f32.gmra.mxu2 %vm172_vm0, %v6956_v5  ;;  %5976 = vmatmul.msk.f32.gmra.mxu3 %vm172_vm0, %v6956_v5 }
 0x125   :  { %v7467_v58 = vpop.f32.mrf.mxu2  ;;  %v7469_v62 = vpop.f32.mrf.mxu3 }
 0x126   :  { %12136 = vst [vmem:[#allocation55_spill] sm:$0xff] %v7467_v58  ;;  %v7471_v31 = vpop.f32.mrf.mxu0  ;;  %v7473_v26 = vpop.f32.mrf.mxu1 }
 0x127   :  { %12137 = vst [vmem:[#allocation56_spill] sm:$0xff] %v7469_v62 }
 0x128   :  { %12138 = vst [vmem:[#allocation57_spill] sm:$0xff] %v7471_v31 }
 0x129   :  { %12139 = vst [vmem:[#allocation58_spill] sm:$0xff] %v7473_v26  ;;  %5911 = vmatmul.msk.f32.gmra.mxu0 %vm172_vm0, %v6991_v10  ;;  %5933 = vmatmul.msk.f32.gmra.mxu1 %vm172_vm0, %v6978_v9 }
 0x12a   :  { %5955 = vmatmul.msk.f32.gmra.mxu2 %vm172_vm0, %v6978_v9  ;;  %5977 = vmatmul.msk.f32.gmra.mxu3 %vm172_vm0, %v6978_v9 }
 0x12d   :  { %v7486_v46 = vpop.f32.mrf.mxu2  ;;  %v7488_v62 = vpop.f32.mrf.mxu3 }
 0x12e   :  { %12140 = vst [vmem:[#allocation59_spill] sm:$0xff] %v7486_v46  ;;  %v7490_v58 = vpop.f32.mrf.mxu0  ;;  %v7492_v26 = vpop.f32.mrf.mxu1  ;;  %v94_v46 = vld [vmem:[%s12044_s1 + $0x70] sm:$0xff] }
 0x12f   :  { %12141 = vst [vmem:[#allocation60_spill] sm:$0xff] %v7488_v62  ;;  %v6037_v62 = vld [vmem:[%s12044_s1 + $0x300] sm:$0xff]  ;;  %1002 = vmatpush.msra.mxu1 %v94_v46 }
 0x130   :  { %12142 = vst [vmem:[#allocation61_spill] sm:$0xff] %v7490_v58  ;;  %1303 = vmatpush.msra.mxu3 %v6037_v62 }
 0x131   :  { %12143 = vst [vmem:[#allocation62_spill] sm:$0xff] %v7492_v26  ;;  %5912 = vmatmul.msk.f32.gmra.mxu0 %vm172_vm0, %v7007_v12  ;;  %5934 = vmatmul.msk.f32.gmra.mxu1 %vm172_vm0, %v6991_v10 }
 0x132   :  { %5956 = vmatmul.msk.f32.gmra.mxu2 %vm172_vm0, %v6991_v10  ;;  %5978 = vmatmul.msk.f32.gmra.mxu3 %vm172_vm0, %v6991_v10 }
 0x135   :  { %v7511_v26 = vpop.f32.mrf.mxu2  ;;  %v7513_v58 = vpop.f32.mrf.mxu3 }
 0x136   :  { %12144 = vst [vmem:[#allocation63_spill] sm:$0xff] %v7511_v26  ;;  %v7515_v31 = vpop.f32.mrf.mxu0  ;;  %v7517_v32 = vpop.f32.mrf.mxu1  ;;  %v88_v26 = vld [vmem:[%s12044_s1 + $0x40] sm:$0xff] }
 0x137   :  { %12145 = vst [vmem:[#allocation64_spill] sm:$0xff] %v7513_v58  ;;  %920 = vmatpush.msra.mxu0 %v88_v26  ;;  %v89_v26 = vld [vmem:[%s12044_s1 + $0x48] sm:$0xff] }
 0x138   :  { %12146 = vst [vmem:[#allocation65_spill] sm:$0xff] %v7515_v31  ;;  %1003 = vmatpush.msra.mxu1 %v89_v26  ;;  %v6032_v31 = vld [vmem:[%s12044_s1 + $0x2d8] sm:$0xff] }
 0x139   :  { %12147 = vst [vmem:[#allocation66_spill] sm:$0xff] %v7517_v32  ;;  %5913 = vmatmul.msk.f32.gmra.mxu0 %vm172_vm0, %v7029_v16  ;;  %5935 = vmatmul.msk.f32.gmra.mxu1 %vm172_vm0, %v7007_v12  ;;  %v6031_v32 = vld [vmem:[%s12044_s1 + $0x2d0] sm:$0xff] }
 0x13a   :  { %5957 = vmatmul.msk.f32.gmra.mxu2 %vm172_vm0, %v7007_v12  ;;  %5979 = vmatmul.msk.f32.gmra.mxu3 %vm172_vm0, %v7007_v12 }
 0x13b   :  { %1221 = vmatpush.msra.mxu2 %v6031_v32  ;;  %1304 = vmatpush.msra.mxu3 %v6032_v31  ;;  %v83_v31 = vld [vmem:[%s12044_s1 + $0x18] sm:$0xff] }
 0x13c   :  { %921 = vmatpush.msra.mxu0 %v83_v31  ;;  %1004 = vmatpush.msra.mxu1 %v84_v47 }
 0x13d   :  { %v7527_v62 = vpop.f32.mrf.mxu2  ;;  %v7529_v46 = vpop.f32.mrf.mxu3 }
 0x13e   :  { %12148 = vst [vmem:[#allocation67_spill] sm:$0xff] %v7527_v62  ;;  %v319_v25 = vpop.f32.mrf.mxu0  ;;  %v402_v58 = vpop.f32.mrf.mxu1  ;;  %1379 = vmatpush.msrb.mxu0 %v6073_v40  ;;  %v6074_v40 = vld [vmem:[%s12044_s1 + $0x428] sm:$0xff] }
 0x13f   :  { %12149 = vst [vmem:[#allocation68_spill] sm:$0xff] %v7529_v46  ;;  %1462 = vmatpush.msrb.mxu1 %v6074_v40 }
 0x141   :  { %5914 = vmatmul.msk.f32.gmra.mxu0 %vm172_vm0, %v7042_v17  ;;  %5936 = vmatmul.msk.f32.gmra.mxu1 %vm172_vm0, %v7029_v16 }
 0x142   :  { %5958 = vmatmul.msk.f32.gmra.mxu2 %vm172_vm0, %v7029_v16  ;;  %5980 = vmatmul.msk.f32.gmra.mxu3 %vm172_vm0, %v7029_v16 }
 0x145   :  { %v485_v46 = vpop.f32.mrf.mxu2  ;;  %v568_v25 = vpop.f32.mrf.mxu3 }
 0x146   :  { %v7542_v58 = vpop.f32.mrf.mxu0  ;;  %v7544_v62 = vpop.f32.mrf.mxu1 }
 0x147   :  { %12150 = vst [vmem:[#allocation69_spill] sm:$0xff] %v7542_v58 }
 0x149   :  { %5915 = vmatmul.msk.f32.gmra.mxu0 %vm172_vm0, %v7058_v19  ;;  %5937 = vmatmul.msk.f32.gmra.mxu1 %vm172_vm0, %v7042_v17 }
 0x14a   :  { %5959 = vmatmul.msk.f32.gmra.mxu2 %vm172_vm0, %v7042_v17  ;;  %5981 = vmatmul.msk.f32.gmra.mxu3 %vm172_vm0, %v7042_v17 }
 0x14d   :  { %v7563_v46 = vpop.f32.mrf.mxu2  ;;  %v7565_v32 = vpop.f32.mrf.mxu3 }
 0x14e   :  { %12151 = vst [vmem:[#allocation70_spill] sm:$0xff] %v7565_v32  ;;  %v7567_v25 = vpop.f32.mrf.mxu0  ;;  %v7569_v26 = vpop.f32.mrf.mxu1 }
 0x14f   :  { %12152 = vst [vmem:[#allocation71_spill] sm:$0xff] %v7567_v25 }
 0x151   :  { %5916 = vmatmul.msk.f32.gmra.mxu0 %vm172_vm0, %v7092_v29  ;;  %5938 = vmatmul.msk.f32.gmra.mxu1 %vm172_vm0, %v7058_v19 }
 0x152   :  { %5960 = vmatmul.msk.f32.gmra.mxu2 %vm172_vm0, %v7058_v19  ;;  %5982 = vmatmul.msk.f32.gmra.mxu3 %vm172_vm0, %v7058_v19 }
 0x155   :  { %v7582_v25 = vpop.f32.mrf.mxu2  ;;  %v7584_v58 = vpop.f32.mrf.mxu3 }
 0x156   :  { %12153 = vst [vmem:[#allocation72_spill] sm:$0xff] %v7584_v58  ;;  %v7586_v32 = vpop.f32.mrf.mxu0  ;;  %v7588_v4 = vpop.f32.mrf.mxu1 }
 0x157   :  { %12154 = vst [vmem:[#allocation73_spill] sm:$0xff] %v7586_v32 }
 0x159   :  { %5917 = vmatmul.msk.f32.gmra.mxu0 %vm172_vm0, %v7116_v35  ;;  %5939 = vmatmul.msk.f32.gmra.mxu1 %vm172_vm0, %v7092_v29 }
 0x15a   :  { %5961 = vmatmul.msk.f32.gmra.mxu2 %vm172_vm0, %v7092_v29  ;;  %5983 = vmatmul.msk.f32.gmra.mxu3 %vm172_vm0, %v7092_v29 }
 0x15d   :  { %v7601_v19 = vpop.f32.mrf.mxu2  ;;  %v7603_v31 = vpop.f32.mrf.mxu3 }
 0x15e   :  { %12155 = vst [vmem:[#allocation74_spill] sm:$0xff] %v7603_v31  ;;  %v7605_v32 = vpop.f32.mrf.mxu0  ;;  %v7607_v58 = vpop.f32.mrf.mxu1 }
 0x15f   :  { %12156 = vst [vmem:[#allocation75_spill] sm:$0xff] %v7605_v32 }
 0x161   :  { %5918 = vmatmul.msk.f32.gmra.mxu0 %vm172_vm0, %v7146_v45  ;;  %5940 = vmatmul.msk.f32.gmra.mxu1 %vm172_vm0, %v7116_v35 }
 0x162   :  { %5962 = vmatmul.msk.f32.gmra.mxu2 %vm172_vm0, %v7116_v35  ;;  %5984 = vmatmul.msk.f32.gmra.mxu3 %vm172_vm0, %v7116_v35 }
 0x165   :  { %v7617_v29 = vpop.f32.mrf.mxu2  ;;  %v7619_v47 = vpop.f32.mrf.mxu3 }
 0x166   :  { %12157 = vst [vmem:[#allocation76_spill] sm:$0xff] %v7619_v47  ;;  %v7621_v31 = vpop.f32.mrf.mxu0  ;;  %v7623_v32 = vpop.f32.mrf.mxu1 }
 0x167   :  { %12158 = vst [vmem:[#allocation77_spill] sm:$0xff] %v7621_v31 }
 0x169   :  { %5919 = vmatmul.msk.f32.gmra.mxu0 %vm172_vm0, %v7170_v53  ;;  %5941 = vmatmul.msk.f32.gmra.mxu1 %vm172_vm0, %v7146_v45 }
 0x16a   :  { %5963 = vmatmul.msk.f32.gmra.mxu2 %vm172_vm0, %v7146_v45  ;;  %5985 = vmatmul.msk.f32.gmra.mxu3 %vm172_vm0, %v7146_v45 }
 0x16d   :  { %v7636_v35 = vpop.f32.mrf.mxu2  ;;  %v7638_v31 = vpop.f32.mrf.mxu3 }
 0x16e   :  { %12159 = vst [vmem:[#allocation78_spill] sm:$0xff] %v7638_v31  ;;  %v7640_v47 = vpop.f32.mrf.mxu0  ;;  %v7642_v41 = vpop.f32.mrf.mxu1 }
 0x16f   :  { %12160 = vst [vmem:[#allocation79_spill] sm:$0xff] %v7640_v47 }
 0x171   :  { %5920 = vmatmul.msk.f32.gmra.mxu0 %vm172_vm0, %v7200_v2  ;;  %5942 = vmatmul.msk.f32.gmra.mxu1 %vm172_vm0, %v7170_v53 }
 0x172   :  { %5964 = vmatmul.msk.f32.gmra.mxu2 %vm172_vm0, %v7170_v53  ;;  %5986 = vmatmul.msk.f32.gmra.mxu3 %vm172_vm0, %v7170_v53  ;;  %v6068_v53 = vld [vmem:[%s12044_s1 + $0x3f8] sm:$0xff] }
 0x173   :  { %1380 = vmatpush.msrb.mxu0 %v6068_v53 }
 0x175   :  { %v7655_v45 = vpop.f32.mrf.mxu2  ;;  %v7657_v47 = vpop.f32.mrf.mxu3  ;;  %1381 = vmatpush.msrb.mxu0 %v6063_v6  ;;  %v6064_v6 = vld [vmem:[%s12044_s1 + $0x3d8] sm:$0xff] }
 0x176   :  { %12161 = vst [vmem:[#allocation80_spill] sm:$0xff] %v7657_v47  ;;  %v7659_v31 = vpop.f32.mrf.mxu0  ;;  %v7661_v55 = vpop.f32.mrf.mxu1 }
 0x177   :  { %12162 = vst [vmem:[#allocation81_spill] sm:$0xff] %v7659_v31 }
 0x179   :  { %5987 = vmatmul.msk.f32.vlgmr.msra.gmra.mxu0 %vm172_vm0, %v7221_v11  ;;  %6009 = vmatmul.msk.f32.vlgmr.msra.gmra.mxu1 %vm172_vm0, %v7221_v11  ;;  %v6069_v11 = vld [vmem:[%s12044_s1 + $0x400] sm:$0xff] }
 0x17a   :  { %6076 = vmatmul.msk.f32.vlgmr.msra.gmra.mxu2 %vm172_vm0, %v6791_v44  ;;  %6098 = vmatmul.msk.f32.vlgmr.msra.gmra.mxu3 %vm172_vm0, %v6791_v44 }
 0x17b   :  { %1463 = vmatpush.msrb.mxu1 %v6069_v11 }
 0x17d   :  { %v7674_v2 = vpop.f32.mrf.mxu2  ;;  %v7676_v40 = vpop.f32.mrf.mxu3  ;;  %1464 = vmatpush.msrb.mxu1 %v6064_v6 }
 0x17e   :  { %12163 = vst [vmem:[#allocation82_spill] sm:$0xff] %v7676_v40  ;;  %v7678_v31 = vpop.f32.mrf.mxu0  ;;  %v7680_v47 = vpop.f32.mrf.mxu1 }
 0x17f   :  { %12164 = vst [vmem:[#allocation83_spill] sm:$0xff] %v7678_v31 }
 0x181   :  { %5988 = vmatmul.msk.f32.gmra.mxu0 %vm172_vm0, %v6757_v36  ;;  %6010 = vmatmul.msk.f32.gmra.mxu1 %vm172_vm0, %v6757_v36 }
 0x182   :  { %6077 = vmatmul.msk.f32.gmra.mxu2 %vm172_vm0, %v6813_v48  ;;  %6099 = vmatmul.msk.f32.gmra.mxu3 %vm172_vm0, %v6813_v48 }
 0x185   :  { %v7693_v53 = vpop.f32.mrf.mxu2  ;;  %v7695_v31 = vpop.f32.mrf.mxu3 }
 0x186   :  { %12165 = vst [vmem:[#allocation84_spill] sm:$0xff] %v7695_v31  ;;  %v7697_v40 = vpop.f32.mrf.mxu0  ;;  %v7699_v24 = vpop.f32.mrf.mxu1 }
 0x187   :  { %12166 = vst [vmem:[#allocation85_spill] sm:$0xff] %v7697_v40 }
 0x189   :  { %5989 = vmatmul.msk.f32.gmra.mxu0 %vm172_vm0, %v6791_v44  ;;  %6011 = vmatmul.msk.f32.gmra.mxu1 %vm172_vm0, %v6791_v44 }
 0x18a   :  { %6078 = vmatmul.msk.f32.gmra.mxu2 %vm172_vm0, %v6829_v50  ;;  %6100 = vmatmul.msk.f32.gmra.mxu3 %vm172_vm0, %v6829_v50 }
 0x18d   :  { %v7709_v36 = vpop.f32.mrf.mxu2  ;;  %v7711_v11 = vpop.f32.mrf.mxu3 }
 0x18e   :  { %12167 = vst [vmem:[#allocation86_spill] sm:$0xff] %v7711_v11  ;;  %v7713_v31 = vpop.f32.mrf.mxu0  ;;  %v7715_v40 = vpop.f32.mrf.mxu1 }
 0x18f   :  { %12168 = vst [vmem:[#allocation87_spill] sm:$0xff] %v7713_v31 }
 0x191   :  { %5990 = vmatmul.msk.f32.gmra.mxu0 %vm172_vm0, %v6813_v48  ;;  %6012 = vmatmul.msk.f32.gmra.mxu1 %vm172_vm0, %v6813_v48  ;;  %v6075_v48 = vld [vmem:[%s12044_s1 + $0x430] sm:$0xff] }
 0x192   :  { %6079 = vmatmul.msk.f32.gmra.mxu2 %vm172_vm0, %v6851_v54  ;;  %6101 = vmatmul.msk.f32.gmra.mxu3 %vm172_vm0, %v6851_v54 }
 0x193   :  { %1545 = vmatpush.msrb.mxu2 %v6075_v48  ;;  %v6058_v48 = vld [vmem:[%s12044_s1 + $0x3a8] sm:$0xff] }
 0x194   :  { %1382 = vmatpush.msrb.mxu0 %v6058_v48  ;;  %v6059_v48 = vld [vmem:[%s12044_s1 + $0x3b0] sm:$0xff] }
 0x195   :  { %v7728_v44 = vpop.f32.mrf.mxu2  ;;  %v7730_v31 = vpop.f32.mrf.mxu3  ;;  %1465 = vmatpush.msrb.mxu1 %v6059_v48 }
 0x196   :  { %12169 = vst [vmem:[#allocation88_spill] sm:$0xff] %v7730_v31  ;;  %v7732_v11 = vpop.f32.mrf.mxu0  ;;  %v7734_v57 = vpop.f32.mrf.mxu1 }
 0x197   :  { %12170 = vst [vmem:[#allocation89_spill] sm:$0xff] %v7732_v11 }
 0x199   :  { %5991 = vmatmul.msk.f32.gmra.mxu0 %vm172_vm0, %v6829_v50  ;;  %6013 = vmatmul.msk.f32.gmra.mxu1 %vm172_vm0, %v6829_v50 }
 0x19a   :  { %6080 = vmatmul.msk.f32.gmra.mxu2 %vm172_vm0, %v6867_v56  ;;  %6102 = vmatmul.msk.f32.gmra.mxu3 %vm172_vm0, %v6867_v56 }
 0x19d   :  { %v7750_v11 = vpop.f32.mrf.mxu2  ;;  %v7752_v31 = vpop.f32.mrf.mxu3 }
 0x19e   :  { %12171 = vst [vmem:[#allocation90_spill] sm:$0xff] %v7752_v31  ;;  %v7754_v14 = vpop.f32.mrf.mxu0  ;;  %v7756_v6 = vpop.f32.mrf.mxu1 }
 0x19f   :  { %12172 = vst [vmem:[#allocation91_spill] sm:$0xff] %v7754_v14 }
 0x1a1   :  { %5992 = vmatmul.msk.f32.gmra.mxu0 %vm172_vm0, %v6851_v54  ;;  %6014 = vmatmul.msk.f32.gmra.mxu1 %vm172_vm0, %v6851_v54  ;;  %v6070_v54 = vld [vmem:[%s12044_s1 + $0x408] sm:$0xff] }
 0x1a2   :  { %6081 = vmatmul.msk.f32.gmra.mxu2 %vm172_vm0, %v6889_v60  ;;  %6103 = vmatmul.msk.f32.gmra.mxu3 %vm172_vm0, %v6889_v60 }
 0x1a3   :  { %1546 = vmatpush.msrb.mxu2 %v6070_v54 }
 0x1a5   :  { %v7769_v50 = vpop.f32.mrf.mxu2  ;;  %v7771_v14 = vpop.f32.mrf.mxu3 }
 0x1a6   :  { %12173 = vst [vmem:[#allocation92_spill] sm:$0xff] %v7771_v14  ;;  %v7773_v31 = vpop.f32.mrf.mxu0  ;;  %v7775_v30 = vpop.f32.mrf.mxu1 }
 0x1a7   :  { %12174 = vst [vmem:[#allocation93_spill] sm:$0xff] %v7773_v31 }
 0x1a8   :  { %12175 = vst [vmem:[#allocation94_spill] sm:$0xff] %v7775_v30 }
 0x1a9   :  { %5993 = vmatmul.msk.f32.gmra.mxu0 %vm172_vm0, %v6867_v56  ;;  %6015 = vmatmul.msk.f32.gmra.mxu1 %vm172_vm0, %v6867_v56 }
 0x1aa   :  { %6082 = vmatmul.msk.f32.gmra.mxu2 %vm172_vm0, %v6902_v61  ;;  %6104 = vmatmul.msk.f32.gmra.mxu3 %vm172_vm0, %v6902_v61 }
 0x1ad   :  { %v7791_v31 = vpop.f32.mrf.mxu2  ;;  %v7793_v48 = vpop.f32.mrf.mxu3 }
 0x1ae   :  { %12176 = vst [vmem:[#allocation95_spill] sm:$0xff] %v7793_v48  ;;  %v7795_v14 = vpop.f32.mrf.mxu0  ;;  %v7797_v30 = vpop.f32.mrf.mxu1 }
 0x1af   :  { %12177 = vst [vmem:[#allocation96_spill] sm:$0xff] %v7795_v14 }
 0x1b0   :  { %12178 = vst [vmem:[#allocation97_spill] sm:$0xff] %v7797_v30  ;;  %v6053_v30 = vld [vmem:[%s12044_s1 + $0x380] sm:$0xff] }
 0x1b1   :  { %5994 = vmatmul.msk.f32.gmra.mxu0 %vm172_vm0, %v6889_v60  ;;  %6016 = vmatmul.msk.f32.gmra.mxu1 %vm172_vm0, %v6889_v60  ;;  %v7821_v60 = vld [vmem:[%s12043_s0 + $0x50] sm:$0xff] }
 0x1b2   :  { %6083 = vmatmul.msk.f32.gmra.mxu2 %vm172_vm0, %v6918_v63  ;;  %6105 = vmatmul.msk.f32.gmra.mxu3 %vm172_vm0, %v6918_v63  ;;  %12183 = vst [vmem:[#allocation102_spill] sm:$0xff] %v7821_v60 }
 0x1b3   :  { %1383 = vmatpush.msrb.mxu0 %v6053_v30  ;;  %v6054_v30 = vld [vmem:[%s12044_s1 + $0x388] sm:$0xff] }
 0x1b4   :  { %1466 = vmatpush.msrb.mxu1 %v6054_v30 }
 0x1b5   :  { %v7807_v56 = vpop.f32.mrf.mxu2  ;;  %v7809_v54 = vpop.f32.mrf.mxu3 }
 0x1b6   :  { %12179 = vst [vmem:[#allocation98_spill] sm:$0xff] %v7807_v56  ;;  %v7811_v48 = vpop.f32.mrf.mxu0  ;;  %v7813_v14 = vpop.f32.mrf.mxu1 }
 0x1b7   :  { %12180 = vst [vmem:[#allocation99_spill] sm:$0xff] %v7809_v54 }
 0x1b8   :  { %12181 = vst [vmem:[#allocation100_spill] sm:$0xff] %v7811_v48 }
 0x1b9   :  { %12182 = vst [vmem:[#allocation101_spill] sm:$0xff] %v7813_v14  ;;  %5995 = vmatmul.msk.f32.gmra.mxu0 %vm172_vm0, %v6902_v61  ;;  %6017 = vmatmul.msk.f32.gmra.mxu1 %vm172_vm0, %v6902_v61  ;;  %v6065_v61 = vld [vmem:[%s12044_s1 + $0x3e0] sm:$0xff] }
 0x1ba   :  { %6084 = vmatmul.msk.f32.gmra.mxu2 %vm172_vm0, %v7821_v60  ;;  %6106 = vmatmul.msk.f32.gmra.mxu3 %vm172_vm0, %v7821_v60  ;;  %v7848_v60 = vld [vmem:[%s12043_s0 + $0x58] sm:$0xff] }
 0x1bb   :  { %12187 = vst [vmem:[#allocation106_spill] sm:$0xff] %v7848_v60  ;;  %1547 = vmatpush.msrb.mxu2 %v6065_v61  ;;  %v7869_v61 = vld [vmem:[%s12043_s0 + $0x60] sm:$0xff] }
 0x1bc   :  { %12192 = vst [vmem:[#allocation111_spill] sm:$0xff] %v7869_v61 }
 0x1bd   :  { %v7831_v48 = vpop.f32.mrf.mxu2  ;;  %v7833_v54 = vpop.f32.mrf.mxu3 }
 0x1be   :  { %12184 = vst [vmem:[#allocation103_spill] sm:$0xff] %v7833_v54  ;;  %v7835_v14 = vpop.f32.mrf.mxu0  ;;  %v7837_v56 = vpop.f32.mrf.mxu1 }
 0x1bf   :  { %12185 = vst [vmem:[#allocation104_spill] sm:$0xff] %v7835_v14 }
 0x1c0   :  { %12186 = vst [vmem:[#allocation105_spill] sm:$0xff] %v7837_v56 }
 0x1c1   :  { %5996 = vmatmul.msk.f32.gmra.mxu0 %vm172_vm0, %v6918_v63  ;;  %6018 = vmatmul.msk.f32.gmra.mxu1 %vm172_vm0, %v6918_v63  ;;  %v6048_v63 = vld [vmem:[%s12044_s1 + $0x358] sm:$0xff] }
 0x1c2   :  { %6085 = vmatmul.msk.f32.gmra.mxu2 %vm172_vm0, %v7848_v60  ;;  %6107 = vmatmul.msk.f32.gmra.mxu3 %vm172_vm0, %v7848_v60 }
 0x1c3   :  { %1384 = vmatpush.msrb.mxu0 %v6048_v63  ;;  %v7893_v63 = vld [vmem:[%s12043_s0 + $0x68] sm:$0xff] }
 0x1c4   :  { %12197 = vst [vmem:[#allocation116_spill] sm:$0xff] %v7893_v63 }
 0x1c5   :  { %v7858_v14 = vpop.f32.mrf.mxu2  ;;  %v7860_v54 = vpop.f32.mrf.mxu3 }
 0x1c6   :  { %12188 = vst [vmem:[#allocation107_spill] sm:$0xff] %v7858_v14  ;;  %v7862_v56 = vpop.f32.mrf.mxu0  ;;  %v7864_v30 = vpop.f32.mrf.mxu1 }
 0x1c7   :  { %12189 = vst [vmem:[#allocation108_spill] sm:$0xff] %v7860_v54 }
 0x1c8   :  { %12190 = vst [vmem:[#allocation109_spill] sm:$0xff] %v7862_v56 }
 0x1c9   :  { %12191 = vst [vmem:[#allocation110_spill] sm:$0xff] %v7864_v30  ;;  %5997 = vmatmul.msk.f32.gmra.mxu0 %vm172_vm0, %v6940_v3  ;;  %6019 = vmatmul.msk.f32.gmra.mxu1 %vm172_vm0, %v6940_v3  ;;  %v6049_v3 = vld [vmem:[%s12044_s1 + $0x360] sm:$0xff] }
 0x1ca   :  { %6086 = vmatmul.msk.f32.gmra.mxu2 %vm172_vm0, %v7869_v61  ;;  %6108 = vmatmul.msk.f32.gmra.mxu3 %vm172_vm0, %v7869_v61  ;;  %v6060_v61 = vld [vmem:[%s12044_s1 + $0x3b8] sm:$0xff] }
 0x1cb   :  { %1467 = vmatpush.msrb.mxu1 %v6049_v3  ;;  %1548 = vmatpush.msrb.mxu2 %v6060_v61  ;;  %v7920_v61 = vld [vmem:[%s12043_s0 + $0x70] sm:$0xff] }
 0x1cc   :  { %12202 = vst [vmem:[#allocation121_spill] sm:$0xff] %v7920_v61 }
 0x1cd   :  { %v7882_v56 = vpop.f32.mrf.mxu2  ;;  %v7884_v54 = vpop.f32.mrf.mxu3 }
 0x1ce   :  { %12193 = vst [vmem:[#allocation112_spill] sm:$0xff] %v7882_v56  ;;  %v7886_v30 = vpop.f32.mrf.mxu0  ;;  %v7888_v14 = vpop.f32.mrf.mxu1 }
 0x1cf   :  { %12194 = vst [vmem:[#allocation113_spill] sm:$0xff] %v7884_v54 }
 0x1d0   :  { %12195 = vst [vmem:[#allocation114_spill] sm:$0xff] %v7886_v30 }
 0x1d1   :  { %12196 = vst [vmem:[#allocation115_spill] sm:$0xff] %v7888_v14  ;;  %5998 = vmatmul.msk.f32.gmra.mxu0 %vm172_vm0, %v6956_v5  ;;  %6020 = vmatmul.msk.f32.gmra.mxu1 %vm172_vm0, %v6956_v5  ;;  %v6043_v5 = vld [vmem:[%s12044_s1 + $0x330] sm:$0xff] }
 0x1d2   :  { %6087 = vmatmul.msk.f32.gmra.mxu2 %vm172_vm0, %v7893_v63  ;;  %6109 = vmatmul.msk.f32.gmra.mxu3 %vm172_vm0, %v7893_v63 }
 0x1d3   :  { %1385 = vmatpush.msrb.mxu0 %v6043_v5 }
 0x1d5   :  { %v7909_v30 = vpop.f32.mrf.mxu2  ;;  %v7911_v54 = vpop.f32.mrf.mxu3 }
 0x1d6   :  { %12198 = vst [vmem:[#allocation117_spill] sm:$0xff] %v7909_v30  ;;  %v7913_v14 = vpop.f32.mrf.mxu0  ;;  %v7915_v3 = vpop.f32.mrf.mxu1 }
 0x1d7   :  { %12199 = vst [vmem:[#allocation118_spill] sm:$0xff] %v7911_v54 }
 0x1d8   :  { %12200 = vst [vmem:[#allocation119_spill] sm:$0xff] %v7913_v14 }
 0x1d9   :  { %12201 = vst [vmem:[#allocation120_spill] sm:$0xff] %v7915_v3  ;;  %5999 = vmatmul.msk.f32.gmra.mxu0 %vm172_vm0, %v6978_v9  ;;  %6021 = vmatmul.msk.f32.gmra.mxu1 %vm172_vm0, %v6978_v9  ;;  %v1085_v9 = vld [vmem:[%s12043_s0 + $0x78] sm:$0xff] }
 0x1da   :  { %6088 = vmatmul.msk.f32.gmra.mxu2 %vm172_vm0, %v7920_v61  ;;  %6110 = vmatmul.msk.f32.gmra.mxu3 %vm172_vm0, %v7920_v61 }
 0x1dd   :  { %v7933_v14 = vpop.f32.mrf.mxu2  ;;  %v7935_v54 = vpop.f32.mrf.mxu3 }
 0x1de   :  { %12203 = vst [vmem:[#allocation122_spill] sm:$0xff] %v7933_v14  ;;  %v7937_v3 = vpop.f32.mrf.mxu0  ;;  %v7939_v30 = vpop.f32.mrf.mxu1  ;;  %v6044_v14 = vld [vmem:[%s12044_s1 + $0x338] sm:$0xff] }
 0x1df   :  { %12204 = vst [vmem:[#allocation123_spill] sm:$0xff] %v7935_v54  ;;  %1468 = vmatpush.msrb.mxu1 %v6044_v14  ;;  %v6055_v14 = vld [vmem:[%s12044_s1 + $0x390] sm:$0xff] }
 0x1e0   :  { %12205 = vst [vmem:[#allocation124_spill] sm:$0xff] %v7937_v3  ;;  %1549 = vmatpush.msrb.mxu2 %v6055_v14  ;;  %v6038_v14 = vld [vmem:[%s12044_s1 + $0x308] sm:$0xff] }
 0x1e1   :  { %12206 = vst [vmem:[#allocation125_spill] sm:$0xff] %v7939_v30  ;;  %6000 = vmatmul.msk.f32.gmra.mxu0 %vm172_vm0, %v6991_v10  ;;  %6022 = vmatmul.msk.f32.gmra.mxu1 %vm172_vm0, %v6991_v10  ;;  %v1086_v10 = vld [vmem:[%s12043_s0 + $0x80] sm:$0xff] }
 0x1e2   :  { %6089 = vmatmul.msk.f32.gmra.mxu2 %vm172_vm0, %v1085_v9  ;;  %6111 = vmatmul.msk.f32.gmra.mxu3 %vm172_vm0, %v1085_v9 }
 0x1e3   :  { %1386 = vmatpush.msrb.mxu0 %v6038_v14 }
 0x1e5   :  { %v7950_v5 = vpop.f32.mrf.mxu2  ;;  %v7952_v54 = vpop.f32.mrf.mxu3 }
 0x1e6   :  { %12207 = vst [vmem:[#allocation126_spill] sm:$0xff] %v7950_v5  ;;  %v7954_v3 = vpop.f32.mrf.mxu0  ;;  %v7956_v30 = vpop.f32.mrf.mxu1  ;;  %v1087_v5 = vld [vmem:[%s12043_s0 + $0x88] sm:$0xff] }
 0x1e7   :  { %12208 = vst [vmem:[#allocation127_spill] sm:$0xff] %v7952_v54 }
 0x1e8   :  { %12209 = vst [vmem:[#allocation128_spill] sm:$0xff] %v7954_v3 }
 0x1e9   :  { %12210 = vst [vmem:[#allocation129_spill] sm:$0xff] %v7956_v30  ;;  %6001 = vmatmul.msk.f32.gmra.mxu0 %vm172_vm0, %v7007_v12  ;;  %6023 = vmatmul.msk.f32.gmra.mxu1 %vm172_vm0, %v7007_v12 }
 0x1ea   :  { %6090 = vmatmul.msk.f32.gmra.mxu2 %vm172_vm0, %v1086_v10  ;;  %6112 = vmatmul.msk.f32.gmra.mxu3 %vm172_vm0, %v1086_v10 }
 0x1ed   :  { %v7970_v9 = vpop.f32.mrf.mxu2  ;;  %v7972_v3 = vpop.f32.mrf.mxu3 }
 0x1ee   :  { %12211 = vst [vmem:[#allocation130_spill] sm:$0xff] %v7970_v9  ;;  %v651_v54 = vpop.f32.mrf.mxu0  ;;  %v737_v30 = vpop.f32.mrf.mxu1 }
 0x1ef   :  { %12212 = vst [vmem:[#allocation131_spill] sm:$0xff] %v7972_v3  ;;  %v1088_v3 = vld [vmem:[%s12043_s0 + $0x90] sm:$0xff] }
 0x1f1   :  { %6002 = vmatmul.msk.f32.gmra.mxu0 %vm172_vm0, %v7029_v16  ;;  %6024 = vmatmul.msk.f32.gmra.mxu1 %vm172_vm0, %v7029_v16  ;;  %v1731_v16 = vld [vmem:[%s12047_s4] sm:$0x1f] }
 0x1f2   :  { %6091 = vmatmul.msk.f32.gmra.mxu2 %vm172_vm0, %v1087_v5  ;;  %6113 = vmatmul.msk.f32.gmra.mxu3 %vm172_vm0, %v1087_v5  ;;  %v675_v5 = vadd.f32 %v7544_v62, %v7060_v20  ;;  %v8011_v14 = vperm.slane %v1731_v16, 1  ;;  %v6050_v20 = vld [vmem:[%s12044_s1 + $0x368] sm:$0xff]  ;;  %v1089_v62 = vld [vmem:[%s12043_s0 + $0x98] sm:$0xff] }
 0x1f3   :  { %1550 = vmatpush.msrb.mxu2 %v6050_v20 }
 0x1f5   :  { %v820_v12 = vpop.f32.mrf.mxu2  ;;  %v903_v54 = vpop.f32.mrf.mxu3 }
 0x1f6   :  { %v7986_v30 = vpop.f32.mrf.mxu0  ;;  %v7988_v10 = vpop.f32.mrf.mxu1  ;;  %v758_v12 = vadd.f32 %v7563_v46, %v7062_v21  ;;  %v8009_v54 = vperm.slane %v1731_v16, 0  ;;  %v8023_v21 = vstv %s54_s22  ;;  %v6509_v16 = vld [vmem:[%s12043_s0 + $0x88] sm:$0xff]  ;;  %s6572_s22 = smov 116  }
 0x1f7   :  { %12213 = vst [vmem:[#allocation132_spill] sm:$0xff] %v7986_v30 }
 0x1f8   :  { %12214 = vst [vmem:[#allocation133_spill] sm:$0xff] %v7988_v10 }
 0x1f9   :  { %6003 = vmatmul.msk.f32.gmra.mxu0 %vm172_vm0, %v7042_v17  ;;  %6025 = vmatmul.msk.f32.gmra.mxu1 %vm172_vm0, %v7042_v17 }
 0x1fa   :  { %6092 = vmatmul.msk.f32.gmra.mxu2 %vm172_vm0, %v1088_v3  ;;  %6114 = vmatmul.msk.f32.gmra.mxu3 %vm172_vm0, %v1088_v3  ;;  %v6039_v3 = vld [vmem:[%s12044_s1 + $0x310] sm:$0xff] }
 0x1fb   :  { %1469 = vmatpush.msrb.mxu1 %v6039_v3 }
 0x1fd   :  { %v1223_v10 = vpop.f32.mrf.mxu2  ;;  %v1306_v17 = vpop.f32.mrf.mxu3 }
 0x1fe   :  { %v1621_v30 = vadd.f32 %v1223_v10, %v675_v5  ;;  %v1622_v9 = vadd.f32 %v1306_v17, %v758_v12  ;;  %v8013_v61 = vpop.f32.mrf.mxu0  ;;  %v8015_v63 = vpop.f32.mrf.mxu1 }
 0x1ff   :  { %12215 = vst [vmem:[#allocation134_spill] sm:$0xff] %v8013_v61 }
 0x200   :  { %12216 = vst [vmem:[#allocation135_spill] sm:$0xff] %v8015_v63  ;;  %v1743_v46 = vadd.f32 %v8009_v54, %v1621_v30  ;;  %v1744_v10 = vadd.f32 %v8011_v14, %v1622_v9  ;;  %v678_v9 = vadd.f32 %v7569_v26, %v7085_v27  ;;  %v761_v30 = vadd.f32 %v7582_v25, %v7087_v28  ;;  %v6045_v63 = vld [vmem:[%s12044_s1 + $0x340] sm:$0xff]  ;;  %v6040_v25 = vld [vmem:[%s12044_s1 + $0x318] sm:$0xff] }
 0x201   :  { %6004 = vmatmul.msk.f32.gmra.mxu0 %vm172_vm0, %v6509_v16  ;;  %6026 = vmatmul.msk.f32.gmra.mxu1 %vm172_vm0, %v6509_v16  ;;  %v6033_v27 = vld [vmem:[%s12044_s1 + $0x2e0] sm:$0xff] }
 0x202   :  { %vm1853_vm1 = vcmp.gt.f32.partialorder %v1743_v46, 0.0  ;;  %v1964_v5 = vmul.f32 %v8023_v21, %v1743_v46  ;;  %vm1854_vm2 = vcmp.gt.f32.partialorder %v1744_v10, 0.0  ;;  %v1965_v12 = vmul.f32 %v8023_v21, %v1744_v10  ;;  %6093 = vmatmul.msk.f32.gmra.mxu2 %vm172_vm0, %v1089_v62  ;;  %6115 = vmatmul.msk.f32.gmra.mxu3 %vm172_vm0, %v1089_v62  ;;  %v1090_v28 = vld [vmem:[%s12043_s0 + $0xa0] sm:$0xff] }
 0x203   :  { %1551 = vmatpush.msrb.mxu2 %v6045_v63  ;;  %1387 = vmatpush.msrb.mxu0 %v6033_v27  ;;  %v6034_v63 = vld [vmem:[%s12044_s1 + $0x2e8] sm:$0xff] }
 0x204   :  { %v2074_v17 = vsel %vm1853_vm1, %v1743_v46, %v1964_v5  ;;  %v2075_v3 = vsel %vm1854_vm2, %v1744_v10, %v1965_v12  ;;  %v6510_v10 = vld [vmem:[%s12043_s0 + $0x90] sm:$0xff]  ;;  %1470 = vmatpush.msrb.mxu1 %v6034_v63  ;;  %v681_v12 = vadd.f32 %v7588_v4, %v7109_v33  ;;  %v6511_v4 = vld [vmem:[%s12043_s0 + $0x98] sm:$0xff]  ;;  %v767_v63 = vadd.f32 %v7617_v29, %v7141_v43 }
 0x205   :  { %2184 = vst [vmem:[#allocation2] sm:$0xff] %v2074_v17  ;;  %v1226_v20 = vpop.f32.mrf.mxu2  ;;  %v1309_v16 = vpop.f32.mrf.mxu3  ;;  %1552 = vmatpush.msrb.mxu2 %v6040_v25  ;;  %v6035_v5 = vld [vmem:[%s12044_s1 + $0x2f0] sm:$0xff] }
 0x206   :  { %2185 = vst [vmem:[#allocation2 + $0x8] sm:$0xff] %v2075_v3  ;;  %v1626_v61 = vadd.f32 %v1226_v20, %v678_v9  ;;  %v1627_v56 = vadd.f32 %v1309_v16, %v761_v30  ;;  %v8046_v60 = vpop.f32.mrf.mxu0  ;;  %v8048_v62 = vpop.f32.mrf.mxu1  ;;  %v764_v9 = vadd.f32 %v7601_v19, %v7111_v34 }
 0x207   :  { %1553 = vmatpush.msrb.mxu2 %v6035_v5 }
 0x208   :  { %v1748_v26 = vadd.f32 %v8009_v54, %v1626_v61  ;;  %v1749_v46 = vadd.f32 %v8011_v14, %v1627_v56 }
 0x209   :  { %6005 = vmatmul.msk.f32.gmra.mxu0 %vm172_vm0, %v6510_v10  ;;  %6027 = vmatmul.msk.f32.gmra.mxu1 %vm172_vm0, %v6510_v10 }
 0x20a   :  { %vm1858_vm3 = vcmp.gt.f32.partialorder %v1748_v26, 0.0  ;;  %v1969_v56 = vmul.f32 %v8023_v21, %v1748_v26  ;;  %vm1859_vm4 = vcmp.gt.f32.partialorder %v1749_v46, 0.0  ;;  %v1970_v61 = vmul.f32 %v8023_v21, %v1749_v46  ;;  %6094 = vmatmul.msk.f32.gmra.mxu2 %vm172_vm0, %v1090_v28  ;;  %6116 = vmatmul.msk.f32.gmra.mxu3 %vm172_vm0, %v1090_v28  ;;  %v1091_v28 = vld [vmem:[%s12043_s0 + $0xa8] sm:$0xff] }
 0x20c   :  { %v2079_v30 = vsel %vm1858_vm3, %v1748_v26, %v1969_v56  ;;  %v2080_v17 = vsel %vm1859_vm4, %v1749_v46, %v1970_v61  ;;  %v684_v46 = vadd.f32 %v7607_v58, %v7139_v42  ;;  %v6512_v58 = vld [vmem:[%s12043_s0 + $0xa0] sm:$0xff] }
 0x20d   :  { %2190 = vst [vmem:[#allocation2 + $0x28] sm:$0xff] %v2079_v30  ;;  %v1229_v3 = vpop.f32.mrf.mxu2  ;;  %v1312_v20 = vpop.f32.mrf.mxu3 }
 0x20e   :  { %2191 = vst [vmem:[#allocation2 + $0x30] sm:$0xff] %v2080_v17  ;;  %v1631_v16 = vadd.f32 %v1229_v3, %v681_v12  ;;  %v1632_v27 = vadd.f32 %v1312_v20, %v764_v9  ;;  %v8080_v25 = vpop.f32.mrf.mxu0  ;;  %v8082_v10 = vpop.f32.mrf.mxu1  ;;  %v1092_v20 = vld [vmem:[%s12043_s0 + $0xb0] sm:$0xff] }
 0x210   :  { %v1753_v33 = vadd.f32 %v8009_v54, %v1631_v16  ;;  %v1754_v34 = vadd.f32 %v8011_v14, %v1632_v27  ;;  %v687_v27 = vadd.f32 %v7623_v32, %v7163_v51 }
 0x211   :  { %6006 = vmatmul.msk.f32.gmra.mxu0 %vm172_vm0, %v6511_v4  ;;  %6028 = vmatmul.msk.f32.gmra.mxu1 %vm172_vm0, %v6511_v4 }
 0x212   :  { %vm1863_vm5 = vcmp.gt.f32.partialorder %v1753_v33, 0.0  ;;  %v1974_v19 = vmul.f32 %v8023_v21, %v1753_v33  ;;  %vm1864_vm6 = vcmp.gt.f32.partialorder %v1754_v34, 0.0  ;;  %v1975_v26 = vmul.f32 %v8023_v21, %v1754_v34  ;;  %6095 = vmatmul.msk.f32.gmra.mxu2 %vm172_vm0, %v1091_v28  ;;  %6117 = vmatmul.msk.f32.gmra.mxu3 %vm172_vm0, %v1091_v28 }
 0x213   :  { %v770_v28 = vadd.f32 %v7636_v35, %v7165_v52  ;;  %v6513_v52 = vld [vmem:[%s12043_s0 + $0xa8] sm:$0xff] }
 0x214   :  { %v2084_v5 = vsel %vm1863_vm5, %v1753_v33, %v1974_v19  ;;  %v2085_v56 = vsel %vm1864_vm6, %v1754_v34, %v1975_v26 }
 0x215   :  { %2195 = vst [vmem:[#allocation2 + $0x50] sm:$0xff] %v2084_v5  ;;  %v1232_v61 = vpop.f32.mrf.mxu2  ;;  %v1315_v12 = vpop.f32.mrf.mxu3 }
 0x216   :  { %2196 = vst [vmem:[#allocation2 + $0x58] sm:$0xff] %v2085_v56  ;;  %v1636_v9 = vadd.f32 %v1232_v61, %v684_v46  ;;  %v1637_v30 = vadd.f32 %v1315_v12, %v767_v63  ;;  %v8102_v17 = vpop.f32.mrf.mxu0  ;;  %v8104_v3 = vpop.f32.mrf.mxu1 }
 0x218   :  { %v1758_v42 = vadd.f32 %v8009_v54, %v1636_v9  ;;  %v1759_v43 = vadd.f32 %v8011_v14, %v1637_v30  ;;  %v1093_v9 = vld [vmem:[%s12043_s0 + $0xb8] sm:$0xff] }
 0x219   :  { %6007 = vmatmul.msk.f32.gmra.mxu0 %vm172_vm0, %v6512_v58  ;;  %6029 = vmatmul.msk.f32.gmra.mxu1 %vm172_vm0, %v6512_v58 }
 0x21a   :  { %vm1868_vm7 = vcmp.gt.f32.partialorder %v1758_v42, 0.0  ;;  %v1979_v29 = vmul.f32 %v8023_v21, %v1758_v42  ;;  %vm1869_vm8 = vcmp.gt.f32.partialorder %v1759_v43, 0.0  ;;  %v1980_v16 = vmul.f32 %v8023_v21, %v1759_v43  ;;  %6096 = vmatmul.msk.f32.gmra.mxu2 %vm172_vm0, %v1092_v20  ;;  %6118 = vmatmul.msk.f32.gmra.mxu3 %vm172_vm0, %v1092_v20 }
 0x21b   :  { %v690_v20 = vadd.f32 %v7642_v41, %v7193_v0 }
 0x21c   :  { %v2089_v33 = vsel %vm1868_vm7, %v1758_v42, %v1979_v29  ;;  %v2090_v34 = vsel %vm1869_vm8, %v1759_v43, %v1980_v16  ;;  %v773_v42 = vadd.f32 %v7655_v45, %v7195_v1  ;;  %v6514_v1 = vld [vmem:[%s12043_s0 + $0x10] sm:$0xff] }
 0x21d   :  { %v1235_v4 = vpop.f32.mrf.mxu2  ;;  %v1318_v19 = vpop.f32.mrf.mxu3  ;;  %v2449_v26 = vmax.f32 %v2085_v56, %v2090_v34  ;;  %v2448_v30 = vmax.f32 %v2084_v5, %v2089_v33  ;;  %v693_v33 = vadd.f32 %v7661_v55, %v7214_v7  ;;  %v6515_v55 = vld [vmem:[%s12043_s0 + $0x18] sm:$0xff] }
 0x21e   :  { %v1641_v46 = vadd.f32 %v1235_v4, %v687_v27  ;;  %v1642_v63 = vadd.f32 %v1318_v19, %v770_v28  ;;  %v8124_v61 = vpop.f32.mrf.mxu0  ;;  %v8126_v12 = vpop.f32.mrf.mxu1 }
 0x220   :  { %v1763_v51 = vadd.f32 %v8009_v54, %v1641_v46  ;;  %v1764_v32 = vadd.f32 %v8011_v14, %v1642_v63 }
 0x221   :  { %6008 = vmatmul.msk.f32.gmra.mxu0 %vm172_vm0, %v6513_v52  ;;  %6030 = vmatmul.msk.f32.gmra.mxu1 %vm172_vm0, %v6513_v52 }
 0x222   :  { %vm1873_vm9 = vcmp.gt.f32.partialorder %v1763_v51, 0.0  ;;  %v1984_v35 = vmul.f32 %v8023_v21, %v1763_v51  ;;  %vm1874_vm10 = vcmp.gt.f32.partialorder %v1764_v32, 0.0  ;;  %v1985_v56 = vmul.f32 %v8023_v21, %v1764_v32  ;;  %6097 = vmatmul.msk.f32.gmra.mxu2 %vm172_vm0, %v1093_v9  ;;  %6119 = vmatmul.msk.f32.gmra.mxu3 %vm172_vm0, %v1093_v9 }
 0x224   :  { %v2094_v43 = vsel %vm1873_vm9, %v1763_v51, %v1984_v35  ;;  %v2095_v58 = vsel %vm1874_vm10, %v1764_v32, %v1985_v56 }
 0x225   :  { %v1238_v29 = vpop.f32.mrf.mxu2  ;;  %v1321_v16 = vpop.f32.mrf.mxu3  ;;  %v8146_v27 = vmax.f32 %v2449_v26, %v2095_v58  ;;  %v8148_v28 = vmax.f32 %v2448_v30, %v2094_v43  ;;  %v776_v26 = vadd.f32 %v7674_v2, %v7216_v8 }
 0x226   :  { %v1646_v34 = vadd.f32 %v1238_v29, %v690_v20  ;;  %v1647_v4 = vadd.f32 %v1321_v16, %v773_v42  ;;  %v8150_v19 = vpop.f32.mrf.mxu0  ;;  %v8152_v46 = vpop.f32.mrf.mxu1  ;;  %v779_v16 = vadd.f32 %v7693_v53, %v7240_v22 }
 0x227   :  { %12217 = vst [vmem:[#allocation136_spill] sm:$0xff] %v8146_v27  ;;  %2494 = vrot.lane.b32.xlu2 %v8146_v27, %s6568_s20  ;;  %2492 = vrot.lane.b32.xlu1 %v8148_v28, %s6568_s20 }
 0x228   :  { %v1768_v41 = vadd.f32 %v8009_v54, %v1646_v34  ;;  %v1769_v0 = vadd.f32 %v8011_v14, %v1647_v4  ;;  %2468 = vrot.lane.b32.xlu0 %v8148_v28, %s6569_s21 }
 0x229   :  { %6120 = vmatmul.msk.f32.vlgmr.msrb.gmra.mxu0 %vm172_vm0, %v6514_v1  ;;  %6142 = vmatmul.msk.f32.vlgmr.msrb.gmra.mxu1 %vm172_vm0, %v6514_v1 }
 0x22a   :  { %vm1878_vm11 = vcmp.gt.f32.partialorder %v1768_v41, 0.0  ;;  %v1989_v45 = vmul.f32 %v8023_v21, %v1768_v41  ;;  %vm1879_vm12 = vcmp.gt.f32.partialorder %v1769_v0, 0.0  ;;  %v1990_v5 = vmul.f32 %v8023_v21, %v1769_v0  ;;  %6164 = vmatmul.msk.f32.vlgmr.msrb.gmra.mxu2 %vm172_vm0, %v6514_v1 }
 0x22c   :  { %v2099_v63 = vsel %vm1878_vm11, %v1768_v41, %v1989_v45  ;;  %v2100_v9 = vsel %vm1879_vm12, %v1769_v0, %v1990_v5 }
 0x22d   :  { %v1241_v51 = vpop.f32.mrf.mxu2  ;;  %v1324_v32 = vpop.f32.mrf.mxu3  ;;  %v2578_v52 = vmax.f32 %v2095_v58, %v2100_v9  ;;  %v2577_v2 = vmax.f32 %v2094_v43, %v2099_v63  ;;  %v696_v58 = vadd.f32 %v7680_v47, %v7238_v18  ;;  %v6516_v47 = vld [vmem:[%s12043_s0 + $0x20] sm:$0xff]  ;;  %v699_v63 = vadd.f32 %v7699_v24, %v7263_v39 }
 0x22e   :  { %v1651_v35 = vadd.f32 %v1241_v51, %v693_v33  ;;  %v1652_v56 = vadd.f32 %v1324_v32, %v776_v26  ;;  %v8174_v30 = vpop.f32.mrf.mxu0  ;;  %v8176_v20 = vpop.f32.mrf.mxu1  ;;  %v782_v51 = vadd.f32 %v7709_v36, %v7265_v49  ;;  %v6517_v49 = vld [vmem:[%s12043_s0 + $0x28] sm:$0xff] }
 0x230   :  { %v1773_v42 = vadd.f32 %v8009_v54, %v1651_v35  ;;  %v1774_v29 = vadd.f32 %v8011_v14, %v1652_v56  ;;  %2470 = vrot.lane.b32.xlu0 %v8146_v27, %s6569_s21 }
 0x231   :  { %6121 = vmatmul.msk.f32.gmra.mxu0 %vm172_vm0, %v6515_v55  ;;  %6143 = vmatmul.msk.f32.gmra.mxu1 %vm172_vm0, %v6515_v55 }
 0x232   :  { %vm1883_vm13 = vcmp.gt.f32.partialorder %v1773_v42, 0.0  ;;  %v1994_v7 = vmul.f32 %v8023_v21, %v1773_v42  ;;  %vm1884_vm14 = vcmp.gt.f32.partialorder %v1774_v29, 0.0  ;;  %v1995_v8 = vmul.f32 %v8023_v21, %v1774_v29  ;;  %6165 = vmatmul.msk.f32.gmra.mxu2 %vm172_vm0, %v6515_v55 }
 0x234   :  { %v2104_v34 = vsel %vm1883_vm13, %v1773_v42, %v1994_v7  ;;  %v2105_v4 = vsel %vm1884_vm14, %v1774_v29, %v1995_v8 }
 0x235   :  { %v1244_v41 = vpop.f32.mrf.mxu2  ;;  %v1327_v0 = vpop.f32.mrf.mxu3  ;;  %v8194_v1 = vmax.f32 %v2578_v52, %v2105_v4  ;;  %v8196_v45 = vmax.f32 %v2577_v2, %v2104_v34 }
 0x236   :  { %v1656_v5 = vadd.f32 %v1244_v41, %v696_v58  ;;  %v1657_v33 = vadd.f32 %v1327_v0, %v779_v16  ;;  %v8198_v26 = vpop.f32.mrf.mxu0  ;;  %v8200_v9 = vpop.f32.mrf.mxu1  ;;  %v702_v16 = vadd.f32 %v7715_v40, %v7282_v13  ;;  %v6518_v40 = vld [vmem:[%s12043_s0 + $0x30] sm:$0xff] }
 0x237   :  { %12218 = vst [vmem:[#allocation137_spill] sm:$0xff] %v8194_v1  ;;  %2599 = vrot.lane.b32.xlu1 %v8194_v1, %s6569_s21 }
 0x238   :  { %v1778_v18 = vadd.f32 %v8009_v54, %v1656_v5  ;;  %v1779_v22 = vadd.f32 %v8011_v14, %v1657_v33  ;;  %2597 = vrot.lane.b32.xlu0 %v8196_v45, %s6569_s21 }
 0x239   :  { %6122 = vmatmul.msk.f32.gmra.mxu0 %vm172_vm0, %v6516_v47  ;;  %6144 = vmatmul.msk.f32.gmra.mxu1 %vm172_vm0, %v6516_v47 }
 0x23a   :  { %vm1888_vm15 = vcmp.gt.f32.partialorder %v1778_v18, 0.0  ;;  %v1999_v53 = vmul.f32 %v8023_v21, %v1778_v18  ;;  %vm1889_vm1 = vcmp.gt.f32.partialorder %v1779_v22, 0.0  ;;  %v2000_v43 = vmul.f32 %v8023_v21, %v1779_v22  ;;  %6166 = vmatmul.msk.f32.gmra.mxu2 %vm172_vm0, %v6516_v47 }
 0x23c   :  { %v2109_v32 = vsel %vm1888_vm15, %v1778_v18, %v1999_v53  ;;  %v2110_v52 = vsel %vm1889_vm1, %v1779_v22, %v2000_v43 }
 0x23d   :  { %v1247_v35 = vpop.f32.mrf.mxu2  ;;  %v1330_v56 = vpop.f32.mrf.mxu3  ;;  %v2707_v42 = vmax.f32 %v2105_v4, %v2110_v52  ;;  %v2706_v58 = vmax.f32 %v2104_v34, %v2109_v32  ;;  %v785_v4 = vadd.f32 %v7728_v44, %v7284_v23  ;;  %v788_v32 = vadd.f32 %v7750_v11, %v7309_v37  ;;  %v6519_v37 = vld [vmem:[%s12043_s0 + $0x38] sm:$0xff] }
 0x23e   :  { %v1661_v29 = vadd.f32 %v1247_v35, %v699_v63  ;;  %v1662_v55 = vadd.f32 %v1330_v56, %v782_v51  ;;  %v8220_v7 = vpop.f32.mrf.mxu0  ;;  %v8222_v8 = vpop.f32.mrf.mxu1  ;;  %v705_v51 = vadd.f32 %v7734_v57, %v7307_v38 }
 0x23f   :  { %2623 = vrot.lane.b32.xlu1 %v8194_v1, %s6568_s20 }
 0x240   :  { %v1783_v2 = vadd.f32 %v8009_v54, %v1661_v29  ;;  %v1784_v39 = vadd.f32 %v8011_v14, %v1662_v55  ;;  %2621 = vrot.lane.b32.xlu0 %v8196_v45, %s6568_s20 }
 0x241   :  { %6123 = vmatmul.msk.f32.gmra.mxu0 %vm172_vm0, %v6517_v49  ;;  %6145 = vmatmul.msk.f32.gmra.mxu1 %vm172_vm0, %v6517_v49 }
 0x242   :  { %vm1893_vm2 = vcmp.gt.f32.partialorder %v1783_v2, 0.0  ;;  %v2004_v24 = vmul.f32 %v8023_v21, %v1783_v2  ;;  %vm1894_vm3 = vcmp.gt.f32.partialorder %v1784_v39, 0.0  ;;  %v2005_v36 = vmul.f32 %v8023_v21, %v1784_v39  ;;  %6167 = vmatmul.msk.f32.gmra.mxu2 %vm172_vm0, %v6517_v49 }
 0x244   :  { %v2114_v41 = vsel %vm1893_vm2, %v1783_v2, %v2004_v24  ;;  %v2115_v0 = vsel %vm1894_vm3, %v1784_v39, %v2005_v36 }
 0x245   :  { %v1250_v5 = vpop.f32.mrf.mxu2  ;;  %v1333_v33 = vpop.f32.mrf.mxu3  ;;  %v8242_v18 = vmax.f32 %v2707_v42, %v2115_v0  ;;  %v8244_v22 = vmax.f32 %v2706_v58, %v2114_v41  ;;  %v708_v58 = vadd.f32 %v7756_v6, %v7323_v15  ;;  %v6520_v6 = vld [vmem:[%s12043_s0 + $0x40] sm:$0xff] }
 0x246   :  { %v1666_v47 = vadd.f32 %v1250_v5, %v702_v16  ;;  %v1667_v53 = vadd.f32 %v1333_v33, %v785_v4  ;;  %v8246_v43 = vpop.f32.mrf.mxu0  ;;  %v8248_v63 = vpop.f32.mrf.mxu1  ;;  %v791_v16 = vadd.f32 %v7769_v50, %v7325_v59 }
 0x247   :  { %12219 = vst [vmem:[#allocation138_spill] sm:$0xff] %v8242_v18  ;;  %2728 = vrot.lane.b32.xlu1 %v8242_v18, %s6569_s21 }
 0x248   :  { %v1788_v13 = vadd.f32 %v8009_v54, %v1666_v47  ;;  %v1789_v23 = vadd.f32 %v8011_v14, %v1667_v53  ;;  %2726 = vrot.lane.b32.xlu0 %v8244_v22, %s6569_s21 }
 0x249   :  { %6124 = vmatmul.msk.f32.gmra.mxu0 %vm172_vm0, %v6518_v40  ;;  %6146 = vmatmul.msk.f32.gmra.mxu1 %vm172_vm0, %v6518_v40 }
 0x24a   :  { %vm1898_vm4 = vcmp.gt.f32.partialorder %v1788_v13, 0.0  ;;  %v2009_v44 = vmul.f32 %v8023_v21, %v1788_v13  ;;  %vm1899_vm5 = vcmp.gt.f32.partialorder %v1789_v23, 0.0  ;;  %v2010_v34 = vmul.f32 %v8023_v21, %v1789_v23  ;;  %6168 = vmatmul.msk.f32.gmra.mxu2 %vm172_vm0, %v6518_v40 }
 0x24c   :  { %v2119_v52 = vsel %vm1898_vm4, %v1788_v13, %v2009_v44  ;;  %v2120_v35 = vsel %vm1899_vm5, %v1789_v23, %v2010_v34  ;;  %v12221_v34 = vld [vmem:[#allocation33_spill] sm:$0xff] }
 0x24d   :  { %v1253_v56 = vpop.f32.mrf.mxu2  ;;  %v1336_v42 = vpop.f32.mrf.mxu3  ;;  %v2836_v29 = vmax.f32 %v2115_v0, %v2120_v35  ;;  %v2835_v36 = vmax.f32 %v2114_v41, %v2119_v52  ;;  %v12223_v52 = vld [vmem:[#allocation34_spill] sm:$0xff] }
 0x24e   :  { %v1671_v55 = vadd.f32 %v1253_v56, %v705_v51  ;;  %v1672_v2 = vadd.f32 %v1336_v42, %v788_v32  ;;  %v8268_v39 = vpop.f32.mrf.mxu0  ;;  %v8270_v49 = vpop.f32.mrf.mxu1  ;;  %v12222_v51 = vld [vmem:[#allocation94_spill] sm:$0xff]  ;;  %v794_v35 = vadd.f32 %v7791_v31, %v12223_v52  ;;  %v6521_v31 = vld [vmem:[%s12043_s0 + $0x48] sm:$0xff] }
 0x24f   :  { %2752 = vrot.lane.b32.xlu1 %v8242_v18, %s6568_s20  ;;  %v711_v32 = vadd.f32 %v12222_v51, %v12221_v34 }
 0x250   :  { %v1793_v24 = vadd.f32 %v8009_v54, %v1671_v55  ;;  %v1794_v57 = vadd.f32 %v8011_v14, %v1672_v2  ;;  %2750 = vrot.lane.b32.xlu0 %v8244_v22, %s6568_s20 }
 0x251   :  { %6125 = vmatmul.msk.f32.gmra.mxu0 %vm172_vm0, %v6519_v37  ;;  %6147 = vmatmul.msk.f32.gmra.mxu1 %vm172_vm0, %v6519_v37 }
 0x252   :  { %vm1903_vm6 = vcmp.gt.f32.partialorder %v1793_v24, 0.0  ;;  %v2014_v38 = vmul.f32 %v8023_v21, %v1793_v24  ;;  %vm1904_vm7 = vcmp.gt.f32.partialorder %v1794_v57, 0.0  ;;  %v2015_v11 = vmul.f32 %v8023_v21, %v1794_v57  ;;  %6169 = vmatmul.msk.f32.gmra.mxu2 %vm172_vm0, %v6519_v37 }
 0x254   :  { %v2124_v4 = vsel %vm1903_vm6, %v1793_v24, %v2014_v38  ;;  %v2125_v0 = vsel %vm1904_vm7, %v1794_v57, %v2015_v11 }
 0x255   :  { %v1256_v5 = vpop.f32.mrf.mxu2  ;;  %v1339_v33 = vpop.f32.mrf.mxu3  ;;  %v8290_v47 = vmax.f32 %v2836_v29, %v2125_v0  ;;  %v8292_v53 = vmax.f32 %v2835_v36, %v2124_v4 }
 0x256   :  { %v1676_v13 = vadd.f32 %v1256_v5, %v708_v58  ;;  %v1677_v23 = vadd.f32 %v1339_v33, %v791_v16  ;;  %v8294_v40 = vpop.f32.mrf.mxu0  ;;  %v8296_v44 = vpop.f32.mrf.mxu1  ;;  %v12224_v5 = vld [vmem:[#allocation37_spill] sm:$0xff] }
 0x257   :  { %12220 = vst [vmem:[#allocation139_spill] sm:$0xff] %v8290_v47  ;;  %2857 = vrot.lane.b32.xlu1 %v8290_v47, %s6569_s21  ;;  %v12225_v33 = vld [vmem:[#allocation97_spill] sm:$0xff] }
 0x258   :  { %v1798_v15 = vadd.f32 %v8009_v54, %v1676_v13  ;;  %v1799_v59 = vadd.f32 %v8011_v14, %v1677_v23  ;;  %2855 = vrot.lane.b32.xlu0 %v8292_v53, %s6569_s21  ;;  %v714_v13 = vadd.f32 %v12225_v33, %v12224_v5  ;;  %v12226_v23 = vld [vmem:[#allocation38_spill] sm:$0xff] }
 0x259   :  { %6126 = vmatmul.msk.f32.gmra.mxu0 %vm172_vm0, %v6520_v6  ;;  %6148 = vmatmul.msk.f32.gmra.mxu1 %vm172_vm0, %v6520_v6 }
 0x25a   :  { %vm1908_vm8 = vcmp.gt.f32.partialorder %v1798_v15, 0.0  ;;  %v2019_v50 = vmul.f32 %v8023_v21, %v1798_v15  ;;  %vm1909_vm9 = vcmp.gt.f32.partialorder %v1799_v59, 0.0  ;;  %v2020_v41 = vmul.f32 %v8023_v21, %v1799_v59  ;;  %6170 = vmatmul.msk.f32.gmra.mxu2 %vm172_vm0, %v6520_v6 }
 0x25c   :  { %v2129_v56 = vsel %vm1908_vm8, %v1798_v15, %v2019_v50  ;;  %v2130_v42 = vsel %vm1909_vm9, %v1799_v59, %v2020_v41  ;;  %v12227_v15 = vld [vmem:[#allocation98_spill] sm:$0xff] }
 0x25d   :  { %v1259_v29 = vpop.f32.mrf.mxu2  ;;  %v1342_v55 = vpop.f32.mrf.mxu3  ;;  %v2965_v2 = vmax.f32 %v2125_v0, %v2130_v42  ;;  %v2964_v0 = vmax.f32 %v2124_v4, %v2129_v56  ;;  %v797_v59 = vadd.f32 %v12227_v15, %v12226_v23 }
 0x25e   :  { %v1681_v24 = vadd.f32 %v1259_v29, %v711_v32  ;;  %v1682_v57 = vadd.f32 %v1342_v55, %v794_v35  ;;  %v8316_v37 = vpop.f32.mrf.mxu0  ;;  %v8318_v38 = vpop.f32.mrf.mxu1  ;;  %v12229_v55 = vld [vmem:[#allocation102_spill] sm:$0xff] }
 0x25f   :  { %2881 = vrot.lane.b32.xlu1 %v8290_v47, %s6568_s20 }
 0x260   :  { %v1803_v11 = vadd.f32 %v8009_v54, %v1681_v24  ;;  %v1804_v36 = vadd.f32 %v8011_v14, %v1682_v57  ;;  %2879 = vrot.lane.b32.xlu0 %v8292_v53, %s6568_s20  ;;  %v12230_v57 = vld [vmem:[#allocation41_spill] sm:$0xff] }
 0x261   :  { %6127 = vmatmul.msk.f32.gmra.mxu0 %vm172_vm0, %v6521_v31  ;;  %6149 = vmatmul.msk.f32.gmra.mxu1 %vm172_vm0, %v6521_v31 }
 0x262   :  { %vm1913_vm10 = vcmp.gt.f32.partialorder %v1803_v11, 0.0  ;;  %v2024_v58 = vmul.f32 %v8023_v21, %v1803_v11  ;;  %vm1914_vm11 = vcmp.gt.f32.partialorder %v1804_v36, 0.0  ;;  %v2025_v16 = vmul.f32 %v8023_v21, %v1804_v36  ;;  %6171 = vmatmul.msk.f32.gmra.mxu2 %vm172_vm0, %v6521_v31  ;;  %v12232_v31 = vld [vmem:[#allocation42_spill] sm:$0xff] }
 0x264   :  { %v2134_v6 = vsel %vm1913_vm10, %v1803_v11, %v2024_v58  ;;  %v2135_v50 = vsel %vm1914_vm11, %v1804_v36, %v2025_v16  ;;  %v12231_v11 = vld [vmem:[#allocation101_spill] sm:$0xff]  ;;  %v800_v58 = vadd.f32 %v7831_v48, %v12232_v31  ;;  %v12233_v48 = vld [vmem:[#allocation106_spill] sm:$0xff]  ;;  %vm2335_vm11 = vcmask 818176  }
 0x265   :  { %v1262_v41 = vpop.f32.mrf.mxu2  ;;  %v1345_v34 = vpop.f32.mrf.mxu3  ;;  %v8338_v51 = vmax.f32 %v2965_v2, %v2135_v50  ;;  %v8340_v32 = vmax.f32 %v2964_v0, %v2134_v6  ;;  %v717_v36 = vadd.f32 %v12231_v11, %v12230_v57  ;;  %v12237_v57 = vld [vmem:[#allocation107_spill] sm:$0xff] }
 0x266   :  { %v1686_v52 = vadd.f32 %v1262_v41, %v714_v13  ;;  %v1687_v35 = vadd.f32 %v1345_v34, %v797_v59  ;;  %v8342_v42 = vpop.f32.mrf.mxu0  ;;  %v8344_v29 = vpop.f32.mrf.mxu1 }
 0x267   :  { %12228 = vst [vmem:[#allocation33_spill] sm:$0xff] %v8338_v51  ;;  %2986 = vrot.lane.b32.xlu1 %v8338_v51, %s6569_s21 }
 0x268   :  { %v1808_v4 = vadd.f32 %v8009_v54, %v1686_v52  ;;  %v1809_v56 = vadd.f32 %v8011_v14, %v1687_v35  ;;  %2984 = vrot.lane.b32.xlu0 %v8340_v32, %s6569_s21 }
 0x269   :  { %6128 = vmatmul.msk.f32.gmra.mxu0 %vm172_vm0, %v12229_v55  ;;  %6150 = vmatmul.msk.f32.gmra.mxu1 %vm172_vm0, %v12229_v55 }
 0x26a   :  { %vm1918_vm12 = vcmp.gt.f32.partialorder %v1808_v4, 0.0  ;;  %v2029_v2 = vmul.f32 %v8023_v21, %v1808_v4  ;;  %vm1919_vm13 = vcmp.gt.f32.partialorder %v1809_v56, 0.0  ;;  %v2030_v24 = vmul.f32 %v8023_v21, %v1809_v56  ;;  %6172 = vmatmul.msk.f32.gmra.mxu2 %vm172_vm0, %v12229_v55  ;;  %v12235_v55 = vld [vmem:[#allocation105_spill] sm:$0xff] }
 0x26c   :  { %v2139_v16 = vsel %vm1918_vm12, %v1808_v4, %v2029_v2  ;;  %v2140_v0 = vsel %vm1919_vm13, %v1809_v56, %v2030_v24  ;;  %v12234_v56 = vld [vmem:[#allocation45_spill] sm:$0xff]  ;;  %v12236_v24 = vld [vmem:[#allocation46_spill] sm:$0xff] }
 0x26d   :  { %v1265_v5 = vpop.f32.mrf.mxu2  ;;  %v1348_v33 = vpop.f32.mrf.mxu3  ;;  %v3094_v13 = vmax.f32 %v2135_v50, %v2140_v0  ;;  %v3093_v4 = vmax.f32 %v2134_v6, %v2139_v16  ;;  %v720_v2 = vadd.f32 %v12235_v55, %v12234_v56  ;;  %v803_v11 = vadd.f32 %v12237_v57, %v12236_v24  ;;  %v12243_v56 = vld [vmem:[#allocation50_spill] sm:$0xff]  ;;  %v12244_v55 = vld [vmem:[#allocation112_spill] sm:$0xff] }
 0x26e   :  { %v1691_v23 = vadd.f32 %v1265_v5, %v717_v36  ;;  %v1692_v15 = vadd.f32 %v1348_v33, %v800_v58  ;;  %v8364_v59 = vpop.f32.mrf.mxu0  ;;  %v8366_v41 = vpop.f32.mrf.mxu1 }
 0x26f   :  { %3010 = vrot.lane.b32.xlu1 %v8338_v51, %s6568_s20 }
 0x270   :  { %v1813_v34 = vadd.f32 %v8009_v54, %v1691_v23  ;;  %v1814_v52 = vadd.f32 %v8011_v14, %v1692_v15  ;;  %3008 = vrot.lane.b32.xlu0 %v8340_v32, %s6568_s20 }
 0x271   :  { %6129 = vmatmul.msk.f32.gmra.mxu0 %vm172_vm0, %v12233_v48  ;;  %6151 = vmatmul.msk.f32.gmra.mxu1 %vm172_vm0, %v12233_v48 }
 0x272   :  { %vm1923_vm14 = vcmp.gt.f32.partialorder %v1813_v34, 0.0  ;;  %v2034_v50 = vmul.f32 %v8023_v21, %v1813_v34  ;;  %vm1924_vm15 = vcmp.gt.f32.partialorder %v1814_v52, 0.0  ;;  %v2035_v35 = vmul.f32 %v8023_v21, %v1814_v52  ;;  %6173 = vmatmul.msk.f32.gmra.mxu2 %vm172_vm0, %v12233_v48 }
 0x274   :  { %v2144_v36 = vsel %vm1923_vm14, %v1813_v34, %v2034_v50  ;;  %v2145_v31 = vsel %vm1924_vm15, %v1814_v52, %v2035_v35  ;;  %v12241_v50 = vld [vmem:[#allocation49_spill] sm:$0xff]  ;;  %v12242_v35 = vld [vmem:[#allocation110_spill] sm:$0xff]  ;;  %vm2374_vm14 = vcmask 228352  }
 0x275   :  { %v1268_v58 = vpop.f32.mrf.mxu2  ;;  %v1351_v0 = vpop.f32.mrf.mxu3  ;;  %v8386_v5 = vmax.f32 %v3094_v13, %v2145_v31  ;;  %v8388_v33 = vmax.f32 %v3093_v4, %v2144_v36  ;;  %v12240_v13 = vld [vmem:[#allocation111_spill] sm:$0xff]  ;;  %v723_v4 = vadd.f32 %v12242_v35, %v12241_v50 }
 0x276   :  { %v1696_v23 = vadd.f32 %v1268_v58, %v720_v2  ;;  %v1697_v15 = vadd.f32 %v1351_v0, %v803_v11  ;;  %v8390_v51 = vpop.f32.mrf.mxu0  ;;  %v8392_v48 = vpop.f32.mrf.mxu1  ;;  %v806_v2 = vadd.f32 %v12244_v55, %v12243_v56  ;;  %v12249_v35 = vld [vmem:[#allocation115_spill] sm:$0xff]  ;;  %v12250_v56 = vld [vmem:[#allocation54_spill] sm:$0xff]  ;;  %v12251_v55 = vld [vmem:[#allocation117_spill] sm:$0xff] }
 0x277   :  { %12238 = vst [vmem:[#allocation94_spill] sm:$0xff] %v8386_v5  ;;  %3115 = vrot.lane.b32.xlu1 %v8386_v5, %s6569_s21 }
 0x278   :  { %12239 = vst [vmem:[#allocation34_spill] sm:$0xff] %v8392_v48  ;;  %v1818_v6 = vadd.f32 %v8009_v54, %v1696_v23  ;;  %v1819_v16 = vadd.f32 %v8011_v14, %v1697_v15  ;;  %3113 = vrot.lane.b32.xlu0 %v8388_v33, %s6569_s21 }
 0x279   :  { %6130 = vmatmul.msk.f32.gmra.mxu0 %vm172_vm0, %v12240_v13  ;;  %6152 = vmatmul.msk.f32.gmra.mxu1 %vm172_vm0, %v12240_v13 }
 0x27a   :  { %vm1928_vm1 = vcmp.gt.f32.partialorder %v1818_v6, 0.0  ;;  %v2039_v34 = vmul.f32 %v8023_v21, %v1818_v6  ;;  %vm1929_vm2 = vcmp.gt.f32.partialorder %v1819_v16, 0.0  ;;  %v2040_v52 = vmul.f32 %v8023_v21, %v1819_v16  ;;  %6174 = vmatmul.msk.f32.gmra.mxu2 %vm172_vm0, %v12240_v13 }
 0x27c   :  { %v2149_v24 = vsel %vm1928_vm1, %v1818_v6, %v2039_v34  ;;  %v2150_v57 = vsel %vm1929_vm2, %v1819_v16, %v2040_v52  ;;  %v12247_v6 = vld [vmem:[#allocation116_spill] sm:$0xff]  ;;  %v12248_v52 = vld [vmem:[#allocation53_spill] sm:$0xff] }
 0x27d   :  { %v1271_v11 = vpop.f32.mrf.mxu2  ;;  %v1354_v58 = vpop.f32.mrf.mxu3  ;;  %v3223_v0 = vmax.f32 %v2145_v31, %v2150_v57  ;;  %v3222_v34 = vmax.f32 %v2144_v36, %v2149_v24 }
 0x27e   :  { %v1701_v23 = vadd.f32 %v1271_v11, %v723_v4  ;;  %v1702_v15 = vadd.f32 %v1354_v58, %v806_v2  ;;  %v8412_v47 = vpop.f32.mrf.mxu0  ;;  %v8414_v18 = vpop.f32.mrf.mxu1  ;;  %v726_v4 = vadd.f32 %v12249_v35, %v12248_v52  ;;  %v809_v2 = vadd.f32 %v12251_v55, %v12250_v56 }
 0x27f   :  { %12245 = vst [vmem:[#allocation37_spill] sm:$0xff] %v8412_v47  ;;  %3139 = vrot.lane.b32.xlu1 %v8386_v5, %s6568_s20 }
 0x280   :  { %12246 = vst [vmem:[#allocation97_spill] sm:$0xff] %v8414_v18  ;;  %v1823_v13 = vadd.f32 %v8009_v54, %v1701_v23  ;;  %v1824_v50 = vadd.f32 %v8011_v14, %v1702_v15  ;;  %3137 = vrot.lane.b32.xlu0 %v8388_v33, %s6568_s20 }
 0x281   :  { %6131 = vmatmul.msk.f32.gmra.mxu0 %vm172_vm0, %v12247_v6  ;;  %6153 = vmatmul.msk.f32.gmra.mxu1 %vm172_vm0, %v12247_v6 }
 0x282   :  { %vm1933_vm3 = vcmp.gt.f32.partialorder %v1823_v13, 0.0  ;;  %v2044_v31 = vmul.f32 %v8023_v21, %v1823_v13  ;;  %vm1934_vm4 = vcmp.gt.f32.partialorder %v1824_v50, 0.0  ;;  %v2045_v16 = vmul.f32 %v8023_v21, %v1824_v50  ;;  %6175 = vmatmul.msk.f32.gmra.mxu2 %vm172_vm0, %v12247_v6 }
 0x284   :  { %v2154_v57 = vsel %vm1933_vm3, %v1823_v13, %v2044_v31  ;;  %v2155_v11 = vsel %vm1934_vm4, %v1824_v50, %v2045_v16  ;;  %v12255_v13 = vld [vmem:[#allocation121_spill] sm:$0xff]  ;;  %v12258_v16 = vld [vmem:[#allocation58_spill] sm:$0xff]  ;;  %vm2188_vm3 = vcmask 850944  }
 0x285   :  { %v1274_v58 = vpop.f32.mrf.mxu2  ;;  %v1357_v23 = vpop.f32.mrf.mxu3  ;;  %v8434_v15 = vmax.f32 %v3222_v34, %v2154_v57  ;;  %v8436_v5 = vmax.f32 %v3223_v0, %v2155_v11  ;;  %v12259_v34 = vld [vmem:[#allocation122_spill] sm:$0xff] }
 0x286   :  { %v1706_v1 = vadd.f32 %v1274_v58, %v726_v4  ;;  %v1707_v27 = vadd.f32 %v1357_v23, %v809_v2  ;;  %v8438_v18 = vpop.f32.mrf.mxu0  ;;  %v8440_v6 = vpop.f32.mrf.mxu1  ;;  %v812_v52 = vadd.f32 %v12259_v34, %v12258_v16  ;;  %v12264_v16 = vld [vmem:[#allocation62_spill] sm:$0xff] }
 0x287   :  { %12252 = vst [vmem:[#allocation38_spill] sm:$0xff] %v8436_v5  ;;  %3242 = vrot.lane.b32.xlu2 %v8434_v15, %s6569_s21  ;;  %v12265_v34 = vld [vmem:[#allocation126_spill] sm:$0xff] }
 0x288   :  { %12253 = vst [vmem:[#allocation98_spill] sm:$0xff] %v8438_v18  ;;  %v1828_v36 = vadd.f32 %v8009_v54, %v1706_v1  ;;  %v1829_v24 = vadd.f32 %v8011_v14, %v1707_v27  ;;  %3244 = vrot.lane.b32.xlu0 %v8436_v5, %s6569_s21  ;;  %v12256_v1 = vld [vmem:[#allocation57_spill] sm:$0xff]  ;;  %v12257_v27 = vld [vmem:[#allocation120_spill] sm:$0xff] }
 0x289   :  { %12254 = vst [vmem:[#allocation102_spill] sm:$0xff] %v8440_v6  ;;  %6132 = vmatmul.msk.f32.gmra.mxu0 %vm172_vm0, %v12255_v13  ;;  %6154 = vmatmul.msk.f32.gmra.mxu1 %vm172_vm0, %v12255_v13  ;;  %v729_v31 = vadd.f32 %v12257_v27, %v12256_v1  ;;  %v12263_v27 = vld [vmem:[#allocation125_spill] sm:$0xff] }
 0x28a   :  { %vm1938_vm5 = vcmp.gt.f32.partialorder %v1828_v36, 0.0  ;;  %v2049_v0 = vmul.f32 %v8023_v21, %v1828_v36  ;;  %vm1939_vm6 = vcmp.gt.f32.partialorder %v1829_v24, 0.0  ;;  %v2050_v50 = vmul.f32 %v8023_v21, %v1829_v24  ;;  %6176 = vmatmul.msk.f32.gmra.mxu2 %vm172_vm0, %v12255_v13 }
 0x28c   :  { %v2159_v35 = vsel %vm1938_vm5, %v1828_v36, %v2049_v0  ;;  %v2160_v4 = vsel %vm1939_vm6, %v1829_v24, %v2050_v50  ;;  %v12262_v50 = vld [vmem:[#allocation61_spill] sm:$0xff] }
 0x28d   :  { %v1277_v56 = vpop.f32.mrf.mxu2  ;;  %v1360_v55 = vpop.f32.mrf.mxu3  ;;  %v3352_v2 = vmax.f32 %v2155_v11, %v2160_v4  ;;  %v6522_v11 = vld [vmem:[%s12043_s0 + $0x78] sm:$0xff]  ;;  %v3351_v0 = vmax.f32 %v2154_v57, %v2159_v35 }
 0x28e   :  { %v1711_v58 = vadd.f32 %v1277_v56, %v729_v31  ;;  %v1712_v23 = vadd.f32 %v1360_v55, %v812_v52  ;;  %v8460_v6 = vpop.f32.mrf.mxu0  ;;  %v8462_v18 = vpop.f32.mrf.mxu1  ;;  %v732_v31 = vadd.f32 %v12263_v27, %v12262_v50  ;;  %v815_v52 = vadd.f32 %v12265_v34, %v12264_v16  ;;  %v12271_v50 = vld [vmem:[#allocation66_spill] sm:$0xff] }
 0x28f   :  { %12260 = vst [vmem:[#allocation41_spill] sm:$0xff] %v8460_v6  ;;  %3266 = vrot.lane.b32.xlu2 %v8434_v15, %s6568_s20  ;;  %v12272_v27 = vld [vmem:[#allocation130_spill] sm:$0xff] }
 0x290   :  { %12261 = vst [vmem:[#allocation101_spill] sm:$0xff] %v8462_v18  ;;  %v1833_v13 = vadd.f32 %v8009_v54, %v1711_v58  ;;  %v1834_v1 = vadd.f32 %v8011_v14, %v1712_v23  ;;  %3268 = vrot.lane.b32.xlu0 %v8436_v5, %s6568_s20 }
 0x291   :  { %6133 = vmatmul.msk.f32.gmra.mxu0 %vm172_vm0, %v6522_v11  ;;  %6155 = vmatmul.msk.f32.gmra.mxu1 %vm172_vm0, %v6522_v11 }
 0x292   :  { %vm1943_vm7 = vcmp.gt.f32.partialorder %v1833_v13, 0.0  ;;  %v2054_v36 = vmul.f32 %v8023_v21, %v1833_v13  ;;  %vm1944_vm8 = vcmp.gt.f32.partialorder %v1834_v1, 0.0  ;;  %v2055_v24 = vmul.f32 %v8023_v21, %v1834_v1  ;;  %6177 = vmatmul.msk.f32.gmra.mxu2 %vm172_vm0, %v6522_v11 }
 0x294   :  { %v2164_v4 = vsel %vm1943_vm7, %v1833_v13, %v2054_v36  ;;  %v2165_v56 = vsel %vm1944_vm8, %v1834_v1, %v2055_v24  ;;  %v6523_v13 = vld [vmem:[%s12043_s0 + $0x80] sm:$0xff] }
 0x295   :  { %2275 = vst [vmem:[#allocation2 + $0x2d0] sm:$0xff] %v2164_v4  ;;  %v1280_v55 = vpop.f32.mrf.mxu2  ;;  %v1363_v58 = vpop.f32.mrf.mxu3  ;;  %v8482_v23 = vmax.f32 %v3352_v2, %v2165_v56  ;;  %v8484_v5 = vmax.f32 %v3351_v0, %v2164_v4  ;;  %v12270_v0 = vld [vmem:[#allocation129_spill] sm:$0xff] }
 0x296   :  { %2276 = vst [vmem:[#allocation2 + $0x2d8] sm:$0xff] %v2165_v56  ;;  %v1716_v18 = vadd.f32 %v1280_v55, %v732_v31  ;;  %v1717_v6 = vadd.f32 %v1363_v58, %v815_v52  ;;  %v8486_v11 = vpop.f32.mrf.mxu0  ;;  %v8488_v57 = vpop.f32.mrf.mxu1  ;;  %v818_v31 = vadd.f32 %v12272_v27, %v12271_v50  ;;  %v12276_v50 = vld [vmem:[#allocation10_spill] sm:$0xff]  ;;  %v12277_v27 = vld [vmem:[#allocation132_spill] sm:$0xff] }
 0x297   :  { %12266 = vst [vmem:[#allocation42_spill] sm:$0xff] %v8482_v23  ;;  %3373 = vrot.lane.b32.xlu2 %v8482_v23, %s6569_s21  ;;  %3371 = vrot.lane.b32.xlu1 %v8484_v5, %s6569_s21 }
 0x298   :  { %12267 = vst [vmem:[#allocation106_spill] sm:$0xff] %v8486_v11  ;;  %v1838_v35 = vadd.f32 %v8009_v54, %v1716_v18  ;;  %v1839_v2 = vadd.f32 %v8011_v14, %v1717_v6  ;;  %v12269_v18 = vld [vmem:[#allocation65_spill] sm:$0xff] }
 0x299   :  { %12268 = vst [vmem:[#allocation45_spill] sm:$0xff] %v8488_v57  ;;  %6134 = vmatmul.msk.f32.gmra.mxu0 %vm172_vm0, %v6523_v13  ;;  %6156 = vmatmul.msk.f32.gmra.mxu1 %vm172_vm0, %v6523_v13  ;;  %v735_v6 = vadd.f32 %v12270_v0, %v12269_v18 }
 0x29a   :  { %vm1948_vm9 = vcmp.gt.f32.partialorder %v1838_v35, 0.0  ;;  %v2059_v1 = vmul.f32 %v8023_v21, %v1838_v35  ;;  %vm1949_vm10 = vcmp.gt.f32.partialorder %v1839_v2, 0.0  ;;  %v2060_v36 = vmul.f32 %v8023_v21, %v1839_v2  ;;  %6178 = vmatmul.msk.f32.gmra.mxu2 %vm172_vm0, %v6523_v13  ;;  %v2469_v24 = vpop.permute.xlu0 %2468 }
 0x29c   :  { %v2169_v16 = vsel %vm1948_vm9, %v1838_v35, %v2059_v1  ;;  %v2170_v34 = vsel %vm1949_vm10, %v1839_v2, %v2060_v36  ;;  %v2493_v35 = vpop.permute.xlu1 %2492  ;;  %v6524_v2 = vld [vmem:[%s12043_s0 + $0x88] sm:$0xff]  ;;  %v12275_v36 = vld [vmem:[#allocation70_spill] sm:$0xff] }
 0x29d   :  { %2280 = vst [vmem:[#allocation2 + $0x2f8] sm:$0xff] %v2169_v16  ;;  %v1283_v52 = vpop.f32.mrf.mxu2  ;;  %v1366_v4 = vpop.f32.mrf.mxu3 }
 0x29e   :  { %2281 = vst [vmem:[#allocation2 + $0x300] sm:$0xff] %v2170_v34  ;;  %v1721_v56 = vadd.f32 %v1283_v52, %v735_v6  ;;  %v1722_v55 = vadd.f32 %v1366_v4, %v818_v31  ;;  %v986_v58 = vpop.f32.mrf.mxu0  ;;  %v1069_v57 = vpop.f32.mrf.mxu1  ;;  %v924_v31 = vadd.f32 %v12277_v27, %v12276_v50 }
 0x29f   :  { %3397 = vrot.lane.b32.xlu2 %v8482_v23, %s6568_s20  ;;  %3395 = vrot.lane.b32.xlu1 %v8484_v5, %s6568_s20  ;;  %v8530_v16 = vpop.permute.xlu2 %2494 }
 0x2a0   :  { %v1843_v13 = vadd.f32 %v8009_v54, %v1721_v56  ;;  %v1844_v18 = vadd.f32 %v8011_v14, %v1722_v55  ;;  %v12274_v14 = vld [vmem:[#allocation9_spill] sm:$0xff]  ;;  %12278 = vst [vmem:[#allocation46_spill] sm:$0xff] %v8530_v16  ;;  %v2502_v56 = vsel %vm172_vm0, %v2493_v35, %v8530_v16 }
 0x2a1   :  { %6135 = vmatmul.msk.f32.gmra.mxu0 %vm172_vm0, %v6524_v2  ;;  %6157 = vmatmul.msk.f32.gmra.mxu1 %vm172_vm0, %v6524_v2  ;;  %v841_v0 = vadd.f32 %v12275_v36, %v12274_v14 }
 0x2a2   :  { %vm1953_vm12 = vcmp.gt.f32.partialorder %v1843_v13, 0.0  ;;  %v2064_v57 = vmul.f32 %v8023_v21, %v1843_v13  ;;  %vm1954_vm13 = vcmp.gt.f32.partialorder %v1844_v18, 0.0  ;;  %v2065_v1 = vmul.f32 %v8023_v21, %v1844_v18  ;;  %6179 = vmatmul.msk.f32.gmra.mxu2 %vm172_vm0, %v6524_v2  ;;  %v8522_v54 = vpop.permute.xlu0 %2470  ;;  %v6525_v2 = vld [vmem:[%s12047_s4] sm:$0x1f] }
 0x2a3   :  { %12273 = vst [vmem:[#allocation105_spill] sm:$0xff] %v8522_v54  ;;  %v2478_v6 = vsel %vm2335_vm11, %v2469_v24, %v8522_v54  ;;  %v8538_v24 = vperm.slane %v6525_v2, 2  ;;  %v8540_v14 = vperm.slane %v6525_v2, 3 }
 0x2a4   :  { %v2174_v34 = vsel %vm1953_vm12, %v1843_v13, %v2064_v57  ;;  %v2175_v52 = vsel %vm1954_vm13, %v1844_v18, %v2065_v1  ;;  %v2487_v4 = vmax.f32 %v8148_v28, %v2478_v6  ;;  %v6526_v6 = vld [vmem:[%s12043_s0 + $0x90] sm:$0xff] }
 0x2a5   :  { %2285 = vst [vmem:[#allocation2 + $0x320] sm:$0xff] %v2174_v34  ;;  %v1286_v55 = vpop.f32.mrf.mxu2  ;;  %v1369_v58 = vpop.f32.mrf.mxu3  ;;  %v12280_v34 = vld [vmem:[#allocation69_spill] sm:$0xff] }
 0x2a6   :  { %2286 = vst [vmem:[#allocation2 + $0x328] sm:$0xff] %v2175_v52  ;;  %v1389_v13 = vpop.f32.mrf.mxu0  ;;  %v1472_v18 = vpop.f32.mrf.mxu1  ;;  %v2511_v57 = vmax.f32 %v2487_v4, %v2502_v56  ;;  %v12281_v52 = vld [vmem:[#allocation133_spill] sm:$0xff]  ;;  %v8559_v56 = vperm.slane %v6525_v2, 4  ;;  %v12282_v55 = vld [vmem:[#allocation11_spill] sm:$0xff]  ;;  %v12283_v58 = vld [vmem:[#allocation72_spill] sm:$0xff] }
 0x2a7   :  { %v1623_v28 = vadd.f32 %v1389_v13, %v841_v0  ;;  %v1624_v1 = vadd.f32 %v1472_v18, %v924_v31  ;;  %v1007_v4 = vadd.f32 %v12281_v52, %v12280_v34  ;;  %v844_v13 = vadd.f32 %v12283_v58, %v12282_v55  ;;  %v12284_v18 = vld [vmem:[#allocation12_spill] sm:$0xff] }
 0x2a8   :  { %2523 = vrot.lane.b32.xlu1 %v2511_v57, %s6568_s20  ;;  %2518 = vrot.lane.b32.xlu0 %v2511_v57, %s6569_s21  ;;  %2516 = vst.msk [vmem:[#allocation3 + $0x18] sm:$0xff] %vm2374_vm14, %v2511_v57  ;;  %v12285_v57 = vld [vmem:[#allocation134_spill] sm:$0xff] }
 0x2a9   :  { %v1745_v35 = vadd.f32 %v8538_v24, %v1623_v28  ;;  %v1746_v36 = vadd.f32 %v8540_v14, %v1624_v1  ;;  %6136 = vmatmul.msk.f32.gmra.mxu0 %vm172_vm0, %v6526_v6  ;;  %6158 = vmatmul.msk.f32.gmra.mxu1 %vm172_vm0, %v6526_v6  ;;  %v8552_v0 = vpop.permute.xlu1 %2599  ;;  %v927_v28 = vadd.f32 %v12285_v57, %v12284_v18 }
 0x2aa   :  { %12279 = vst [vmem:[#allocation107_spill] sm:$0xff] %v8552_v0  ;;  %6180 = vmatmul.msk.f32.gmra.mxu2 %vm172_vm0, %v6526_v6  ;;  %v2598_v50 = vpop.permute.xlu0 %2597 }
 0x2ab   :  { %vm1855_vm15 = vcmp.gt.f32.partialorder %v1745_v35, 0.0  ;;  %v1966_v27 = vmul.f32 %v8023_v21, %v1745_v35  ;;  %vm1856_vm1 = vcmp.gt.f32.partialorder %v1746_v36, 0.0  ;;  %v1967_v31 = vmul.f32 %v8023_v21, %v1746_v36 }
 0x2ac   :  { %v2607_v34 = vsel %vm2335_vm11, %v2598_v50, %v8552_v0  ;;  %v12287_v50 = vld [vmem:[#allocation74_spill] sm:$0xff] }
 0x2ad   :  { %v2076_v1 = vsel %vm1855_vm15, %v1745_v35, %v1966_v27  ;;  %v2077_v6 = vsel %vm1856_vm1, %v1746_v36, %v1967_v31  ;;  %v1555_v23 = vpop.f32.mrf.mxu2  ;;  %v6527_v35 = vld [vmem:[%s12043_s0 + $0x98] sm:$0xff]  ;;  %v12286_v36 = vld [vmem:[#allocation13_spill] sm:$0xff]  ;;  %v12288_v31 = vld [vmem:[#allocation71_spill] sm:$0xff] }
 0x2ae   :  { %v1625_v16 = vadd.f32 %v1555_v23, %v1007_v4  ;;  %v1392_v54 = vpop.f32.mrf.mxu0  ;;  %v1475_v11 = vpop.f32.mrf.mxu1  ;;  %2186 = vst [vmem:[#allocation2 + $0x10] sm:$0xff] %v2076_v1  ;;  %v847_v27 = vadd.f32 %v12287_v50, %v12286_v36  ;;  %v12289_v4 = vld [vmem:[#allocation135_spill] sm:$0xff] }
 0x2af   :  { %v1628_v47 = vadd.f32 %v1392_v54, %v844_v13  ;;  %v1629_v48 = vadd.f32 %v1475_v11, %v927_v28  ;;  %2187 = vst [vmem:[#allocation2 + $0x18] sm:$0xff] %v2077_v6  ;;  %v2616_v54 = vmax.f32 %v8196_v45, %v2607_v34  ;;  %v1010_v58 = vadd.f32 %v12289_v4, %v12288_v31  ;;  %v12290_v45 = vld [vmem:[#allocation14_spill] sm:$0xff] }
 0x2b0   :  { %v1747_v2 = vadd.f32 %v8559_v56, %v1625_v16  ;;  %v930_v57 = vadd.f32 %v8046_v60, %v12290_v45  ;;  %v12294_v45 = vld [vmem:[#allocation16_spill] sm:$0xff] }
 0x2b1   :  { %v1750_v52 = vadd.f32 %v8538_v24, %v1628_v47  ;;  %v1751_v55 = vadd.f32 %v8540_v14, %v1629_v48  ;;  %6137 = vmatmul.msk.f32.gmra.mxu0 %vm172_vm0, %v6527_v35  ;;  %6159 = vmatmul.msk.f32.gmra.mxu1 %vm172_vm0, %v6527_v35  ;;  %v8575_v23 = vpop.permute.xlu1 %2623 }
 0x2b2   :  { %vm1857_vm2 = vcmp.gt.f32.partialorder %v1747_v2, 0.0  ;;  %v1968_v11 = vmul.f32 %v8023_v21, %v1747_v2  ;;  %6181 = vmatmul.msk.f32.gmra.mxu2 %vm172_vm0, %v6527_v35  ;;  %v2622_v47 = vpop.permute.xlu0 %2621 }
 0x2b3   :  { %vm1860_vm4 = vcmp.gt.f32.partialorder %v1750_v52, 0.0  ;;  %v1971_v48 = vmul.f32 %v8023_v21, %v1750_v52  ;;  %vm1861_vm5 = vcmp.gt.f32.partialorder %v1751_v55, 0.0  ;;  %v1972_v16 = vmul.f32 %v8023_v21, %v1751_v55 }
 0x2b4   :  { %v2078_v13 = vsel %vm1857_vm2, %v1747_v2, %v1968_v11  ;;  %v2631_v18 = vsel %vm172_vm0, %v2622_v47, %v8575_v23 }
 0x2b5   :  { %2189 = vst.msk [vmem:[#allocation2 + $0x20] sm:$0xff] %vm2188_vm3, %v2078_v13  ;;  %v2081_v28 = vsel %vm1860_vm4, %v1750_v52, %v1971_v48  ;;  %v2082_v1 = vsel %vm1861_vm5, %v1751_v55, %v1972_v16  ;;  %v1558_v6 = vpop.f32.mrf.mxu2  ;;  %v2640_v34 = vmax.f32 %v2616_v54, %v2631_v18  ;;  %v6528_v55 = vld [vmem:[%s12043_s0 + $0xa0] sm:$0xff]  ;;  %v12291_v16 = vld [vmem:[#allocation73_spill] sm:$0xff]  ;;  %v12293_v13 = vld [vmem:[#allocation76_spill] sm:$0xff] }
 0x2b6   :  { %2192 = vst [vmem:[#allocation2 + $0x38] sm:$0xff] %v2081_v28  ;;  %v1630_v35 = vadd.f32 %v1558_v6, %v1010_v58  ;;  %v1395_v0 = vpop.f32.mrf.mxu0  ;;  %v1478_v36 = vpop.f32.mrf.mxu1  ;;  %v12292_v58 = vld [vmem:[#allocation15_spill] sm:$0xff] }
 0x2b7   :  { %2193 = vst [vmem:[#allocation2 + $0x40] sm:$0xff] %v2082_v1  ;;  %v1633_v50 = vadd.f32 %v1395_v0, %v847_v27  ;;  %v1634_v31 = vadd.f32 %v1478_v36, %v930_v57  ;;  %2652 = vrot.lane.b32.xlu0 %v2640_v34, %s6568_s20  ;;  %2647 = vrot.lane.b32.xlu2 %v2640_v34, %s6569_s21 }
 0x2b8   :  { %v1752_v2 = vadd.f32 %v8559_v56, %v1630_v35  ;;  %2645 = vst.msk [vmem:[#allocation3 + $0x30] sm:$0xff] %vm2374_vm14, %v2640_v34  ;;  %v1013_v27 = vadd.f32 %v8048_v62, %v12291_v16  ;;  %v850_v18 = vadd.f32 %v12293_v13, %v12292_v58  ;;  %v933_v57 = vadd.f32 %v8080_v25, %v12294_v45  ;;  %v12297_v13 = vld [vmem:[#allocation75_spill] sm:$0xff] }
 0x2b9   :  { %v1755_v60 = vadd.f32 %v8538_v24, %v1633_v50  ;;  %v1756_v52 = vadd.f32 %v8540_v14, %v1634_v31  ;;  %6138 = vmatmul.msk.f32.gmra.mxu0 %vm172_vm0, %v6528_v55  ;;  %6160 = vmatmul.msk.f32.gmra.mxu1 %vm172_vm0, %v6528_v55  ;;  %v8602_v0 = vpop.permute.xlu1 %2728 }
 0x2ba   :  { %vm1862_vm6 = vcmp.gt.f32.partialorder %v1752_v2, 0.0  ;;  %v1973_v11 = vmul.f32 %v8023_v21, %v1752_v2  ;;  %6182 = vmatmul.msk.f32.gmra.mxu2 %vm172_vm0, %v6528_v55  ;;  %v2727_v54 = vpop.permute.xlu0 %2726 }
 0x2bb   :  { %vm1865_vm7 = vcmp.gt.f32.partialorder %v1755_v60, 0.0  ;;  %v1976_v47 = vmul.f32 %v8023_v21, %v1755_v60  ;;  %vm1866_vm8 = vcmp.gt.f32.partialorder %v1756_v52, 0.0  ;;  %v1977_v48 = vmul.f32 %v8023_v21, %v1756_v52 }
 0x2bc   :  { %v2083_v4 = vsel %vm1862_vm6, %v1752_v2, %v1973_v11  ;;  %v2736_v31 = vsel %vm2335_vm11, %v2727_v54, %v8602_v0 }
 0x2bd   :  { %2194 = vst.msk [vmem:[#allocation2 + $0x48] sm:$0xff] %vm2188_vm3, %v2083_v4  ;;  %v8615_v28 = vsel %vm1865_vm7, %v1755_v60, %v1976_v47  ;;  %v8617_v1 = vsel %vm1866_vm8, %v1756_v52, %v1977_v48  ;;  %v1561_v6 = vpop.f32.mrf.mxu2  ;;  %v6529_v52 = vld [vmem:[%s12043_s0 + $0xa8] sm:$0xff]  ;;  %v2745_v54 = vmax.f32 %v8244_v22, %v2736_v31  ;;  %v12296_v4 = vld [vmem:[#allocation78_spill] sm:$0xff] }
 0x2be   :  { %2197 = vst [vmem:[#allocation2 + $0x60] sm:$0xff] %v8615_v28  ;;  %v1635_v34 = vadd.f32 %v1561_v6, %v1013_v27  ;;  %v1398_v35 = vpop.f32.mrf.mxu0  ;;  %v1481_v36 = vpop.f32.mrf.mxu1  ;;  %v12295_v27 = vld [vmem:[#allocation17_spill] sm:$0xff]  ;;  %v12298_v22 = vld [vmem:[#allocation18_spill] sm:$0xff] }
 0x2bf   :  { %2198 = vst [vmem:[#allocation2 + $0x68] sm:$0xff] %v8617_v1  ;;  %v1638_v62 = vadd.f32 %v1398_v35, %v850_v18  ;;  %v1639_v50 = vadd.f32 %v1481_v36, %v933_v57  ;;  %v853_v58 = vadd.f32 %v12296_v4, %v12295_v27  ;;  %v1016_v18 = vadd.f32 %v8082_v10, %v12297_v13  ;;  %v12299_v4 = vld [vmem:[#allocation77_spill] sm:$0xff] }
 0x2c0   :  { %v1757_v25 = vadd.f32 %v8559_v56, %v1635_v34  ;;  %v936_v6 = vadd.f32 %v8102_v17, %v12298_v22  ;;  %v12302_v22 = vld [vmem:[#allocation20_spill] sm:$0xff] }
 0x2c1   :  { %v1760_v2 = vadd.f32 %v8538_v24, %v1638_v62  ;;  %v1761_v60 = vadd.f32 %v8540_v14, %v1639_v50  ;;  %6139 = vmatmul.msk.f32.gmra.mxu0 %vm172_vm0, %v6529_v52  ;;  %6161 = vmatmul.msk.f32.gmra.mxu1 %vm172_vm0, %v6529_v52  ;;  %v8631_v55 = vpop.permute.xlu1 %2752 }
 0x2c2   :  { %vm1867_vm9 = vcmp.gt.f32.partialorder %v1757_v25, 0.0  ;;  %v1978_v11 = vmul.f32 %v8023_v21, %v1757_v25  ;;  %6183 = vmatmul.msk.f32.gmra.mxu2 %vm172_vm0, %v6529_v52  ;;  %v2751_v47 = vpop.permute.xlu0 %2750 }
 0x2c3   :  { %vm1870_vm10 = vcmp.gt.f32.partialorder %v1760_v2, 0.0  ;;  %v1981_v48 = vmul.f32 %v8023_v21, %v1760_v2  ;;  %vm1871_vm12 = vcmp.gt.f32.partialorder %v1761_v60, 0.0  ;;  %v1982_v16 = vmul.f32 %v8023_v21, %v1761_v60 }
 0x2c4   :  { %v2088_v45 = vsel %vm1867_vm9, %v1757_v25, %v1978_v11  ;;  %v2760_v57 = vsel %vm172_vm0, %v2751_v47, %v8631_v55  ;;  %v6530_v11 = vld [vmem:[%s12043_s0 + $0xb0] sm:$0xff] }
 0x2c5   :  { %2199 = vst.msk [vmem:[#allocation2 + $0x70] sm:$0xff] %vm2188_vm3, %v2088_v45  ;;  %v2091_v34 = vsel %vm1870_vm10, %v1760_v2, %v1981_v48  ;;  %v8647_v35 = vsel %vm1871_vm12, %v1761_v60, %v1982_v16  ;;  %v1564_v36 = vpop.f32.mrf.mxu2  ;;  %v2769_v62 = vmax.f32 %v2745_v54, %v2760_v57  ;;  %v12301_v45 = vld [vmem:[#allocation80_spill] sm:$0xff] }
 0x2c6   :  { %v1640_v50 = vadd.f32 %v1564_v36, %v1016_v18  ;;  %v1401_v31 = vpop.f32.mrf.mxu0  ;;  %v1484_v52 = vpop.f32.mrf.mxu1  ;;  %v2450_v27 = vmax.f32 %v8615_v28, %v2091_v34  ;;  %v12300_v18 = vld [vmem:[#allocation19_spill] sm:$0xff] }
 0x2c7   :  { %v1643_v10 = vadd.f32 %v1401_v31, %v853_v58  ;;  %v1644_v25 = vadd.f32 %v1484_v52, %v936_v6  ;;  %2781 = vrot.lane.b32.xlu2 %v2769_v62, %s6568_s20  ;;  %2776 = vrot.lane.b32.xlu1 %v2769_v62, %s6569_s21  ;;  %2774 = vst.msk [vmem:[#allocation3 + $0x48] sm:$0xff] %vm2374_vm14, %v2769_v62 }
 0x2c8   :  { %v1762_v17 = vadd.f32 %v8559_v56, %v1640_v50  ;;  %v1019_v58 = vadd.f32 %v8104_v3, %v12299_v4  ;;  %v856_v57 = vadd.f32 %v12301_v45, %v12300_v18  ;;  %v939_v6 = vadd.f32 %v8124_v61, %v12302_v22  ;;  %v12305_v45 = vld [vmem:[#allocation79_spill] sm:$0xff] }
 0x2c9   :  { %v1765_v2 = vadd.f32 %v8538_v24, %v1643_v10  ;;  %v1766_v60 = vadd.f32 %v8540_v14, %v1644_v25  ;;  %6140 = vmatmul.msk.f32.gmra.mxu0 %vm172_vm0, %v6530_v11  ;;  %6162 = vmatmul.msk.f32.gmra.mxu1 %vm172_vm0, %v6530_v11  ;;  %v8661_v28 = vpop.permute.xlu1 %2857 }
 0x2ca   :  { %vm1872_vm13 = vcmp.gt.f32.partialorder %v1762_v17, 0.0  ;;  %v1983_v54 = vmul.f32 %v8023_v21, %v1762_v17  ;;  %6184 = vmatmul.msk.f32.gmra.mxu2 %vm172_vm0, %v6530_v11  ;;  %v2856_v47 = vpop.permute.xlu0 %2855 }
 0x2cb   :  { %vm1875_vm15 = vcmp.gt.f32.partialorder %v1765_v2, 0.0  ;;  %v1986_v48 = vmul.f32 %v8023_v21, %v1765_v2  ;;  %vm1876_vm1 = vcmp.gt.f32.partialorder %v1766_v60, 0.0  ;;  %v1987_v16 = vmul.f32 %v8023_v21, %v1766_v60 }
 0x2cc   :  { %v2093_v13 = vsel %vm1872_vm13, %v1762_v17, %v1983_v54  ;;  %v2865_v17 = vsel %vm2335_vm11, %v2856_v47, %v8661_v28 }
 0x2cd   :  { %2204 = vst.msk [vmem:[#allocation2 + $0x98] sm:$0xff] %vm2188_vm3, %v2093_v13  ;;  %v8674_v34 = vsel %vm1875_vm15, %v1765_v2, %v1986_v48  ;;  %v8676_v36 = vsel %vm1876_vm1, %v1766_v60, %v1987_v16  ;;  %v1567_v62 = vpop.f32.mrf.mxu2  ;;  %v6531_v60 = vld [vmem:[%s12043_s0 + $0xb8] sm:$0xff]  ;;  %v2874_v47 = vmax.f32 %v8292_v53, %v2865_v17  ;;  %s6570_s0 = smov 44  }
 0x2ce   :  { %v1645_v50 = vadd.f32 %v1567_v62, %v1019_v58  ;;  %v1404_v31 = vpop.f32.mrf.mxu0  ;;  %v1487_v52 = vpop.f32.mrf.mxu1  ;;  %v8679_v10 = vmax.f32 %v2450_v27, %v8674_v34  ;;  %v12303_v58 = vld [vmem:[#allocation21_spill] sm:$0xff]  ;;  %v12304_v13 = vld [vmem:[#allocation82_spill] sm:$0xff] }
 0x2cf   :  { %v1648_v3 = vadd.f32 %v1404_v31, %v856_v57  ;;  %v1649_v25 = vadd.f32 %v1487_v52, %v939_v6  ;;  %v859_v18 = vadd.f32 %v12304_v13, %v12303_v58  ;;  %v1022_v57 = vadd.f32 %v8126_v12, %v12305_v45  ;;  %v12306_v53 = vld [vmem:[#allocation22_spill] sm:$0xff]  ;;  %v12307_v45 = vld [vmem:[#allocation23_spill] sm:$0xff] }
 0x2d0   :  { %v1767_v61 = vadd.f32 %v8559_v56, %v1645_v50  ;;  %v942_v62 = vadd.f32 %v8150_v19, %v12306_v53 }
 0x2d1   :  { %v1770_v11 = vadd.f32 %v8538_v24, %v1648_v3  ;;  %v1771_v2 = vadd.f32 %v8540_v14, %v1649_v25  ;;  %6141 = vmatmul.msk.f32.gmra.mxu0 %vm172_vm0, %v6531_v60  ;;  %6163 = vmatmul.msk.f32.gmra.mxu1 %vm172_vm0, %v6531_v60  ;;  %v8691_v27 = vpop.permute.xlu1 %2881 }
 0x2d2   :  { %vm1877_vm2 = vcmp.gt.f32.partialorder %v1767_v61, 0.0  ;;  %v1988_v54 = vmul.f32 %v8023_v21, %v1767_v61  ;;  %6185 = vmatmul.msk.f32.gmra.mxu2 %vm172_vm0, %v6531_v60  ;;  %v2880_v48 = vpop.permute.xlu0 %2879 }
 0x2d3   :  { %vm1880_vm4 = vcmp.gt.f32.partialorder %v1770_v11, 0.0  ;;  %v1991_v16 = vmul.f32 %v8023_v21, %v1770_v11  ;;  %vm1881_vm5 = vcmp.gt.f32.partialorder %v1771_v2, 0.0  ;;  %v1992_v4 = vmul.f32 %v8023_v21, %v1771_v2 }
 0x2d4   :  { %v2098_v22 = vsel %vm1877_vm2, %v1767_v61, %v1988_v54  ;;  %v2889_v6 = vsel %vm172_vm0, %v2880_v48, %v8691_v27  ;;  %v2447_v54 = vld [vmem:[#allocation2 + $0x98] sm:$0xff] }
 0x2d5   :  { %2209 = vst.msk [vmem:[#allocation2 + $0xc0] sm:$0xff] %vm2188_vm3, %v2098_v22  ;;  %v2101_v50 = vsel %vm1880_vm4, %v1770_v11, %v1991_v16  ;;  %v8707_v31 = vsel %vm1881_vm5, %v1771_v2, %v1992_v4  ;;  %v1570_v52 = vpop.f32.mrf.mxu2  ;;  %v2898_v3 = vmax.f32 %v2874_v47, %v2889_v6  ;;  %v2442_v47 = vld [vmem:[#allocation2 + $0x70] sm:$0xff] }
 0x2d6   :  { %v1650_v25 = vadd.f32 %v1570_v52, %v1022_v57  ;;  %v1407_v17 = vpop.f32.mrf.mxu0  ;;  %v1490_v60 = vpop.f32.mrf.mxu1  ;;  %v2579_v58 = vmax.f32 %v8674_v34, %v2101_v50  ;;  %v2452_v16 = vmax.f32 %v2442_v47, %v2447_v54  ;;  %v12308_v57 = vld [vmem:[#allocation84_spill] sm:$0xff]  ;;  %v12309_v6 = vld [vmem:[#allocation81_spill] sm:$0xff] }
 0x2d7   :  { %v1653_v12 = vadd.f32 %v1407_v17, %v859_v18  ;;  %v1654_v61 = vadd.f32 %v1490_v60, %v942_v62  ;;  %2910 = vrot.lane.b32.xlu2 %v2898_v3, %s6568_s20  ;;  %2905 = vrot.lane.b32.xlu1 %v2898_v3, %s6569_s21  ;;  %2903 = vst.msk [vmem:[#allocation3 + $0x60] sm:$0xff] %vm2374_vm14, %v2898_v3  ;;  %v12310_v52 = vld [vmem:[#allocation24_spill] sm:$0xff] }
 0x2d8   :  { %v1772_v19 = vadd.f32 %v8559_v56, %v1650_v25  ;;  %v862_v22 = vadd.f32 %v12308_v57, %v12307_v45  ;;  %v1025_v53 = vadd.f32 %v8152_v46, %v12309_v6  ;;  %v945_v3 = vadd.f32 %v8174_v30, %v12310_v52  ;;  %v12315_v52 = vld [vmem:[#allocation83_spill] sm:$0xff] }
 0x2d9   :  { %v1775_v11 = vadd.f32 %v8538_v24, %v1653_v12  ;;  %v1776_v2 = vadd.f32 %v8540_v14, %v1654_v61  ;;  %v8716_v48 = vpop.permute.xlu1 %2986  ;;  %v2451_v6 = vmax.f32 %v8617_v1, %v8647_v35 }
 0x2da   :  { %vm1882_vm6 = vcmp.gt.f32.partialorder %v1772_v19, 0.0  ;;  %v1993_v34 = vmul.f32 %v8023_v21, %v1772_v19  ;;  %v2985_v4 = vpop.permute.xlu0 %2984 }
 0x2db   :  { %vm1885_vm7 = vcmp.gt.f32.partialorder %v1775_v11, 0.0  ;;  %v1996_v13 = vmul.f32 %v8023_v21, %v1775_v11  ;;  %vm1886_vm8 = vcmp.gt.f32.partialorder %v1776_v2, 0.0  ;;  %v1997_v18 = vmul.f32 %v8023_v21, %v1776_v2 }
 0x2dc   :  { %v2103_v62 = vsel %vm1882_vm6, %v1772_v19, %v1993_v34  ;;  %v8725_v50 = vld [vmem:[#allocation2 + $0xc0] sm:$0xff]  ;;  %v2994_v30 = vsel %vm2335_vm11, %v2985_v4, %v8716_v48 }
 0x2dd   :  { %2214 = vst.msk [vmem:[#allocation2 + $0xe8] sm:$0xff] %vm2188_vm3, %v2103_v62  ;;  %v8730_v25 = vsel %vm1885_vm7, %v1775_v11, %v1996_v13  ;;  %v8732_v17 = vsel %vm1886_vm8, %v1776_v2, %v1997_v18  ;;  %v1573_v60 = vpop.f32.mrf.mxu2  ;;  %v8735_v12 = vmax.f32 %v2452_v16, %v8725_v50  ;;  %v12312_v2 = vld [vmem:[#allocation25_spill] sm:$0xff]  ;;  %v12313_v16 = vld [vmem:[#allocation86_spill] sm:$0xff]  ;;  %v3003_v57 = vmax.f32 %v8340_v32, %v2994_v30 }
 0x2de   :  { %v1655_v61 = vadd.f32 %v1573_v60, %v1025_v53  ;;  %v1410_v54 = vpop.f32.mrf.mxu0  ;;  %v1493_v47 = vpop.f32.mrf.mxu1  ;;  %v8738_v46 = vmax.f32 %v2579_v58, %v8730_v25  ;;  %v865_v58 = vadd.f32 %v12313_v16, %v12312_v2  ;;  %v12316_v60 = vld [vmem:[#allocation26_spill] sm:$0xff] }
 0x2df   :  { %12311 = vst [vmem:[#allocation111_spill] sm:$0xff] %v8735_v12  ;;  %v1658_v19 = vadd.f32 %v1410_v54, %v862_v22  ;;  %v1659_v34 = vadd.f32 %v1493_v47, %v945_v3  ;;  %2500 = vrot.lane.b32.xlu0 %v8735_v12, %s6568_s20  ;;  %2496 = vrot.lane.b32.xlu2 %v8679_v10, %s6568_s20 }
 0x2e0   :  { %v1777_v11 = vadd.f32 %v8559_v56, %v1655_v61  ;;  %2472 = vrot.lane.b32.xlu1 %v8679_v10, %s6569_s21  ;;  %v1028_v3 = vadd.f32 %v8176_v20, %v12315_v52  ;;  %v948_v61 = vadd.f32 %v8198_v26, %v12316_v60  ;;  %v12318_v60 = vld [vmem:[#allocation27_spill] sm:$0xff] }
 0x2e1   :  { %v1780_v13 = vadd.f32 %v8538_v24, %v1658_v19  ;;  %v1781_v18 = vadd.f32 %v8540_v14, %v1659_v34  ;;  %v8753_v45 = vpop.permute.xlu1 %3010  ;;  %v8771_v34 = vmax.f32 %v2451_v6, %v8676_v36 }
 0x2e2   :  { %12314 = vst [vmem:[#allocation49_spill] sm:$0xff] %v8753_v45  ;;  %vm1887_vm9 = vcmp.gt.f32.partialorder %v1777_v11, 0.0  ;;  %v1998_v4 = vmul.f32 %v8023_v21, %v1777_v11  ;;  %v3009_v22 = vpop.permute.xlu0 %3008 }
 0x2e3   :  { %vm1890_vm10 = vcmp.gt.f32.partialorder %v1780_v13, 0.0  ;;  %v2001_v53 = vmul.f32 %v8023_v21, %v1780_v13  ;;  %vm1891_vm12 = vcmp.gt.f32.partialorder %v1781_v18, 0.0  ;;  %v2002_v62 = vmul.f32 %v8023_v21, %v1781_v18 }
 0x2e4   :  { %v2108_v54 = vsel %vm1887_vm9, %v1777_v11, %v1998_v4  ;;  %v3018_v32 = vsel %vm172_vm0, %v3009_v22, %v8753_v45 }
 0x2e5   :  { %2219 = vst.msk [vmem:[#allocation2 + $0x110] sm:$0xff] %vm2188_vm3, %v2108_v54  ;;  %v2111_v47 = vsel %vm1890_vm10, %v1780_v13, %v2001_v53  ;;  %v2112_v1 = vsel %vm1891_vm12, %v1781_v18, %v2002_v62  ;;  %v1576_v35 = vpop.f32.mrf.mxu2  ;;  %v8768_v19 = vmax.f32 %v3003_v57, %v3018_v32  ;;  %v2576_v13 = vld [vmem:[#allocation2 + $0xe8] sm:$0xff]  ;;  %v12320_v32 = vld [vmem:[#allocation85_spill] sm:$0xff] }
 0x2e6   :  { %v1660_v30 = vadd.f32 %v1576_v35, %v1028_v3  ;;  %v1413_v2 = vpop.f32.mrf.mxu0  ;;  %v1496_v20 = vpop.f32.mrf.mxu1  ;;  %v2708_v16 = vmax.f32 %v8730_v25, %v2111_v47  ;;  %v2709_v26 = vmax.f32 %v8732_v17, %v2112_v1  ;;  %v2581_v6 = vmax.f32 %v8725_v50, %v2576_v13 }
 0x2e7   :  { %v1663_v11 = vadd.f32 %v1413_v2, %v865_v58  ;;  %v1664_v4 = vadd.f32 %v1496_v20, %v948_v61  ;;  %2474 = vrot.lane.b32.xlu2 %v8771_v34, %s6569_s21  ;;  %3032 = vst.msk [vmem:[#allocation3 + $0x78] sm:$0xff] %vm2374_vm14, %v8768_v19  ;;  %v8790_v3 = vpop.permute.xlu2 %3242  ;;  %v12319_v61 = vld [vmem:[#allocation88_spill] sm:$0xff]  ;;  %v1031_v47 = vadd.f32 %v8200_v9, %v12320_v32 }
 0x2e8   :  { %v1782_v18 = vadd.f32 %v8559_v56, %v1660_v30  ;;  %2476 = vrot.lane.b32.xlu1 %v8735_v12, %s6569_s21  ;;  %v868_v54 = vadd.f32 %v12319_v61, %v12318_v60  ;;  %v12321_v30 = vld [vmem:[#allocation28_spill] sm:$0xff] }
 0x2e9   :  { %v1785_v57 = vadd.f32 %v8538_v24, %v1663_v11  ;;  %v1786_v25 = vadd.f32 %v8540_v14, %v1664_v4  ;;  %v8784_v22 = vpop.permute.xlu1 %3115  ;;  %v951_v50 = vadd.f32 %v8220_v7, %v12321_v30 }
 0x2ea   :  { %12317 = vst [vmem:[#allocation110_spill] sm:$0xff] %v8784_v22  ;;  %vm1892_vm13 = vcmp.gt.f32.partialorder %v1782_v18, 0.0  ;;  %v2003_v58 = vmul.f32 %v8023_v21, %v1782_v18  ;;  %v3114_v53 = vpop.permute.xlu0 %3113 }
 0x2eb   :  { %vm1895_vm15 = vcmp.gt.f32.partialorder %v1785_v57, 0.0  ;;  %v2006_v62 = vmul.f32 %v8023_v21, %v1785_v57  ;;  %vm1896_vm1 = vcmp.gt.f32.partialorder %v1786_v25, 0.0  ;;  %v2007_v52 = vmul.f32 %v8023_v21, %v1786_v25 }
 0x2ec   :  { %v2113_v1 = vsel %vm1892_vm13, %v1782_v18, %v2003_v58  ;;  %v8796_v35 = vld [vmem:[#allocation2 + $0x110] sm:$0xff] }
 0x2ed   :  { %2224 = vst.msk [vmem:[#allocation2 + $0x138] sm:$0xff] %vm2188_vm3, %v2113_v1  ;;  %v8801_v2 = vsel %vm1895_vm15, %v1785_v57, %v2006_v62  ;;  %v8803_v20 = vsel %vm1896_vm1, %v1786_v25, %v2007_v52  ;;  %v1579_v11 = vpop.f32.mrf.mxu2  ;;  %v8806_v4 = vmax.f32 %v2581_v6, %v8796_v35  ;;  %v3123_v57 = vsel %vm2335_vm11, %v3114_v53, %v8784_v22  ;;  %v12324_v1 = vld [vmem:[#allocation90_spill] sm:$0xff] }
 0x2ee   :  { %v1665_v13 = vadd.f32 %v1579_v11, %v1031_v47  ;;  %v1416_v60 = vpop.f32.mrf.mxu0  ;;  %v1499_v61 = vpop.f32.mrf.mxu1  ;;  %v8809_v9 = vmax.f32 %v2708_v16, %v8801_v2  ;;  %v8812_v18 = vmax.f32 %v2709_v26, %v8803_v20  ;;  %v3132_v52 = vmax.f32 %v8388_v33, %v3123_v57  ;;  %v12323_v47 = vld [vmem:[#allocation29_spill] sm:$0xff] }
 0x2ef   :  { %12322 = vst [vmem:[#allocation50_spill] sm:$0xff] %v8806_v4  ;;  %v1668_v7 = vadd.f32 %v1416_v60, %v868_v54  ;;  %v1669_v58 = vadd.f32 %v1499_v61, %v951_v50  ;;  %2629 = vrot.lane.b32.xlu0 %v8806_v4, %s6568_s20  ;;  %2498 = vrot.lane.b32.xlu2 %v8771_v34, %s6568_s20  ;;  %v12325_v50 = vld [vmem:[#allocation87_spill] sm:$0xff]  ;;  %v12326_v61 = vld [vmem:[#allocation30_spill] sm:$0xff]  ;;  %v3267_v57 = vpop.permute.xlu2 %3266 }
 0x2f0   :  { %v1787_v25 = vadd.f32 %v8559_v56, %v1665_v13  ;;  %3034 = vrot.lane.b32.xlu1 %v8768_v19, %s6569_s21  ;;  %v871_v30 = vadd.f32 %v12324_v1, %v12323_v47  ;;  %v1034_v11 = vadd.f32 %v8222_v8, %v12325_v50  ;;  %v954_v33 = vadd.f32 %v8246_v43, %v12326_v61  ;;  %v12329_v50 = vld [vmem:[#allocation89_spill] sm:$0xff]  ;;  %v12330_v61 = vld [vmem:[#allocation32_spill] sm:$0xff] }
 0x2f1   :  { %v1790_v16 = vadd.f32 %v8538_v24, %v1668_v7  ;;  %v1791_v26 = vadd.f32 %v8540_v14, %v1669_v58  ;;  %v8825_v6 = vpop.permute.xlu1 %3139 }
 0x2f2   :  { %vm1897_vm2 = vcmp.gt.f32.partialorder %v1787_v25, 0.0  ;;  %v2008_v62 = vmul.f32 %v8023_v21, %v1787_v25  ;;  %v3138_v53 = vpop.permute.xlu0 %3137 }
 0x2f3   :  { %vm1900_vm4 = vcmp.gt.f32.partialorder %v1790_v16, 0.0  ;;  %v2011_v54 = vmul.f32 %v8023_v21, %v1790_v16  ;;  %vm1901_vm5 = vcmp.gt.f32.partialorder %v1791_v26, 0.0  ;;  %v2012_v32 = vmul.f32 %v8023_v21, %v1791_v26 }
 0x2f4   :  { %v2118_v13 = vsel %vm1897_vm2, %v1787_v25, %v2008_v62  ;;  %v3147_v60 = vsel %vm172_vm0, %v3138_v53, %v8825_v6  ;;  %v2705_v43 = vld [vmem:[#allocation2 + $0x138] sm:$0xff]  ;;  %vm2380_vm2 = vcmask 457952  }
 0x2f5   :  { %2229 = vst.msk [vmem:[#allocation2 + $0x160] sm:$0xff] %vm2188_vm3, %v2118_v13  ;;  %v2121_v7 = vsel %vm1900_vm4, %v1790_v16, %v2011_v54  ;;  %v2122_v58 = vsel %vm1901_vm5, %v1791_v26, %v2012_v32  ;;  %v1582_v12 = vpop.f32.mrf.mxu2  ;;  %v8840_v22 = vmax.f32 %v3132_v52, %v3147_v60  ;;  %v2710_v26 = vmax.f32 %v8796_v35, %v2705_v43  ;;  %v12327_v54 = vld [vmem:[#allocation31_spill] sm:$0xff]  ;;  %v12328_v32 = vld [vmem:[#allocation92_spill] sm:$0xff] }
 0x2f6   :  { %v1670_v45 = vadd.f32 %v1582_v12, %v1034_v11  ;;  %v1419_v47 = vpop.f32.mrf.mxu0  ;;  %v1502_v1 = vpop.f32.mrf.mxu1  ;;  %v2837_v8 = vmax.f32 %v8801_v2, %v2121_v7  ;;  %v2838_v25 = vmax.f32 %v8803_v20, %v2122_v58  ;;  %v1037_v11 = vadd.f32 %v8248_v63, %v12329_v50 }
 0x2f7   :  { %v1673_v62 = vadd.f32 %v1419_v47, %v871_v30  ;;  %v1674_v53 = vadd.f32 %v1502_v1, %v954_v33  ;;  %3039 = vrot.lane.b32.xlu2 %v8768_v19, %s6568_s20  ;;  %3161 = vst.msk [vmem:[#allocation3 + $0x90] sm:$0xff] %vm2374_vm14, %v8840_v22  ;;  %v874_v30 = vadd.f32 %v12328_v32, %v12327_v54  ;;  %v12332_v32 = vld [vmem:[#allocation35_spill] sm:$0xff] }
 0x2f8   :  { %v1792_v16 = vadd.f32 %v8559_v56, %v1670_v45  ;;  %2605 = vrot.lane.b32.xlu1 %v8806_v4, %s6569_s21  ;;  %v957_v35 = vadd.f32 %v8268_v39, %v12330_v61  ;;  %v8881_v39 = vpop.permute.xlu2 %3373 }
 0x2f9   :  { %v1795_v12 = vadd.f32 %v8538_v24, %v1673_v62  ;;  %v1796_v2 = vadd.f32 %v8540_v14, %v1674_v53 }
 0x2fa   :  { %vm1902_vm6 = vcmp.gt.f32.partialorder %v1792_v16, 0.0  ;;  %v2013_v20 = vmul.f32 %v8023_v21, %v1792_v16  ;;  %v8855_v52 = vpop.permute.xlu0 %3244 }
 0x2fb   :  { %vm1905_vm7 = vcmp.gt.f32.partialorder %v1795_v12, 0.0  ;;  %v2016_v45 = vmul.f32 %v8023_v21, %v1795_v12  ;;  %vm1906_vm8 = vcmp.gt.f32.partialorder %v1796_v2, 0.0  ;;  %v2017_v19 = vmul.f32 %v8023_v21, %v1796_v2 }
 0x2fc   :  { %v2123_v13 = vsel %vm1902_vm6, %v1792_v16, %v2013_v20  ;;  %v8863_v60 = vld [vmem:[#allocation2 + $0x160] sm:$0xff] }
 0x2fd   :  { %2234 = vst.msk [vmem:[#allocation2 + $0x188] sm:$0xff] %vm2188_vm3, %v2123_v13  ;;  %v8868_v33 = vsel %vm1905_vm7, %v1795_v12, %v2016_v45  ;;  %v8870_v7 = vsel %vm1906_vm8, %v1796_v2, %v2017_v19  ;;  %v1585_v58 = vpop.f32.mrf.mxu2  ;;  %v8873_v47 = vmax.f32 %v2710_v26, %v8863_v60  ;;  %v3252_v2 = vsel %vm2335_vm11, %v8790_v3, %v8855_v52 }
 0x2fe   :  { %v1675_v1 = vadd.f32 %v1585_v58, %v1037_v11  ;;  %v1422_v62 = vpop.f32.mrf.mxu0  ;;  %v1505_v53 = vpop.f32.mrf.mxu1  ;;  %v8876_v63 = vmax.f32 %v2837_v8, %v8868_v33  ;;  %v8879_v43 = vmax.f32 %v2838_v25, %v8870_v7  ;;  %v3261_v45 = vmax.f32 %v8434_v15, %v3252_v2  ;;  %v12334_v11 = vld [vmem:[#allocation91_spill] sm:$0xff]  ;;  %v12335_v58 = vld [vmem:[#allocation36_spill] sm:$0xff] }
 0x2ff   :  { %12331 = vst [vmem:[#allocation112_spill] sm:$0xff] %v8873_v47  ;;  %v1678_v16 = vadd.f32 %v1422_v62, %v874_v30  ;;  %v1679_v12 = vadd.f32 %v1505_v53, %v957_v35  ;;  %2758 = vrot.lane.b32.xlu0 %v8873_v47, %s6568_s20  ;;  %2601 = vrot.lane.b32.xlu2 %v8738_v46, %s6569_s21  ;;  %v12333_v30 = vld [vmem:[#allocation95_spill] sm:$0xff] }
 0x300   :  { %v1797_v8 = vadd.f32 %v8559_v56, %v1675_v1  ;;  %3163 = vrot.lane.b32.xlu1 %v8840_v22, %s6569_s21  ;;  %v877_v50 = vadd.f32 %v12333_v30, %v12332_v32  ;;  %v1040_v13 = vadd.f32 %v8270_v49, %v12334_v11  ;;  %v960_v15 = vadd.f32 %v8294_v40, %v12335_v58  ;;  %v12338_v58 = vld [vmem:[#allocation93_spill] sm:$0xff] }
 0x301   :  { %v1800_v25 = vadd.f32 %v8538_v24, %v1678_v16  ;;  %v1801_v20 = vadd.f32 %v8540_v14, %v1679_v12 }
 0x302   :  { %vm1907_vm9 = vcmp.gt.f32.partialorder %v1797_v8, 0.0  ;;  %v2018_v26 = vmul.f32 %v8023_v21, %v1797_v8  ;;  %v8897_v19 = vpop.permute.xlu0 %3268 }
 0x303   :  { %vm1910_vm10 = vcmp.gt.f32.partialorder %v1800_v25, 0.0  ;;  %v2021_v3 = vmul.f32 %v8023_v21, %v1800_v25  ;;  %vm1911_vm12 = vcmp.gt.f32.partialorder %v1801_v20, 0.0  ;;  %v2022_v54 = vmul.f32 %v8023_v21, %v1801_v20 }
 0x304   :  { %v2128_v61 = vsel %vm1907_vm9, %v1797_v8, %v2018_v26  ;;  %v3276_v35 = vsel %vm172_vm0, %v3267_v57, %v8897_v19  ;;  %v2834_v40 = vld [vmem:[#allocation2 + $0x188] sm:$0xff] }
 0x305   :  { %2239 = vst.msk [vmem:[#allocation2 + $0x1b0] sm:$0xff] %vm2188_vm3, %v2128_v61  ;;  %v2131_v1 = vsel %vm1910_vm10, %v1800_v25, %v2021_v3  ;;  %v2132_v62 = vsel %vm1911_vm12, %v1801_v20, %v2022_v54  ;;  %v1588_v53 = vpop.f32.mrf.mxu2  ;;  %v8910_v16 = vmax.f32 %v3261_v45, %v3276_v35  ;;  %v8921_v25 = vpop.permute.xlu2 %3397  ;;  %v2839_v3 = vmax.f32 %v8863_v60, %v2834_v40  ;;  %v12337_v61 = vld [vmem:[#allocation99_spill] sm:$0xff] }
 0x306   :  { %v1680_v12 = vadd.f32 %v1588_v53, %v1040_v13  ;;  %v1425_v2 = vpop.f32.mrf.mxu0  ;;  %v1508_v32 = vpop.f32.mrf.mxu1  ;;  %v2966_v30 = vmax.f32 %v8868_v33, %v2131_v1  ;;  %v2967_v49 = vmax.f32 %v8870_v7, %v2132_v62  ;;  %v2580_v54 = vmax.f32 %v8676_v36, %v8707_v31  ;;  %v12336_v13 = vld [vmem:[#allocation39_spill] sm:$0xff]  ;;  %v12339_v1 = vld [vmem:[#allocation40_spill] sm:$0xff] }
 0x307   :  { %v1683_v8 = vadd.f32 %v1425_v2, %v877_v50  ;;  %v1684_v26 = vadd.f32 %v1508_v32, %v960_v15  ;;  %2625 = vrot.lane.b32.xlu2 %v8738_v46, %s6568_s20  ;;  %3290 = vst.msk [vmem:[#allocation3 + $0xa8] sm:$0xff] %vm2374_vm14, %v8910_v16  ;;  %v880_v35 = vadd.f32 %v12337_v61, %v12336_v13  ;;  %v12341_v61 = vld [vmem:[#allocation96_spill] sm:$0xff] }
 0x308   :  { %v1802_v57 = vadd.f32 %v8559_v56, %v1680_v12  ;;  %2734 = vrot.lane.b32.xlu1 %v8873_v47, %s6569_s21  ;;  %v1043_v15 = vadd.f32 %v8296_v44, %v12338_v58  ;;  %v963_v62 = vadd.f32 %v8316_v37, %v12339_v1  ;;  %v8948_v32 = vmax.f32 %v2580_v54, %v8732_v17  ;;  %v12342_v1 = vld [vmem:[#allocation43_spill] sm:$0xff] }
 0x309   :  { %v1805_v33 = vadd.f32 %v8538_v24, %v1683_v8  ;;  %v1806_v7 = vadd.f32 %v8540_v14, %v1684_v26  ;;  %v3372_v20 = vpop.permute.xlu1 %3371 }
 0x30a   :  { %vm1912_vm13 = vcmp.gt.f32.partialorder %v1802_v57, 0.0  ;;  %v2023_v45 = vmul.f32 %v8023_v21, %v1802_v57 }
 0x30b   :  { %vm1915_vm15 = vcmp.gt.f32.partialorder %v1805_v33, 0.0  ;;  %v2026_v50 = vmul.f32 %v8023_v21, %v1805_v33  ;;  %vm1916_vm1 = vcmp.gt.f32.partialorder %v1806_v7, 0.0  ;;  %v2027_v11 = vmul.f32 %v8023_v21, %v1806_v7 }
 0x30c   :  { %v2133_v53 = vsel %vm1912_vm13, %v1802_v57, %v2023_v45  ;;  %v8937_v60 = vld [vmem:[#allocation2 + $0x1b0] sm:$0xff] }
 0x30d   :  { %2244 = vst.msk [vmem:[#allocation2 + $0x1d8] sm:$0xff] %vm2188_vm3, %v2133_v53  ;;  %v8940_v36 = vsel %vm1915_vm15, %v1805_v33, %v2026_v50  ;;  %v8942_v31 = vsel %vm1916_vm1, %v1806_v7, %v2027_v11  ;;  %v1591_v12 = vpop.f32.mrf.mxu2  ;;  %v8945_v2 = vmax.f32 %v2839_v3, %v8937_v60  ;;  %v3381_v7 = vsel %vm2335_vm11, %v3372_v20, %v8881_v39  ;;  %v12344_v53 = vld [vmem:[#allocation44_spill] sm:$0xff] }
 0x30e   :  { %v1685_v44 = vadd.f32 %v1591_v12, %v1043_v15  ;;  %v1428_v8 = vpop.f32.mrf.mxu0  ;;  %v1511_v26 = vpop.f32.mrf.mxu1  ;;  %v8951_v37 = vmax.f32 %v2966_v30, %v8940_v36  ;;  %v8954_v40 = vmax.f32 %v2967_v49, %v8942_v31  ;;  %v3390_v20 = vmax.f32 %v8484_v5, %v3381_v7 }
 0x30f   :  { %12340 = vst [vmem:[#allocation116_spill] sm:$0xff] %v8945_v2  ;;  %v1688_v57 = vadd.f32 %v1428_v8, %v880_v35  ;;  %v1689_v33 = vadd.f32 %v1511_v26, %v963_v62  ;;  %2887 = vrot.lane.b32.xlu0 %v8945_v2, %s6568_s20  ;;  %2603 = vrot.lane.b32.xlu2 %v8948_v32, %s6569_s21  ;;  %v12343_v62 = vld [vmem:[#allocation103_spill] sm:$0xff] }
 0x310   :  { %v1807_v17 = vadd.f32 %v8559_v56, %v1685_v44  ;;  %3292 = vrot.lane.b32.xlu1 %v8910_v16, %s6569_s21  ;;  %v1046_v35 = vadd.f32 %v8318_v38, %v12341_v61  ;;  %v883_v5 = vadd.f32 %v12343_v62, %v12342_v1  ;;  %v966_v12 = vadd.f32 %v8342_v42, %v12344_v53  ;;  %v12346_v61 = vld [vmem:[#allocation108_spill] sm:$0xff] }
 0x311   :  { %v1810_v30 = vadd.f32 %v8538_v24, %v1688_v57  ;;  %v1811_v49 = vadd.f32 %v8540_v14, %v1689_v33  ;;  %v2648_v45 = vpop.permute.xlu2 %2647  ;;  %v3396_v3 = vpop.permute.xlu1 %3395  ;;  %v12348_v53 = vld [vmem:[#allocation48_spill] sm:$0xff] }
 0x312   :  { %vm1917_vm4 = vcmp.gt.f32.partialorder %v1807_v17, 0.0  ;;  %v2028_v54 = vmul.f32 %v8023_v21, %v1807_v17  ;;  %2650 = vst.msk [vmem:[#allocation3 + $0x30] sm:$0xff] %vm2380_vm2, %v2648_v45  ;;  %v3405_v50 = vsel %vm172_vm0, %v3396_v3, %v8921_v25 }
 0x313   :  { %vm1920_vm5 = vcmp.gt.f32.partialorder %v1810_v30, 0.0  ;;  %v2031_v11 = vmul.f32 %v8023_v21, %v1810_v30  ;;  %vm1921_vm6 = vcmp.gt.f32.partialorder %v1811_v49, 0.0  ;;  %v2032_v13 = vmul.f32 %v8023_v21, %v1811_v49 }
 0x314   :  { %v2138_v58 = vsel %vm1917_vm4, %v1807_v17, %v2028_v54  ;;  %v8976_v15 = vmax.f32 %v3390_v20, %v3405_v50  ;;  %v2963_v54 = vld [vmem:[#allocation2 + $0x1d8] sm:$0xff] }
 0x315   :  { %2249 = vst.msk [vmem:[#allocation2 + $0x200] sm:$0xff] %vm2188_vm3, %v2138_v58  ;;  %v2141_v44 = vsel %vm1920_vm5, %v1810_v30, %v2031_v11  ;;  %v2142_v8 = vsel %vm1921_vm6, %v1811_v49, %v2032_v13  ;;  %v1594_v26 = vpop.f32.mrf.mxu2  ;;  %v2968_v49 = vmax.f32 %v8937_v60, %v2963_v54  ;;  %v12345_v13 = vld [vmem:[#allocation47_spill] sm:$0xff]  ;;  %v12347_v58 = vld [vmem:[#allocation100_spill] sm:$0xff]  ;;  %v969_v60 = vadd.f32 %v8364_v59, %v12348_v53 }
 0x316   :  { %v1690_v57 = vadd.f32 %v1594_v26, %v1046_v35  ;;  %v1431_v33 = vpop.f32.mrf.mxu0  ;;  %v1514_v7 = vpop.f32.mrf.mxu1  ;;  %v3095_v45 = vmax.f32 %v8940_v36, %v2141_v44  ;;  %v3096_v38 = vmax.f32 %v8942_v31, %v2142_v8  ;;  %3419 = vst.msk [vmem:[#allocation3 + $0xc0] sm:$0xff] %vm2374_vm14, %v8976_v15  ;;  %v886_v35 = vadd.f32 %v12346_v61, %v12345_v13  ;;  %v12353_v13 = vld [vmem:[#allocation52_spill] sm:$0xff] }
 0x317   :  { %v1693_v17 = vadd.f32 %v1431_v33, %v883_v5  ;;  %v1694_v3 = vadd.f32 %v1514_v7, %v966_v12  ;;  %2627 = vrot.lane.b32.xlu2 %v8948_v32, %s6568_s20  ;;  %v1049_v1 = vadd.f32 %v8344_v29, %v12347_v58  ;;  %v972_v61 = vadd.f32 %v8390_v51, %v12353_v13  ;;  %v12358_v13 = vld [vmem:[#allocation56_spill] sm:$0xff] }
 0x318   :  { %v1812_v42 = vadd.f32 %v8559_v56, %v1690_v57  ;;  %2863 = vrot.lane.b32.xlu1 %v8945_v2, %s6569_s21 }
 0x319   :  { %v1815_v30 = vadd.f32 %v8538_v24, %v1693_v17  ;;  %v1816_v36 = vadd.f32 %v8540_v14, %v1694_v3 }
 0x31a   :  { %vm1922_vm7 = vcmp.gt.f32.partialorder %v1812_v42, 0.0  ;;  %v2033_v31 = vmul.f32 %v8023_v21, %v1812_v42  ;;  %v2519_v20 = vpop.permute.xlu0 %2518 }
 0x31b   :  { %vm1925_vm8 = vcmp.gt.f32.partialorder %v1815_v30, 0.0  ;;  %v2036_v50 = vmul.f32 %v8023_v21, %v1815_v30  ;;  %vm1926_vm9 = vcmp.gt.f32.partialorder %v1816_v36, 0.0  ;;  %v2037_v11 = vmul.f32 %v8023_v21, %v1816_v36  ;;  %2521 = vst.msk [vmem:[#allocation3 + $0x18] sm:$0xff] %vm2380_vm2, %v2519_v20  ;;  %v12351_v20 = vld [vmem:[#allocation51_spill] sm:$0xff] }
 0x31c   :  { %v2143_v62 = vsel %vm1922_vm7, %v1812_v42, %v2033_v31  ;;  %v9003_v5 = vld [vmem:[#allocation2 + $0x200] sm:$0xff]  ;;  %v12350_v31 = vld [vmem:[#allocation104_spill] sm:$0xff] }
 0x31d   :  { %2254 = vst.msk [vmem:[#allocation2 + $0x228] sm:$0xff] %vm2188_vm3, %v2143_v62  ;;  %v9008_v12 = vsel %vm1925_vm8, %v1815_v30, %v2036_v50  ;;  %v9010_v44 = vsel %vm1926_vm9, %v1816_v36, %v2037_v11  ;;  %v1597_v8 = vpop.f32.mrf.mxu2  ;;  %v9013_v26 = vmax.f32 %v2968_v49, %v9003_v5  ;;  %v12352_v50 = vld [vmem:[#allocation113_spill] sm:$0xff] }
 0x31e   :  { %v1695_v57 = vadd.f32 %v1597_v8, %v1049_v1  ;;  %v1434_v33 = vpop.f32.mrf.mxu0  ;;  %v1517_v7 = vpop.f32.mrf.mxu1  ;;  %v9016_v29 = vmax.f32 %v3095_v45, %v9008_v12  ;;  %v9019_v17 = vmax.f32 %v3096_v38, %v9010_v44  ;;  %v889_v11 = vadd.f32 %v12352_v50, %v12351_v20 }
 0x31f   :  { %12349 = vst [vmem:[#allocation53_spill] sm:$0xff] %v9013_v26  ;;  %v1698_v59 = vadd.f32 %v1434_v33, %v886_v35  ;;  %v1699_v3 = vadd.f32 %v1517_v7, %v969_v60  ;;  %3016 = vrot.lane.b32.xlu0 %v9013_v26, %s6568_s20  ;;  %3168 = vrot.lane.b32.xlu2 %v8840_v22, %s6568_s20 }
 0x320   :  { %v1817_v54 = vadd.f32 %v8559_v56, %v1695_v57  ;;  %3421 = vrot.lane.b32.xlu1 %v8976_v15, %s6569_s21  ;;  %v1052_v22 = vadd.f32 %v8366_v41, %v12350_v31  ;;  %v12356_v31 = vld [vmem:[#allocation109_spill] sm:$0xff] }
 0x321   :  { %v1820_v42 = vadd.f32 %v8538_v24, %v1698_v59  ;;  %v1821_v45 = vadd.f32 %v8540_v14, %v1699_v3  ;;  %v9048_v3 = vpop.permute.xlu2 %2781 }
 0x322   :  { %vm1927_vm10 = vcmp.gt.f32.partialorder %v1817_v54, 0.0  ;;  %v2038_v38 = vmul.f32 %v8023_v21, %v1817_v54 }
 0x323   :  { %vm1930_vm12 = vcmp.gt.f32.partialorder %v1820_v42, 0.0  ;;  %v2041_v30 = vmul.f32 %v8023_v21, %v1820_v42  ;;  %vm1931_vm13 = vcmp.gt.f32.partialorder %v1821_v45, 0.0  ;;  %v2042_v36 = vmul.f32 %v8023_v21, %v1821_v45 }
 0x324   :  { %v2148_v49 = vsel %vm1927_vm10, %v1817_v54, %v2038_v38  ;;  %v3092_v41 = vld [vmem:[#allocation2 + $0x228] sm:$0xff]  ;;  %v12354_v38 = vld [vmem:[#allocation55_spill] sm:$0xff] }
 0x325   :  { %2259 = vst.msk [vmem:[#allocation2 + $0x250] sm:$0xff] %vm2188_vm3, %v2148_v49  ;;  %v2151_v35 = vsel %vm1930_vm12, %v1820_v42, %v2041_v30  ;;  %v2152_v58 = vsel %vm1931_vm13, %v1821_v45, %v2042_v36  ;;  %v1600_v1 = vpop.f32.mrf.mxu2  ;;  %v3097_v54 = vmax.f32 %v9003_v5, %v3092_v41  ;;  %v12355_v30 = vld [vmem:[#allocation118_spill] sm:$0xff] }
 0x326   :  { %v1700_v62 = vadd.f32 %v1600_v1, %v1052_v22  ;;  %v1437_v53 = vpop.f32.mrf.mxu0  ;;  %v1520_v60 = vpop.f32.mrf.mxu1  ;;  %v3224_v8 = vmax.f32 %v9008_v12, %v2151_v35  ;;  %v892_v36 = vadd.f32 %v12355_v30, %v12354_v38  ;;  %v12357_v22 = vld [vmem:[#allocation34_spill] sm:$0xff] }
 0x327   :  { %v1703_v57 = vadd.f32 %v1437_v53, %v889_v11  ;;  %v1704_v33 = vadd.f32 %v1520_v60, %v972_v61  ;;  %2730 = vrot.lane.b32.xlu2 %v8809_v9, %s6569_s21  ;;  %v1055_v49 = vadd.f32 %v12357_v22, %v12356_v31  ;;  %v3225_v11 = vmax.f32 %v9010_v44, %v2152_v58  ;;  %v12359_v61 = vld [vmem:[#allocation37_spill] sm:$0xff]  ;;  %v12362_v30 = vld [vmem:[#allocation114_spill] sm:$0xff] }
 0x328   :  { %v1822_v7 = vadd.f32 %v8559_v56, %v1700_v62  ;;  %2992 = vrot.lane.b32.xlu1 %v9013_v26, %s6569_s21  ;;  %v975_v5 = vadd.f32 %v12359_v61, %v12358_v13  ;;  %v12366_v13 = vld [vmem:[#allocation60_spill] sm:$0xff]  ;;  %v12367_v61 = vld [vmem:[#allocation98_spill] sm:$0xff] }
 0x329   :  { %v1825_v51 = vadd.f32 %v8538_v24, %v1703_v57  ;;  %v1826_v59 = vadd.f32 %v8540_v14, %v1704_v33 }
 0x32a   :  { %vm1932_vm15 = vcmp.gt.f32.partialorder %v1822_v7, 0.0  ;;  %v2043_v12 = vmul.f32 %v8023_v21, %v1822_v7 }
 0x32b   :  { %vm1935_vm1 = vcmp.gt.f32.partialorder %v1825_v51, 0.0  ;;  %v2046_v42 = vmul.f32 %v8023_v21, %v1825_v51  ;;  %vm1936_vm4 = vcmp.gt.f32.partialorder %v1826_v59, 0.0  ;;  %v2047_v45 = vmul.f32 %v8023_v21, %v1826_v59 }
 0x32c   :  { %v2153_v20 = vsel %vm1932_vm15, %v1822_v7, %v2043_v12  ;;  %v9058_v50 = vld [vmem:[#allocation2 + $0x250] sm:$0xff] }
 0x32d   :  { %2264 = vst.msk [vmem:[#allocation2 + $0x278] sm:$0xff] %vm2188_vm3, %v2153_v20  ;;  %v9064_v35 = vsel %vm1935_vm1, %v1825_v51, %v2046_v42  ;;  %v9066_v1 = vsel %vm1936_vm4, %v1826_v59, %v2047_v45  ;;  %v1603_v62 = vpop.f32.mrf.mxu2  ;;  %v9069_v53 = vmax.f32 %v3097_v54, %v9058_v50  ;;  %v9084_v59 = vpop.permute.xlu1 %2523  ;;  %v12365_v20 = vld [vmem:[#allocation123_spill] sm:$0xff] }
 0x32e   :  { %v1705_v60 = vadd.f32 %v1603_v62, %v1055_v49  ;;  %v1440_v57 = vpop.f32.mrf.mxu0  ;;  %v1523_v33 = vpop.f32.mrf.mxu1  ;;  %v9072_v41 = vmax.f32 %v3225_v11, %v9066_v1  ;;  %v9075_v44 = vmax.f32 %v3224_v8, %v9064_v35  ;;  %v12364_v49 = vld [vmem:[#allocation59_spill] sm:$0xff] }
 0x32f   :  { %12360 = vst [vmem:[#allocation115_spill] sm:$0xff] %v9069_v53  ;;  %v1708_v58 = vadd.f32 %v1440_v57, %v892_v36  ;;  %v1709_v7 = vadd.f32 %v1523_v33, %v975_v5  ;;  %2754 = vrot.lane.b32.xlu2 %v8809_v9, %s6568_s20  ;;  %v12363_v36 = vld [vmem:[#allocation97_spill] sm:$0xff]  ;;  %v895_v11 = vadd.f32 %v12365_v20, %v12364_v49  ;;  %v12370_v20 = vld [vmem:[#allocation63_spill] sm:$0xff] }
 0x330   :  { %v1827_v51 = vadd.f32 %v8559_v56, %v1705_v60  ;;  %3121 = vrot.lane.b32.xlu1 %v9069_v53, %s6569_s21  ;;  %3248 = vrot.lane.b32.xlu0 %v9072_v41, %s6569_s21  ;;  %v1058_v31 = vadd.f32 %v12363_v36, %v12362_v30  ;;  %v978_v5 = vadd.f32 %v12367_v61, %v12366_v13  ;;  %v12372_v61 = vld [vmem:[#allocation64_spill] sm:$0xff] }
 0x331   :  { %v1830_v12 = vadd.f32 %v8538_v24, %v1708_v58  ;;  %v1831_v8 = vadd.f32 %v8540_v14, %v1709_v7  ;;  %v9088_v54 = vpop.permute.xlu2 %2910 }
 0x332   :  { %12361 = vst [vmem:[#allocation54_spill] sm:$0xff] %v9088_v54  ;;  %vm1937_vm5 = vcmp.gt.f32.partialorder %v1827_v51, 0.0  ;;  %v2048_v42 = vmul.f32 %v8023_v21, %v1827_v51 }
 0x333   :  { %vm1940_vm6 = vcmp.gt.f32.partialorder %v1830_v12, 0.0  ;;  %v2051_v45 = vmul.f32 %v8023_v21, %v1830_v12  ;;  %vm1941_vm7 = vcmp.gt.f32.partialorder %v1831_v8, 0.0  ;;  %v2052_v38 = vmul.f32 %v8023_v21, %v1831_v8 }
 0x334   :  { %v2158_v22 = vsel %vm1937_vm5, %v1827_v51, %v2048_v42 }
 0x335   :  { %2269 = vst.msk [vmem:[#allocation2 + $0x2a0] sm:$0xff] %vm2188_vm3, %v2158_v22  ;;  %v2161_v62 = vsel %vm1940_vm6, %v1830_v12, %v2051_v45  ;;  %v9100_v60 = vsel %vm1941_vm7, %v1831_v8, %v2052_v38  ;;  %v1606_v57 = vpop.f32.mrf.mxu2  ;;  %v12369_v22 = vld [vmem:[#allocation102_spill] sm:$0xff]  ;;  %vm2407_vm7 = vcmask 326752  }
 0x336   :  { %v1710_v33 = vadd.f32 %v1606_v57, %v1058_v31  ;;  %v1443_v58 = vpop.f32.mrf.mxu0  ;;  %v1526_v7 = vpop.f32.mrf.mxu1  ;;  %v3353_v47 = vmax.f32 %v9064_v35, %v2161_v62  ;;  %v12368_v31 = vld [vmem:[#allocation119_spill] sm:$0xff] }
 0x337   :  { %v1713_v2 = vadd.f32 %v1443_v58, %v895_v11  ;;  %v1714_v30 = vadd.f32 %v1526_v7, %v978_v5  ;;  %2732 = vrot.lane.b32.xlu2 %v8812_v18, %s6569_s21  ;;  %v1061_v49 = vadd.f32 %v12369_v22, %v12368_v31  ;;  %v12371_v11 = vld [vmem:[#allocation127_spill] sm:$0xff]  ;;  %v12373_v5 = vld [vmem:[#allocation41_spill] sm:$0xff] }
 0x338   :  { %v1832_v51 = vadd.f32 %v8559_v56, %v1710_v33  ;;  %3145 = vrot.lane.b32.xlu1 %v9069_v53, %s6568_s20  ;;  %v898_v13 = vadd.f32 %v12371_v11, %v12370_v20  ;;  %v981_v62 = vadd.f32 %v12373_v5, %v12372_v61  ;;  %v12377_v61 = vld [vmem:[#allocation131_spill] sm:$0xff] }
 0x339   :  { %v1835_v12 = vadd.f32 %v8538_v24, %v1713_v2  ;;  %v1836_v8 = vadd.f32 %v8540_v14, %v1714_v30  ;;  %v2777_v42 = vpop.permute.xlu1 %2776  ;;  %v9110_v45 = vpop.permute.xlu2 %2496 }
 0x33a   :  { %vm1942_vm8 = vcmp.gt.f32.partialorder %v1832_v51, 0.0  ;;  %v2053_v35 = vmul.f32 %v8023_v21, %v1832_v51  ;;  %2779 = vst.msk [vmem:[#allocation3 + $0x48] sm:$0xff] %vm2380_vm2, %v2777_v42 }
 0x33b   :  { %vm1945_vm9 = vcmp.gt.f32.partialorder %v1835_v12, 0.0  ;;  %v2056_v38 = vmul.f32 %v8023_v21, %v1835_v12  ;;  %vm1946_vm10 = vcmp.gt.f32.partialorder %v1836_v8, 0.0  ;;  %v2057_v36 = vmul.f32 %v8023_v21, %v1836_v8 }
 0x33c   :  { %v2163_v2 = vsel %vm1942_vm8, %v1832_v51, %v2053_v35  ;;  %vm2389_vm8 = vcmask 687552  }
 0x33d   :  { %2274 = vst.msk [vmem:[#allocation2 + $0x2c8] sm:$0xff] %vm2188_vm3, %v2163_v2  ;;  %v2166_v57 = vsel %vm1945_vm9, %v1835_v12, %v2056_v38  ;;  %v9123_v33 = vsel %vm1946_vm10, %v1836_v8, %v2057_v36  ;;  %v1609_v58 = vpop.f32.mrf.mxu2  ;;  %v12375_v2 = vld [vmem:[#allocation101_spill] sm:$0xff]  ;;  %vm2394_vm9 = vcmask 917152   ;;  %vm2399_vm10 = vcmask 1048448  }
 0x33e   :  { %2277 = vst [vmem:[#allocation2 + $0x2e0] sm:$0xff] %v2166_v57  ;;  %v1715_v7 = vadd.f32 %v1609_v58, %v1061_v49  ;;  %v1446_v30 = vpop.f32.mrf.mxu0  ;;  %v1529_v42 = vpop.f32.mrf.mxu1  ;;  %v9125_v53 = vmax.f32 %v3353_v47, %v2166_v57  ;;  %v12374_v49 = vld [vmem:[#allocation124_spill] sm:$0xff]  ;;  %v12379_v57 = vld [vmem:[#allocation106_spill] sm:$0xff] }
 0x33f   :  { %2278 = vst [vmem:[#allocation2 + $0x2e8] sm:$0xff] %v9123_v33  ;;  %v1718_v51 = vadd.f32 %v1446_v30, %v898_v13  ;;  %v1719_v35 = vadd.f32 %v1529_v42, %v981_v62  ;;  %2756 = vrot.lane.b32.xlu2 %v8812_v18, %s6568_s20  ;;  %v1064_v20 = vadd.f32 %v12375_v2, %v12374_v49  ;;  %v12376_v13 = vld [vmem:[#allocation67_spill] sm:$0xff]  ;;  %v12378_v62 = vld [vmem:[#allocation68_spill] sm:$0xff] }
 0x340   :  { %v1837_v31 = vadd.f32 %v8559_v56, %v1715_v7  ;;  %3246 = vrot.lane.b32.xlu1 %v9075_v44, %s6569_s21  ;;  %3375 = vrot.lane.b32.xlu0 %v9125_v53, %s6569_s21  ;;  %v901_v5 = vadd.f32 %v12377_v61, %v12376_v13  ;;  %v984_v58 = vadd.f32 %v12379_v57, %v12378_v62  ;;  %v9162_v2 = vld [vmem:[#allocation2 + $0x2a0] sm:$0xff] }
 0x341   :  { %v1840_v12 = vadd.f32 %v8538_v24, %v1718_v51  ;;  %v1841_v47 = vadd.f32 %v8540_v14, %v1719_v35  ;;  %v9137_v8 = vpop.permute.xlu2 %2474 }
 0x342   :  { %vm1947_vm12 = vcmp.gt.f32.partialorder %v1837_v31, 0.0  ;;  %v2058_v38 = vmul.f32 %v8023_v21, %v1837_v31 }
 0x343   :  { %vm1950_vm13 = vcmp.gt.f32.partialorder %v1840_v12, 0.0  ;;  %v2061_v36 = vmul.f32 %v8023_v21, %v1840_v12  ;;  %vm1951_vm15 = vcmp.gt.f32.partialorder %v1841_v47, 0.0  ;;  %v2062_v22 = vmul.f32 %v8023_v21, %v1841_v47 }
 0x344   :  { %v2168_v11 = vsel %vm1947_vm12, %v1837_v31, %v2058_v38  ;;  %vm2412_vm12 = vcmask 556352  }
 0x345   :  { %2279 = vst.msk [vmem:[#allocation2 + $0x2f0] sm:$0xff] %vm2188_vm3, %v2168_v11  ;;  %v2171_v7 = vsel %vm1950_vm13, %v1840_v12, %v2061_v36  ;;  %v2172_v30 = vsel %vm1951_vm15, %v1841_v47, %v2062_v22  ;;  %v1612_v42 = vpop.f32.mrf.mxu2  ;;  %v3221_v22 = vld [vmem:[#allocation2 + $0x278] sm:$0xff]  ;;  %vm2418_vm13 = vcmask 785952   ;;  %vm2423_vm15 = vcmask 1015552  }
 0x346   :  { %2282 = vst [vmem:[#allocation2 + $0x308] sm:$0xff] %v2171_v7  ;;  %v1720_v51 = vadd.f32 %v1612_v42, %v1064_v20  ;;  %v1449_v35 = vpop.f32.mrf.mxu0  ;;  %v1532_v26 = vpop.f32.mrf.mxu1  ;;  %v12380_v20 = vld [vmem:[#allocation128_spill] sm:$0xff] }
 0x347   :  { %2283 = vst [vmem:[#allocation2 + $0x310] sm:$0xff] %v2172_v30  ;;  %v1723_v4 = vadd.f32 %v1449_v35, %v901_v5  ;;  %v1724_v54 = vadd.f32 %v1532_v26, %v984_v58  ;;  %3297 = vrot.lane.b32.xlu2 %v8910_v16, %s6568_s20 }
 0x348   :  { %v1842_v31 = vadd.f32 %v8559_v56, %v1720_v51  ;;  %3270 = vrot.lane.b32.xlu1 %v9075_v44, %s6568_s20  ;;  %3399 = vrot.lane.b32.xlu0 %v9125_v53, %s6568_s20  ;;  %v9179_v51 = vpop.permute.xlu0 %2652 }
 0x349   :  { %v1845_v12 = vadd.f32 %v8538_v24, %v1723_v4  ;;  %v1846_v47 = vadd.f32 %v8540_v14, %v1724_v54  ;;  %v2499_v38 = vpop.permute.xlu2 %2498  ;;  %v2906_v36 = vpop.permute.xlu1 %2905  ;;  %v12381_v24 = vld [vmem:[#allocation45_spill] sm:$0xff]  ;;  %v3226_v54 = vmax.f32 %v9058_v50, %v3221_v22  ;;  %v12385_v22 = vld [vmem:[#allocation46_spill] sm:$0xff] }
 0x34a   :  { %vm1952_vm1 = vcmp.gt.f32.partialorder %v1842_v31, 0.0  ;;  %v2063_v26 = vmul.f32 %v8023_v21, %v1842_v31  ;;  %2908 = vst.msk [vmem:[#allocation3 + $0x60] sm:$0xff] %vm2380_vm2, %v2906_v36  ;;  %v1067_v4 = vadd.f32 %v12381_v24, %v12380_v20  ;;  %v12384_v36 = vld [vmem:[#allocation136_spill] sm:$0xff] }
 0x34b   :  { %vm1955_vm4 = vcmp.gt.f32.partialorder %v1845_v12, 0.0  ;;  %v2066_v16 = vmul.f32 %v8023_v21, %v1845_v12  ;;  %vm1956_vm5 = vcmp.gt.f32.partialorder %v1846_v47, 0.0  ;;  %v2067_v49 = vmul.f32 %v8023_v21, %v1846_v47 }
 0x34c   :  { %v2173_v14 = vsel %vm1952_vm1, %v1842_v31, %v2063_v26  ;;  %v9169_v58 = vmax.f32 %v3226_v54, %v9162_v2  ;;  %v12383_v31 = vld [vmem:[#allocation105_spill] sm:$0xff]  ;;  %v2503_v26 = vsel %vm172_vm0, %v12385_v22, %v9110_v45  ;;  %vm2434_vm1 = vcmask 1048544  }
 0x34d   :  { %2284 = vst.msk [vmem:[#allocation2 + $0x318] sm:$0xff] %vm2188_vm3, %v2173_v14  ;;  %v2176_v11 = vsel %vm1955_vm4, %v1845_v12, %v2066_v16  ;;  %v2177_v13 = vsel %vm1956_vm5, %v1846_v47, %v2067_v49  ;;  %v1615_v61 = vpop.f32.mrf.mxu2  ;;  %vm2430_vm4 = vcmask 31744   ;;  %vm2436_vm5 = vcmask 195584  }
 0x34e   :  { %2287 = vst [vmem:[#allocation2 + $0x330] sm:$0xff] %v2176_v11  ;;  %v1725_v5 = vadd.f32 %v1615_v61, %v1067_v4  ;;  %v1452_v62 = vpop.f32.mrf.mxu0  ;;  %v1535_v57 = vpop.f32.mrf.mxu1  ;;  %v2504_v11 = vsel %vm172_vm0, %v9110_v45, %v2499_v38 }
 0x34f   :  { %12382 = vst [vmem:[#allocation117_spill] sm:$0xff] %v9169_v58  ;;  %2859 = vrot.lane.b32.xlu2 %v8876_v63, %s6569_s21  ;;  %v12387_v62 = vld [vmem:[#allocation137_spill] sm:$0xff] }
 0x350   :  { %2288 = vst [vmem:[#allocation2 + $0x338] sm:$0xff] %v2177_v13  ;;  %v1847_v7 = vadd.f32 %v8559_v56, %v1725_v5  ;;  %3250 = vrot.lane.b32.xlu1 %v9169_v58, %s6569_s21 }
 0x351   :  { %v9176_v50 = vpop.permute.xlu2 %3039  ;;  %v9200_v24 = vpop.permute.xlu0 %2500 }
 0x352   :  { %vm1957_vm6 = vcmp.gt.f32.partialorder %v1847_v7, 0.0  ;;  %v2068_v30 = vmul.f32 %v8023_v21, %v1847_v7  ;;  %v2473_v42 = vpop.permute.xlu1 %2472  ;;  %v2505_v13 = vsel %vm172_vm0, %v2499_v38, %v9200_v24 }
 0x353   :  { %v2479_v12 = vsel %vm2335_vm11, %v12383_v31, %v2473_v42  ;;  %v2480_v21 = vsel %vm2335_vm11, %v2473_v42, %v9137_v8 }
 0x354   :  { %v2178_v35 = vsel %vm1957_vm6, %v1847_v7, %v2068_v30  ;;  %v2488_v56 = vmax.f32 %v12384_v36, %v2479_v12  ;;  %v2489_v4 = vmax.f32 %v8679_v10, %v2480_v21  ;;  %v3360_v36 = vld [vmem:[#allocation2 + $0x2f0] sm:$0xff] }
 0x355   :  { %2289 = vst.msk [vmem:[#allocation2 + $0x340] sm:$0xff] %vm2188_vm3, %v2178_v35  ;;  %v1618_v47 = vpop.f32.mrf.mxu2  ;;  %vm2401_vm3 = vcmask 97280  }
 0x356   :  { %v9188_v16 = vmax.f32 %v2488_v56, %v2503_v26  ;;  %v9211_v61 = vmax.f32 %v2489_v4, %v2504_v11  ;;  %v3350_v47 = vld [vmem:[#allocation2 + $0x2c8] sm:$0xff] }
 0x357   :  { %2883 = vrot.lane.b32.xlu2 %v8876_v63, %s6568_s20 }
 0x358   :  { %2530 = vrot.lane.b32.xlu0 %v9188_v16, %s6570_s0  ;;  %2534 = vrot.lane.b32.xlu1 %v9188_v16, %s6571_s19 }
 0x359   :  { %v2602_v49 = vpop.permute.xlu2 %2601 }
 0x35a   :  { %v9198_v20 = vpop.permute.xlu1 %2476 }
 0x35b   :  { %v2481_v14 = vsel %vm2335_vm11, %v9137_v8, %v9198_v20 }
 0x35c   :  { %v2490_v54 = vmax.f32 %v8771_v34, %v2481_v14  ;;  %v12386_v34 = vld [vmem:[#allocation107_spill] sm:$0xff] }
 0x35d   :  { %v2608_v45 = vsel %vm2335_vm11, %v12386_v34, %v2602_v49 }
 0x35e   :  { %v9215_v5 = vmax.f32 %v2490_v54, %v2505_v13  ;;  %v2617_v57 = vmax.f32 %v12387_v62, %v2608_v45  ;;  %v12392_v45 = vld [vmem:[#allocation138_spill] sm:$0xff] }
 0x35f   :  { %2861 = vrot.lane.b32.xlu2 %v8879_v43, %s6569_s21 }
 0x360   :  { %2540 = vrot.lane.b32.xlu0 %v9211_v61, %s6572_s22  ;;  %2553 = vrot.lane.b32.xlu1 %v9215_v5, %s6573_s23 }
 0x361   :  { %v2626_v10 = vpop.permute.xlu2 %2625  ;;  %v9275_v14 = vpop.permute.xlu0 %2629 }
 0x362   :  { %v3035_v8 = vpop.permute.xlu1 %3034  ;;  %v2632_v38 = vsel %vm172_vm0, %v8575_v23, %v2626_v10  ;;  %v3354_v23 = vmax.f32 %v9066_v1, %v9100_v60  ;;  %v3355_v1 = vmax.f32 %v9162_v2, %v3350_v47 }
 0x363   :  { %3037 = vst.msk [vmem:[#allocation3 + $0x78] sm:$0xff] %vm2380_vm2, %v3035_v8  ;;  %v9229_v7 = vmax.f32 %v2617_v57, %v2632_v38 }
 0x364   :  { %v9242_v35 = vmax.f32 %v3354_v23, %v9123_v33 }
 0x367   :  { %2885 = vrot.lane.b32.xlu2 %v8879_v43, %s6568_s20 }
 0x368   :  { %2654 = vrot.lane.b32.xlu1 %v9229_v7, %s6568_s20  ;;  %2549 = vrot.lane.b32.xlu0 %v9215_v5, %s6574_s24 }
 0x369   :  { %v2604_v30 = vpop.permute.xlu2 %2603 }
 0x36a   :  { %v9235_v42 = vpop.permute.xlu1 %2605  ;;  %v2609_v33 = vsel %vm2335_vm11, %v2602_v49, %v2604_v30 }
 0x36b   :  { %v2618_v2 = vmax.f32 %v8738_v46, %v2609_v33  ;;  %v2610_v49 = vsel %vm2335_vm11, %v2604_v30, %v9235_v42 }
 0x36c   :  { %v2619_v54 = vmax.f32 %v8948_v32, %v2610_v49 }
 0x36f   :  { %3426 = vrot.lane.b32.xlu2 %v8976_v15, %s6568_s20  ;;  %v9252_v15 = vmax.f32 %v3355_v1, %v3360_v36 }
 0x370   :  { %3274 = vrot.lane.b32.xlu1 %v9169_v58, %s6568_s20  ;;  %3377 = vrot.lane.b32.xlu0 %v9242_v35, %s6569_s21  ;;  %v6193_v58 = vld [vmem:[%s12045_s2 + $0x380] sm:$0xff] }
 0x371   :  { %v2628_v31 = vpop.permute.xlu2 %2627  ;;  %12388 = vst [vmem:[#allocation121_spill] sm:$0xff] %v9252_v15 }
 0x372   :  { %v3164_v12 = vpop.permute.xlu1 %3163  ;;  %v2633_v22 = vsel %vm172_vm0, %v2626_v10, %v2628_v31  ;;  %v2634_v46 = vsel %vm172_vm0, %v2628_v31, %v9275_v14 }
 0x373   :  { %3166 = vst.msk [vmem:[#allocation3 + $0x90] sm:$0xff] %vm2380_vm2, %v3164_v12  ;;  %v9267_v26 = vmax.f32 %v2618_v2, %v2633_v22  ;;  %v9283_v11 = vmax.f32 %v2619_v54, %v2634_v46 }
 0x377   :  { %2988 = vrot.lane.b32.xlu2 %v8951_v37, %s6569_s21 }
 0x378   :  { %3379 = vrot.lane.b32.xlu1 %v9252_v15, %s6569_s21  ;;  %2663 = vrot.lane.b32.xlu0 %v9229_v7, %s6571_s19 }
 0x379   :  { %v9258_v60 = vpop.permute.xlu2 %3168 }
 0x37a   :  { %12389 = vst [vmem:[#allocation57_spill] sm:$0xff] %v9258_v60  ;;  %v9261_v56 = vpop.permute.xlu1 %2734 }
 0x37b   :  { %12390 = vst [vmem:[#allocation120_spill] sm:$0xff] %v9261_v56 }
 0x37f   :  { %3012 = vrot.lane.b32.xlu2 %v8951_v37, %s6568_s20 }
 0x380   :  { %3403 = vrot.lane.b32.xlu1 %v9252_v15, %s6568_s20  ;;  %2669 = vrot.lane.b32.xlu0 %v9267_v26, %s6572_s22 }
 0x381   :  { %v2731_v21 = vpop.permute.xlu2 %2730 }
 0x382   :  { %v3293_v4 = vpop.permute.xlu1 %3292  ;;  %v2737_v10 = vsel %vm2335_vm11, %v8602_v0, %v2731_v21 }
 0x383   :  { %3295 = vst.msk [vmem:[#allocation3 + $0xa8] sm:$0xff] %vm2380_vm2, %v3293_v4  ;;  %v2746_v8 = vmax.f32 %v12392_v45, %v2737_v10 }
 0x387   :  { %2990 = vrot.lane.b32.xlu2 %v8954_v40, %s6569_s21 }
 0x388   :  { %2682 = vrot.lane.b32.xlu1 %v9283_v11, %s6573_s23  ;;  %2678 = vrot.lane.b32.xlu0 %v9283_v11, %s6574_s24 }
 0x389   :  { %v2755_v13 = vpop.permute.xlu2 %2754 }
 0x38a   :  { %v9291_v34 = vpop.permute.xlu1 %2863  ;;  %v2761_v32 = vsel %vm172_vm0, %v8631_v55, %v2755_v13  ;;  %v9305_v55 = vpop.permute.xlu0 %2758 }
 0x38b   :  { %12391 = vst [vmem:[#allocation58_spill] sm:$0xff] %v9291_v34  ;;  %v2770_v38 = vmax.f32 %v2746_v8, %v2761_v32 }
 0x38c   :  { %12393 = vst [vmem:[#allocation122_spill] sm:$0xff] %v9305_v55 }
 0x38f   :  { %3014 = vrot.lane.b32.xlu2 %v8954_v40, %s6568_s20 }
 0x390   :  { %2788 = vrot.lane.b32.xlu1 %v2770_v38, %s6570_s0  ;;  %2783 = vrot.lane.b32.xlu0 %v2770_v38, %s6568_s20 }
 0x391   :  { %v2733_v62 = vpop.permute.xlu2 %2732 }
 0x392   :  { %v3422_v57 = vpop.permute.xlu1 %3421  ;;  %v2739_v0 = vsel %vm2335_vm11, %v2733_v62, %v9261_v56  ;;  %v2738_v31 = vsel %vm2335_vm11, %v2731_v21, %v2733_v62  ;;  %v9324_v22 = vpop.permute.xlu0 %2887  ;;  %v6192_v56 = vld [vmem:[%s12045_s2 + $0x378] sm:$0xff] }
 0x393   :  { %3424 = vst.msk [vmem:[#allocation3 + $0xc0] sm:$0xff] %vm2380_vm2, %v3422_v57  ;;  %v2748_v30 = vmax.f32 %v8812_v18, %v2739_v0  ;;  %v2747_v33 = vmax.f32 %v8809_v9, %v2738_v31 }
 0x397   :  { %3117 = vrot.lane.b32.xlu2 %v9016_v29, %s6569_s21 }
 0x398   :  { %2792 = vrot.lane.b32.xlu0 %v2770_v38, %s6571_s19 }
 0x399   :  { %v2757_v23 = vpop.permute.xlu2 %2756 }
 0x39a   :  { %v2763_v12 = vsel %vm172_vm0, %v2757_v23, %v9305_v55  ;;  %v9312_v47 = vpop.permute.xlu1 %2992  ;;  %v2762_v1 = vsel %vm172_vm0, %v2755_v13, %v2757_v23  ;;  %v9334_v9 = vpop.permute.xlu0 %3016  ;;  %v12395_v13 = vld [vmem:[#allocation139_spill] sm:$0xff]  ;;  %v12399_v55 = vld [vmem:[#allocation110_spill] sm:$0xff] }
 0x39b   :  { %v9314_v36 = vmax.f32 %v2748_v30, %v2763_v12  ;;  %v9322_v18 = vmax.f32 %v2747_v33, %v2762_v1 }
 0x39d   :  { %2811 = vrot.lane.b32.xlu1 %v9314_v36, %s6573_s23 }
 0x39f   :  { %3141 = vrot.lane.b32.xlu2 %v9016_v29, %s6568_s20 }
 0x3a0   :  { %2798 = vrot.lane.b32.xlu0 %v9322_v18, %s6572_s22 }
 0x3a1   :  { %v9328_v2 = vpop.permute.xlu2 %3297 }
 0x3a2   :  { %12394 = vst [vmem:[#allocation61_spill] sm:$0xff] %v9328_v2  ;;  %v9330_v21 = vpop.permute.xlu1 %3121  ;;  %v9344_v54 = vpop.permute.xlu0 %3248 }
 0x3a7   :  { %3119 = vrot.lane.b32.xlu2 %v9019_v17, %s6569_s21 }
 0x3a8   :  { %2807 = vrot.lane.b32.xlu0 %v9314_v36, %s6574_s24 }
 0x3a9   :  { %v2860_v49 = vpop.permute.xlu2 %2859 }
 0x3aa   :  { %v9338_v4 = vpop.permute.xlu1 %3145  ;;  %v2866_v46 = vsel %vm2335_vm11, %v8661_v28, %v2860_v49 }
 0x3ab   :  { %v2875_v10 = vmax.f32 %v12395_v13, %v2866_v46  ;;  %v12397_v13 = vld [vmem:[#allocation33_spill] sm:$0xff] }
 0x3af   :  { %3143 = vrot.lane.b32.xlu2 %v9019_v17, %s6568_s20 }
 0x3b1   :  { %v2884_v32 = vpop.permute.xlu2 %2883 }
 0x3b2   :  { %v2890_v45 = vsel %vm172_vm0, %v8691_v27, %v2884_v32  ;;  %v9349_v8 = vpop.permute.xlu1 %3246  ;;  %v9355_v28 = vpop.permute.xlu0 %3375 }
 0x3b3   :  { %v2899_v38 = vmax.f32 %v2875_v10, %v2890_v45 }
 0x3b5   :  { %2917 = vrot.lane.b32.xlu1 %v2899_v38, %s6570_s0  ;;  %2912 = vrot.lane.b32.xlu0 %v2899_v38, %s6568_s20 }
 0x3b7   :  { %2525 = vrot.lane.b32.xlu2 %v9188_v16, %s6568_s20 }
 0x3b9   :  { %v9357_v62 = vpop.permute.xlu2 %2861 }
 0x3ba   :  { %v9359_v57 = vpop.permute.xlu1 %3270  ;;  %v2867_v27 = vsel %vm2335_vm11, %v2860_v49, %v9357_v62  ;;  %v9373_v31 = vpop.permute.xlu0 %3399 }
 0x3bb   :  { %v2876_v0 = vmax.f32 %v8876_v63, %v2867_v27 }
 0x3bd   :  { %2921 = vrot.lane.b32.xlu0 %v2899_v38, %s6571_s19 }
 0x3bf   :  { %2544 = vrot.lane.b32.xlu2 %v9211_v61, %s6575_s25 }
 0x3c1   :  { %v9367_v30 = vpop.permute.xlu2 %2885 }
 0x3c2   :  { %v2891_v16 = vsel %vm172_vm0, %v2884_v32, %v9367_v30  ;;  %v9371_v23 = vpop.permute.xlu1 %3250 }
 0x3c3   :  { %v9375_v12 = vmax.f32 %v2876_v0, %v2891_v16 }
 0x3c5   :  { %2927 = vrot.lane.b32.xlu0 %v9375_v12, %s6572_s22 }
 0x3c7   :  { %2558 = vrot.lane.b32.xlu2 %v9215_v5, %s6576_s26 }
 0x3c9   :  { %v9381_v61 = vpop.permute.xlu2 %3426 }
 0x3ca   :  { %12396 = vst [vmem:[#allocation125_spill] sm:$0xff] %v9381_v61  ;;  %v9383_v63 = vpop.permute.xlu1 %2534  ;;  %v9385_v1 = vpop.permute.xlu0 %2530  ;;  %v6204_v61 = vld [vmem:[%s12045_s2 + $0x3d8] sm:$0xff] }
 0x3cb   :  { %2538 = vst.msk [vmem:[#allocation3 + $0x20] sm:$0xff] %vm2401_vm3, %v9383_v63 }
 0x3cf   :  { %2659 = vrot.lane.b32.xlu2 %v9229_v7, %s6570_s0  ;;  %v12398_v7 = vld [vmem:[#allocation49_spill] sm:$0xff] }
 0x3d1   :  { %v9391_v33 = vpop.permute.xlu2 %2988 }
 0x3d2   :  { %v9393_v49 = vpop.permute.xlu1 %2553  ;;  %v2541_v46 = vpop.permute.xlu0 %2540  ;;  %v2995_v5 = vsel %vm2335_vm11, %v8716_v48, %v9391_v33  ;;  %v6231_v48 = vld [vmem:[%s12045_s2 + $0x4b0] sm:$0xff] }
 0x3d3   :  { %2543 = vst.msk [vmem:[#allocation3 + $0x20] sm:$0xff] %vm2407_vm7, %v2541_v46  ;;  %v3004_v10 = vmax.f32 %v12397_v13, %v2995_v5  ;;  %v6232_v46 = vld [vmem:[%s12045_s2 + $0x4b8] sm:$0xff]  ;;  %3861 = vmatpush.msrb.mxu3 %v6231_v48  ;;  %v6229_v5 = vld [vmem:[%s12045_s2 + $0x4a0] sm:$0xff]  ;;  %v6223_v48 = vld [vmem:[%s12045_s2 + $0x470] sm:$0xff] }
 0x3d4   :  { %3984 = vmatpush.msra.mxu0 %v6232_v46  ;;  %v6219_v46 = vld [vmem:[%s12045_s2 + $0x450] sm:$0xff] }
 0x3d6   :  { %3985 = vmatpush.msra.mxu0 %v6229_v5  ;;  %v6217_v5 = vld [vmem:[%s12045_s2 + $0x440] sm:$0xff] }
 0x3d7   :  { %3272 = vrot.lane.b32.xlu2 %v9072_v41, %s6568_s20 }
 0x3d9   :  { %v9402_v32 = vpop.permute.xlu2 %3012 }
 0x3da   :  { %v3019_v45 = vsel %vm172_vm0, %v12398_v7, %v9402_v32  ;;  %v2655_v38 = vpop.permute.xlu1 %2654  ;;  %v9407_v27 = vpop.permute.xlu0 %2549 }
 0x3db   :  { %v3028_v0 = vmax.f32 %v3004_v10, %v3019_v45  ;;  %v2656_v16 = vsel %vm172_vm0, %v9179_v51, %v2655_v38  ;;  %v6228_v51 = vld [vmem:[%s12045_s2 + $0x498] sm:$0xff]  ;;  %v6225_v45 = vld [vmem:[%s12045_s2 + $0x480] sm:$0xff]  ;;  %v6226_v38 = vld [vmem:[%s12045_s2 + $0x488] sm:$0xff] }
 0x3dc   :  { %2658 = vst.msk [vmem:[#allocation3 + $0x30] sm:$0xff] %vm2389_vm8, %v2656_v16  ;;  %3862 = vmatpush.msrb.mxu3 %v6228_v51  ;;  %3986 = vmatpush.msra.mxu0 %v6226_v38  ;;  %v6222_v16 = vld [vmem:[%s12045_s2 + $0x468] sm:$0xff]  ;;  %v6220_v51 = vld [vmem:[%s12045_s2 + $0x458] sm:$0xff] }
 0x3dd   :  { %3046 = vrot.lane.b32.xlu1 %v3028_v0, %s6570_s0  ;;  %3041 = vrot.lane.b32.xlu0 %v3028_v0, %s6568_s20 }
 0x3de   :  { %3863 = vmatpush.msrb.mxu3 %v6225_v45  ;;  %3987 = vmatpush.msra.mxu0 %v6223_v48  ;;  %v6214_v48 = vld [vmem:[%s12045_s2 + $0x428] sm:$0xff] }
 0x3df   :  { %3401 = vrot.lane.b32.xlu2 %v9242_v35, %s6568_s20 }
 0x3e0   :  { %3864 = vmatpush.msrb.mxu3 %v6222_v16  ;;  %3988 = vmatpush.msra.mxu0 %v6220_v51  ;;  %v6210_v51 = vld [vmem:[%s12045_s2 + $0x408] sm:$0xff] }
 0x3e1   :  { %v9428_v13 = vpop.permute.xlu2 %2990 }
 0x3e2   :  { %v9430_v10 = vpop.permute.xlu1 %3274  ;;  %v9432_v7 = vpop.permute.xlu0 %3377  ;;  %3865 = vmatpush.msrb.mxu3 %v6219_v46  ;;  %3989 = vmatpush.msra.mxu0 %v6217_v5  ;;  %v6280_v46 = vld [vmem:[%s12045_s2 + $0x638] sm:$0xff]  ;;  %v6277_v5 = vld [vmem:[%s12045_s2 + $0x620] sm:$0xff] }
 0x3e3   :  { %4025 = vmatpush.msra.mxu1 %v6280_v46  ;;  %v6274_v46 = vld [vmem:[%s12045_s2 + $0x608] sm:$0xff] }
 0x3e4   :  { %3990 = vmatpush.msra.mxu0 %v6214_v48  ;;  %v6208_v48 = vld [vmem:[%s12045_s2 + $0x3f8] sm:$0xff] }
 0x3e5   :  { %3050 = vrot.lane.b32.xlu0 %v3028_v0, %s6571_s19  ;;  %v6216_v0 = vld [vmem:[%s12045_s2 + $0x438] sm:$0xff]  ;;  %4026 = vmatpush.msra.mxu1 %v6277_v5  ;;  %v6201_v5 = vld [vmem:[%s12045_s2 + $0x3c0] sm:$0xff] }
 0x3e6   :  { %3866 = vmatpush.msrb.mxu3 %v6216_v0  ;;  %v6211_v0 = vld [vmem:[%s12045_s2 + $0x410] sm:$0xff] }
 0x3e7   :  { %2673 = vrot.lane.b32.xlu2 %v9267_v26, %s6575_s25  ;;  %v6213_v26 = vld [vmem:[%s12045_s2 + $0x420] sm:$0xff]  ;;  %3991 = vmatpush.msra.mxu0 %v6211_v0 }
 0x3e8   :  { %3867 = vmatpush.msrb.mxu3 %v6213_v26  ;;  %v6207_v26 = vld [vmem:[%s12045_s2 + $0x3f0] sm:$0xff]  ;;  %4027 = vmatpush.msra.mxu1 %v6274_v46  ;;  %v6198_v46 = vld [vmem:[%s12045_s2 + $0x3a8] sm:$0xff] }
 0x3e9   :  { %v9461_v45 = vpop.permute.xlu2 %3014  ;;  %3992 = vmatpush.msra.mxu0 %v6208_v48 }
 0x3ea   :  { %v9463_v38 = vpop.permute.xlu1 %3379  ;;  %v9465_v16 = vpop.permute.xlu0 %2663  ;;  %3868 = vmatpush.msrb.mxu3 %v6210_v51  ;;  %v6271_v51 = vld [vmem:[%s12045_s2 + $0x5f0] sm:$0xff] }
 0x3eb   :  { %2667 = vst.msk [vmem:[#allocation3 + $0x38] sm:$0xff] %vm2401_vm3, %v9465_v16  ;;  %4028 = vmatpush.msra.mxu1 %v6271_v51  ;;  %v6195_v51 = vld [vmem:[%s12045_s2 + $0x390] sm:$0xff] }
 0x3ec   :  { %3869 = vmatpush.msrb.mxu3 %v6207_v26  ;;  %v6202_v26 = vld [vmem:[%s12045_s2 + $0x3c8] sm:$0xff] }
 0x3ee   :  { %3870 = vmatpush.msrb.mxu3 %v6204_v61  ;;  %v6268_v61 = vld [vmem:[%s12045_s2 + $0x5d8] sm:$0xff] }
 0x3ef   :  { %2687 = vrot.lane.b32.xlu2 %v9283_v11, %s6576_s26  ;;  %v6205_v11 = vld [vmem:[%s12045_s2 + $0x3e0] sm:$0xff]  ;;  %4029 = vmatpush.msra.mxu1 %v6268_v61 }
 0x3f0   :  { %3993 = vmatpush.msra.mxu0 %v6205_v11  ;;  %3871 = vmatpush.msrb.mxu3 %v6201_v5  ;;  %v6199_v11 = vld [vmem:[%s12045_s2 + $0x3b0] sm:$0xff]  ;;  %v6262_v5 = vld [vmem:[%s12045_s2 + $0x5a8] sm:$0xff] }
 0x3f1   :  { %v9501_v2 = vpop.permute.xlu2 %3117 }
 0x3f2   :  { %v9509_v60 = vpop.permute.xlu1 %3403  ;;  %v2670_v0 = vpop.permute.xlu0 %2669  ;;  %v3124_v48 = vsel %vm2335_vm11, %v12399_v55, %v9501_v2  ;;  %3994 = vmatpush.msra.mxu0 %v6202_v26  ;;  %v6265_v55 = vld [vmem:[%s12045_s2 + $0x5c0] sm:$0xff]  ;;  %3872 = vmatpush.msrb.mxu3 %v6198_v46 }
 0x3f3   :  { %2672 = vst.msk [vmem:[#allocation3 + $0x38] sm:$0xff] %vm2407_vm7, %v2670_v0  ;;  %v6196_v0 = vld [vmem:[%s12045_s2 + $0x398] sm:$0xff]  ;;  %4030 = vmatpush.msra.mxu1 %v6265_v55  ;;  %v6259_v55 = vld [vmem:[%s12045_s2 + $0x590] sm:$0xff] }
 0x3f4   :  { %3995 = vmatpush.msra.mxu0 %v6199_v11  ;;  %3873 = vmatpush.msrb.mxu3 %v6195_v51  ;;  %v6256_v51 = vld [vmem:[%s12045_s2 + $0x578] sm:$0xff] }
 0x3f5   :  { %4031 = vmatpush.msra.mxu1 %v6262_v5  ;;  %v6253_v5 = vld [vmem:[%s12045_s2 + $0x560] sm:$0xff] }
 0x3f6   :  { %3996 = vmatpush.msra.mxu0 %v6196_v0  ;;  %3874 = vmatpush.msrb.mxu3 %v6192_v56  ;;  %v6186_v0 = vld [vmem:[%s12045_s2 + $0x348] sm:$0xff]  ;;  %v6187_v56 = vld [vmem:[%s12045_s2 + $0x350] sm:$0xff] }
 0x3f7   :  { %2802 = vrot.lane.b32.xlu2 %v9322_v18, %s6575_s25  ;;  %v12400_v18 = vld [vmem:[#allocation94_spill] sm:$0xff]  ;;  %4032 = vmatpush.msra.mxu1 %v6259_v55 }
 0x3f8   :  { %v3133_v26 = vmax.f32 %v12400_v18, %v3124_v48  ;;  %v6189_v18 = vld [vmem:[%s12045_s2 + $0x360] sm:$0xff]  ;;  %3997 = vmatpush.msra.mxu0 %v6193_v58  ;;  %v3253_v58 = vsel %vm2335_vm11, %v8855_v52, %v9349_v8  ;;  %v3277_v52 = vsel %vm172_vm0, %v8897_v19, %v9359_v57 }
 0x3f9   :  { %v9545_v61 = vpop.permute.xlu2 %3141  ;;  %3875 = vmatpush.msrb.mxu3 %v6189_v18  ;;  %4033 = vmatpush.msra.mxu1 %v6256_v51 }
 0x3fa   :  { %v3148_v46 = vsel %vm172_vm0, %v8825_v6, %v9545_v61  ;;  %v9556_v15 = vpop.permute.xlu1 %2682  ;;  %v9558_v48 = vpop.permute.xlu0 %2678  ;;  %v6190_v6 = vld [vmem:[%s12045_s2 + $0x368] sm:$0xff] }
 0x3fb   :  { %v3157_v11 = vmax.f32 %v3133_v26, %v3148_v46  ;;  %3998 = vmatpush.msra.mxu0 %v6190_v6  ;;  %v2868_v26 = vsel %vm2335_vm11, %v9357_v62, %v9291_v34  ;;  %3876 = vmatpush.msrb.mxu3 %v6186_v0  ;;  %v12401_v46 = vld [vmem:[#allocation38_spill] sm:$0xff]  ;;  %v2892_v6 = vsel %vm172_vm0, %v9367_v30, %v9324_v22  ;;  %v6247_v0 = vld [vmem:[%s12045_s2 + $0x530] sm:$0xff] }
 0x3fc   :  { %v3262_v55 = vmax.f32 %v12401_v46, %v3253_v58  ;;  %4034 = vmatpush.msra.mxu1 %v6253_v5  ;;  %v2877_v62 = vmax.f32 %v8879_v43, %v2868_v26  ;;  %v6244_v43 = vld [vmem:[%s12045_s2 + $0x518] sm:$0xff]  ;;  %v2996_v5 = vsel %vm2335_vm11, %v9391_v33, %v9428_v13  ;;  %v3020_v46 = vsel %vm172_vm0, %v9402_v32, %v9461_v45  ;;  %v6235_v33 = vld [vmem:[%s12045_s2 + $0x4d0] sm:$0xff] }
 0x3fd   :  { %3175 = vrot.lane.b32.xlu1 %v3157_v11, %s6570_s0  ;;  %3170 = vrot.lane.b32.xlu0 %v3157_v11, %s6568_s20 }
 0x3fe   :  { %3999 = vmatpush.msra.mxu0 %v6187_v56  ;;  %v3286_v51 = vmax.f32 %v3262_v55, %v3277_v52  ;;  %v9612_v30 = vmax.f32 %v2877_v62, %v2892_v6  ;;  %v3382_v56 = vsel %vm2335_vm11, %v8881_v39, %v9355_v28  ;;  %v12402_v39 = vld [vmem:[#allocation42_spill] sm:$0xff]  ;;  %v6238_v52 = vld [vmem:[%s12045_s2 + $0x4e8] sm:$0xff]  ;;  %v3021_v62 = vsel %vm172_vm0, %v9461_v45, %v9334_v9 }
 0x3ff   :  { %2816 = vrot.lane.b32.xlu2 %v9314_v36, %s6576_s26  ;;  %v6250_v36 = vld [vmem:[%s12045_s2 + $0x548] sm:$0xff]  ;;  %v3391_v26 = vmax.f32 %v12402_v39, %v3382_v56  ;;  %v12403_v56 = vld [vmem:[#allocation54_spill] sm:$0xff] }
 0x400   :  { %4035 = vmatpush.msra.mxu1 %v6250_v36 }
 0x401   :  { %v9595_v18 = vpop.permute.xlu2 %3119 }
 0x402   :  { %v2789_v34 = vpop.permute.xlu1 %2788  ;;  %v2784_v19 = vpop.permute.xlu0 %2783  ;;  %4036 = vmatpush.msra.mxu1 %v6247_v0 }
 0x403   :  { %v2785_v58 = vsel %vm172_vm0, %v9048_v3, %v2784_v19  ;;  %v6241_v3 = vld [vmem:[%s12045_s2 + $0x500] sm:$0xff] }
 0x404   :  { %2787 = vst.msk [vmem:[#allocation3 + $0x48] sm:$0xff] %vm2389_vm8, %v2785_v58  ;;  %4037 = vmatpush.msra.mxu1 %v6244_v43 }
 0x405   :  { %3304 = vrot.lane.b32.xlu1 %v3286_v51, %s6570_s0  ;;  %3179 = vrot.lane.b32.xlu0 %v3157_v11, %s6571_s19  ;;  %2791 = vst.msk [vmem:[#allocation3 + $0x48] sm:$0xff] %vm2394_vm9, %v2789_v34  ;;  %v3406_v11 = vsel %vm172_vm0, %v8921_v25, %v9373_v31  ;;  %v3005_v25 = vmax.f32 %v8951_v37, %v2996_v5 }
 0x406   :  { %4038 = vmatpush.msra.mxu1 %v6241_v3  ;;  %v3415_v36 = vmax.f32 %v3391_v26, %v3406_v11  ;;  %v2997_v37 = vsel %vm2335_vm11, %v9428_v13, %v9312_v47 }
 0x407   :  { %2936 = vrot.lane.b32.xlu2 %v9612_v30, %s6574_s24  ;;  %v9644_v6 = vmax.f32 %v3005_v25, %v3020_v46  ;;  %v3006_v0 = vmax.f32 %v8954_v40, %v2997_v37  ;;  %v3125_v40 = vsel %vm2335_vm11, %v9501_v2, %v9595_v18 }
 0x408   :  { %4039 = vmatpush.msra.mxu1 %v6238_v52 }
 0x409   :  { %v3144_v34 = vpop.permute.xlu2 %3143  ;;  %v9663_v43 = vmax.f32 %v3006_v0, %v3021_v62 }
 0x40a   :  { %v2793_v55 = vpop.permute.xlu0 %2792  ;;  %4040 = vmatpush.msra.mxu1 %v6235_v33  ;;  %v3150_v45 = vsel %vm172_vm0, %v3144_v34, %v9338_v4 }
 0x40b   :  { %2795 = vst.msk [vmem:[#allocation3 + $0x48] sm:$0xff] %vm2399_vm10, %v2793_v55 }
 0x40c   :  { %2796 = vst.msk [vmem:[#allocation3 + $0x50] sm:$0xff] %vm2401_vm3, %v2793_v55 }
 0x40d   :  { %3299 = vrot.lane.b32.xlu0 %v3286_v51, %s6568_s20  ;;  %3433 = vrot.lane.b32.xlu1 %v3415_v36, %s6570_s0 }
 0x40f   :  { %3056 = vrot.lane.b32.xlu2 %v9644_v6, %s6572_s22 }
 0x411   :  { %v2526_v32 = vpop.permute.xlu2 %2525 }
 0x412   :  { %v2527_v19 = vsel %vm172_vm0, %v9084_v59, %v2526_v32  ;;  %v2799_v58 = vpop.permute.xlu0 %2798 }
 0x413   :  { %2529 = vst.msk [vmem:[#allocation3 + $0x18] sm:$0xff] %vm2389_vm8, %v2527_v19 }
 0x414   :  { %2533 = vst.msk [vmem:[#allocation3 + $0x18] sm:$0xff] %vm2394_vm9, %v9385_v1 }
 0x415   :  { %2537 = vst.msk [vmem:[#allocation3 + $0x18] sm:$0xff] %vm2399_vm10, %v9383_v63  ;;  %3308 = vrot.lane.b32.xlu0 %v3286_v51, %s6571_s19  ;;  %2931 = vrot.lane.b32.xlu1 %v9375_v12, %s6575_s25  ;;  %v3149_v63 = vsel %vm172_vm0, %v9545_v61, %v3144_v34  ;;  %v3134_v12 = vmax.f32 %v9016_v29, %v3125_v40 }
 0x416   :  { %2801 = vst.msk [vmem:[#allocation3 + $0x50] sm:$0xff] %vm2407_vm7, %v2799_v58  ;;  %v3126_v29 = vsel %vm2335_vm11, %v9595_v18, %v9330_v21 }
 0x417   :  { %3069 = vrot.lane.b32.xlu2 %v9663_v43, %s6573_s23  ;;  %v3158_v13 = vmax.f32 %v3134_v12, %v3149_v63  ;;  %v3135_v61 = vmax.f32 %v9019_v17, %v3126_v29  ;;  %v3255_v17 = vsel %vm2335_vm11, %v9344_v54, %v9371_v23 }
 0x418   :  { %v3264_v34 = vmax.f32 %v9072_v41, %v3255_v17  ;;  %v3254_v41 = vsel %vm2335_vm11, %v9349_v8, %v9344_v54 }
 0x419   :  { %v2545_v59 = vpop.permute.xlu2 %2544  ;;  %v3159_v51 = vmax.f32 %v3135_v61, %v3150_v45  ;;  %v3263_v33 = vmax.f32 %v9075_v44, %v3254_v41  ;;  %v2302_v61 = vld [vmem:[#allocation2 + $0x38] sm:$0xff] }
 0x41a   :  { %2547 = vst.msk [vmem:[#allocation3 + $0x20] sm:$0xff] %vm2412_vm12, %v2545_v59  ;;  %v9687_v2 = vpop.permute.xlu0 %2807 }
 0x41b   :  { %2552 = vst.msk [vmem:[#allocation3 + $0x20] sm:$0xff] %vm2418_vm13, %v9407_v27  ;;  %v9693_v27 = vpop.permute.xlu1 %2811 }
 0x41c   :  { %v3602_v1 = vld [vmem:[#allocation3 + $0x18] sm:$0xff]  ;;  %2556 = vst.msk [vmem:[#allocation3 + $0x20] sm:$0xff] %vm2423_vm15, %v9393_v49 }
 0x41d   :  { %2945 = vrot.lane.b32.xlu1 %v9612_v30, %s6576_s26  ;;  %3428 = vrot.lane.b32.xlu0 %v3415_v36, %s6568_s20 }
 0x41e   :  { %3877 = vmatmul.f32.vlgmr.msrb.gmra.mxu3 %v3602_v1  ;;  %4000 = vmatmul.f32.vlgmr.msra.gmra.mxu0 %v3602_v1 }
 0x41f   :  { %3189 = vrot.lane.b32.xlu2 %v3158_v13, %s6575_s25 }
 0x421   :  { %v9695_v49 = vpop.permute.xlu2 %2558 }
 0x422   :  { %2565 = vst.msk [vmem:[#allocation3 + $0x20] sm:$0xff] %vm2434_vm1, %v9695_v49 }
 0x425   :  { %3065 = vrot.lane.b32.xlu1 %v9663_v43, %s6574_s24  ;;  %3437 = vrot.lane.b32.xlu0 %v3415_v36, %s6571_s19 }
 0x427   :  { %3203 = vrot.lane.b32.xlu2 %v3159_v51, %s6576_s26  ;;  %v2913_v18 = vpop.permute.xlu0 %2912  ;;  %v2918_v11 = vpop.permute.xlu1 %2917 }
 0x428   :  { %v2914_v3 = vsel %vm172_vm0, %v12403_v56, %v2913_v18  ;;  %v2312_v18 = vld [vmem:[#allocation2 + $0x60] sm:$0xff]  ;;  %v12410_v56 = vld [vmem:[#allocation117_spill] sm:$0xff] }
 0x429   :  { %2916 = vst.msk [vmem:[#allocation3 + $0x60] sm:$0xff] %vm2389_vm8, %v2914_v3  ;;  %v2660_v5 = vpop.permute.xlu2 %2659  ;;  %v9709_v39 = vld [vmem:[#allocation3 + $0x20] sm:$0xff] }
 0x42a   :  { %2920 = vst.msk [vmem:[#allocation3 + $0x60] sm:$0xff] %vm2394_vm9, %v2918_v11  ;;  %4041 = vmatmul.f32.vlgmr.msra.gmra.mxu1 %v9709_v39 }
 0x42b   :  { %2662 = vst.msk [vmem:[#allocation3 + $0x30] sm:$0xff] %vm2394_vm9, %v2660_v5 }
 0x42c   :  { %2666 = vst.msk [vmem:[#allocation3 + $0x30] sm:$0xff] %vm2399_vm10, %v9465_v16 }
 0x42d   :  { %3185 = vrot.lane.b32.xlu1 %v3158_v13, %s6572_s22  ;;  %2940 = vrot.lane.b32.xlu0 %v9612_v30, %s6573_s23  ;;  %v3383_v30 = vsel %vm2335_vm11, %v9355_v28, %v9432_v7  ;;  %v9748_v28 = vld [vmem:[#allocation3 + $0x48] sm:$0xff] }
 0x42e   :  { %v3392_v37 = vmax.f32 %v9125_v53, %v3383_v30  ;;  %v3384_v53 = vsel %vm2335_vm11, %v9432_v7, %v9463_v38 }
 0x42f   :  { %v2922_v26 = vpop.permute.xlu0 %2921 }
 0x430   :  { %2924 = vst.msk [vmem:[#allocation3 + $0x60] sm:$0xff] %vm2399_vm10, %v2922_v26 }
 0x431   :  { %2925 = vst.msk [vmem:[#allocation3 + $0x68] sm:$0xff] %vm2401_vm3, %v2922_v26  ;;  %v3273_v52 = vpop.permute.xlu2 %3272  ;;  %v2301_v26 = vld [vmem:[#allocation2 + $0x30] sm:$0xff] }
 0x432   :  { %v3279_v16 = vsel %vm172_vm0, %v3273_v52, %v9430_v10  ;;  %v3278_v36 = vsel %vm172_vm0, %v9359_v57, %v3273_v52  ;;  %v3393_v57 = vmax.f32 %v9242_v35, %v3384_v53  ;;  %v12404_v35 = vld [vmem:[#allocation50_spill] sm:$0xff]  ;;  %v2300_v53 = vld [vmem:[#allocation2 + $0x28] sm:$0xff] }
 0x433   :  { %v3288_v46 = vmax.f32 %v3264_v34, %v3279_v16  ;;  %v9727_v25 = vld [vmem:[#allocation3 + $0x30] sm:$0xff]  ;;  %v3287_v8 = vmax.f32 %v3263_v33, %v3278_v36  ;;  %v2620_v7 = vmax.f32 %v12404_v35, %v9235_v42  ;;  %v12412_v34 = vld [vmem:[#allocation112_spill] sm:$0xff]  ;;  %v6276_v33 = vld [vmem:[%s12045_s2 + $0x618] sm:$0xff] }
 0x434   :  { %3880 = vmatmul.f32.gmra.mxu3 %v9727_v25  ;;  %4003 = vmatmul.f32.gmra.mxu0 %v9727_v25  ;;  %v2296_v16 = vld [vmem:[#allocation2 + $0x8] sm:$0xff]  ;;  %v6281_v36 = vld [vmem:[%s12045_s2 + $0x640] sm:$0xff]  ;;  %v2310_v35 = vld [vmem:[#allocation2 + $0x50] sm:$0xff] }
 0x435   :  { %3323 = vrot.lane.b32.xlu2 %v3288_v46, %s6574_s24  ;;  %3198 = vrot.lane.b32.xlu1 %v3159_v51, %s6573_s23  ;;  %v2306_v30 = vmax.f32 %v2296_v16, %v2301_v26  ;;  %v6255_v26 = vld [vmem:[%s12045_s2 + $0x570] sm:$0xff]  ;;  %v6254_v16 = vld [vmem:[%s12045_s2 + $0x568] sm:$0xff] }
 0x436   :  { %3060 = vrot.lane.b32.xlu0 %v9644_v6, %s6575_s25  ;;  %4148 = vmatpush.msrb.mxu0 %v6281_v36  ;;  %v12416_v36 = vld [vmem:[#allocation61_spill] sm:$0xff] }
 0x437   :  { %v2928_v55 = vpop.permute.xlu0 %2927  ;;  %v9765_v19 = vld [vmem:[#allocation3 + $0x60] sm:$0xff] }
 0x438   :  { %2930 = vst.msk [vmem:[#allocation3 + $0x68] sm:$0xff] %vm2407_vm7, %v2928_v55  ;;  %v6279_v55 = vld [vmem:[%s12045_s2 + $0x630] sm:$0xff] }
 0x439   :  { %v3402_v32 = vpop.permute.xlu2 %3401  ;;  %3902 = vmatpush.msra.mxu3 %v6279_v55 }
 0x43a   :  { %v3407_v54 = vsel %vm172_vm0, %v9373_v31, %v3402_v32  ;;  %v3408_v44 = vsel %vm172_vm0, %v3402_v32, %v9509_v60 }
 0x43b   :  { %v3416_v62 = vmax.f32 %v3392_v37, %v3407_v54  ;;  %v3417_v6 = vmax.f32 %v3393_v57, %v3408_v44  ;;  %v12413_v37 = vld [vmem:[#allocation122_spill] sm:$0xff]  ;;  %v6278_v54 = vld [vmem:[%s12045_s2 + $0x628] sm:$0xff]  ;;  %3903 = vmatpush.msra.mxu3 %v6276_v33  ;;  %v6275_v44 = vld [vmem:[%s12045_s2 + $0x610] sm:$0xff] }
 0x43c   :  { %3883 = vmatmul.f32.gmra.mxu3 %v9748_v28  ;;  %4006 = vmatmul.f32.gmra.mxu0 %v9748_v28 }
 0x43d   :  { %3318 = vrot.lane.b32.xlu1 %v3287_v8, %s6575_s25  ;;  %3443 = vrot.lane.b32.xlu2 %v3416_v62, %s6572_s22 }
 0x43e   :  { %3074 = vrot.lane.b32.xlu0 %v9663_v43, %s6576_s26  ;;  %v12406_v43 = vld [vmem:[#allocation53_spill] sm:$0xff]  ;;  %4149 = vmatpush.msrb.mxu0 %v6278_v54  ;;  %v6248_v54 = vld [vmem:[%s12045_s2 + $0x538] sm:$0xff] }
 0x43f   :  { %v3007_v40 = vmax.f32 %v12406_v43, %v9312_v47  ;;  %v12408_v47 = vld [vmem:[#allocation116_spill] sm:$0xff] }
 0x440   :  { %v2313_v43 = vld [vmem:[#allocation2 + $0x68] sm:$0xff]  ;;  %4150 = vmatpush.msrb.mxu0 %v6275_v44 }
 0x441   :  { %v2674_v31 = vpop.permute.xlu2 %2673 }
 0x442   :  { %2676 = vst.msk [vmem:[#allocation3 + $0x38] sm:$0xff] %vm2412_vm12, %v2674_v31 }
 0x443   :  { %2681 = vst.msk [vmem:[#allocation3 + $0x38] sm:$0xff] %vm2418_vm13, %v9558_v48  ;;  %v12405_v48 = vld [vmem:[#allocation111_spill] sm:$0xff] }
 0x444   :  { %2685 = vst.msk [vmem:[#allocation3 + $0x38] sm:$0xff] %vm2423_vm15, %v9556_v15  ;;  %3886 = vmatmul.f32.gmra.mxu3 %v9765_v19  ;;  %4009 = vmatmul.f32.gmra.mxu0 %v9765_v19  ;;  %v2644_v15 = vmax.f32 %v2620_v7, %v9275_v14  ;;  %v2491_v58 = vmax.f32 %v12405_v48, %v9198_v20  ;;  %v6270_v7 = vld [vmem:[%s12045_s2 + $0x5e8] sm:$0xff] }
 0x445   :  { %3332 = vrot.lane.b32.xlu1 %v3288_v46, %s6576_s26  ;;  %3456 = vrot.lane.b32.xlu2 %v3417_v6, %s6573_s23  ;;  %v3031_v20 = vmax.f32 %v3007_v40, %v9334_v9  ;;  %v12409_v9 = vld [vmem:[#allocation121_spill] sm:$0xff]  ;;  %v6272_v40 = vld [vmem:[%s12045_s2 + $0x5f8] sm:$0xff] }
 0x446   :  { %3194 = vrot.lane.b32.xlu0 %v3159_v51, %s6574_s24  ;;  %v2515_v1 = vmax.f32 %v2491_v58, %v9200_v24  ;;  %v3394_v29 = vmax.f32 %v12409_v9, %v9463_v38  ;;  %v2297_v38 = vld [vmem:[#allocation2 + $0x10] sm:$0xff]  ;;  %v2298_v58 = vld [vmem:[#allocation2 + $0x18] sm:$0xff]  ;;  %4151 = vmatpush.msrb.mxu0 %v6272_v40  ;;  %v6266_v9 = vld [vmem:[%s12045_s2 + $0x5c8] sm:$0xff] }
 0x447   :  { %v2307_v11 = vmax.f32 %v2297_v38, %v2302_v61  ;;  %v6263_v61 = vld [vmem:[%s12045_s2 + $0x5b0] sm:$0xff]  ;;  %v2299_v38 = vld [vmem:[#allocation2 + $0x20] sm:$0xff] }
 0x448   :  { %v3418_v45 = vmax.f32 %v3394_v29, %v9509_v60  ;;  %v2304_v29 = vld [vmem:[#allocation2 + $0x48] sm:$0xff]  ;;  %v12417_v40 = vld [vmem:[#allocation125_spill] sm:$0xff] }
 0x449   :  { %v9776_v0 = vpop.permute.xlu2 %2687  ;;  %v9832_v17 = vmax.f32 %v2307_v11, %v2312_v18  ;;  %v2314_v18 = vld [vmem:[#allocation2 + $0x70] sm:$0xff]  ;;  %v6260_v11 = vld [vmem:[%s12045_s2 + $0x598] sm:$0xff] }
 0x44a   :  { %2694 = vst.msk [vmem:[#allocation3 + $0x38] sm:$0xff] %vm2434_vm1, %v9776_v0 }
 0x44d   :  { %3452 = vrot.lane.b32.xlu1 %v3417_v6, %s6574_s24  ;;  %2689 = vrot.lane.b32.xlu2 %v2644_v15, %s6576_s26  ;;  %v12414_v15 = vld [vmem:[#allocation57_spill] sm:$0xff] }
 0x44e   :  { %3314 = vrot.lane.b32.xlu0 %v3287_v8, %s6572_s22  ;;  %v6273_v8 = vld [vmem:[%s12045_s2 + $0x600] sm:$0xff] }
 0x44f   :  { %v3042_v42 = vpop.permute.xlu0 %3041  ;;  %v3047_v63 = vpop.permute.xlu1 %3046  ;;  %3904 = vmatpush.msra.mxu3 %v6273_v8  ;;  %v6243_v8 = vld [vmem:[%s12045_s2 + $0x510] sm:$0xff] }
 0x450   :  { %v3043_v59 = vsel %vm172_vm0, %v9176_v50, %v3042_v42  ;;  %v12407_v50 = vld [vmem:[#allocation58_spill] sm:$0xff] }
 0x451   :  { %3045 = vst.msk [vmem:[#allocation3 + $0x78] sm:$0xff] %vm2389_vm8, %v3043_v59  ;;  %v2803_v14 = vpop.permute.xlu2 %2802  ;;  %v9791_v12 = vld [vmem:[#allocation3 + $0x38] sm:$0xff]  ;;  %v2878_v13 = vmax.f32 %v12408_v47, %v12407_v50  ;;  %3905 = vmatpush.msra.mxu3 %v6270_v7  ;;  %v6267_v47 = vld [vmem:[%s12045_s2 + $0x5d0] sm:$0xff] }
 0x452   :  { %3049 = vst.msk [vmem:[#allocation3 + $0x78] sm:$0xff] %vm2394_vm9, %v3047_v63  ;;  %4044 = vmatmul.f32.gmra.mxu1 %v9791_v12  ;;  %v12415_v63 = vld [vmem:[#allocation115_spill] sm:$0xff]  ;;  %v6239_v7 = vld [vmem:[%s12045_s2 + $0x4f0] sm:$0xff] }
 0x453   :  { %2805 = vst.msk [vmem:[#allocation3 + $0x50] sm:$0xff] %vm2412_vm12, %v2803_v14  ;;  %v3136_v14 = vmax.f32 %v12415_v63, %v9330_v21  ;;  %3906 = vmatpush.msra.mxu3 %v6267_v47 }
 0x454   :  { %2810 = vst.msk [vmem:[#allocation3 + $0x50] sm:$0xff] %vm2418_vm13, %v9687_v2 }
 0x455   :  { %2814 = vst.msk [vmem:[#allocation3 + $0x50] sm:$0xff] %vm2423_vm15, %v9693_v27  ;;  %2560 = vrot.lane.b32.xlu1 %v2515_v1, %s6576_s26  ;;  %3076 = vrot.lane.b32.xlu2 %v3031_v20, %s6576_s26  ;;  %v2902_v27 = vmax.f32 %v2878_v13, %v9324_v22  ;;  %v3265_v22 = vmax.f32 %v12410_v56, %v9371_v23  ;;  %v12411_v23 = vld [vmem:[#allocation120_spill] sm:$0xff]  ;;  %v6269_v13 = vld [vmem:[%s12045_s2 + $0x5e0] sm:$0xff] }
 0x456   :  { %3327 = vrot.lane.b32.xlu0 %v3288_v46, %s6573_s23  ;;  %v2749_v52 = vmax.f32 %v12412_v34, %v12411_v23  ;;  %v2311_v46 = vld [vmem:[#allocation2 + $0x58] sm:$0xff]  ;;  %v3160_v21 = vmax.f32 %v3136_v14, %v9338_v4  ;;  %4152 = vmatpush.msrb.mxu0 %v6269_v13  ;;  %v6261_v4 = vld [vmem:[%s12045_s2 + $0x5a0] sm:$0xff]  ;;  %v6258_v56 = vld [vmem:[%s12045_s2 + $0x588] sm:$0xff] }
 0x457   :  { %v3051_v24 = vpop.permute.xlu0 %3050  ;;  %v3289_v5 = vmax.f32 %v3265_v22, %v9430_v10  ;;  %v9841_v10 = vmax.f32 %v2306_v30, %v2311_v46  ;;  %v2309_v22 = vmax.f32 %v2299_v38, %v2304_v29  ;;  %v6257_v23 = vld [vmem:[%s12045_s2 + $0x580] sm:$0xff] }
 0x458   :  { %3053 = vst.msk [vmem:[#allocation3 + $0x78] sm:$0xff] %vm2399_vm10, %v3051_v24  ;;  %v2773_v32 = vmax.f32 %v2749_v52, %v12413_v37  ;;  %4153 = vmatpush.msrb.mxu0 %v6266_v9  ;;  %v6252_v52 = vld [vmem:[%s12045_s2 + $0x558] sm:$0xff]  ;;  %v6249_v46 = vld [vmem:[%s12045_s2 + $0x540] sm:$0xff]  ;;  %v6251_v37 = vld [vmem:[%s12045_s2 + $0x550] sm:$0xff] }
 0x459   :  { %3054 = vst.msk [vmem:[#allocation3 + $0x80] sm:$0xff] %vm2401_vm3, %v3051_v24  ;;  %v9811_v2 = vpop.permute.xlu2 %2816  ;;  %v6264_v24 = vld [vmem:[%s12045_s2 + $0x5b8] sm:$0xff]  ;;  %v6289_v38 = vld [vmem:[%s12045_s2 + $0x680] sm:$0xff] }
 0x45a   :  { %2823 = vst.msk [vmem:[#allocation3 + $0x50] sm:$0xff] %vm2434_vm1, %v9811_v2  ;;  %3907 = vmatpush.msra.mxu3 %v6264_v24  ;;  %4154 = vmatpush.msrb.mxu0 %v6263_v61 }
 0x45b   :  { %4079 = vmatpush.msra.mxu2 %v6289_v38 }
 0x45c   :  { %3908 = vmatpush.msra.mxu3 %v6261_v4  ;;  %4155 = vmatpush.msrb.mxu0 %v6260_v11  ;;  %v6283_v11 = vld [vmem:[%s12045_s2 + $0x650] sm:$0xff] }
 0x45d   :  { %2947 = vrot.lane.b32.xlu1 %v2902_v27, %s6576_s26  ;;  %3463 = vrot.lane.b32.xlu2 %v3418_v45, %s6576_s26 }
 0x45e   :  { %3447 = vrot.lane.b32.xlu0 %v3416_v62, %s6575_s25  ;;  %v2303_v62 = vld [vmem:[#allocation2 + $0x40] sm:$0xff]  ;;  %3909 = vmatpush.msra.mxu3 %v6258_v56 }
 0x45f   :  { %v9820_v51 = vld [vmem:[#allocation3 + $0x78] sm:$0xff]  ;;  %v2308_v42 = vmax.f32 %v2298_v58, %v2303_v62  ;;  %4156 = vmatpush.msrb.mxu0 %v6257_v23  ;;  %v6245_v62 = vld [vmem:[%s12045_s2 + $0x520] sm:$0xff] }
 0x460   :  { %3889 = vmatmul.f32.gmra.mxu3 %v9820_v51  ;;  %4012 = vmatmul.f32.gmra.mxu0 %v9820_v51 }
 0x461   :  { %v9826_v3 = vpop.permute.xlu2 %2936  ;;  %v9828_v60 = vld [vmem:[#allocation3 + $0x50] sm:$0xff]  ;;  %v9881_v20 = vmax.f32 %v2308_v42, %v2313_v43  ;;  %3910 = vmatpush.msra.mxu3 %v6255_v26  ;;  %4157 = vmatpush.msrb.mxu0 %v6254_v16  ;;  %v6290_v16 = vld [vmem:[%s12045_s2 + $0x688] sm:$0xff] }
 0x462   :  { %4047 = vmatmul.f32.gmra.mxu1 %v9828_v60 }
 0x463   :  { %3911 = vmatpush.msra.mxu3 %v6252_v52  ;;  %4158 = vmatpush.msrb.mxu0 %v6251_v37 }
 0x464   :  { %4202 = vmatpush.msrb.mxu1 %v6290_v16 }
 0x465   :  { %3334 = vrot.lane.b32.xlu1 %v3289_v5, %s6576_s26  ;;  %2329 = vrot.lane.b32.xlu2 %v9832_v17, %s6569_s21  ;;  %v9917_v5 = vmax.f32 %v2309_v22, %v2314_v18 }
 0x466   :  { %3461 = vrot.lane.b32.xlu0 %v3417_v6, %s6576_s26  ;;  %v2295_v6 = vld [vmem:[#allocation2] sm:$0xff]  ;;  %3912 = vmatpush.msra.mxu3 %v6249_v46 }
 0x467   :  { %v2305_v59 = vmax.f32 %v2295_v6, %v2300_v53  ;;  %v6240_v53 = vld [vmem:[%s12045_s2 + $0x4f8] sm:$0xff]  ;;  %4159 = vmatpush.msrb.mxu0 %v6248_v54  ;;  %v6285_v46 = vld [vmem:[%s12045_s2 + $0x660] sm:$0xff] }
 0x469   :  { %v3057_v41 = vpop.permute.xlu2 %3056  ;;  %v9883_v50 = vmax.f32 %v2305_v59, %v2310_v35  ;;  %4160 = vmatpush.msrb.mxu0 %v6245_v62 }
 0x46a   :  { %3059 = vst.msk [vmem:[#allocation3 + $0x80] sm:$0xff] %vm2407_vm7, %v3057_v41 }
 0x46d   :  { %2352 = vrot.lane.b32.xlu2 %v9841_v10, %s6568_s20  ;;  %2327 = vrot.lane.b32.xlu1 %v9841_v10, %s6569_s21 }
 0x46e   :  { %2818 = vrot.lane.b32.xlu0 %v2773_v32, %s6576_s26  ;;  %v6246_v32 = vld [vmem:[%s12045_s2 + $0x528] sm:$0xff] }
 0x46f   :  { %v3176_v57 = vpop.permute.xlu1 %3175  ;;  %v3171_v31 = vpop.permute.xlu0 %3170  ;;  %3913 = vmatpush.msra.mxu3 %v6246_v32 }
 0x470   :  { %v3172_v48 = vsel %vm172_vm0, %v12414_v15, %v3171_v31  ;;  %v6237_v31 = vld [vmem:[%s12045_s2 + $0x4e0] sm:$0xff]  ;;  %v6234_v15 = vld [vmem:[%s12045_s2 + $0x4c8] sm:$0xff] }
 0x471   :  { %3174 = vst.msk [vmem:[#allocation3 + $0x90] sm:$0xff] %vm2389_vm8, %v3172_v48  ;;  %v9879_v1 = vpop.permute.xlu2 %3069  ;;  %3914 = vmatpush.msra.mxu3 %v6243_v8  ;;  %v6236_v48 = vld [vmem:[%s12045_s2 + $0x4d8] sm:$0xff] }
 0x472   :  { %3178 = vst.msk [vmem:[#allocation3 + $0x90] sm:$0xff] %vm2394_vm9, %v3176_v57  ;;  %v6242_v57 = vld [vmem:[%s12045_s2 + $0x508] sm:$0xff] }
 0x473   :  { %3915 = vmatpush.msra.mxu3 %v6240_v53  ;;  %4161 = vmatpush.msrb.mxu0 %v6242_v57 }
 0x475   :  { %2356 = vrot.lane.b32.xlu2 %v9881_v20, %s6568_s20  ;;  %2350 = vrot.lane.b32.xlu1 %v9883_v50, %s6568_s20 }
 0x476   :  { %3205 = vrot.lane.b32.xlu0 %v3160_v21, %s6576_s26  ;;  %3916 = vmatpush.msra.mxu3 %v6237_v31 }
 0x477   :  { %v3305_v27 = vpop.permute.xlu1 %3304  ;;  %v3180_v45 = vpop.permute.xlu0 %3179  ;;  %4162 = vmatpush.msrb.mxu0 %v6239_v7 }
 0x478   :  { %3182 = vst.msk [vmem:[#allocation3 + $0x90] sm:$0xff] %vm2399_vm10, %v3180_v45  ;;  %3917 = vmatpush.msra.mxu3 %v6234_v15 }
 0x479   :  { %3183 = vst.msk [vmem:[#allocation3 + $0x98] sm:$0xff] %vm2401_vm3, %v3180_v45  ;;  %v9925_v34 = vpop.permute.xlu2 %3189  ;;  %4163 = vmatpush.msrb.mxu0 %v6236_v48 }
 0x47d   :  { %2333 = vrot.lane.b32.xlu1 %v9917_v5, %s6569_s21 }
 0x47e   :  { %2325 = vrot.lane.b32.xlu0 %v9883_v50, %s6569_s21 }
 0x47f   :  { %v3434_v41 = vpop.permute.xlu1 %3433  ;;  %v3300_v30 = vpop.permute.xlu0 %3299  ;;  %v9940_v55 = vld [vmem:[#allocation3 + $0x90] sm:$0xff] }
 0x480   :  { %v3301_v33 = vsel %vm172_vm0, %v12416_v36, %v3300_v30  ;;  %3892 = vmatmul.f32.gmra.mxu3 %v9940_v55  ;;  %4015 = vmatmul.f32.gmra.mxu0 %v9940_v55  ;;  %v6282_v30 = vld [vmem:[%s12045_s2 + $0x648] sm:$0xff]  ;;  %v6284_v36 = vld [vmem:[%s12045_s2 + $0x658] sm:$0xff] }
 0x481   :  { %3303 = vst.msk [vmem:[#allocation3 + $0xa8] sm:$0xff] %vm2389_vm8, %v3301_v33  ;;  %v9966_v44 = vpop.permute.xlu2 %3203 }
 0x482   :  { %3307 = vst.msk [vmem:[#allocation3 + $0xa8] sm:$0xff] %vm2394_vm9, %v3305_v27 }
 0x486   :  { %2331 = vrot.lane.b32.xlu0 %v9881_v20, %s6569_s21 }
 0x487   :  { %v2932_v6 = vpop.permute.xlu1 %2931  ;;  %v3309_v35 = vpop.permute.xlu0 %3308 }
 0x488   :  { %2934 = vst.msk [vmem:[#allocation3 + $0x68] sm:$0xff] %vm2412_vm12, %v2932_v6 }
 0x489   :  { %2939 = vst.msk [vmem:[#allocation3 + $0x68] sm:$0xff] %vm2418_vm13, %v9826_v3 }
 0x48a   :  { %3311 = vst.msk [vmem:[#allocation3 + $0xa8] sm:$0xff] %vm2399_vm10, %v3309_v35 }
 0x48b   :  { %3312 = vst.msk [vmem:[#allocation3 + $0xb0] sm:$0xff] %vm2401_vm3, %v3309_v35 }
 0x48e   :  { %2354 = vrot.lane.b32.xlu0 %v9832_v17, %s6568_s20 }
 0x48f   :  { %v9992_v58 = vpop.permute.xlu2 %3323  ;;  %v9994_v43 = vpop.permute.xlu1 %2945 }
 0x490   :  { %v3429_v3 = vpop.permute.xlu0 %3428 }
 0x491   :  { %v3430_v42 = vsel %vm172_vm0, %v12417_v40, %v3429_v3  ;;  %v9998_v59 = vld [vmem:[#allocation3 + $0xa8] sm:$0xff] }
 0x492   :  { %3432 = vst.msk [vmem:[#allocation3 + $0xc0] sm:$0xff] %vm2389_vm8, %v3430_v42  ;;  %3895 = vmatmul.f32.gmra.mxu3 %v9998_v59  ;;  %4018 = vmatmul.f32.gmra.mxu0 %v9998_v59 }
 0x493   :  { %3436 = vst.msk [vmem:[#allocation3 + $0xc0] sm:$0xff] %vm2394_vm9, %v3434_v41  ;;  %v6287_v41 = vld [vmem:[%s12045_s2 + $0x670] sm:$0xff] }
 0x494   :  { %4203 = vmatpush.msrb.mxu1 %v6287_v41 }
 0x496   :  { %2358 = vrot.lane.b32.xlu0 %v9917_v5, %s6568_s20  ;;  %4204 = vmatpush.msrb.mxu1 %v6284_v36 }
 0x497   :  { %v3066_v63 = vpop.permute.xlu1 %3065  ;;  %v3444_v14 = vpop.permute.xlu2 %3443 }
 0x498   :  { %v3438_v47 = vpop.permute.xlu0 %3437 }
 0x499   :  { %3440 = vst.msk [vmem:[#allocation3 + $0xc0] sm:$0xff] %vm2399_vm10, %v3438_v47 }
 0x49a   :  { %3441 = vst.msk [vmem:[#allocation3 + $0xc8] sm:$0xff] %vm2401_vm3, %v3438_v47 }
 0x49b   :  { %3446 = vst.msk [vmem:[#allocation3 + $0xc8] sm:$0xff] %vm2407_vm7, %v3444_v14  ;;  %v10099_v3 = vpop.f32.mrf.mxu0 }
 0x49f   :  { %v3186_v13 = vpop.permute.xlu1 %3185  ;;  %v10009_v21 = vpop.permute.xlu2 %3456 }
 0x4a0   :  { %3188 = vst.msk [vmem:[#allocation3 + $0x98] sm:$0xff] %vm2407_vm7, %v3186_v13  ;;  %v2941_v24 = vpop.permute.xlu0 %2940  ;;  %v10012_v9 = vld [vmem:[#allocation3 + $0xc0] sm:$0xff] }
 0x4a1   :  { %3192 = vst.msk [vmem:[#allocation3 + $0x98] sm:$0xff] %vm2412_vm12, %v9925_v34  ;;  %3898 = vmatmul.f32.gmra.mxu3 %v10012_v9  ;;  %4021 = vmatmul.f32.gmra.mxu0 %v10012_v9  ;;  %v10102_v42 = vpop.f32.mrf.mxu3 }
 0x4a2   :  { %2943 = vst.msk [vmem:[#allocation3 + $0x68] sm:$0xff] %vm2423_vm15, %v2941_v24 }
 0x4a3   :  { %2952 = vst.msk [vmem:[#allocation3 + $0x68] sm:$0xff] %vm2434_vm1, %v9994_v43 }
 0x4a7   :  { %v3199_v29 = vpop.permute.xlu1 %3198  ;;  %v2690_v4 = vpop.permute.xlu2 %2689 }
 0x4a8   :  { %v3061_v27 = vpop.permute.xlu0 %3060  ;;  %v2691_v45 = vsel %vm2430_vm4, %v9776_v0, %v2690_v4  ;;  %v6286_v0 = vld [vmem:[%s12045_s2 + $0x668] sm:$0xff] }
 0x4a9   :  { %3063 = vst.msk [vmem:[#allocation3 + $0x80] sm:$0xff] %vm2412_vm12, %v3061_v27  ;;  %3918 = vmatmul.f32.vlgmr.msra.gmra.mxu3 %v9709_v39  ;;  %4164 = vmatmul.f32.vlgmr.msrb.gmra.mxu0 %v9709_v39 }
 0x4aa   :  { %2695 = vst.msk [vmem:[#allocation3 + $0x40] sm:$0xff] %vm2436_vm5, %v2691_v45  ;;  %v3612_v61 = vld [vmem:[#allocation3 + $0x68] sm:$0xff]  ;;  %4080 = vmatpush.msra.mxu2 %v6286_v0 }
 0x4ab   :  { %3068 = vst.msk [vmem:[#allocation3 + $0x80] sm:$0xff] %vm2418_vm13, %v3066_v63  ;;  %4050 = vmatmul.f32.gmra.mxu1 %v3612_v61  ;;  %v6224_v45 = vld [vmem:[%s12045_s2 + $0x478] sm:$0xff] }
 0x4ac   :  { %3072 = vst.msk [vmem:[#allocation3 + $0x80] sm:$0xff] %vm2423_vm15, %v9879_v1  ;;  %4081 = vmatpush.msra.mxu2 %v6283_v11  ;;  %v6218_v11 = vld [vmem:[%s12045_s2 + $0x448] sm:$0xff] }
 0x4af   :  { %v3319_v39 = vpop.permute.xlu1 %3318  ;;  %v3077_v18 = vpop.permute.xlu2 %3076 }
 0x4b0   :  { %v3075_v56 = vpop.permute.xlu0 %3074 }
 0x4b1   :  { %v3078_v22 = vsel %vm2430_vm4, %v3075_v56, %v3077_v18  ;;  %3081 = vst.msk [vmem:[#allocation3 + $0x80] sm:$0xff] %vm2434_vm1, %v3075_v56  ;;  %3921 = vmatmul.f32.gmra.mxu3 %v9791_v12  ;;  %4167 = vmatmul.f32.gmra.mxu0 %v9791_v12  ;;  %v10089_v7 = vld [vmem:[#allocation3 + $0x40] sm:$0xff]  ;;  %v6221_v56 = vld [vmem:[%s12045_s2 + $0x460] sm:$0xff] }
 0x4b2   :  { %3082 = vst.msk [vmem:[#allocation3 + $0x88] sm:$0xff] %vm2436_vm5, %v3078_v22 }
 0x4b7   :  { %v3333_v1 = vpop.permute.xlu1 %3332  ;;  %v3464_v31 = vpop.permute.xlu2 %3463 }
 0x4b8   :  { %v3195_v26 = vpop.permute.xlu0 %3194  ;;  %v3615_v23 = vld [vmem:[#allocation3 + $0x80] sm:$0xff]  ;;  %v10123_v24 = vpop.f32.mrf.mxu3 }
 0x4b9   :  { %3197 = vst.msk [vmem:[#allocation3 + $0x98] sm:$0xff] %vm2418_vm13, %v3195_v26  ;;  %3924 = vmatmul.f32.gmra.mxu3 %v9828_v60  ;;  %4053 = vmatmul.f32.gmra.mxu1 %v3615_v23 }
 0x4ba   :  { %3201 = vst.msk [vmem:[#allocation3 + $0x98] sm:$0xff] %vm2423_vm15, %v3199_v29  ;;  %4170 = vmatmul.f32.gmra.mxu0 %v9828_v60  ;;  %v6288_v60 = vld [vmem:[%s12045_s2 + $0x678] sm:$0xff]  ;;  %v6227_v29 = vld [vmem:[%s12045_s2 + $0x490] sm:$0xff] }
 0x4bb   :  { %3210 = vst.msk [vmem:[#allocation3 + $0x98] sm:$0xff] %vm2434_vm1, %v9966_v44  ;;  %3956 = vmatpush.msrb.mxu3 %v6288_v60  ;;  %v6206_v60 = vld [vmem:[%s12045_s2 + $0x3e8] sm:$0xff] }
 0x4bd   :  { %3957 = vmatpush.msrb.mxu3 %v6285_v46 }
 0x4bf   :  { %v3453_v12 = vpop.permute.xlu1 %3452  ;;  %3958 = vmatpush.msrb.mxu3 %v6282_v30  ;;  %v2330_v63 = vpop.permute.xlu2 %2329  ;;  %v6203_v30 = vld [vmem:[%s12045_s2 + $0x3d0] sm:$0xff] }
 0x4c0   :  { %v3315_v34 = vpop.permute.xlu0 %3314 }
 0x4c1   :  { %3317 = vst.msk [vmem:[#allocation3 + $0xb0] sm:$0xff] %vm2407_vm7, %v3315_v34  ;;  %3927 = vmatmul.f32.gmra.mxu3 %v3612_v61  ;;  %v10165_v34 = vld [vmem:[#allocation3 + $0x88] sm:$0xff] }
 0x4c2   :  { %3321 = vst.msk [vmem:[#allocation3 + $0xb0] sm:$0xff] %vm2412_vm12, %v3319_v39  ;;  %4173 = vmatmul.f32.gmra.mxu0 %v3612_v61  ;;  %v3618_v52 = vld [vmem:[#allocation3 + $0x98] sm:$0xff] }
 0x4c3   :  { %3326 = vst.msk [vmem:[#allocation3 + $0xb0] sm:$0xff] %vm2418_vm13, %v9992_v58  ;;  %4056 = vmatmul.f32.gmra.mxu1 %v3618_v52 }
 0x4c7   :  { %v2561_v33 = vpop.permute.xlu1 %2560  ;;  %v2353_v38 = vpop.permute.xlu2 %2352 }
 0x4c8   :  { %v2562_v37 = vsel %vm2430_vm4, %v9695_v49, %v2561_v33  ;;  %v3328_v32 = vpop.permute.xlu0 %3327 }
 0x4c9   :  { %2566 = vst.msk [vmem:[#allocation3 + $0x28] sm:$0xff] %vm2436_vm5, %v2562_v37  ;;  %3930 = vmatmul.f32.gmra.mxu3 %v3615_v23 }
 0x4ca   :  { %3330 = vst.msk [vmem:[#allocation3 + $0xb0] sm:$0xff] %vm2423_vm15, %v3328_v32  ;;  %4176 = vmatmul.f32.gmra.mxu0 %v3615_v23  ;;  %v6212_v23 = vld [vmem:[%s12045_s2 + $0x418] sm:$0xff] }
 0x4cb   :  { %3339 = vst.msk [vmem:[#allocation3 + $0xb0] sm:$0xff] %vm2434_vm1, %v3333_v1 }
 0x4cf   :  { %v2948_v54 = vpop.permute.xlu1 %2947  ;;  %v2357_v36 = vpop.permute.xlu2 %2356 }
 0x4d0   :  { %v2949_v8 = vsel %vm2430_vm4, %v9994_v43, %v2948_v54  ;;  %v3448_v62 = vpop.permute.xlu0 %3447  ;;  %v10079_v53 = vld [vmem:[#allocation3 + $0x28] sm:$0xff] }
 0x4d1   :  { %2953 = vst.msk [vmem:[#allocation3 + $0x70] sm:$0xff] %vm2436_vm5, %v2949_v8  ;;  %3933 = vmatmul.f32.gmra.mxu3 %v3618_v52  ;;  %6299 = vmatmul.msk.f32.vlgmr.msra.gmra.mxu2 %vm2436_vm5, %v10079_v53  ;;  %v6200_v54 = vld [vmem:[%s12045_s2 + $0x3b8] sm:$0xff] }
 0x4d2   :  { %3450 = vst.msk [vmem:[#allocation3 + $0xc8] sm:$0xff] %vm2412_vm12, %v3448_v62  ;;  %4179 = vmatmul.f32.gmra.mxu0 %v3618_v52  ;;  %v3621_v49 = vld [vmem:[#allocation3 + $0xb0] sm:$0xff] }
 0x4d3   :  { %3455 = vst.msk [vmem:[#allocation3 + $0xc8] sm:$0xff] %vm2418_vm13, %v3453_v12  ;;  %4059 = vmatmul.f32.gmra.mxu1 %v3621_v49  ;;  %v10159_v12 = vpop.f32.mrf.mxu3  ;;  %v6209_v52 = vld [vmem:[%s12045_s2 + $0x400] sm:$0xff] }
 0x4d4   :  { %3459 = vst.msk [vmem:[#allocation3 + $0xc8] sm:$0xff] %vm2423_vm15, %v10009_v21  ;;  %v10108_v21 = vpop.f32.mrf.mxu0 }
 0x4d5   :  { %12418 = vst [vmem:[#allocation62_spill] sm:$0xff] %v10108_v21 }
 0x4d7   :  { %v3335_v57 = vpop.permute.xlu1 %3334 }
 0x4d8   :  { %v3336_v6 = vsel %vm2430_vm4, %v3333_v1, %v3335_v57  ;;  %v3462_v35 = vpop.permute.xlu0 %3461  ;;  %v10137_v39 = vld [vmem:[#allocation3 + $0x70] sm:$0xff]  ;;  %v6215_v1 = vld [vmem:[%s12045_s2 + $0x430] sm:$0xff] }
 0x4d9   :  { %3340 = vst.msk [vmem:[#allocation3 + $0xb8] sm:$0xff] %vm2436_vm5, %v3336_v6  ;;  %v3465_v15 = vsel %vm2430_vm4, %v3462_v35, %v3464_v31  ;;  %3936 = vmatmul.f32.gmra.mxu3 %v3621_v49  ;;  %6300 = vmatmul.msk.f32.gmra.mxu2 %vm2436_vm5, %v10089_v7 }
 0x4da   :  { %3468 = vst.msk [vmem:[#allocation3 + $0xc8] sm:$0xff] %vm2434_vm1, %v3462_v35  ;;  %4182 = vmatmul.f32.gmra.mxu0 %v3621_v49  ;;  %v6194_v35 = vld [vmem:[%s12045_s2 + $0x388] sm:$0xff] }
 0x4db   :  { %3469 = vst.msk [vmem:[#allocation3 + $0xd0] sm:$0xff] %vm2436_vm5, %v3465_v15  ;;  %v10200_v31 = vpop.f32.mrf.mxu3 }
 0x4dc   :  { %v10145_v22 = vpop.f32.mrf.mxu0 }
 0x4dd   :  { %12419 = vst [vmem:[#allocation126_spill] sm:$0xff] %v10145_v22 }
 0x4df   :  { %v2328_v40 = vpop.permute.xlu1 %2327 }
 0x4e0   :  { %v2819_v48 = vpop.permute.xlu0 %2818  ;;  %v2337_v16 = vsel %vm2335_vm11, %v2328_v40, %v2330_v63 }
 0x4e1   :  { %v2820_v58 = vsel %vm2430_vm4, %v9811_v2, %v2819_v48  ;;  %v3729_v43 = vld [vmem:[#allocation3 + $0xc8] sm:$0xff]  ;;  %v6233_v2 = vld [vmem:[%s12045_s2 + $0x4c0] sm:$0xff]  ;;  %v2346_v33 = vmax.f32 %v9841_v10, %v2337_v16 }
 0x4e2   :  { %2824 = vst.msk [vmem:[#allocation3 + $0x58] sm:$0xff] %vm2436_vm5, %v2820_v58  ;;  %3939 = vmatmul.f32.gmra.mxu3 %v3729_v43  ;;  %4062 = vmatmul.f32.gmra.mxu1 %v3729_v43  ;;  %v6191_v58 = vld [vmem:[%s12045_s2 + $0x370] sm:$0xff] }
 0x4e3   :  { %4185 = vmatmul.f32.gmra.mxu0 %v3729_v43  ;;  %4107 = vmatpush.msra.mxu3 %v6233_v2  ;;  %v10223_v2 = vld [vmem:[#allocation3 + $0xb8] sm:$0xff] }
 0x4e4   :  { %v10177_v41 = vpop.f32.mrf.mxu0 }
 0x4e5   :  { %12420 = vst [vmem:[#allocation65_spill] sm:$0xff] %v10177_v41  ;;  %v3706_v41 = vld [vmem:[%s12045_s2 + $0x298] sm:$0xff] }
 0x4e7   :  { %v2351_v4 = vpop.permute.xlu1 %2350 }
 0x4e8   :  { %v3206_v14 = vpop.permute.xlu0 %3205  ;;  %v2360_v18 = vsel %vm172_vm0, %v2351_v4, %v2353_v38 }
 0x4e9   :  { %v3207_v47 = vsel %vm2430_vm4, %v9966_v44, %v3206_v14  ;;  %v10106_v13 = vld [vmem:[#allocation3 + $0x58] sm:$0xff]  ;;  %v6188_v14 = vld [vmem:[%s12045_s2 + $0x358] sm:$0xff] }
 0x4ea   :  { %3211 = vst.msk [vmem:[#allocation3 + $0xa0] sm:$0xff] %vm2436_vm5, %v3207_v47  ;;  %6291 = vmatmul.msk.f32.vlgmr.msrb.gmra.mxu3 %vm2436_vm5, %v10079_v53  ;;  %6307 = vmatmul.msk.f32.vlgmr.msrb.gmra.mxu1 %vm2436_vm5, %v10079_v53  ;;  %v6230_v44 = vld [vmem:[%s12045_s2 + $0x4a8] sm:$0xff] }
 0x4eb   :  { %6301 = vmatmul.msk.f32.gmra.mxu2 %vm2436_vm5, %v10106_v13  ;;  %4108 = vmatpush.msra.mxu3 %v6230_v44 }
 0x4ec   :  { %v10209_v48 = vpop.f32.mrf.mxu0 }
 0x4ed   :  { %4109 = vmatpush.msra.mxu3 %v6227_v29  ;;  %12421 = vst [vmem:[#allocation129_spill] sm:$0xff] %v10209_v48 }
 0x4ef   :  { %4110 = vmatpush.msra.mxu3 %v6224_v45  ;;  %v2334_v6 = vpop.permute.xlu1 %2333 }
 0x4f0   :  { %v2326_v27 = vpop.permute.xlu0 %2325  ;;  %v2349_v29 = vmax.f32 %v9917_v5, %v2334_v6  ;;  %v3477_v5 = vld [vmem:[#allocation2 + $0x308] sm:$0xff] }
 0x4f1   :  { %v2336_v61 = vsel %vm2335_vm11, %v2326_v27, %v2328_v40  ;;  %4111 = vmatpush.msra.mxu3 %v6221_v56  ;;  %v10193_v10 = vld [vmem:[#allocation3 + $0xa0] sm:$0xff]  ;;  %v3730_v27 = vld [vmem:[#allocation3 + $0xd0] sm:$0xff]  ;;  %v3486_v56 = vld [vmem:[#allocation2 + $0x328] sm:$0xff] }
 0x4f2   :  { %v2345_v0 = vmax.f32 %v9883_v50, %v2336_v61  ;;  %6292 = vmatmul.msk.f32.gmra.mxu3 %vm2436_vm5, %v10089_v7  ;;  %6308 = vmatmul.msk.f32.gmra.mxu1 %vm2436_vm5, %v10089_v7  ;;  %v3476_v61 = vld [vmem:[#allocation2 + $0x300] sm:$0xff] }
 0x4f3   :  { %6302 = vmatmul.msk.f32.gmra.mxu2 %vm2436_vm5, %v10137_v39  ;;  %4112 = vmatpush.msra.mxu3 %v6218_v11  ;;  %v3487_v11 = vld [vmem:[#allocation2 + $0x330] sm:$0xff] }
 0x4f4   :  { %v2369_v50 = vmax.f32 %v2345_v0, %v2360_v18  ;;  %v3471_v0 = vld [vmem:[#allocation2 + $0x2d8] sm:$0xff] }
 0x4f5   :  { %4113 = vmatpush.msra.mxu3 %v6215_v1  ;;  %v3475_v18 = vld [vmem:[#allocation2 + $0x2f8] sm:$0xff]  ;;  %v3481_v1 = vmax.f32 %v3471_v0, %v3476_v61  ;;  %v3660_v0 = vld [vmem:[%s12045_s2 + $0x128] sm:$0xff] }
 0x4f6   :  { %2375 = vst.msk [vmem:[#allocation3] sm:$0xff] %vm2374_vm14, %v2369_v50  ;;  %2383 = vrot.lane.b32.xlu2 %v2369_v50, %s6568_s20  ;;  %2377 = vrot.lane.b32.xlu1 %v2369_v50, %s6569_s21  ;;  %v3472_v50 = vld [vmem:[#allocation2 + $0x2e0] sm:$0xff]  ;;  %v3662_v61 = vld [vmem:[%s12045_s2 + $0x138] sm:$0xff] }
 0x4f7   :  { %4114 = vmatpush.msra.mxu3 %v6212_v23  ;;  %v3485_v23 = vld [vmem:[#allocation2 + $0x320] sm:$0xff]  ;;  %v10251_v16 = vmax.f32 %v3481_v1, %v3486_v56  ;;  %v3656_v56 = vld [vmem:[%s12045_s2 + $0x108] sm:$0xff]  ;;  %v3653_v1 = vld [vmem:[%s12045_s2 + $0xf0] sm:$0xff] }
 0x4f8   :  { %v2332_v26 = vpop.permute.xlu0 %2331 }
 0x4f9   :  { %v2338_v46 = vsel %vm2335_vm11, %v2330_v63, %v2332_v26  ;;  %4115 = vmatpush.msra.mxu3 %v6209_v52  ;;  %v2339_v15 = vsel %vm2335_vm11, %v2332_v26, %v2334_v6  ;;  %v3470_v26 = vld [vmem:[#allocation2 + $0x2d0] sm:$0xff]  ;;  %v3482_v52 = vmax.f32 %v3472_v50, %v3477_v5  ;;  %v3659_v5 = vld [vmem:[%s12045_s2 + $0x120] sm:$0xff] }
 0x4fa   :  { %6293 = vmatmul.msk.f32.gmra.mxu3 %vm2436_vm5, %v10106_v13  ;;  %6309 = vmatmul.msk.f32.gmra.mxu1 %vm2436_vm5, %v10106_v13  ;;  %v2347_v37 = vmax.f32 %v9832_v17, %v2338_v46  ;;  %v6197_v17 = vld [vmem:[%s12045_s2 + $0x3a0] sm:$0xff]  ;;  %v2348_v43 = vmax.f32 %v9881_v20, %v2339_v15  ;;  %v10227_v20 = vpop.f32.mrf.mxu3  ;;  %v3713_v50 = vld [vmem:[%s12045_s2 + $0x2d0] sm:$0xff] }
 0x4fb   :  { %6303 = vmatmul.msk.f32.gmra.mxu2 %vm2436_vm5, %v10165_v34  ;;  %4116 = vmatpush.msra.mxu3 %v6206_v60  ;;  %v3480_v60 = vmax.f32 %v3470_v26, %v3475_v18  ;;  %v10253_v46 = vmax.f32 %v3482_v52, %v3487_v11  ;;  %v3716_v18 = vld [vmem:[%s12045_s2 + $0x2e8] sm:$0xff]  ;;  %v3657_v11 = vld [vmem:[%s12045_s2 + $0x110] sm:$0xff] }
 0x4fd   :  { %4117 = vmatpush.msra.mxu3 %v6203_v30  ;;  %v10232_v44 = vpop.f32.mrf.mxu0  ;;  %v10255_v30 = vmax.f32 %v3480_v60, %v3485_v23  ;;  %v3654_v23 = vld [vmem:[%s12045_s2 + $0xf8] sm:$0xff] }
 0x4fe   :  { %12422 = vst [vmem:[#allocation66_spill] sm:$0xff] %v10232_v44  ;;  %v3650_v60 = vld [vmem:[%s12045_s2 + $0xd8] sm:$0xff] }
 0x4ff   :  { %4118 = vmatpush.msra.mxu3 %v6200_v54  ;;  %v10275_v54 = vpop.f32.mrf.mxu1 }
 0x500   :  { %v2355_v32 = vpop.permute.xlu0 %2354  ;;  %12425 = vst [vmem:[#allocation70_spill] sm:$0xff] %v10275_v54  ;;  %v11094_v54 = vld [vmem:[#allocation3 + $0x60] sm:$0xff] }
 0x501   :  { %v2361_v8 = vsel %vm172_vm0, %v2353_v38, %v2355_v32  ;;  %v2362_v62 = vsel %vm172_vm0, %v2355_v32, %v2357_v36  ;;  %4119 = vmatpush.msra.mxu3 %v6197_v17 }
 0x502   :  { %v2370_v49 = vmax.f32 %v2346_v33, %v2361_v8  ;;  %v2371_v57 = vmax.f32 %v2347_v37, %v2362_v62  ;;  %6294 = vmatmul.msk.f32.gmra.mxu3 %vm2436_vm5, %v10137_v39  ;;  %6310 = vmatmul.msk.f32.gmra.mxu1 %vm2436_vm5, %v10137_v39  ;;  %v10277_v8 = vld [vmem:[#allocation3 + $0x18] sm:$0xff] }
 0x503   :  { %6304 = vmatmul.msk.f32.gmra.mxu2 %vm2436_vm5, %v10193_v10  ;;  %4120 = vmatpush.msra.mxu3 %v6194_v35  ;;  %v10240_v45 = vpop.f32.mrf.mxu3 }
 0x504   :  { %2404 = vrot.lane.b32.xlu2 %v2371_v57, %s6572_s22  ;;  %2396 = vrot.lane.b32.xlu1 %v2370_v49, %s6571_s19 }
 0x505   :  { %2385 = vrot.lane.b32.xlu0 %v2370_v49, %s6568_s20  ;;  %4121 = vmatpush.msra.mxu3 %v6191_v58 }
 0x507   :  { %4122 = vmatpush.msra.mxu3 %v6188_v14  ;;  %v3668_v14 = vld [vmem:[%s12045_s2 + $0x168] sm:$0xff] }
 0x508   :  { %v2359_v40 = vpop.permute.xlu0 %2358  ;;  %4233 = vmatpush.msrb.mxu2 %v3668_v14  ;;  %v3647_v14 = vld [vmem:[%s12045_s2 + $0xc0] sm:$0xff] }
 0x509   :  { %v2363_v63 = vsel %vm172_vm0, %v2357_v36, %v2359_v40  ;;  %v2373_v4 = vmax.f32 %v2349_v29, %v2359_v40  ;;  %4274 = vmatpush.msrb.mxu3 %v3716_v18  ;;  %v3701_v18 = vld [vmem:[%s12045_s2 + $0x270] sm:$0xff] }
 0x50a   :  { %v2372_v47 = vmax.f32 %v2348_v43, %v2363_v63  ;;  %6295 = vmatmul.msk.f32.gmra.mxu3 %vm2436_vm5, %v10165_v34  ;;  %6311 = vmatmul.msk.f32.gmra.mxu1 %vm2436_vm5, %v10165_v34 }
 0x50b   :  { %6305 = vmatmul.msk.f32.gmra.mxu2 %vm2436_vm5, %v10223_v2  ;;  %4275 = vmatpush.msrb.mxu3 %v3713_v50 }
 0x50c   :  { %2409 = vrot.lane.b32.xlu1 %v2371_v57, %s6575_s25  ;;  %2415 = vrot.lane.b32.xlu2 %v2372_v47, %s6574_s24  ;;  %v10284_v57 = vpop.f32.mrf.mxu1 }
 0x50d   :  { %2391 = vrot.lane.b32.xlu0 %v2370_v49, %s6570_s0  ;;  %12427 = vst [vmem:[#allocation132_spill] sm:$0xff] %v10284_v57  ;;  %v6430_v57 = vld [vmem:[%s12045_s2 + $0x968] sm:$0xff] }
 0x50f   :  { %v10245_v38 = vpop.f32.mrf.mxu0 }
 0x510   :  { %12423 = vst [vmem:[#allocation130_spill] sm:$0xff] %v10245_v38 }
 0x512   :  { %6296 = vmatmul.msk.f32.gmra.mxu3 %vm2436_vm5, %v10193_v10  ;;  %6312 = vmatmul.msk.f32.gmra.mxu1 %vm2436_vm5, %v10193_v10 }
 0x513   :  { %6306 = vmatmul.msk.f32.gmra.mxu2 %vm2436_vm5, %v3730_v27 }
 0x514   :  { %2426 = vrot.lane.b32.xlu1 %v2372_v47, %s6576_s26  ;;  %2428 = vrot.lane.b32.xlu2 %v2373_v4, %s6576_s26  ;;  %v10289_v6 = vpop.f32.mrf.mxu1 }
 0x515   :  { %2420 = vrot.lane.b32.xlu0 %v2372_v47, %s6573_s23  ;;  %v10257_v36 = vpop.f32.mrf.mxu3  ;;  %12428 = vst [vmem:[#allocation69_spill] sm:$0xff] %v10289_v6  ;;  %v3665_v47 = vld [vmem:[%s12045_s2 + $0x150] sm:$0xff] }
 0x516   :  { %4234 = vmatpush.msrb.mxu2 %v3665_v47  ;;  %v3648_v47 = vld [vmem:[%s12045_s2 + $0xc8] sm:$0xff] }
 0x518   :  { %4235 = vmatpush.msrb.mxu2 %v3662_v61  ;;  %v3704_v61 = vld [vmem:[%s12045_s2 + $0x288] sm:$0xff] }
 0x51a   :  { %6297 = vmatmul.msk.f32.gmra.mxu3 %vm2436_vm5, %v10223_v2  ;;  %6313 = vmatmul.msk.f32.gmra.mxu1 %vm2436_vm5, %v10223_v2 }
 0x51b   :  { %4236 = vmatpush.msrb.mxu2 %v3659_v5  ;;  %v3641_v5 = vld [vmem:[%s12045_s2 + $0x90] sm:$0xff] }
 0x51c   :  { %3502 = vrot.lane.b32.xlu1 %v10251_v16, %s6569_s21  ;;  %3504 = vrot.lane.b32.xlu2 %v10253_v46, %s6569_s21 }
 0x51d   :  { %3500 = vrot.lane.b32.xlu0 %v10255_v30, %s6569_s21  ;;  %4237 = vmatpush.msrb.mxu2 %v3656_v56  ;;  %v3642_v56 = vld [vmem:[%s12045_s2 + $0x98] sm:$0xff] }
 0x51e   :  { %v4022_v33 = vpop.f32.mrf.mxu0 }
 0x51f   :  { %4238 = vmatpush.msrb.mxu2 %v3653_v1  ;;  %v3710_v33 = vld [vmem:[%s12045_s2 + $0x2b8] sm:$0xff] }
 0x520   :  { %4276 = vmatpush.msrb.mxu3 %v3710_v33  ;;  %v3698_v1 = vld [vmem:[%s12045_s2 + $0x258] sm:$0xff]  ;;  %v3635_v33 = vld [vmem:[%s12045_s2 + $0x60] sm:$0xff] }
 0x521   :  { %4239 = vmatpush.msrb.mxu2 %v3650_v60 }
 0x522   :  { %6298 = vmatmul.msk.f32.gmra.mxu3 %vm2436_vm5, %v3730_v27  ;;  %6314 = vmatmul.msk.f32.gmra.mxu1 %vm2436_vm5, %v3730_v27 }
 0x523   :  { %4240 = vmatpush.msrb.mxu2 %v3647_v14  ;;  %v3636_v14 = vld [vmem:[%s12045_s2 + $0x68] sm:$0xff] }
 0x524   :  { %v3899_v37 = vpop.f32.mrf.mxu3  ;;  %3526 = vrot.lane.b32.xlu1 %v10251_v16, %s6568_s20  ;;  %3528 = vrot.lane.b32.xlu2 %v10253_v46, %s6568_s20 }
 0x525   :  { %3524 = vrot.lane.b32.xlu0 %v10255_v30, %s6568_s20  ;;  %v3651_v37 = vld [vmem:[%s12045_s2 + $0xe0] sm:$0xff] }
 0x526   :  { %v10273_v32 = vpop.f32.mrf.mxu0 }
 0x527   :  { %12424 = vst [vmem:[#allocation9_spill] sm:$0xff] %v10273_v32  ;;  %v10606_v32 = vld [vmem:[#allocation3 + $0x30] sm:$0xff] }
 0x528   :  { %v10296_v58 = vpop.f32.mrf.mxu1 }
 0x529   :  { %12430 = vst [vmem:[#allocation11_spill] sm:$0xff] %v10296_v58 }
 0x52a   :  { %4123 = vmatmul.f32.vlgmr.msra.gmra.mxu3 %v10277_v8 }
 0x52c   :  { %v10280_v62 = vpop.f32.mrf.mxu3 }
 0x52e   :  { %v10282_v49 = vpop.f32.mrf.mxu0 }
 0x52f   :  { %12426 = vst [vmem:[#allocation10_spill] sm:$0xff] %v10282_v49 }
 0x532   :  { %4126 = vmatmul.f32.gmra.mxu3 %v9727_v25 }
 0x534   :  { %v10287_v17 = vpop.f32.mrf.mxu3 }
 0x536   :  { %v10303_v63 = vpop.f32.mrf.mxu1 }
 0x537   :  { %v10291_v35 = vpop.f32.mrf.mxu0  ;;  %12431 = vst [vmem:[#allocation72_spill] sm:$0xff] %v10303_v63 }
 0x538   :  { %12429 = vst [vmem:[#allocation133_spill] sm:$0xff] %v10291_v35 }
 0x53a   :  { %4129 = vmatmul.f32.gmra.mxu3 %v9748_v28  ;;  %v3669_v28 = vld [vmem:[%s12045_s2 + $0x170] sm:$0xff] }
 0x53b   :  { %4356 = vmatpush.msra.mxu1 %v3669_v28  ;;  %v3707_v28 = vld [vmem:[%s12045_s2 + $0x2a0] sm:$0xff] }
 0x53c   :  { %v10294_v15 = vpop.f32.mrf.mxu3  ;;  %4277 = vmatpush.msrb.mxu3 %v3707_v28  ;;  %v3632_v28 = vld [vmem:[%s12045_s2 + $0x48] sm:$0xff] }
 0x53e   :  { %4278 = vmatpush.msrb.mxu3 %v3704_v61  ;;  %v3629_v61 = vld [vmem:[%s12045_s2 + $0x30] sm:$0xff] }
 0x53f   :  { %v10298_v43 = vpop.f32.mrf.mxu0 }
 0x540   :  { %v10322_v4 = vpop.f32.mrf.mxu1  ;;  %4279 = vmatpush.msrb.mxu3 %v3701_v18 }
 0x541   :  { %12432 = vst [vmem:[#allocation12_spill] sm:$0xff] %v10322_v4 }
 0x542   :  { %4132 = vmatmul.f32.gmra.mxu3 %v9765_v19  ;;  %v3666_v19 = vld [vmem:[%s12045_s2 + $0x158] sm:$0xff] }
 0x543   :  { %4357 = vmatpush.msra.mxu1 %v3666_v19  ;;  %v3644_v19 = vld [vmem:[%s12045_s2 + $0xa8] sm:$0xff]  ;;  %4280 = vmatpush.msrb.mxu3 %v3698_v1  ;;  %v3686_v1 = vld [vmem:[%s12045_s2 + $0x1f8] sm:$0xff] }
 0x544   :  { %v10301_v40 = vpop.f32.mrf.mxu3  ;;  %4241 = vmatpush.msrb.mxu2 %v3644_v19  ;;  %v3633_v19 = vld [vmem:[%s12045_s2 + $0x50] sm:$0xff] }
 0x546   :  { %4242 = vmatpush.msrb.mxu2 %v3641_v5 }
 0x547   :  { %v10305_v25 = vpop.f32.mrf.mxu0 }
 0x54a   :  { %4135 = vmatmul.f32.gmra.mxu3 %v9820_v51  ;;  %v3663_v51 = vld [vmem:[%s12045_s2 + $0x140] sm:$0xff] }
 0x54b   :  { %4358 = vmatpush.msra.mxu1 %v3663_v51  ;;  %v3645_v51 = vld [vmem:[%s12045_s2 + $0xb0] sm:$0xff] }
 0x54c   :  { %v10320_v29 = vpop.f32.mrf.mxu3 }
 0x54d   :  { %4359 = vmatpush.msra.mxu1 %v3660_v0 }
 0x54f   :  { %v10324_v27 = vpop.f32.mrf.mxu0  ;;  %4360 = vmatpush.msra.mxu1 %v3657_v11  ;;  %v3638_v11 = vld [vmem:[%s12045_s2 + $0x78] sm:$0xff] }
 0x550   :  { %4243 = vmatpush.msrb.mxu2 %v3638_v11  ;;  %v2384_v5 = vpop.permute.xlu2 %2383  ;;  %v3626_v11 = vld [vmem:[%s12045_s2 + $0x18] sm:$0xff] }
 0x551   :  { %4361 = vmatpush.msra.mxu1 %v3654_v23  ;;  %v3639_v23 = vld [vmem:[%s12045_s2 + $0x80] sm:$0xff] }
 0x552   :  { %4138 = vmatmul.f32.gmra.mxu3 %v9940_v55  ;;  %v10359_v55 = vpop.f32.mrf.mxu1  ;;  %4244 = vmatpush.msrb.mxu2 %v3635_v33  ;;  %v3623_v33 = vld [vmem:[%s12045_s2] sm:$0xff] }
 0x553   :  { %12433 = vst [vmem:[#allocation134_spill] sm:$0xff] %v10359_v55  ;;  %4362 = vmatpush.msra.mxu1 %v3651_v37  ;;  %v3695_v37 = vld [vmem:[%s12045_s2 + $0x240] sm:$0xff] }
 0x554   :  { %v10354_v26 = vpop.f32.mrf.mxu3  ;;  %4281 = vmatpush.msrb.mxu3 %v3695_v37  ;;  %4245 = vmatpush.msrb.mxu2 %v3632_v28  ;;  %v3683_v37 = vld [vmem:[%s12045_s2 + $0x1e0] sm:$0xff]  ;;  %v3680_v28 = vld [vmem:[%s12045_s2 + $0x1c8] sm:$0xff] }
 0x555   :  { %4363 = vmatpush.msra.mxu1 %v3648_v47  ;;  %v3692_v47 = vld [vmem:[%s12045_s2 + $0x228] sm:$0xff] }
 0x556   :  { %4282 = vmatpush.msrb.mxu3 %v3692_v47  ;;  %4246 = vmatpush.msrb.mxu2 %v3629_v61  ;;  %v3725_v47 = vld [vmem:[%s12045_s2 + $0x330] sm:$0xff] }
 0x557   :  { %v10361_v52 = vpop.f32.mrf.mxu0  ;;  %4364 = vmatpush.msra.mxu1 %v3645_v51  ;;  %v3630_v51 = vld [vmem:[%s12045_s2 + $0x38] sm:$0xff]  ;;  %4328 = vmatpush.msra.mxu0 %v3725_v47 }
 0x558   :  { %4247 = vmatpush.msrb.mxu2 %v3626_v11  ;;  %v3674_v11 = vld [vmem:[%s12045_s2 + $0x198] sm:$0xff] }
 0x559   :  { %4365 = vmatpush.msra.mxu1 %v3642_v56 }
 0x55a   :  { %4141 = vmatmul.f32.gmra.mxu3 %v9998_v59  ;;  %v10394_v59 = vpop.f32.mrf.mxu2  ;;  %4248 = vmatpush.msrb.mxu2 %v3623_v33 }
 0x55b   :  { %12434 = vst [vmem:[#allocation13_spill] sm:$0xff] %v10394_v59  ;;  %4366 = vmatpush.msra.mxu1 %v3639_v23  ;;  %v3627_v23 = vld [vmem:[%s12045_s2 + $0x20] sm:$0xff]  ;;  %v6418_v59 = vld [vmem:[%s12045_s2 + $0x908] sm:$0xff] }
 0x55c   :  { %v10396_v0 = vpop.f32.mrf.mxu3 }
 0x55d   :  { %4367 = vmatpush.msra.mxu1 %v3636_v14  ;;  %v3624_v14 = vld [vmem:[%s12045_s2 + $0x8] sm:$0xff] }
 0x55e   :  { %v2405_v61 = vpop.permute.xlu2 %2404 }
 0x55f   :  { %v4063_v50 = vpop.f32.mrf.mxu1  ;;  %4368 = vmatpush.msra.mxu1 %v3633_v19  ;;  %v3677_v19 = vld [vmem:[%s12045_s2 + $0x1b0] sm:$0xff] }
 0x560   :  { %v4186_v60 = vpop.f32.mrf.mxu0 }
 0x561   :  { %4369 = vmatpush.msra.mxu1 %v3630_v51 }
 0x562   :  { %4144 = vmatmul.f32.gmra.mxu3 %v10012_v9  ;;  %v3689_v9 = vld [vmem:[%s12045_s2 + $0x210] sm:$0xff]  ;;  %v10441_v56 = vpop.f32.mrf.mxu2 }
 0x563   :  { %12435 = vst [vmem:[#allocation74_spill] sm:$0xff] %v10441_v56  ;;  %4283 = vmatpush.msrb.mxu3 %v3689_v9  ;;  %4370 = vmatpush.msra.mxu1 %v3627_v23  ;;  %v3671_v23 = vld [vmem:[%s12045_s2 + $0x180] sm:$0xff]  ;;  %v10609_v56 = vld [vmem:[#allocation3 + $0x20] sm:$0xff] }
 0x565   :  { %v3940_v18 = vpop.f32.mrf.mxu3  ;;  %4284 = vmatpush.msrb.mxu3 %v3686_v1  ;;  %4371 = vmatpush.msra.mxu1 %v3624_v14  ;;  %v3722_v1 = vld [vmem:[%s12045_s2 + $0x318] sm:$0xff] }
 0x566   :  { %4329 = vmatpush.msra.mxu0 %v3722_v1 }
 0x567   :  { %v10443_v50 = vpop.f32.mrf.mxu1  ;;  %4285 = vmatpush.msrb.mxu3 %v3683_v37 }
 0x568   :  { %12436 = vst [vmem:[#allocation71_spill] sm:$0xff] %v10443_v50  ;;  %v2378_v60 = vpop.permute.xlu1 %2377 }
 0x569   :  { %2381 = vst.msk [vmem:[#allocation3] sm:$0xff] %vm2380_vm2, %v2378_v60  ;;  %4286 = vmatpush.msrb.mxu3 %v3680_v28  ;;  %v3719_v60 = vld [vmem:[%s12045_s2 + $0x300] sm:$0xff]  ;;  %v2416_v28 = vpop.permute.xlu2 %2415 }
 0x56a   :  { %4330 = vmatpush.msra.mxu0 %v3719_v60 }
 0x56b   :  { %4287 = vmatpush.msrb.mxu3 %v3677_v19 }
 0x56d   :  { %v10473_v9 = vpop.f32.mrf.mxu3  ;;  %4288 = vmatpush.msrb.mxu3 %v3674_v11 }
 0x56e   :  { %v10475_v51 = vpop.f32.mrf.mxu2 }
 0x56f   :  { %12437 = vst [vmem:[#allocation135_spill] sm:$0xff] %v10475_v51  ;;  %v10477_v18 = vpop.f32.mrf.mxu1  ;;  %4289 = vmatpush.msrb.mxu3 %v3671_v23 }
 0x570   :  { %12438 = vst [vmem:[#allocation14_spill] sm:$0xff] %v10477_v18  ;;  %v3699_v18 = vld [vmem:[%s12045_s2 + $0x260] sm:$0xff] }
 0x571   :  { %v2429_v4 = vpop.permute.xlu2 %2428 }
 0x575   :  { %v10491_v33 = vpop.f32.mrf.mxu3 }
 0x576   :  { %v10493_v37 = vpop.f32.mrf.mxu2  ;;  %v2397_v14 = vpop.permute.xlu1 %2396 }
 0x577   :  { %12439 = vst [vmem:[#allocation73_spill] sm:$0xff] %v10493_v37  ;;  %v10495_v47 = vpop.f32.mrf.mxu1  ;;  %v2386_v19 = vpop.permute.xlu0 %2385 }
 0x578   :  { %12440 = vst [vmem:[#allocation15_spill] sm:$0xff] %v10495_v47  ;;  %v2387_v11 = vsel %vm172_vm0, %v2384_v5, %v2386_v19  ;;  %v3702_v47 = vld [vmem:[%s12045_s2 + $0x278] sm:$0xff] }
 0x579   :  { %2402 = vst.msk [vmem:[#allocation3 + $0x8] sm:$0xff] %vm2401_vm3, %v2397_v14 }
 0x57a   :  { %2408 = vst.msk [vmem:[#allocation3 + $0x8] sm:$0xff] %vm2407_vm7, %v2405_v61 }
 0x57b   :  { %2390 = vst.msk [vmem:[#allocation3] sm:$0xff] %vm2389_vm8, %v2387_v11 }
 0x57d   :  { %v10501_v1 = vpop.f32.mrf.mxu3 }
 0x57e   :  { %v10503_v23 = vpop.f32.mrf.mxu2  ;;  %v2410_v60 = vpop.permute.xlu1 %2409 }
 0x57f   :  { %12441 = vst [vmem:[#allocation76_spill] sm:$0xff] %v10503_v23  ;;  %v10505_v55 = vpop.f32.mrf.mxu1  ;;  %v2392_v38 = vpop.permute.xlu0 %2391 }
 0x580   :  { %2413 = vst.msk [vmem:[#allocation3 + $0x8] sm:$0xff] %vm2412_vm12, %v2410_v60 }
 0x581   :  { %2419 = vst.msk [vmem:[#allocation3 + $0x8] sm:$0xff] %vm2418_vm13, %v2416_v28 }
 0x582   :  { %2395 = vst.msk [vmem:[#allocation3] sm:$0xff] %vm2394_vm9, %v2392_v38  ;;  %v10525_v38 = vpop.permute.xlu2 %3504 }
 0x583   :  { %2400 = vst.msk [vmem:[#allocation3] sm:$0xff] %vm2399_vm10, %v2397_v14  ;;  %v3717_v14 = vld [vmem:[%s12045_s2 + $0x2f0] sm:$0xff] }
 0x584   :  { %4397 = vmatpush.msra.mxu2 %v3717_v14  ;;  %v3711_v14 = vld [vmem:[%s12045_s2 + $0x2c0] sm:$0xff] }
 0x585   :  { %v10511_v5 = vpop.f32.mrf.mxu3 }
 0x586   :  { %v10513_v61 = vpop.f32.mrf.mxu2  ;;  %v2427_v19 = vpop.permute.xlu1 %2426 }
 0x587   :  { %12442 = vst [vmem:[#allocation16_spill] sm:$0xff] %v10513_v61  ;;  %v10515_v11 = vpop.f32.mrf.mxu1  ;;  %v2431_v44 = vsel %vm2430_vm4, %v2427_v19, %v2429_v4  ;;  %v2421_v60 = vpop.permute.xlu0 %2420  ;;  %v3714_v4 = vld [vmem:[%s12045_s2 + $0x2d8] sm:$0xff] }
 0x588   :  { %2437 = vst.msk [vmem:[#allocation3 + $0x10] sm:$0xff] %vm2436_vm5, %v2431_v44  ;;  %v3718_v44 = vld [vmem:[%s12045_s2 + $0x2f8] sm:$0xff]  ;;  %4398 = vmatpush.msra.mxu2 %v3714_v4  ;;  %v3708_v4 = vld [vmem:[%s12045_s2 + $0x2a8] sm:$0xff] }
 0x589   :  { %2424 = vst.msk [vmem:[#allocation3 + $0x8] sm:$0xff] %vm2423_vm15, %v2421_v60  ;;  %4520 = vmatpush.msrb.mxu1 %v3718_v44  ;;  %v3712_v44 = vld [vmem:[%s12045_s2 + $0x2c8] sm:$0xff] }
 0x58a   :  { %v10520_v28 = vld [vmem:[#allocation3] sm:$0xff]  ;;  %2435 = vst.msk [vmem:[#allocation3 + $0x8] sm:$0xff] %vm2434_vm1, %v2427_v19  ;;  %v3715_v19 = vld [vmem:[%s12045_s2 + $0x2e0] sm:$0xff]  ;;  %4399 = vmatpush.msra.mxu2 %v3711_v14  ;;  %v10583_v51 = vpop.permute.xlu2 %3528 }
 0x58b   :  { %4249 = vmatmul.f32.vlgmr.msrb.gmra.mxu2 %v10520_v28  ;;  %4372 = vmatmul.f32.vlgmr.msra.gmra.mxu1 %v10520_v28  ;;  %v3705_v14 = vld [vmem:[%s12045_s2 + $0x290] sm:$0xff] }
 0x58c   :  { %4521 = vmatpush.msrb.mxu1 %v3715_v19  ;;  %4400 = vmatpush.msra.mxu2 %v3708_v4  ;;  %v3667_v4 = vld [vmem:[%s12045_s2 + $0x160] sm:$0xff] }
 0x58d   :  { %v10539_v60 = vpop.f32.mrf.mxu3 }
 0x58e   :  { %v10541_v61 = vpop.f32.mrf.mxu2  ;;  %v3503_v23 = vpop.permute.xlu1 %3502  ;;  %4522 = vmatpush.msrb.mxu1 %v3712_v44  ;;  %v3670_v44 = vld [vmem:[%s12045_s2 + $0x178] sm:$0xff]  ;;  %4401 = vmatpush.msra.mxu2 %v3705_v14 }
 0x58f   :  { %12443 = vst [vmem:[#allocation17_spill] sm:$0xff] %v10541_v61  ;;  %v10549_v63 = vpop.f32.mrf.mxu1  ;;  %v10551_v48 = vld [vmem:[#allocation3 + $0x10] sm:$0xff]  ;;  %v3501_v37 = vpop.permute.xlu0 %3500  ;;  %v3709_v61 = vld [vmem:[%s12045_s2 + $0x2b0] sm:$0xff]  ;;  %v3511_v58 = vsel %vm2335_vm11, %v3503_v23, %v10525_v38  ;;  %4479 = vmatpush.msrb.mxu0 %v3670_v44 }
 0x590   :  { %6315 = vmatmul.msk.f32.vlgmr.msra.gmra.mxu0 %vm2436_vm5, %v10551_v48  ;;  %4523 = vmatpush.msrb.mxu1 %v3709_v61  ;;  %v3510_v35 = vsel %vm2335_vm11, %v3501_v37, %v3503_v23  ;;  %v3703_v61 = vld [vmem:[%s12045_s2 + $0x280] sm:$0xff]  ;;  %v3520_v44 = vmax.f32 %v10251_v16, %v3511_v58  ;;  %v3664_v37 = vld [vmem:[%s12045_s2 + $0x148] sm:$0xff] }
 0x591   :  { %v10558_v19 = vld [vmem:[#allocation3 + $0x8] sm:$0xff]  ;;  %4480 = vmatpush.msrb.mxu0 %v3667_v4  ;;  %4402 = vmatpush.msra.mxu2 %v3702_v47  ;;  %v3519_v16 = vmax.f32 %v10255_v30, %v3510_v35  ;;  %v3700_v30 = vld [vmem:[%s12045_s2 + $0x268] sm:$0xff]  ;;  %v3661_v35 = vld [vmem:[%s12045_s2 + $0x130] sm:$0xff] }
 0x592   :  { %4290 = vmatmul.f32.vlgmr.msrb.gmra.mxu3 %v10558_v19  ;;  %4524 = vmatpush.msrb.mxu1 %v3706_v41  ;;  %v3693_v47 = vld [vmem:[%s12045_s2 + $0x230] sm:$0xff] }
 0x593   :  { %4252 = vmatmul.f32.gmra.mxu2 %v10277_v8  ;;  %4375 = vmatmul.f32.gmra.mxu1 %v10277_v8 }
 0x594   :  { %4525 = vmatpush.msrb.mxu1 %v3703_v61  ;;  %4403 = vmatpush.msra.mxu2 %v3699_v18  ;;  %v3697_v18 = vld [vmem:[%s12045_s2 + $0x250] sm:$0xff] }
 0x595   :  { %v10586_v6 = vpop.f32.mrf.mxu3  ;;  %4481 = vmatpush.msrb.mxu0 %v3664_v37  ;;  %v3488_v37 = vld [vmem:[#allocation2 + $0x338] sm:$0xff] }
 0x596   :  { %v4104_v22 = vpop.f32.mrf.mxu2  ;;  %v3527_v50 = vpop.permute.xlu1 %3526  ;;  %4526 = vmatpush.msrb.mxu1 %v3700_v30 }
 0x597   :  { %v10598_v23 = vpop.f32.mrf.mxu1  ;;  %v3535_v14 = vsel %vm172_vm0, %v3527_v50, %v10583_v51  ;;  %v3525_v58 = vpop.permute.xlu0 %3524  ;;  %4482 = vmatpush.msrb.mxu0 %v3661_v35  ;;  %v10650_v35 = vld [vmem:[#allocation3 + $0x38] sm:$0xff] }
 0x598   :  { %v3544_v22 = vmax.f32 %v3520_v44, %v3535_v14  ;;  %6316 = vmatmul.msk.f32.gmra.mxu0 %vm2436_vm5, %v10079_v53  ;;  %v3534_v41 = vsel %vm172_vm0, %v3525_v58, %v3527_v50  ;;  %v3696_v53 = vld [vmem:[%s12045_s2 + $0x248] sm:$0xff]  ;;  %v3478_v50 = vld [vmem:[#allocation2 + $0x310] sm:$0xff]  ;;  %v3658_v14 = vld [vmem:[%s12045_s2 + $0x118] sm:$0xff]  ;;  %4527 = vmatpush.msrb.mxu1 %v3697_v18 }
 0x599   :  { %v3543_v4 = vmax.f32 %v3519_v16, %v3534_v41  ;;  %v3473_v44 = vld [vmem:[#allocation2 + $0x2e8] sm:$0xff]  ;;  %4404 = vmatpush.msra.mxu2 %v3696_v53  ;;  %v3694_v16 = vld [vmem:[%s12045_s2 + $0x238] sm:$0xff]  ;;  %4483 = vmatpush.msrb.mxu0 %v3658_v14  ;;  %v3691_v18 = vld [vmem:[%s12045_s2 + $0x220] sm:$0xff] }
 0x59a   :  { %4293 = vmatmul.f32.gmra.mxu3 %v10609_v56  ;;  %3557 = vrot.lane.b32.xlu2 %v3544_v22, %s6568_s20  ;;  %v3483_v41 = vmax.f32 %v3473_v44, %v3478_v50  ;;  %v10647_v53 = vld [vmem:[#allocation3 + $0x48] sm:$0xff]  ;;  %v3687_v44 = vld [vmem:[%s12045_s2 + $0x200] sm:$0xff] }
 0x59b   :  { %4255 = vmatmul.f32.gmra.mxu2 %v10606_v32  ;;  %4378 = vmatmul.f32.gmra.mxu1 %v10606_v32  ;;  %3548 = vst.msk [vmem:[#allocation3 + $0xd8] sm:$0xff] %vm2374_vm14, %v3543_v4  ;;  %v3690_v50 = vld [vmem:[%s12045_s2 + $0x218] sm:$0xff] }
 0x59c   :  { %3555 = vrot.lane.b32.xlu1 %v3543_v4, %s6568_s20  ;;  %3550 = vrot.lane.b32.xlu0 %v3543_v4, %s6569_s21  ;;  %v3726_v4 = vld [vmem:[%s12045_s2 + $0x338] sm:$0xff]  ;;  %v10645_v30 = vmax.f32 %v3483_v41, %v3488_v37  ;;  %v3652_v37 = vld [vmem:[%s12045_s2 + $0xe8] sm:$0xff]  ;;  %v3489_v41 = vld [vmem:[#allocation2 + $0x340] sm:$0xff] }
 0x59d   :  { %v10632_v61 = vpop.f32.mrf.mxu3  ;;  %4405 = vmatpush.msra.mxu2 %v3693_v47  ;;  %4451 = vmatpush.msra.mxu3 %v3726_v4  ;;  %v3479_v47 = vld [vmem:[#allocation2 + $0x318] sm:$0xff]  ;;  %v3649_v4 = vld [vmem:[%s12045_s2 + $0xd0] sm:$0xff] }
 0x59e   :  { %4528 = vmatpush.msrb.mxu1 %v3694_v16  ;;  %v3474_v16 = vld [vmem:[#allocation2 + $0x2f0] sm:$0xff] }
 0x59f   :  { %v4227_v58 = vpop.f32.mrf.mxu1  ;;  %4406 = vmatpush.msra.mxu2 %v3690_v50  ;;  %v3484_v49 = vmax.f32 %v3474_v16, %v3479_v47  ;;  %v3685_v47 = vld [vmem:[%s12045_s2 + $0x1f0] sm:$0xff]  ;;  %v3643_v16 = vld [vmem:[%s12045_s2 + $0xa0] sm:$0xff] }
 0x5a0   :  { %6317 = vmatmul.msk.f32.gmra.mxu0 %vm2436_vm5, %v10089_v7  ;;  %v3655_v7 = vld [vmem:[%s12045_s2 + $0x100] sm:$0xff]  ;;  %v3688_v58 = vld [vmem:[%s12045_s2 + $0x208] sm:$0xff]  ;;  %4529 = vmatpush.msrb.mxu1 %v3691_v18 }
 0x5a1   :  { %4484 = vmatpush.msrb.mxu0 %v3655_v7  ;;  %4407 = vmatpush.msra.mxu2 %v3687_v44  ;;  %v10684_v50 = vmax.f32 %v3484_v49, %v3489_v41  ;;  %v10686_v7 = vld [vmem:[#allocation3 + $0x60] sm:$0xff]  ;;  %v10689_v18 = vld [vmem:[#allocation3 + $0x50] sm:$0xff]  ;;  %v3646_v49 = vld [vmem:[%s12045_s2 + $0xb8] sm:$0xff] }
 0x5a2   :  { %4296 = vmatmul.f32.gmra.mxu3 %v10650_v35  ;;  %3506 = vrot.lane.b32.xlu2 %v10645_v30, %s6569_s21  ;;  %v3682_v44 = vld [vmem:[%s12045_s2 + $0x1d8] sm:$0xff]  ;;  %v3723_v41 = vld [vmem:[%s12045_s2 + $0x320] sm:$0xff] }
 0x5a3   :  { %4258 = vmatmul.f32.gmra.mxu2 %v10647_v53  ;;  %4381 = vmatmul.f32.gmra.mxu1 %v10647_v53 }
 0x5a4   :  { %3566 = vrot.lane.b32.xlu1 %v3544_v22, %s6571_s19  ;;  %3562 = vrot.lane.b32.xlu0 %v3544_v22, %s6570_s0  ;;  %v3684_v22 = vld [vmem:[%s12045_s2 + $0x1e8] sm:$0xff] }
 0x5a5   :  { %v3981_v14 = vpop.f32.mrf.mxu3  ;;  %4485 = vmatpush.msrb.mxu0 %v3652_v37  ;;  %4530 = vmatpush.msrb.mxu1 %v3688_v58  ;;  %v3678_v37 = vld [vmem:[%s12045_s2 + $0x1b8] sm:$0xff]  ;;  %v3679_v58 = vld [vmem:[%s12045_s2 + $0x1c0] sm:$0xff] }
 0x5a6   :  { %4408 = vmatpush.msra.mxu2 %v3684_v22  ;;  %v3675_v22 = vld [vmem:[%s12045_s2 + $0x1a0] sm:$0xff]  ;;  %4452 = vmatpush.msra.mxu3 %v3723_v41  ;;  %v3634_v41 = vld [vmem:[%s12045_s2 + $0x58] sm:$0xff] }
 0x5a7   :  { %4486 = vmatpush.msrb.mxu0 %v3649_v4  ;;  %4531 = vmatpush.msrb.mxu1 %v3685_v47  ;;  %v3640_v4 = vld [vmem:[%s12045_s2 + $0x88] sm:$0xff] }
 0x5a8   :  { %6318 = vmatmul.msk.f32.gmra.mxu0 %vm2436_vm5, %v10106_v13  ;;  %v3681_v13 = vld [vmem:[%s12045_s2 + $0x1d0] sm:$0xff]  ;;  %v3676_v47 = vld [vmem:[%s12045_s2 + $0x1a8] sm:$0xff] }
 0x5a9   :  { %4409 = vmatpush.msra.mxu2 %v3681_v13  ;;  %4487 = vmatpush.msrb.mxu0 %v3646_v49  ;;  %v10736_v13 = vld [vmem:[#allocation3 + $0x78] sm:$0xff] }
 0x5aa   :  { %4299 = vmatmul.f32.gmra.mxu3 %v10689_v18  ;;  %3532 = vrot.lane.b32.xlu2 %v10684_v50, %s6568_s20  ;;  %v3672_v49 = vld [vmem:[%s12045_s2 + $0x188] sm:$0xff] }
 0x5ab   :  { %4261 = vmatmul.f32.gmra.mxu2 %v10686_v7  ;;  %4384 = vmatmul.f32.gmra.mxu1 %v10686_v7 }
 0x5ac   :  { %3530 = vrot.lane.b32.xlu1 %v10645_v30, %s6568_s20  ;;  %3508 = vrot.lane.b32.xlu0 %v10684_v50, %s6569_s21 }
 0x5ad   :  { %v10714_v14 = vpop.f32.mrf.mxu3  ;;  %4532 = vmatpush.msrb.mxu1 %v3682_v44  ;;  %4410 = vmatpush.msra.mxu2 %v3678_v37  ;;  %v3720_v44 = vld [vmem:[%s12045_s2 + $0x308] sm:$0xff]  ;;  %v3637_v37 = vld [vmem:[%s12045_s2 + $0x70] sm:$0xff] }
 0x5ae   :  { %12444 = vst [vmem:[#allocation78_spill] sm:$0xff] %v10714_v14  ;;  %4488 = vmatpush.msrb.mxu0 %v3643_v16  ;;  %v3673_v16 = vld [vmem:[%s12045_s2 + $0x190] sm:$0xff]  ;;  %4453 = vmatpush.msra.mxu3 %v3720_v44 }
 0x5af   :  { %4533 = vmatpush.msrb.mxu1 %v3679_v58  ;;  %4411 = vmatpush.msra.mxu2 %v3675_v22  ;;  %v3631_v22 = vld [vmem:[%s12045_s2 + $0x40] sm:$0xff] }
 0x5b0   :  { %6319 = vmatmul.msk.f32.gmra.mxu0 %vm2436_vm5, %v10137_v39  ;;  %v10739_v39 = vld [vmem:[#allocation3 + $0x68] sm:$0xff] }
 0x5b1   :  { %4489 = vmatpush.msrb.mxu0 %v3640_v4  ;;  %4534 = vmatpush.msrb.mxu1 %v3676_v47  ;;  %v10765_v4 = vld [vmem:[#allocation3 + $0x90] sm:$0xff]  ;;  %v10768_v47 = vld [vmem:[#allocation3 + $0x80] sm:$0xff] }
 0x5b2   :  { %4302 = vmatmul.f32.gmra.mxu3 %v10739_v39  ;;  %4412 = vmatpush.msra.mxu2 %v3672_v49  ;;  %v3628_v49 = vld [vmem:[%s12045_s2 + $0x28] sm:$0xff] }
 0x5b3   :  { %4264 = vmatmul.f32.gmra.mxu2 %v10736_v13  ;;  %4387 = vmatmul.f32.gmra.mxu1 %v10736_v13 }
 0x5b4   :  { %4490 = vmatpush.msrb.mxu0 %v3637_v37  ;;  %4535 = vmatpush.msrb.mxu1 %v3673_v16  ;;  %v10782_v37 = vld [vmem:[#allocation3 + $0xa8] sm:$0xff]  ;;  %v10785_v16 = vld [vmem:[#allocation3 + $0x98] sm:$0xff] }
 0x5b5   :  { %v10755_v58 = vpop.f32.mrf.mxu3 }
 0x5b6   :  { %12445 = vst [vmem:[#allocation75_spill] sm:$0xff] %v10755_v58  ;;  %4491 = vmatpush.msrb.mxu0 %v3634_v41  ;;  %v10999_v58 = vld [vmem:[#allocation3 + $0x30] sm:$0xff] }
 0x5b8   :  { %6320 = vmatmul.msk.f32.gmra.mxu0 %vm2436_vm5, %v10165_v34  ;;  %v3625_v34 = vld [vmem:[%s12045_s2 + $0x10] sm:$0xff] }
 0x5b9   :  { %4492 = vmatpush.msrb.mxu0 %v3631_v22  ;;  %v10793_v22 = vld [vmem:[#allocation3 + $0xb0] sm:$0xff] }
 0x5ba   :  { %4305 = vmatmul.f32.gmra.mxu3 %v10768_v47 }
 0x5bb   :  { %4267 = vmatmul.f32.gmra.mxu2 %v10765_v4  ;;  %4390 = vmatmul.f32.gmra.mxu1 %v10765_v4 }
 0x5bc   :  { %4493 = vmatpush.msrb.mxu0 %v3628_v49  ;;  %v6432_v49 = vld [vmem:[%s12045_s2 + $0x978] sm:$0xff] }
 0x5bd   :  { %v10778_v44 = vpop.f32.mrf.mxu3 }
 0x5be   :  { %12446 = vst [vmem:[#allocation18_spill] sm:$0xff] %v10778_v44  ;;  %4494 = vmatpush.msrb.mxu0 %v3625_v34  ;;  %v6426_v44 = vld [vmem:[%s12045_s2 + $0x948] sm:$0xff] }
 0x5c0   :  { %6321 = vmatmul.msk.f32.gmra.mxu0 %vm2436_vm5, %v10193_v10 }
 0x5c1   :  { %4797 = vmatpush.msra.mxu0 %v6432_v49  ;;  %v6423_v49 = vld [vmem:[%s12045_s2 + $0x930] sm:$0xff] }
 0x5c2   :  { %4308 = vmatmul.f32.gmra.mxu3 %v10785_v16 }
 0x5c3   :  { %4270 = vmatmul.f32.gmra.mxu2 %v10782_v37  ;;  %4393 = vmatmul.f32.gmra.mxu1 %v10782_v37 }
 0x5c5   :  { %v10789_v41 = vpop.f32.mrf.mxu3 }
 0x5c8   :  { %6322 = vmatmul.msk.f32.gmra.mxu0 %vm2436_vm5, %v10223_v2  ;;  %v6384_v2 = vld [vmem:[%s12045_s2 + $0x7f8] sm:$0xff] }
 0x5c9   :  { %4756 = vmatpush.msrb.mxu3 %v6384_v2  ;;  %v6375_v2 = vld [vmem:[%s12045_s2 + $0x7b0] sm:$0xff] }
 0x5ca   :  { %4311 = vmatmul.f32.gmra.mxu3 %v10793_v22 }
 0x5cb   :  { %4413 = vmatmul.f32.vlgmr.msra.gmra.mxu2 %v10558_v19  ;;  %4536 = vmatmul.f32.vlgmr.msrb.gmra.mxu1 %v10558_v19  ;;  %v6381_v19 = vld [vmem:[%s12045_s2 + $0x7e0] sm:$0xff] }
 0x5cc   :  { %4757 = vmatpush.msrb.mxu3 %v6381_v19  ;;  %v10833_v19 = vld [vmem:[#allocation3 + $0x28] sm:$0xff] }
 0x5cd   :  { %v10798_v10 = vpop.f32.mrf.mxu3 }
 0x5d0   :  { %4495 = vmatmul.f32.vlgmr.msrb.gmra.mxu0 %v10520_v28  ;;  %v6429_v28 = vld [vmem:[%s12045_s2 + $0x960] sm:$0xff] }
 0x5d1   :  { %4798 = vmatpush.msra.mxu0 %v6429_v28  ;;  %v6369_v28 = vld [vmem:[%s12045_s2 + $0x780] sm:$0xff] }
 0x5d2   :  { %6323 = vmatmul.msk.f32.vlgmr.msra.gmra.mxu3 %vm2436_vm5, %v10551_v48 }
 0x5d3   :  { %4416 = vmatmul.f32.gmra.mxu2 %v10609_v56  ;;  %4539 = vmatmul.f32.gmra.mxu1 %v10609_v56  ;;  %v6378_v56 = vld [vmem:[%s12045_s2 + $0x7c8] sm:$0xff] }
 0x5d4   :  { %4758 = vmatpush.msrb.mxu3 %v6378_v56  ;;  %4799 = vmatpush.msra.mxu0 %v6426_v44  ;;  %v6420_v44 = vld [vmem:[%s12045_s2 + $0x918] sm:$0xff] }
 0x5d5   :  { %v10817_v34 = vpop.f32.mrf.mxu3 }
 0x5d6   :  { %4759 = vmatpush.msrb.mxu3 %v6375_v2  ;;  %4800 = vmatpush.msra.mxu0 %v6423_v49  ;;  %v3727_v2 = vld [vmem:[%s12045_s2 + $0x340] sm:$0xff]  ;;  %v6366_v49 = vld [vmem:[%s12045_s2 + $0x768] sm:$0xff] }
 0x5d7   :  { %4574 = vmatpush.msrb.mxu2 %v3727_v2  ;;  %v6408_v2 = vld [vmem:[%s12045_s2 + $0x8b8] sm:$0xff] }
 0x5d8   :  { %4498 = vmatmul.f32.gmra.mxu0 %v10277_v8  ;;  %v6372_v8 = vld [vmem:[%s12045_s2 + $0x798] sm:$0xff] }
 0x5d9   :  { %4760 = vmatpush.msrb.mxu3 %v6372_v8  ;;  %4801 = vmatpush.msra.mxu0 %v6420_v44  ;;  %v6414_v8 = vld [vmem:[%s12045_s2 + $0x8e8] sm:$0xff]  ;;  %v6363_v44 = vld [vmem:[%s12045_s2 + $0x750] sm:$0xff] }
 0x5da   :  { %6324 = vmatmul.msk.f32.gmra.mxu3 %vm2436_vm5, %v10833_v19 }
 0x5db   :  { %4419 = vmatmul.f32.gmra.mxu2 %v10650_v35  ;;  %4542 = vmatmul.f32.gmra.mxu1 %v10650_v35  ;;  %v6417_v35 = vld [vmem:[%s12045_s2 + $0x900] sm:$0xff] }
 0x5dc   :  { %4761 = vmatpush.msrb.mxu3 %v6369_v28  ;;  %4802 = vmatpush.msra.mxu0 %v6417_v35  ;;  %v10866_v28 = vld [vmem:[#allocation3 + $0x40] sm:$0xff]  ;;  %v6360_v35 = vld [vmem:[%s12045_s2 + $0x738] sm:$0xff] }
 0x5dd   :  { %v10847_v56 = vpop.f32.mrf.mxu3 }
 0x5de   :  { %4762 = vmatpush.msrb.mxu3 %v6366_v49  ;;  %4803 = vmatpush.msra.mxu0 %v6414_v8  ;;  %v6441_v49 = vld [vmem:[%s12045_s2 + $0x9c0] sm:$0xff] }
 0x5df   :  { %4851 = vmatpush.msra.mxu1 %v6441_v49  ;;  %v6405_v8 = vld [vmem:[%s12045_s2 + $0x8a0] sm:$0xff]  ;;  %v6351_v49 = vld [vmem:[%s12045_s2 + $0x6f0] sm:$0xff] }
 0x5e0   :  { %4501 = vmatmul.f32.gmra.mxu0 %v10606_v32  ;;  %v6411_v32 = vld [vmem:[%s12045_s2 + $0x8d0] sm:$0xff]  ;;  %4763 = vmatpush.msrb.mxu3 %v6363_v44  ;;  %v3724_v44 = vld [vmem:[%s12045_s2 + $0x328] sm:$0xff] }
 0x5e1   :  { %4804 = vmatpush.msra.mxu0 %v6411_v32  ;;  %4575 = vmatpush.msrb.mxu2 %v3724_v44  ;;  %v6402_v32 = vld [vmem:[%s12045_s2 + $0x888] sm:$0xff]  ;;  %v6348_v44 = vld [vmem:[%s12045_s2 + $0x6d8] sm:$0xff] }
 0x5e2   :  { %6325 = vmatmul.msk.f32.gmra.mxu3 %vm2436_vm5, %v10866_v28 }
 0x5e3   :  { %4422 = vmatmul.f32.gmra.mxu2 %v10689_v18  ;;  %4545 = vmatmul.f32.gmra.mxu1 %v10689_v18  ;;  %v6357_v18 = vld [vmem:[%s12045_s2 + $0x720] sm:$0xff] }
 0x5e4   :  { %4764 = vmatpush.msrb.mxu3 %v6360_v35  ;;  %4805 = vmatpush.msra.mxu0 %v6408_v2  ;;  %v6438_v35 = vld [vmem:[%s12045_s2 + $0x9a8] sm:$0xff] }
 0x5e5   :  { %v4145_v14 = vpop.f32.mrf.mxu3  ;;  %v10903_v2 = vld [vmem:[#allocation3 + $0x58] sm:$0xff]  ;;  %4852 = vmatpush.msra.mxu1 %v6438_v35 }
 0x5e6   :  { %4765 = vmatpush.msrb.mxu3 %v6357_v18  ;;  %v6354_v14 = vld [vmem:[%s12045_s2 + $0x708] sm:$0xff]  ;;  %4806 = vmatpush.msra.mxu0 %v6405_v8  ;;  %v6399_v18 = vld [vmem:[%s12045_s2 + $0x870] sm:$0xff] }
 0x5e7   :  { %v6435_v8 = vld [vmem:[%s12045_s2 + $0x990] sm:$0xff]  ;;  %v6342_v35 = vld [vmem:[%s12045_s2 + $0x6a8] sm:$0xff] }
 0x5e8   :  { %4504 = vmatmul.f32.gmra.mxu0 %v10647_v53  ;;  %v3721_v53 = vld [vmem:[%s12045_s2 + $0x310] sm:$0xff]  ;;  %4766 = vmatpush.msrb.mxu3 %v6354_v14  ;;  %v6345_v14 = vld [vmem:[%s12045_s2 + $0x6c0] sm:$0xff] }
 0x5e9   :  { %4807 = vmatpush.msra.mxu0 %v6402_v32  ;;  %4576 = vmatpush.msrb.mxu2 %v3721_v53  ;;  %v6393_v32 = vld [vmem:[%s12045_s2 + $0x840] sm:$0xff] }
 0x5ea   :  { %6326 = vmatmul.msk.f32.gmra.mxu3 %vm2436_vm5, %v10903_v2  ;;  %4853 = vmatpush.msra.mxu1 %v6435_v8  ;;  %v10937_v53 = vld [vmem:[#allocation3 + $0x70] sm:$0xff]  ;;  %v10953_v8 = vld [vmem:[#allocation3 + $0x88] sm:$0xff] }
 0x5eb   :  { %4425 = vmatmul.f32.gmra.mxu2 %v10739_v39  ;;  %4548 = vmatmul.f32.gmra.mxu1 %v10739_v39  ;;  %v6396_v39 = vld [vmem:[%s12045_s2 + $0x858] sm:$0xff] }
 0x5ec   :  { %4767 = vmatpush.msrb.mxu3 %v6351_v49  ;;  %4808 = vmatpush.msra.mxu0 %v6399_v18  ;;  %v6339_v49 = vld [vmem:[%s12045_s2 + $0x690] sm:$0xff] }
 0x5ed   :  { %v6387_v18 = vld [vmem:[%s12045_s2 + $0x810] sm:$0xff] }
 0x5ee   :  { %4768 = vmatpush.msrb.mxu3 %v6348_v44  ;;  %4809 = vmatpush.msra.mxu0 %v6396_v39  ;;  %v10968_v39 = vld [vmem:[#allocation3 + $0xb8] sm:$0xff] }
 0x5f0   :  { %4507 = vmatmul.f32.gmra.mxu0 %v10686_v7  ;;  %4769 = vmatpush.msrb.mxu3 %v6345_v14  ;;  %v6390_v7 = vld [vmem:[%s12045_s2 + $0x828] sm:$0xff] }
 0x5f1   :  { %4810 = vmatpush.msra.mxu0 %v6393_v32 }
 0x5f2   :  { %6327 = vmatmul.msk.f32.gmra.mxu3 %vm2436_vm5, %v10937_v53 }
 0x5f3   :  { %4428 = vmatmul.f32.gmra.mxu2 %v10768_v47  ;;  %4551 = vmatmul.f32.gmra.mxu1 %v10768_v47  ;;  %v10960_v47 = vld [vmem:[#allocation3 + $0xa0] sm:$0xff] }
 0x5f4   :  { %4770 = vmatpush.msrb.mxu3 %v6342_v35  ;;  %4811 = vmatpush.msra.mxu0 %v6390_v7  ;;  %v3558_v44 = vpop.permute.xlu2 %3557  ;;  %v6382_v35 = vld [vmem:[%s12045_s2 + $0x7e8] sm:$0xff] }
 0x5f5   :  { %v10988_v7 = vld [vmem:[#allocation3 + $0x38] sm:$0xff] }
 0x5f6   :  { %4771 = vmatpush.msrb.mxu3 %v6339_v49  ;;  %4812 = vmatpush.msra.mxu0 %v6387_v18  ;;  %v3920_v49 = vadd.f32 %v10280_v62, %v10102_v42  ;;  %v11008_v42 = vld [vmem:[#allocation3 + $0x58] sm:$0xff]  ;;  %v6373_v62 = vld [vmem:[%s12045_s2 + $0x7a0] sm:$0xff] }
 0x5f8   :  { %4510 = vmatmul.f32.gmra.mxu0 %v10736_v13 }
 0x5fa   :  { %6328 = vmatmul.msk.f32.gmra.mxu3 %vm2436_vm5, %v10953_v8 }
 0x5fb   :  { %4431 = vmatmul.f32.gmra.mxu2 %v10785_v16  ;;  %4554 = vmatmul.f32.gmra.mxu1 %v10785_v16  ;;  %v6385_v16 = vld [vmem:[%s12045_s2 + $0x800] sm:$0xff] }
 0x5fc   :  { %4879 = vmatpush.msra.mxu2 %v6385_v16  ;;  %v6379_v16 = vld [vmem:[%s12045_s2 + $0x7d0] sm:$0xff] }
 0x5fe   :  { %4880 = vmatpush.msra.mxu2 %v6382_v35 }
 0x600   :  { %4513 = vmatmul.f32.gmra.mxu0 %v10765_v4  ;;  %v10974_v4 = vld [vmem:[#allocation3 + $0x40] sm:$0xff]  ;;  %4881 = vmatpush.msra.mxu2 %v6379_v16 }
 0x602   :  { %6329 = vmatmul.msk.f32.gmra.mxu3 %vm2436_vm5, %v10960_v47 }
 0x603   :  { %4434 = vmatmul.f32.gmra.mxu2 %v10793_v22  ;;  %4557 = vmatmul.f32.gmra.mxu1 %v10793_v22 }
 0x608   :  { %v10965_v13 = vpop.f32.mrf.mxu1  ;;  %4516 = vmatmul.f32.gmra.mxu0 %v10782_v37 }
 0x609   :  { %12447 = vst [vmem:[#allocation77_spill] sm:$0xff] %v10965_v13 }
 0x60a   :  { %6330 = vmatmul.msk.f32.gmra.mxu3 %vm2436_vm5, %v10968_v39 }
 0x60b   :  { %6331 = vmatmul.msk.f32.vlgmr.msrb.gmra.mxu2 %vm2436_vm5, %v10551_v48  ;;  %6444 = vmatmul.msk.f32.vlgmr.msra.gmra.mxu1 %vm2436_vm5, %v10974_v4 }
 0x60d   :  { %v10981_v37 = vpop.f32.mrf.mxu0 }
 0x60e   :  { %v4250_v22 = vpop.f32.mrf.mxu2  ;;  %v3556_v14 = vpop.permute.xlu1 %3555 }
 0x60f   :  { %v3551_v32 = vpop.permute.xlu0 %3550  ;;  %v3559_v48 = vsel %vm172_vm0, %v3556_v14, %v3558_v44  ;;  %v6376_v44 = vld [vmem:[%s12045_s2 + $0x7b8] sm:$0xff]  ;;  %v3961_v14 = vadd.f32 %v10473_v9, %v3920_v49  ;;  %v3507_v9 = vpop.permute.xlu2 %3506 }
 0x610   :  { %3553 = vst.msk [vmem:[#allocation3 + $0xd8] sm:$0xff] %vm2380_vm2, %v3551_v32  ;;  %v10993_v18 = vpop.f32.mrf.mxu1  ;;  %4813 = vmatmul.f32.vlgmr.msra.gmra.mxu0 %v10988_v7  ;;  %4882 = vmatpush.msra.mxu2 %v6376_v44  ;;  %v6433_v32 = vld [vmem:[%s12045_s2 + $0x980] sm:$0xff]  ;;  %v6370_v44 = vld [vmem:[%s12045_s2 + $0x788] sm:$0xff] }
 0x611   :  { %3561 = vst.msk [vmem:[#allocation3 + $0xd8] sm:$0xff] %vm2389_vm8, %v3559_v48  ;;  %v4251_v35 = vadd.f32 %v4250_v22, %v3961_v14  ;;  %4920 = vmatpush.msra.mxu3 %v6433_v32  ;;  %v11029_v22 = vld [vmem:[#allocation3 + $0x50] sm:$0xff]  ;;  %v3923_v14 = vadd.f32 %v10287_v17, %v10123_v24  ;;  %v6367_v32 = vld [vmem:[%s12045_s2 + $0x770] sm:$0xff]  ;;  %v6364_v24 = vld [vmem:[%s12045_s2 + $0x758] sm:$0xff] }
 0x612   :  { %12448 = vst [vmem:[#allocation19_spill] sm:$0xff] %v10993_v18  ;;  %4772 = vmatmul.f32.vlgmr.msrb.gmra.mxu3 %v10999_v58  ;;  %4883 = vmatpush.msra.mxu2 %v6373_v62  ;;  %v6424_v17 = vld [vmem:[%s12045_s2 + $0x938] sm:$0xff] }
 0x613   :  { %6332 = vmatmul.msk.f32.gmra.mxu2 %vm2436_vm5, %v10833_v19  ;;  %6445 = vmatmul.msk.f32.gmra.mxu1 %vm2436_vm5, %v11008_v42 }
 0x614   :  { %4884 = vmatpush.msra.mxu2 %v6370_v44  ;;  %4921 = vmatpush.msra.mxu3 %v6430_v57  ;;  %v11044_v57 = vld [vmem:[#allocation3 + $0x48] sm:$0xff]  ;;  %v6361_v44 = vld [vmem:[%s12045_s2 + $0x740] sm:$0xff] }
 0x615   :  { %v4291_v48 = vpop.f32.mrf.mxu3  ;;  %v11027_v21 = vpop.f32.mrf.mxu0 }
 0x616   :  { %v4253_v19 = vpop.f32.mrf.mxu2  ;;  %v11018_v49 = vadd.f32 %v4291_v48, %v4251_v35  ;;  %v3567_v16 = vpop.permute.xlu1 %3566  ;;  %v6427_v35 = vld [vmem:[%s12045_s2 + $0x950] sm:$0xff]  ;;  %4885 = vmatpush.msra.mxu2 %v6367_v32  ;;  %v11056_v48 = vld [vmem:[#allocation3 + $0x70] sm:$0xff] }
 0x617   :  { %v3563_v18 = vpop.permute.xlu0 %3562  ;;  %3570 = vst.msk [vmem:[#allocation3 + $0xe0] sm:$0xff] %vm2401_vm3, %v3567_v16  ;;  %4922 = vmatpush.msra.mxu3 %v6427_v35 }
 0x618   :  { %3565 = vst.msk [vmem:[#allocation3 + $0xd8] sm:$0xff] %vm2394_vm9, %v3563_v18  ;;  %v11034_v62 = vpop.f32.mrf.mxu1  ;;  %4816 = vmatmul.f32.gmra.mxu0 %v11029_v22  ;;  %v3964_v18 = vadd.f32 %v10491_v33, %v3923_v14  ;;  %4886 = vmatpush.msra.mxu2 %v6364_v24  ;;  %v6421_v33 = vld [vmem:[%s12045_s2 + $0x920] sm:$0xff]  ;;  %v6358_v24 = vld [vmem:[%s12045_s2 + $0x728] sm:$0xff] }
 0x619   :  { %12449 = vst [vmem:[#allocation80_spill] sm:$0xff] %v11034_v62  ;;  %4923 = vmatpush.msra.mxu3 %v6424_v17 }
 0x61a   :  { %3569 = vst.msk [vmem:[#allocation3 + $0xd8] sm:$0xff] %vm2399_vm10, %v3567_v16  ;;  %4775 = vmatmul.f32.gmra.mxu3 %v11044_v57  ;;  %v3512_v16 = vsel %vm2335_vm11, %v10525_v38, %v3507_v9  ;;  %4887 = vmatpush.msra.mxu2 %v6361_v44  ;;  %v3533_v44 = vpop.permute.xlu2 %3532 }
 0x61b   :  { %6333 = vmatmul.msk.f32.gmra.mxu2 %vm2436_vm5, %v10866_v28  ;;  %6446 = vmatmul.msk.f32.gmra.mxu1 %vm2436_vm5, %v11056_v48  ;;  %v4254_v28 = vadd.f32 %v4253_v19, %v3964_v18  ;;  %v3521_v35 = vmax.f32 %v10253_v46, %v3512_v16  ;;  %v11082_v46 = vld [vmem:[#allocation3 + $0x68] sm:$0xff]  ;;  %v3926_v16 = vadd.f32 %v10294_v15, %v10159_v12 }
 0x61c   :  { %4924 = vmatpush.msra.mxu3 %v6421_v33  ;;  %4888 = vmatpush.msra.mxu2 %v6358_v24 }
 0x61d   :  { %v4294_v32 = vpop.f32.mrf.mxu3  ;;  %v11080_v18 = vpop.f32.mrf.mxu0  ;;  %v3967_v12 = vadd.f32 %v10501_v1, %v3926_v16 }
 0x61e   :  { %v4256_v14 = vpop.f32.mrf.mxu2  ;;  %v11069_v38 = vadd.f32 %v4294_v32, %v4254_v28  ;;  %v3531_v62 = vpop.permute.xlu1 %3530  ;;  %4925 = vmatpush.msra.mxu3 %v6418_v59  ;;  %v6415_v59 = vld [vmem:[%s12045_s2 + $0x8f0] sm:$0xff] }
 0x61f   :  { %v3509_v13 = vpop.permute.xlu0 %3508  ;;  %v3536_v19 = vsel %vm172_vm0, %v10583_v51, %v3531_v62  ;;  %v6355_v51 = vld [vmem:[%s12045_s2 + $0x710] sm:$0xff]  ;;  %v4257_v1 = vadd.f32 %v4256_v14, %v3967_v12  ;;  %v6409_v14 = vld [vmem:[%s12045_s2 + $0x8c0] sm:$0xff] }
 0x620   :  { %v3513_v17 = vsel %vm2335_vm11, %v3507_v9, %v3509_v13  ;;  %v3545_v33 = vmax.f32 %v3521_v35, %v3536_v19  ;;  %v11087_v32 = vpop.f32.mrf.mxu1  ;;  %4819 = vmatmul.f32.gmra.mxu0 %v11082_v46  ;;  %v3537_v9 = vsel %vm172_vm0, %v3531_v62, %v3533_v44  ;;  %4889 = vmatpush.msra.mxu2 %v6355_v51  ;;  %v6352_v62 = vld [vmem:[%s12045_s2 + $0x6f8] sm:$0xff]  ;;  %v6349_v35 = vld [vmem:[%s12045_s2 + $0x6e0] sm:$0xff]  ;;  %v11130_v51 = vld [vmem:[#allocation3 + $0x80] sm:$0xff] }
 0x621   :  { %v3522_v28 = vmax.f32 %v10645_v30, %v3513_v17  ;;  %12450 = vst [vmem:[#allocation20_spill] sm:$0xff] %v11087_v32  ;;  %v11100_v30 = vld [vmem:[#allocation3 + $0x88] sm:$0xff]  ;;  %4926 = vmatpush.msra.mxu3 %v6415_v59  ;;  %v3523_v17 = vmax.f32 %v10684_v50, %v3509_v13  ;;  %v11137_v13 = vld [vmem:[#allocation3 + $0x78] sm:$0xff] }
 0x622   :  { %4778 = vmatmul.f32.gmra.mxu3 %v11094_v54  ;;  %3576 = vrot.lane.b32.xlu1 %v3545_v33, %s6575_s25  ;;  %v6404_v32 = vld [vmem:[%s12045_s2 + $0x898] sm:$0xff] }
 0x623   :  { %v3546_v15 = vmax.f32 %v3522_v28, %v3537_v9  ;;  %6334 = vmatmul.msk.f32.gmra.mxu2 %vm2436_vm5, %v10903_v2  ;;  %6447 = vmatmul.msk.f32.gmra.mxu1 %vm2436_vm5, %v11100_v30  ;;  %v6412_v2 = vld [vmem:[%s12045_s2 + $0x8d8] sm:$0xff]  ;;  %v3929_v9 = vadd.f32 %v10301_v40, %v10200_v31  ;;  %v3547_v59 = vmax.f32 %v3523_v17, %v3533_v44  ;;  %v6406_v31 = vld [vmem:[%s12045_s2 + $0x8a8] sm:$0xff]  ;;  %v6343_v40 = vld [vmem:[%s12045_s2 + $0x6b0] sm:$0xff] }
 0x624   :  { %3572 = vrot.lane.b32.xlu0 %v3545_v33, %s6572_s22  ;;  %4890 = vmatpush.msra.mxu2 %v6352_v62  ;;  %v6346_v33 = vld [vmem:[%s12045_s2 + $0x6c8] sm:$0xff]  ;;  %v11143_v62 = vld [vmem:[#allocation3 + $0xa0] sm:$0xff]  ;;  %v6340_v44 = vld [vmem:[%s12045_s2 + $0x698] sm:$0xff]  ;;  %v3932_v17 = vadd.f32 %v10320_v29, %v10227_v20 }
 0x625   :  { %3581 = vrot.lane.b32.xlu2 %v3546_v15, %s6574_s24  ;;  %v4297_v19 = vpop.f32.mrf.mxu3  ;;  %v11128_v28 = vpop.f32.mrf.mxu0  ;;  %4927 = vmatpush.msra.mxu3 %v6412_v2  ;;  %v3970_v12 = vadd.f32 %v10511_v5, %v3929_v9  ;;  %v11179_v9 = vld [vmem:[#allocation3 + $0x90] sm:$0xff]  ;;  %v11187_v20 = vld [vmem:[#allocation3 + $0xb8] sm:$0xff] }
 0x626   :  { %v4259_v24 = vpop.f32.mrf.mxu2  ;;  %v11120_v16 = vadd.f32 %v4297_v19, %v4257_v1  ;;  %4891 = vmatpush.msra.mxu2 %v6349_v35  ;;  %v11169_v19 = vld [vmem:[#allocation3 + $0x98] sm:$0xff] }
 0x627   :  { %4928 = vmatpush.msra.mxu3 %v6409_v14  ;;  %v4260_v5 = vadd.f32 %v4259_v24, %v3970_v12  ;;  %v3935_v12 = vadd.f32 %v10354_v26, %v10240_v45  ;;  %v6394_v29 = vld [vmem:[%s12045_s2 + $0x848] sm:$0xff]  ;;  %v6391_v26 = vld [vmem:[%s12045_s2 + $0x830] sm:$0xff] }
 0x628   :  { %v11134_v50 = vpop.f32.mrf.mxu1  ;;  %4822 = vmatmul.f32.gmra.mxu0 %v11130_v51  ;;  %4892 = vmatpush.msra.mxu2 %v6346_v33  ;;  %v6397_v33 = vld [vmem:[%s12045_s2 + $0x860] sm:$0xff] }
 0x629   :  { %12451 = vst [vmem:[#allocation21_spill] sm:$0xff] %v11134_v50  ;;  %4929 = vmatpush.msra.mxu3 %v6406_v31  ;;  %v3976_v31 = vadd.f32 %v10586_v6, %v3935_v12  ;;  %v6407_v50 = vld [vmem:[%s12045_s2 + $0x8b0] sm:$0xff] }
 0x62a   :  { %4781 = vmatmul.f32.gmra.mxu3 %v11137_v13  ;;  %3590 = vrot.lane.b32.xlu1 %v3546_v15, %s6576_s26 }
 0x62b   :  { %6335 = vmatmul.msk.f32.gmra.mxu2 %vm2436_vm5, %v10937_v53  ;;  %6448 = vmatmul.msk.f32.gmra.mxu1 %vm2436_vm5, %v11143_v62  ;;  %v6403_v53 = vld [vmem:[%s12045_s2 + $0x890] sm:$0xff] }
 0x62c   :  { %3585 = vrot.lane.b32.xlu0 %v3546_v15, %s6573_s23  ;;  %4893 = vmatpush.msra.mxu2 %v6343_v40  ;;  %v6400_v15 = vld [vmem:[%s12045_s2 + $0x878] sm:$0xff] }
 0x62d   :  { %3592 = vrot.lane.b32.xlu2 %v3547_v59, %s6576_s26  ;;  %v4300_v2 = vpop.f32.mrf.mxu3  ;;  %v11167_v24 = vpop.f32.mrf.mxu0  ;;  %4930 = vmatpush.msra.mxu3 %v6403_v53  ;;  %v3973_v59 = vadd.f32 %v10539_v60, %v3932_v17  ;;  %v6388_v53 = vld [vmem:[%s12045_s2 + $0x818] sm:$0xff]  ;;  %v11217_v17 = vld [vmem:[#allocation3 + $0xd0] sm:$0xff] }
 0x62e   :  { %v4262_v1 = vpop.f32.mrf.mxu2  ;;  %v11162_v35 = vadd.f32 %v4300_v2, %v4260_v5  ;;  %4894 = vmatpush.msra.mxu2 %v6340_v44  ;;  %v11205_v2 = vld [vmem:[#allocation3 + $0xb0] sm:$0xff] }
 0x62f   :  { %4931 = vmatpush.msra.mxu3 %v6400_v15  ;;  %v4263_v45 = vadd.f32 %v4262_v1, %v3973_v59  ;;  %v11210_v1 = vld [vmem:[#allocation3 + $0xa8] sm:$0xff]  ;;  %v3938_v15 = vadd.f32 %v10396_v0, %v10257_v36 }
 0x630   :  { %v11173_v14 = vpop.f32.mrf.mxu1  ;;  %4825 = vmatmul.f32.gmra.mxu0 %v11169_v19  ;;  %v11226_v36 = vld [vmem:[#allocation3 + $0xc8] sm:$0xff] }
 0x631   :  { %12452 = vst [vmem:[#allocation82_spill] sm:$0xff] %v11173_v14  ;;  %4932 = vmatpush.msra.mxu3 %v6397_v33  ;;  %v3979_v33 = vadd.f32 %v10632_v61, %v3938_v15  ;;  %v6434_v15 = vld [vmem:[%s12045_s2 + $0x988] sm:$0xff] }
 0x632   :  { %4784 = vmatmul.f32.gmra.mxu3 %v11179_v9  ;;  %5043 = vmatpush.msrb.mxu2 %v6434_v15 }
 0x633   :  { %6336 = vmatmul.msk.f32.gmra.mxu2 %vm2436_vm5, %v10953_v8  ;;  %6449 = vmatmul.msk.f32.gmra.mxu1 %vm2436_vm5, %v11187_v20 }
 0x634   :  { %4933 = vmatpush.msra.mxu3 %v6394_v29 }
 0x635   :  { %v4303_v8 = vpop.f32.mrf.mxu3  ;;  %v11203_v44 = vpop.f32.mrf.mxu0 }
 0x636   :  { %v4265_v60 = vpop.f32.mrf.mxu2  ;;  %v11198_v5 = vadd.f32 %v4303_v8, %v4263_v45  ;;  %4934 = vmatpush.msra.mxu3 %v6391_v26 }
 0x637   :  { %v4266_v40 = vadd.f32 %v4265_v60, %v3976_v31 }
 0x638   :  { %v11207_v6 = vpop.f32.mrf.mxu1  ;;  %4828 = vmatmul.f32.gmra.mxu0 %v11205_v2  ;;  %4935 = vmatpush.msra.mxu3 %v6388_v53  ;;  %v11238_v53 = vld [vmem:[#allocation3 + $0xd8] sm:$0xff] }
 0x639   :  { %12453 = vst [vmem:[#allocation79_spill] sm:$0xff] %v11207_v6  ;;  %v6416_v6 = vld [vmem:[%s12045_s2 + $0x8f8] sm:$0xff] }
 0x63a   :  { %4787 = vmatmul.f32.gmra.mxu3 %v11210_v1 }
 0x63b   :  { %6337 = vmatmul.msk.f32.gmra.mxu2 %vm2436_vm5, %v10960_v47  ;;  %6450 = vmatmul.msk.f32.gmra.mxu1 %vm2436_vm5, %v11217_v17  ;;  %v11229_v47 = vld [vmem:[#allocation3 + $0xc0] sm:$0xff] }
 0x63d   :  { %v4306_v59 = vpop.f32.mrf.mxu3  ;;  %v11224_v45 = vpop.f32.mrf.mxu0 }
 0x63e   :  { %v4268_v12 = vpop.f32.mrf.mxu2  ;;  %v11222_v31 = vadd.f32 %v4306_v59, %v4266_v40  ;;  %v6442_v59 = vld [vmem:[%s12045_s2 + $0x9c8] sm:$0xff] }
 0x63f   :  { %v4269_v29 = vadd.f32 %v4268_v12, %v3979_v33  ;;  %v6431_v12 = vld [vmem:[%s12045_s2 + $0x970] sm:$0xff]  ;;  %4974 = vmatpush.msrb.mxu0 %v6442_v59 }
 0x640   :  { %v4394_v0 = vpop.f32.mrf.mxu1  ;;  %4831 = vmatmul.f32.gmra.mxu0 %v11226_v36  ;;  %5044 = vmatpush.msrb.mxu2 %v6431_v12  ;;  %v6419_v12 = vld [vmem:[%s12045_s2 + $0x910] sm:$0xff] }
 0x642   :  { %4790 = vmatmul.f32.gmra.mxu3 %v11229_v47 }
 0x643   :  { %6338 = vmatmul.msk.f32.gmra.mxu2 %vm2436_vm5, %v10968_v39 }
 0x645   :  { %v4309_v26 = vpop.f32.mrf.mxu3  ;;  %v4353_v8 = vpop.f32.mrf.mxu0 }
 0x646   :  { %v4271_v61 = vpop.f32.mrf.mxu2  ;;  %v11234_v60 = vadd.f32 %v4309_v26, %v4269_v29  ;;  %v6425_v26 = vld [vmem:[%s12045_s2 + $0x940] sm:$0xff]  ;;  %v6422_v8 = vld [vmem:[%s12045_s2 + $0x928] sm:$0xff] }
 0x647   :  { %v6428_v61 = vld [vmem:[%s12045_s2 + $0x958] sm:$0xff] }
 0x648   :  { %v11236_v40 = vpop.f32.mrf.mxu1  ;;  %5045 = vmatpush.msrb.mxu2 %v6428_v61 }
 0x649   :  { %12454 = vst [vmem:[#allocation22_spill] sm:$0xff] %v11236_v40  ;;  %v6395_v40 = vld [vmem:[%s12045_s2 + $0x850] sm:$0xff] }
 0x64a   :  { %4793 = vmatmul.f32.gmra.mxu3 %v11238_v53  ;;  %5046 = vmatpush.msrb.mxu2 %v6425_v26  ;;  %v6413_v26 = vld [vmem:[%s12045_s2 + $0x8e0] sm:$0xff] }
 0x64b   :  { %4895 = vmatmul.f32.vlgmr.msra.gmra.mxu2 %v10999_v58 }
 0x64c   :  { %5047 = vmatpush.msrb.mxu2 %v6422_v8  ;;  %v6410_v8 = vld [vmem:[%s12045_s2 + $0x8c8] sm:$0xff] }
 0x64d   :  { %v4312_v39 = vpop.f32.mrf.mxu3  ;;  %v11253_v29 = vpop.f32.mrf.mxu0 }
 0x64e   :  { %v11245_v33 = vpop.f32.mrf.mxu2  ;;  %12455 = vst [vmem:[#allocation23_spill] sm:$0xff] %v11253_v29  ;;  %5048 = vmatpush.msrb.mxu2 %v6419_v12  ;;  %v6392_v29 = vld [vmem:[%s12045_s2 + $0x838] sm:$0xff] }
 0x650   :  { %v11255_v0 = vpop.f32.mrf.mxu1  ;;  %5049 = vmatpush.msrb.mxu2 %v6416_v6 }
 0x651   :  { %12456 = vst [vmem:[#allocation84_spill] sm:$0xff] %v11255_v0 }
 0x652   :  { %4936 = vmatmul.f32.vlgmr.msra.gmra.mxu3 %v10988_v7  ;;  %5050 = vmatpush.msrb.mxu2 %v6413_v26  ;;  %v6443_v26 = vld [vmem:[%s12045_s2 + $0x9d0] sm:$0xff] }
 0x653   :  { %4898 = vmatmul.f32.gmra.mxu2 %v11044_v57  ;;  %5097 = vmatpush.msrb.mxu3 %v6443_v26 }
 0x654   :  { %5051 = vmatpush.msrb.mxu2 %v6410_v8  ;;  %v6401_v8 = vld [vmem:[%s12045_s2 + $0x880] sm:$0xff] }
 0x655   :  { %v11270_v39 = vpop.f32.mrf.mxu3  ;;  %v11275_v59 = vpop.f32.mrf.mxu0 }
 0x656   :  { %v11268_v15 = vpop.f32.mrf.mxu2  ;;  %12457 = vst [vmem:[#allocation81_spill] sm:$0xff] %v11275_v59  ;;  %5052 = vmatpush.msrb.mxu2 %v6407_v50  ;;  %v6398_v50 = vld [vmem:[%s12045_s2 + $0x868] sm:$0xff] }
 0x658   :  { %v11277_v61 = vpop.f32.mrf.mxu1  ;;  %5053 = vmatpush.msrb.mxu2 %v6404_v32 }
 0x659   :  { %12458 = vst [vmem:[#allocation24_spill] sm:$0xff] %v11277_v61 }
 0x65a   :  { %4939 = vmatmul.f32.gmra.mxu3 %v11029_v22  ;;  %5054 = vmatpush.msrb.mxu2 %v6401_v8  ;;  %v4178_v8 = vadd.f32 %v10305_v25, %v10798_v10  ;;  %v6377_v25 = vld [vmem:[%s12045_s2 + $0x7c0] sm:$0xff]  ;;  %v4181_v10 = vadd.f32 %v10324_v27, %v10817_v34  ;;  %v4184_v34 = vadd.f32 %v10361_v52, %v10847_v56 }
 0x65b   :  { %4901 = vmatmul.f32.gmra.mxu2 %v11094_v54 }
 0x65c   :  { %5055 = vmatpush.msrb.mxu2 %v6398_v50  ;;  %v4225_v52 = vadd.f32 %v10598_v23, %v4184_v34  ;;  %v6362_v23 = vld [vmem:[%s12045_s2 + $0x748] sm:$0xff] }
 0x65d   :  { %v11292_v14 = vpop.f32.mrf.mxu3  ;;  %v11297_v61 = vpop.f32.mrf.mxu0 }
 0x65e   :  { %v11290_v12 = vpop.f32.mrf.mxu2  ;;  %12460 = vst [vmem:[#allocation86_spill] sm:$0xff] %v11292_v14  ;;  %5056 = vmatpush.msrb.mxu2 %v6395_v40  ;;  %v6380_v40 = vld [vmem:[%s12045_s2 + $0x7d8] sm:$0xff] }
 0x65f   :  { %12459 = vst [vmem:[#allocation25_spill] sm:$0xff] %v11290_v12  ;;  %v6386_v12 = vld [vmem:[%s12045_s2 + $0x808] sm:$0xff] }
 0x660   :  { %12461 = vst [vmem:[#allocation83_spill] sm:$0xff] %v11297_v61  ;;  %v11299_v6 = vpop.f32.mrf.mxu1  ;;  %v6439_v61 = vld [vmem:[%s12045_s2 + $0x9b0] sm:$0xff]  ;;  %5002 = vmatpush.msrb.mxu1 %v6386_v12  ;;  %v6389_v12 = vld [vmem:[%s12045_s2 + $0x820] sm:$0xff]  ;;  %5057 = vmatpush.msrb.mxu2 %v6392_v29  ;;  %v4219_v29 = vadd.f32 %v10515_v11, %v4178_v8 }
 0x661   :  { %4975 = vmatpush.msrb.mxu0 %v6439_v61  ;;  %v6383_v61 = vld [vmem:[%s12045_s2 + $0x7f0] sm:$0xff] }
 0x662   :  { %4942 = vmatmul.f32.gmra.mxu3 %v11082_v46  ;;  %5003 = vmatpush.msrb.mxu1 %v6383_v61 }
 0x663   :  { %4904 = vmatmul.f32.gmra.mxu2 %v11137_v13 }
 0x664   :  { %5058 = vmatpush.msrb.mxu2 %v6389_v12  ;;  %5004 = vmatpush.msrb.mxu1 %v6380_v40  ;;  %v6374_v12 = vld [vmem:[%s12045_s2 + $0x7a8] sm:$0xff] }
 0x665   :  { %v11323_v26 = vpop.f32.mrf.mxu3  ;;  %v11328_v0 = vpop.f32.mrf.mxu0 }
 0x666   :  { %v11321_v32 = vpop.f32.mrf.mxu2  ;;  %12463 = vst [vmem:[#allocation27_spill] sm:$0xff] %v11323_v26  ;;  %5005 = vmatpush.msrb.mxu1 %v6377_v25 }
 0x667   :  { %12462 = vst [vmem:[#allocation26_spill] sm:$0xff] %v11321_v32 }
 0x668   :  { %v4549_v14 = vpop.f32.mrf.mxu1  ;;  %5006 = vmatpush.msrb.mxu1 %v6374_v12 }
 0x66a   :  { %4945 = vmatmul.f32.gmra.mxu3 %v11130_v51 }
 0x66b   :  { %4907 = vmatmul.f32.gmra.mxu2 %v11179_v9 }
 0x66d   :  { %v11348_v32 = vpop.f32.mrf.mxu3  ;;  %v4508_v61 = vpop.f32.mrf.mxu0 }
 0x66e   :  { %v11346_v50 = vpop.f32.mrf.mxu2  ;;  %v4509_v26 = vadd.f32 %v4508_v61, %v4219_v29  ;;  %v4222_v29 = vadd.f32 %v10549_v63, %v4181_v10  ;;  %v6368_v63 = vld [vmem:[%s12045_s2 + $0x778] sm:$0xff] }
 0x670   :  { %v4552_v59 = vpop.f32.mrf.mxu1  ;;  %v11361_v11 = vadd.f32 %v4549_v14, %v4509_v26  ;;  %v6371_v14 = vld [vmem:[%s12045_s2 + $0x790] sm:$0xff] }
 0x671   :  { %5007 = vmatpush.msrb.mxu1 %v6371_v14 }
 0x672   :  { %4948 = vmatmul.f32.gmra.mxu3 %v11169_v19 }
 0x673   :  { %4910 = vmatmul.f32.gmra.mxu2 %v11210_v1  ;;  %5008 = vmatpush.msrb.mxu1 %v6368_v63  ;;  %v6359_v63 = vld [vmem:[%s12045_s2 + $0x730] sm:$0xff] }
 0x675   :  { %v11365_v40 = vpop.f32.mrf.mxu3  ;;  %v4511_v61 = vpop.f32.mrf.mxu0 }
 0x676   :  { %v11363_v8 = vpop.f32.mrf.mxu2  ;;  %12465 = vst [vmem:[#allocation85_spill] sm:$0xff] %v11365_v40  ;;  %v4512_v25 = vadd.f32 %v4511_v61, %v4222_v29  ;;  %v6440_v29 = vld [vmem:[%s12045_s2 + $0x9b8] sm:$0xff]  ;;  %v6365_v61 = vld [vmem:[%s12045_s2 + $0x760] sm:$0xff] }
 0x677   :  { %12464 = vst [vmem:[#allocation88_spill] sm:$0xff] %v11363_v8  ;;  %5098 = vmatpush.msrb.mxu3 %v6440_v29  ;;  %5009 = vmatpush.msrb.mxu1 %v6365_v61  ;;  %v6356_v29 = vld [vmem:[%s12045_s2 + $0x718] sm:$0xff]  ;;  %v6350_v61 = vld [vmem:[%s12045_s2 + $0x6e8] sm:$0xff] }
 0x678   :  { %v4555_v27 = vpop.f32.mrf.mxu1  ;;  %v11375_v26 = vadd.f32 %v4552_v59, %v4512_v25  ;;  %v6436_v59 = vld [vmem:[%s12045_s2 + $0x998] sm:$0xff] }
 0x679   :  { %4976 = vmatpush.msrb.mxu0 %v6436_v59  ;;  %5010 = vmatpush.msrb.mxu1 %v6362_v23 }
 0x67a   :  { %4951 = vmatmul.f32.gmra.mxu3 %v11205_v2 }
 0x67b   :  { %4913 = vmatmul.f32.gmra.mxu2 %v11229_v47  ;;  %5011 = vmatpush.msrb.mxu1 %v6359_v63 }
 0x67d   :  { %v11382_v12 = vpop.f32.mrf.mxu3  ;;  %v4514_v56 = vpop.f32.mrf.mxu0  ;;  %5012 = vmatpush.msrb.mxu1 %v6356_v29 }
 0x67e   :  { %v11380_v10 = vpop.f32.mrf.mxu2  ;;  %12467 = vst [vmem:[#allocation29_spill] sm:$0xff] %v11382_v12  ;;  %v4515_v25 = vadd.f32 %v4514_v56, %v4225_v52 }
 0x67f   :  { %12466 = vst [vmem:[#allocation28_spill] sm:$0xff] %v11380_v10 }
 0x680   :  { %v4558_v14 = vpop.f32.mrf.mxu1  ;;  %v11399_v34 = vadd.f32 %v4555_v27, %v4515_v25  ;;  %v6353_v27 = vld [vmem:[%s12045_s2 + $0x700] sm:$0xff] }
 0x681   :  { %5013 = vmatpush.msrb.mxu1 %v6353_v27  ;;  %v6347_v14 = vld [vmem:[%s12045_s2 + $0x6d0] sm:$0xff]  ;;  %v3582_v27 = vpop.permute.xlu2 %3581 }
 0x682   :  { %4954 = vmatmul.f32.gmra.mxu3 %v11226_v36 }
 0x683   :  { %4916 = vmatmul.f32.gmra.mxu2 %v11238_v53  ;;  %5014 = vmatpush.msrb.mxu1 %v6350_v61 }
 0x685   :  { %v11404_v56 = vpop.f32.mrf.mxu3  ;;  %v4517_v59 = vpop.f32.mrf.mxu0  ;;  %5015 = vmatpush.msrb.mxu1 %v6347_v14 }
 0x686   :  { %v4435_v52 = vpop.f32.mrf.mxu2  ;;  %12468 = vst [vmem:[#allocation90_spill] sm:$0xff] %v11404_v56  ;;  %v6437_v59 = vld [vmem:[%s12045_s2 + $0x9a0] sm:$0xff] }
 0x687   :  { %v6344_v52 = vld [vmem:[%s12045_s2 + $0x6b8] sm:$0xff]  ;;  %5099 = vmatpush.msrb.mxu3 %v6437_v59  ;;  %v4175_v59 = vadd.f32 %v10298_v43, %v10789_v41 }
 0x688   :  { %v4855_v25 = vpop.f32.mrf.mxu1  ;;  %5016 = vmatpush.msrb.mxu1 %v6344_v52 }
 0x689   :  { %v4216_v43 = vadd.f32 %v10505_v55, %v4175_v59 }
 0x68b   :  { %5059 = vmatmul.f32.vlgmr.msrb.gmra.mxu2 %v10988_v7  ;;  %v6341_v7 = vld [vmem:[%s12045_s2 + $0x6a0] sm:$0xff]  ;;  %s5763_s2 = sld [smem:[#allocation6 + $0x1]] }
 0x68c   :  { %5017 = vmatpush.msrb.mxu1 %v6341_v7 }
 0x68d   :  { %v4476_v23 = vpop.f32.mrf.mxu3  ;;  %v4814_v29 = vpop.f32.mrf.mxu0 }
 0x68e   :  { %v11419_v63 = vpop.f32.mrf.mxu2 }
 0x690   :  { %v4858_v61 = vpop.f32.mrf.mxu1 }
 0x691   :  { %v11460_v59 = vstv %s5763_s2 }
 0x693   :  { %5062 = vmatmul.f32.gmra.mxu2 %v11029_v22  ;;  %v11441_v22 = vld [vmem:[%s12048_s5] sm:$0x7]  ;;  %s6577_s5 = smov 80  }
 0x694   :  { %v3577_v14 = vpop.permute.xlu1 %3576  ;;  %v11447_v7 = vperm.slane %v11441_v22, 0 }
 0x695   :  { %v4773_v10 = vpop.f32.mrf.mxu3  ;;  %v4817_v12 = vpop.f32.mrf.mxu0 }
 0x696   :  { %v11431_v23 = vpop.f32.mrf.mxu2  ;;  %v3573_v56 = vpop.permute.xlu0 %3572  ;;  %v4815_v52 = vadd.f32 %v4814_v29, %v4773_v10  ;;  %v4333_v10 = vadd.f32 %v10981_v37, %v11018_v49  ;;  %v4506_v37 = vadd.f32 %v11328_v0, %v4216_v43 }
 0x697   :  { %3575 = vst.msk [vmem:[#allocation3 + $0xe0] sm:$0xff] %vm2407_vm7, %v3573_v56  ;;  %v3593_v56 = vpop.permute.xlu2 %3592 }
 0x698   :  { %3579 = vst.msk [vmem:[#allocation3 + $0xe0] sm:$0xff] %vm2412_vm12, %v3577_v14  ;;  %v4856_v8 = vadd.f32 %v4855_v25, %v4815_v52  ;;  %v4861_v49 = vpop.f32.mrf.mxu1 }
 0x699   :  { %3584 = vst.msk [vmem:[#allocation3 + $0xe0] sm:$0xff] %vm2418_vm13, %v3582_v27 }
 0x69a   :  { %v5125_v29 = vadd.f32 %v4856_v8, %v4333_v10  ;;  %v4336_v8 = vadd.f32 %v11027_v21, %v11069_v38 }
 0x69b   :  { %5065 = vmatmul.f32.gmra.mxu2 %v11082_v46 }
 0x69c   :  { %v3591_v25 = vpop.permute.xlu1 %3590  ;;  %v5157_v10 = vadd.f32 %v11447_v7, %v5125_v29 }
 0x69d   :  { %v3594_v41 = vsel %vm2430_vm4, %v3591_v25, %v3593_v56  ;;  %v4776_v52 = vpop.f32.mrf.mxu3  ;;  %v4820_v40 = vpop.f32.mrf.mxu0 }
 0x69e   :  { %v11449_v27 = vpop.f32.mrf.mxu2  ;;  %v3586_v14 = vpop.permute.xlu0 %3585  ;;  %3598 = vst.msk [vmem:[#allocation3 + $0xe8] sm:$0xff] %vm2436_vm5, %v3594_v41  ;;  %v4818_v46 = vadd.f32 %v4817_v12, %v4776_v52  ;;  %v4547_v12 = vadd.f32 %v11299_v6, %v4506_v37  ;;  %v5206_v0 = vmul.f32 %v11460_v59, %v5157_v10  ;;  %vm5181_vm0 = vcmp.gt.f32.partialorder %v5157_v10, 0.0 }
 0x69f   :  { %3588 = vst.msk [vmem:[#allocation3 + $0xe0] sm:$0xff] %vm2423_vm15, %v3586_v14 }
 0x6a0   :  { %3597 = vst.msk [vmem:[#allocation3 + $0xe0] sm:$0xff] %vm2434_vm1, %v3591_v25  ;;  %v4859_v55 = vadd.f32 %v4858_v61, %v4818_v46  ;;  %v5230_v46 = vsel %vm5181_vm0, %v5157_v10, %v5206_v0  ;;  %v4342_v10 = vadd.f32 %v11128_v28, %v11162_v35 }
 0x6a2   :  { %v5128_v56 = vadd.f32 %v4859_v55, %v4336_v8  ;;  %v4864_v8 = vpop.f32.mrf.mxu1 }
 0x6a3   :  { %5068 = vmatmul.f32.gmra.mxu2 %v11130_v51  ;;  %v4339_v51 = vadd.f32 %v11080_v18, %v11120_v16 }
 0x6a4   :  { %v5160_v43 = vadd.f32 %v11447_v7, %v5128_v56 }
 0x6a5   :  { %v4779_v21 = vpop.f32.mrf.mxu3  ;;  %v11468_v38 = vld [vmem:[#allocation3 + $0xe8] sm:$0xff]  ;;  %v4823_v25 = vpop.f32.mrf.mxu0 }
 0x6a6   :  { %v4587_v41 = vpop.f32.mrf.mxu2  ;;  %vm5184_vm11 = vcmp.gt.f32.partialorder %v5160_v43, 0.0  ;;  %v5209_v61 = vmul.f32 %v11460_v59, %v5160_v43  ;;  %v4821_v29 = vadd.f32 %v4820_v40, %v4779_v21  ;;  %6451 = vmatmul.msk.f32.gmra.mxu1 %vm2436_vm5, %v11468_v38 }
 0x6a7   :  { %v11466_v14 = vadd.f32 %v4587_v41, %v4547_v12  ;;  %v11475_v6 = vld [vmem:[#allocation3 + $0xe0] sm:$0xff] }
 0x6a8   :  { %v4862_v52 = vadd.f32 %v4861_v49, %v4821_v29  ;;  %4834 = vmatmul.f32.gmra.mxu0 %v11475_v6  ;;  %4957 = vmatmul.f32.gmra.mxu3 %v11475_v6  ;;  %v5233_v37 = vsel %vm5184_vm11, %v5160_v43, %v5209_v61 }
 0x6a9   :  { %v5284_v40 = vmax.f32 %v5230_v46, %v5233_v37 }
 0x6aa   :  { %v5131_v55 = vadd.f32 %v4862_v52, %v4339_v51  ;;  %v4867_v61 = vpop.f32.mrf.mxu1 }
 0x6ab   :  { %5071 = vmatmul.f32.gmra.mxu2 %v11169_v19 }
 0x6ac   :  { %v5163_v56 = vadd.f32 %v11447_v7, %v5131_v55 }
 0x6ad   :  { %v4782_v16 = vpop.f32.mrf.mxu3 }
 0x6ae   :  { %v4590_v12 = vpop.f32.mrf.mxu2  ;;  %v5212_v49 = vmul.f32 %v11460_v59, %v5163_v56  ;;  %v4824_v41 = vadd.f32 %v4823_v25, %v4782_v16  ;;  %5018 = vmatmul.f32.vlgmr.msrb.gmra.mxu1 %v10999_v58  ;;  %vm5187_vm14 = vcmp.gt.f32.partialorder %v5163_v56, 0.0 }
 0x6af   :  { %v11482_v18 = vadd.f32 %v4590_v12, %v11361_v11  ;;  %v4826_v11 = vpop.f32.mrf.mxu0 }
 0x6b0   :  { %v4865_v0 = vadd.f32 %v4864_v8, %v4824_v41  ;;  %6452 = vmatmul.msk.f32.vlgmr.msrb.gmra.mxu0 %vm2436_vm5, %v10974_v4  ;;  %6460 = vmatmul.msk.f32.vlgmr.msrb.gmra.mxu3 %vm2436_vm5, %v10974_v4  ;;  %v5236_v19 = vsel %vm5187_vm14, %v5163_v56, %v5212_v49 }
 0x6b1   :  { %v11493_v43 = vmax.f32 %v5284_v40, %v5236_v19 }
 0x6b2   :  { %v5134_v21 = vadd.f32 %v4865_v0, %v4342_v10 }
 0x6b3   :  { %5074 = vmatmul.f32.gmra.mxu2 %v11205_v2  ;;  %5296 = vrot.lane.b32.xlu0 %v11493_v43, %s6577_s5  ;;  %v4345_v2 = vadd.f32 %v11167_v24, %v11198_v5  ;;  %v4870_v24 = vpop.f32.mrf.mxu1 }
 0x6b4   :  { %v5166_v58 = vadd.f32 %v11447_v7, %v5134_v21 }
 0x6b5   :  { %v4785_v29 = vpop.f32.mrf.mxu3 }
 0x6b6   :  { %v4593_v28 = vpop.f32.mrf.mxu2  ;;  %vm5190_vm2 = vcmp.gt.f32.partialorder %v5166_v58, 0.0  ;;  %v5215_v4 = vmul.f32 %v11460_v59, %v5166_v58  ;;  %v4827_v51 = vadd.f32 %v4826_v11, %v4785_v29  ;;  %5021 = vmatmul.f32.gmra.mxu1 %v11044_v57 }
 0x6b7   :  { %v11499_v35 = vadd.f32 %v4593_v28, %v11375_v26  ;;  %v4829_v37 = vpop.f32.mrf.mxu0 }
 0x6b8   :  { %v4868_v25 = vadd.f32 %v4867_v61, %v4827_v51  ;;  %6453 = vmatmul.msk.f32.gmra.mxu0 %vm2436_vm5, %v11008_v42  ;;  %6461 = vmatmul.msk.f32.gmra.mxu3 %vm2436_vm5, %v11008_v42  ;;  %v5239_v52 = vsel %vm5190_vm2, %v5166_v58, %v5215_v4 }
 0x6b9   :  { %v5347_v26 = vmax.f32 %v5236_v19, %v5239_v52 }
 0x6ba   :  { %v5137_v46 = vadd.f32 %v4868_v25, %v4345_v2 }
 0x6bb   :  { %5077 = vmatmul.f32.gmra.mxu2 %v11226_v36  ;;  %5309 = vrot.lane.b32.xlu0 %v11493_v43, %s6573_s23  ;;  %v4348_v36 = vadd.f32 %v11203_v44, %v11222_v31 }
 0x6bc   :  { %v5169_v57 = vadd.f32 %v11447_v7, %v5137_v46 }
 0x6bd   :  { %v4788_v40 = vpop.f32.mrf.mxu3 }
 0x6be   :  { %v4596_v8 = vpop.f32.mrf.mxu2  ;;  %v5218_v55 = vmul.f32 %v11460_v59, %v5169_v57  ;;  %v4830_v42 = vadd.f32 %v4829_v37, %v4788_v40  ;;  %5024 = vmatmul.f32.gmra.mxu1 %v11094_v54  ;;  %vm5193_vm6 = vcmp.gt.f32.partialorder %v5169_v57, 0.0 }
 0x6bf   :  { %v11514_v5 = vadd.f32 %v4596_v8, %v11399_v34  ;;  %v4832_v44 = vpop.f32.mrf.mxu0 }
 0x6c0   :  { %v4871_v56 = vadd.f32 %v4870_v24, %v4830_v42  ;;  %6454 = vmatmul.msk.f32.gmra.mxu0 %vm2436_vm5, %v11056_v48  ;;  %6462 = vmatmul.msk.f32.gmra.mxu3 %vm2436_vm5, %v11056_v48  ;;  %v5242_v12 = vsel %vm5193_vm6, %v5169_v57, %v5218_v55  ;;  %v4873_v48 = vpop.f32.mrf.mxu1  ;;  %v12469_v24 = vld [vmem:[#allocation70_spill] sm:$0xff]  ;;  %v12470_v55 = vld [vmem:[#allocation13_spill] sm:$0xff] }
 0x6c1   :  { %v11525_v34 = vmax.f32 %v5347_v26, %v5242_v12  ;;  %v4043_v40 = vadd.f32 %v12469_v24, %v10099_v3 }
 0x6c2   :  { %v5140_v16 = vadd.f32 %v4871_v56, %v4348_v36  ;;  %v12471_v36 = vld [vmem:[#allocation77_spill] sm:$0xff] }
 0x6c3   :  { %5080 = vmatmul.f32.gmra.mxu2 %v11475_v6  ;;  %5359 = vrot.lane.b32.xlu0 %v11525_v34, %s6577_s5  ;;  %v4351_v6 = vadd.f32 %v11224_v45, %v11234_v60  ;;  %v4084_v42 = vadd.f32 %v12470_v55, %v4043_v40 }
 0x6c4   :  { %v5172_v54 = vadd.f32 %v11447_v7, %v5140_v16 }
 0x6c5   :  { %v4791_v31 = vpop.f32.mrf.mxu3  ;;  %v4374_v56 = vadd.f32 %v12471_v36, %v4084_v42  ;;  %v12482_v36 = vld [vmem:[#allocation126_spill] sm:$0xff] }
 0x6c6   :  { %v4599_v49 = vpop.f32.mrf.mxu2  ;;  %vm5196_vm3 = vcmp.gt.f32.partialorder %v5172_v54, 0.0  ;;  %v5221_v41 = vmul.f32 %v11460_v59, %v5172_v54  ;;  %v4833_v10 = vadd.f32 %v4832_v44, %v4791_v31  ;;  %5027 = vmatmul.f32.gmra.mxu1 %v11137_v13  ;;  %v12472_v31 = vld [vmem:[#allocation62_spill] sm:$0xff] }
 0x6c8   :  { %v4874_v0 = vadd.f32 %v4873_v48, %v4833_v10  ;;  %6455 = vmatmul.msk.f32.gmra.mxu0 %vm2436_vm5, %v11100_v30  ;;  %6463 = vmatmul.msk.f32.gmra.mxu3 %vm2436_vm5, %v11100_v30  ;;  %v5245_v19 = vsel %vm5196_vm3, %v5172_v54, %v5221_v41  ;;  %v4415_v54 = vadd.f32 %v11245_v33, %v4374_v56  ;;  %v12473_v41 = vld [vmem:[#allocation132_spill] sm:$0xff]  ;;  %v12483_v56 = vld [vmem:[#allocation69_spill] sm:$0xff]  ;;  %vm5302_vm3 = vcmask 654336  }
 0x6c9   :  { %v5404_v11 = vmax.f32 %v5242_v12, %v5245_v19  ;;  %v4046_v10 = vadd.f32 %v12473_v41, %v12472_v31  ;;  %v12475_v19 = vld [vmem:[#allocation10_spill] sm:$0xff]  ;;  %v12486_v41 = vld [vmem:[#allocation81_spill] sm:$0xff] }
 0x6ca   :  { %v5143_v21 = vadd.f32 %v4874_v0, %v4351_v6  ;;  %v4456_v48 = vadd.f32 %v11270_v39, %v4415_v54  ;;  %v12474_v0 = vld [vmem:[#allocation75_spill] sm:$0xff]  ;;  %v12484_v54 = vld [vmem:[#allocation18_spill] sm:$0xff] }
 0x6cb   :  { %5371 = vrot.lane.b32.xlu0 %v11525_v34, %s6573_s23  ;;  %v4169_v3 = vadd.f32 %v12475_v19, %v12474_v0  ;;  %v12481_v39 = vld [vmem:[#allocation71_spill] sm:$0xff]  ;;  %v12488_v19 = vld [vmem:[#allocation86_spill] sm:$0xff] }
 0x6cc   :  { %v5175_v61 = vadd.f32 %v11447_v7, %v5143_v21 }
 0x6cd   :  { %v4794_v58 = vpop.f32.mrf.mxu3 }
 0x6ce   :  { %v4896_v13 = vpop.f32.mrf.mxu2  ;;  %v5224_v28 = vmul.f32 %v11460_v59, %v5175_v61  ;;  %5030 = vmatmul.f32.gmra.mxu1 %v11179_v9  ;;  %vm5199_vm7 = vcmp.gt.f32.partialorder %v5175_v61, 0.0 }
 0x6d0   :  { %6456 = vmatmul.msk.f32.gmra.mxu0 %vm2436_vm5, %v11143_v62  ;;  %6464 = vmatmul.msk.f32.gmra.mxu3 %vm2436_vm5, %v11143_v62  ;;  %v5248_v30 = vsel %vm5199_vm7, %v5175_v61, %v5224_v28  ;;  %v12477_v61 = vld [vmem:[#allocation78_spill] sm:$0xff]  ;;  %vm5315_vm7 = vcmask 261120  }
 0x6d1   :  { %v11547_v45 = vmax.f32 %v5404_v11, %v5248_v30  ;;  %v12476_v11 = vld [vmem:[#allocation74_spill] sm:$0xff]  ;;  %v12479_v30 = vld [vmem:[#allocation19_spill] sm:$0xff] }
 0x6d2   :  { %v4087_v21 = vadd.f32 %v12476_v11, %v4046_v10 }
 0x6d3   :  { %5416 = vrot.lane.b32.xlu0 %v11547_v45, %s6577_s5 }
 0x6d4   :  { %v4377_v33 = vadd.f32 %v12479_v30, %v4087_v21 }
 0x6d5   :  { %v4937_v7 = vpop.f32.mrf.mxu3 }
 0x6d6   :  { %v4899_v60 = vpop.f32.mrf.mxu2  ;;  %v4938_v29 = vadd.f32 %v4937_v7, %v4896_v13  ;;  %5033 = vmatmul.f32.gmra.mxu1 %v11210_v1  ;;  %v12478_v13 = vld [vmem:[#allocation9_spill] sm:$0xff]  ;;  %v11607_v7 = vperm.slane %v11441_v22, 1  ;;  %v4418_v40 = vadd.f32 %v11268_v15, %v4377_v33  ;;  %v12489_v15 = vld [vmem:[#allocation135_spill] sm:$0xff]  ;;  %v12492_v33 = vld [vmem:[#allocation84_spill] sm:$0xff] }
 0x6d7   :  { %v4166_v58 = vadd.f32 %v12478_v13, %v12477_v61  ;;  %v12490_v61 = vld [vmem:[#allocation80_spill] sm:$0xff] }
 0x6d8   :  { %6457 = vmatmul.msk.f32.gmra.mxu0 %vm2436_vm5, %v11187_v20  ;;  %6465 = vmatmul.msk.f32.gmra.mxu3 %vm2436_vm5, %v11187_v20 }
 0x6db   :  { %5428 = vrot.lane.b32.xlu0 %v11547_v45, %s6573_s23 }
 0x6dd   :  { %v4940_v1 = vpop.f32.mrf.mxu3 }
 0x6de   :  { %v11558_v62 = vpop.f32.mrf.mxu2  ;;  %5036 = vmatmul.f32.gmra.mxu1 %v11229_v47  ;;  %v4941_v55 = vadd.f32 %v4940_v1, %v4899_v60 }
 0x6e0   :  { %6458 = vmatmul.msk.f32.gmra.mxu0 %vm2436_vm5, %v11217_v17  ;;  %6466 = vmatmul.msk.f32.gmra.mxu3 %vm2436_vm5, %v11217_v17 }
 0x6e5   :  { %v4943_v4 = vpop.f32.mrf.mxu3 }
 0x6e6   :  { %v11565_v9 = vpop.f32.mrf.mxu2  ;;  %5039 = vmatmul.f32.gmra.mxu1 %v11238_v53 }
 0x6e8   :  { %6459 = vmatmul.msk.f32.gmra.mxu0 %vm2436_vm5, %v11468_v38  ;;  %6467 = vmatmul.msk.f32.gmra.mxu3 %vm2436_vm5, %v11468_v38 }
 0x6ed   :  { %v11578_v17 = vpop.f32.mrf.mxu3 }
 0x6ee   :  { %v11572_v20 = vpop.f32.mrf.mxu2 }
 0x6f5   :  { %v11580_v52 = vpop.f32.mrf.mxu3 }
 0x6f6   :  { %v11574_v47 = vpop.f32.mrf.mxu2 }
 0x6fd   :  { %v11582_v26 = vpop.f32.mrf.mxu3 }
 0x6fe   :  { %v11576_v51 = vpop.f32.mrf.mxu2 }
 0x705   :  { %v11586_v38 = vpop.f32.mrf.mxu3 }
 0x706   :  { %v4917_v2 = vpop.f32.mrf.mxu2 }
 0x707   :  { %v12480_v2 = vld [vmem:[#allocation14_spill] sm:$0xff] }
 0x70e   :  { %v5060_v25 = vpop.f32.mrf.mxu2 }
 0x716   :  { %v5063_v53 = vpop.f32.mrf.mxu2 }
 0x71e   :  { %v11584_v46 = vpop.f32.mrf.mxu2 }
 0x723   :  { %v4876_v37 = vpop.f32.mrf.mxu1 }
 0x724   :  { %v4210_v37 = vadd.f32 %v12480_v2, %v4169_v3  ;;  %v4459_v3 = vadd.f32 %v12488_v19, %v4418_v40  ;;  %v12498_v19 = vld [vmem:[#allocation27_spill] sm:$0xff] }
 0x725   :  { %v4835_v8 = vpop.f32.mrf.mxu0 }
 0x726   :  { %v11588_v57 = vpop.f32.mrf.mxu2  ;;  %v4500_v10 = vadd.f32 %v12486_v41, %v4210_v37 }
 0x728   :  { %v4541_v2 = vadd.f32 %v12492_v33, %v4500_v10 }
 0x72b   :  { %v4958_v12 = vpop.f32.mrf.mxu3  ;;  %v5019_v16 = vpop.f32.mrf.mxu1 }
 0x72c   :  { %v4049_v12 = vadd.f32 %v12483_v56, %v12482_v36  ;;  %v12493_v36 = vld [vmem:[#allocation22_spill] sm:$0xff] }
 0x72d   :  { %v4978_v44 = vpop.f32.mrf.mxu0 }
 0x72e   :  { %v11595_v49 = vpop.f32.mrf.mxu2  ;;  %v4979_v6 = vadd.f32 %v4978_v44, %v4938_v29  ;;  %v4207_v29 = vadd.f32 %v12481_v39, %v4166_v58  ;;  %v12485_v44 = vld [vmem:[#allocation133_spill] sm:$0xff]  ;;  %v4090_v60 = vadd.f32 %v12489_v15, %v4049_v12  ;;  %v12491_v58 = vld [vmem:[#allocation15_spill] sm:$0xff]  ;;  %v5061_v39 = vadd.f32 %v5060_v25, %v5019_v16 }
 0x72f   :  { %v4172_v31 = vadd.f32 %v12485_v44, %v12484_v54  ;;  %v12494_v54 = vld [vmem:[#allocation25_spill] sm:$0xff] }
 0x730   :  { %v5126_v28 = vadd.f32 %v4979_v6, %v4456_v48  ;;  %v12487_v6 = vld [vmem:[#allocation23_spill] sm:$0xff]  ;;  %v4380_v13 = vadd.f32 %v12490_v61, %v4090_v60 }
 0x731   :  { %v4497_v0 = vadd.f32 %v12487_v6, %v4207_v29  ;;  %v4213_v30 = vadd.f32 %v12491_v58, %v4172_v31  ;;  %v4944_v31 = vadd.f32 %v4943_v4, %v11558_v62  ;;  %v12496_v6 = vld [vmem:[#allocation11_spill] sm:$0xff]  ;;  %v12499_v4 = vld [vmem:[#allocation73_spill] sm:$0xff] }
 0x732   :  { %v5158_v11 = vadd.f32 %v11607_v7, %v5126_v28  ;;  %v4421_v28 = vadd.f32 %v12494_v54, %v4380_v13  ;;  %v11642_v13 = vperm.slane %v11441_v22, 2 }
 0x733   :  { %v5101_v8 = vpop.f32.mrf.mxu3  ;;  %v5022_v24 = vpop.f32.mrf.mxu1  ;;  %v4538_v37 = vadd.f32 %v12493_v36, %v4497_v0 }
 0x734   :  { %v5207_v56 = vmul.f32 %v11460_v59, %v5158_v11  ;;  %v5064_v40 = vadd.f32 %v5063_v53, %v5022_v24  ;;  %vm5182_vm8 = vcmp.gt.f32.partialorder %v5158_v11, 0.0  ;;  %v5102_v12 = vadd.f32 %v5101_v8, %v5061_v39  ;;  %v12497_v53 = vld [vmem:[#allocation83_spill] sm:$0xff] }
 0x735   :  { %v4981_v48 = vpop.f32.mrf.mxu0  ;;  %v4503_v24 = vadd.f32 %v12497_v53, %v4213_v30  ;;  %v12501_v30 = vld [vmem:[#allocation24_spill] sm:$0xff] }
 0x736   :  { %v11612_v42 = vpop.f32.mrf.mxu2  ;;  %v4982_v21 = vadd.f32 %v4981_v48, %v4941_v55  ;;  %v4582_v55 = vadd.f32 %v11431_v23, %v4541_v2  ;;  %v12495_v48 = vld [vmem:[#allocation65_spill] sm:$0xff]  ;;  %v4579_v23 = vadd.f32 %v11419_v63, %v4538_v37  ;;  %v12500_v2 = vld [vmem:[#allocation20_spill] sm:$0xff]  ;;  %v12502_v37 = vld [vmem:[#allocation26_spill] sm:$0xff] }
 0x737   :  { %v4052_v0 = vadd.f32 %v12496_v6, %v12495_v48  ;;  %v4544_v36 = vadd.f32 %v12501_v30, %v4503_v24  ;;  %v12505_v24 = vld [vmem:[#allocation76_spill] sm:$0xff] }
 0x738   :  { %v5129_v1 = vadd.f32 %v4982_v21, %v4459_v3  ;;  %v4462_v3 = vadd.f32 %v12498_v19, %v4421_v28  ;;  %v5231_v21 = vsel %vm5182_vm8, %v5158_v11, %v5207_v56  ;;  %v5127_v61 = vadd.f32 %v5102_v12, %v4579_v23 }
 0x739   :  { %vm5322_vm8 = vcmask 392192  }
 0x73a   :  { %v5161_v29 = vadd.f32 %v11607_v7, %v5129_v1  ;;  %v4093_v1 = vadd.f32 %v12499_v4, %v4052_v0  ;;  %v5159_v54 = vadd.f32 %v11642_v13, %v5127_v61 }
 0x73b   :  { %v5104_v44 = vpop.f32.mrf.mxu3  ;;  %v5025_v41 = vpop.f32.mrf.mxu1 }
 0x73c   :  { %vm5185_vm9 = vcmp.gt.f32.partialorder %v5161_v29, 0.0  ;;  %v5210_v25 = vmul.f32 %v11460_v59, %v5161_v29  ;;  %v5105_v16 = vadd.f32 %v5104_v44, %v5064_v40  ;;  %v4383_v39 = vadd.f32 %v12500_v2, %v4093_v1 }
 0x73d   :  { %v4984_v8 = vpop.f32.mrf.mxu0  ;;  %v5067_v11 = vadd.f32 %v11584_v46, %v5025_v41  ;;  %vm5183_vm13 = vcmp.gt.f32.partialorder %v5159_v54, 0.0  ;;  %v4950_v1 = vadd.f32 %v11580_v52, %v11572_v20 }
 0x73e   :  { %v11633_v10 = vpop.f32.mrf.mxu2  ;;  %v5234_v15 = vsel %vm5185_vm9, %v5161_v29, %v5210_v25  ;;  %v5130_v60 = vadd.f32 %v5105_v16, %v4582_v55  ;;  %v4985_v62 = vadd.f32 %v4984_v8, %v4944_v31  ;;  %v4424_v56 = vadd.f32 %v12502_v37, %v4383_v39  ;;  %v12503_v25 = vld [vmem:[#allocation129_spill] sm:$0xff]  ;;  %v12504_v16 = vld [vmem:[#allocation72_spill] sm:$0xff] }
 0x73f   :  { %v5285_v58 = vmax.f32 %v5231_v21, %v5234_v15  ;;  %v4585_v29 = vadd.f32 %v11449_v27, %v4544_v36  ;;  %v4947_v55 = vadd.f32 %v11578_v17, %v11565_v9  ;;  %v4055_v48 = vadd.f32 %v12504_v16, %v12503_v25  ;;  %v12506_v8 = vld [vmem:[#allocation21_spill] sm:$0xff]  ;;  %v12507_v36 = vld [vmem:[#allocation66_spill] sm:$0xff] }
 0x740   :  { %v5132_v33 = vadd.f32 %v4985_v62, %v4462_v3  ;;  %v5162_v40 = vadd.f32 %v11642_v13, %v5130_v60  ;;  %v4465_v46 = vadd.f32 %v11348_v32, %v4424_v56  ;;  %v5208_v9 = vmul.f32 %v11460_v59, %v5159_v54 }
 0x741   :  { %v4096_v19 = vadd.f32 %v12505_v24, %v4055_v48  ;;  %v12514_v24 = vld [vmem:[#allocation134_spill] sm:$0xff]  ;;  %vm5339_vm9 = vcmask 130048  }
 0x742   :  { %v5164_v63 = vadd.f32 %v11607_v7, %v5132_v33  ;;  %v5211_v41 = vmul.f32 %v11460_v59, %v5162_v40  ;;  %vm5186_vm12 = vcmp.gt.f32.partialorder %v5162_v40, 0.0  ;;  %v5232_v61 = vsel %vm5183_vm13, %v5159_v54, %v5208_v9  ;;  %v12510_v54 = vld [vmem:[#allocation16_spill] sm:$0xff]  ;;  %v12515_v9 = vld [vmem:[#allocation29_spill] sm:$0xff] }
 0x743   :  { %v5107_v22 = vpop.f32.mrf.mxu3  ;;  %v5028_v28 = vpop.f32.mrf.mxu1  ;;  %v4386_v21 = vadd.f32 %v12506_v8, %v4096_v19 }
 0x744   :  { %vm5188_vm10 = vcmp.gt.f32.partialorder %v5164_v63, 0.0  ;;  %v5213_v12 = vmul.f32 %v11460_v59, %v5164_v63  ;;  %v5108_v44 = vadd.f32 %v5107_v22, %v5067_v11  ;;  %v5235_v32 = vsel %vm5186_vm12, %v5162_v40, %v5211_v41  ;;  %v12508_v40 = vld [vmem:[#allocation12_spill] sm:$0xff]  ;;  %v12509_v11 = vld [vmem:[#allocation85_spill] sm:$0xff] }
 0x745   :  { %v4987_v27 = vpop.f32.mrf.mxu0  ;;  %v5070_v62 = vadd.f32 %v11588_v57, %v5028_v28  ;;  %v4427_v4 = vadd.f32 %v11346_v50, %v4386_v21  ;;  %v5286_v30 = vmax.f32 %v5232_v61, %v5235_v32  ;;  %vm5337_vm12 = vcmask 1048320  }
 0x746   :  { %v5081_v31 = vpop.f32.mrf.mxu2  ;;  %v5133_v6 = vadd.f32 %v5108_v44, %v4585_v29  ;;  %v4988_v0 = vadd.f32 %v4987_v27, %v4947_v55  ;;  %v5237_v53 = vsel %vm5188_vm10, %v5164_v63, %v5213_v12  ;;  %v4058_v63 = vadd.f32 %v12508_v40, %v12507_v36  ;;  %v12511_v12 = vld [vmem:[#allocation82_spill] sm:$0xff] }
 0x747   :  { %v11661_v17 = vmax.f32 %v5285_v58, %v5237_v53  ;;  %v4468_v37 = vadd.f32 %v12509_v11, %v4427_v4  ;;  %v4953_v27 = vadd.f32 %v11582_v26, %v11574_v47  ;;  %v12517_v4 = vld [vmem:[#allocation79_spill] sm:$0xff]  ;;  %vm5332_vm10 = vcmask 785792  }
 0x748   :  { %v5165_v3 = vadd.f32 %v11642_v13, %v5133_v6  ;;  %v5135_v23 = vadd.f32 %v4988_v0, %v4465_v46  ;;  %v4099_v22 = vadd.f32 %v12510_v54, %v4058_v63 }
 0x749   :  { %5298 = vrot.lane.b32.xlu1 %v11661_v17, %s6577_s5 }
 0x74a   :  { %vm5189_vm15 = vcmp.gt.f32.partialorder %v5165_v3, 0.0  ;;  %v5214_v15 = vmul.f32 %v11460_v59, %v5165_v3  ;;  %v5167_v60 = vadd.f32 %v11607_v7, %v5135_v23  ;;  %v4389_v44 = vadd.f32 %v12511_v12, %v4099_v22 }
 0x74b   :  { %v5110_v58 = vpop.f32.mrf.mxu3  ;;  %v5031_v33 = vpop.f32.mrf.mxu1 }
 0x74c   :  { %vm5191_vm1 = vcmp.gt.f32.partialorder %v5167_v60, 0.0  ;;  %v5216_v2 = vmul.f32 %v11460_v59, %v5167_v60  ;;  %v5111_v39 = vadd.f32 %v5110_v58, %v5070_v62  ;;  %v5238_v57 = vsel %vm5189_vm15, %v5165_v3, %v5214_v15  ;;  %v12516_v15 = vld [vmem:[#allocation17_spill] sm:$0xff] }
 0x74d   :  { %v4990_v56 = vpop.f32.mrf.mxu0  ;;  %v5292_v52 = vmax.f32 %v5286_v30, %v5238_v57  ;;  %v5073_v16 = vadd.f32 %v11595_v49, %v5031_v33  ;;  %v4956_v30 = vadd.f32 %v11586_v38, %v11576_v51 }
 0x74e   :  { %v5240_v50 = vsel %vm5191_vm1, %v5167_v60, %v5216_v2  ;;  %v5136_v29 = vadd.f32 %v5111_v39, %v11466_v14  ;;  %v4991_v20 = vadd.f32 %v4990_v56, %v4950_v1  ;;  %v12512_v14 = vld [vmem:[#allocation88_spill] sm:$0xff]  ;;  %v12519_v56 = vld [vmem:[#allocation90_spill] sm:$0xff] }
 0x74f   :  { %v5348_v28 = vmax.f32 %v5237_v53, %v5240_v50  ;;  %5300 = vrot.lane.b32.xlu2 %v5292_v52, %s6577_s5  ;;  %v4430_v48 = vadd.f32 %v12512_v14, %v4389_v44  ;;  %v12513_v53 = vld [vmem:[#allocation130_spill] sm:$0xff]  ;;  %v12518_v2 = vld [vmem:[#allocation28_spill] sm:$0xff] }
 0x750   :  { %v5138_v55 = vadd.f32 %v4991_v20, %v4468_v37  ;;  %v5168_v31 = vadd.f32 %v11642_v13, %v5136_v29  ;;  %v4061_v19 = vadd.f32 %v12514_v24, %v12513_v53 }
 0x751   :  { %5311 = vrot.lane.b32.xlu1 %v11661_v17, %s6573_s23  ;;  %v4471_v3 = vadd.f32 %v12515_v9, %v4430_v48 }
 0x752   :  { %v5170_v25 = vadd.f32 %v11607_v7, %v5138_v55  ;;  %v5217_v23 = vmul.f32 %v11460_v59, %v5168_v31  ;;  %vm5192_vm5 = vcmp.gt.f32.partialorder %v5168_v31, 0.0  ;;  %v4102_v60 = vadd.f32 %v12516_v15, %v4061_v19 }
 0x753   :  { %v5113_v46 = vpop.f32.mrf.mxu3  ;;  %v5034_v41 = vpop.f32.mrf.mxu1 }
 0x754   :  { %vm5194_vm4 = vcmp.gt.f32.partialorder %v5170_v25, 0.0  ;;  %v5219_v6 = vmul.f32 %v11460_v59, %v5170_v25  ;;  %v5114_v0 = vadd.f32 %v5113_v46, %v5073_v16  ;;  %v4392_v1 = vadd.f32 %v12517_v4, %v4102_v60 }
 0x755   :  { %v4993_v8 = vpop.f32.mrf.mxu0  ;;  %v5241_v61 = vsel %vm5192_vm5, %v5168_v31, %v5217_v23  ;;  %v5076_v33 = vadd.f32 %v11612_v42, %v5034_v41 }
 0x756   :  { %v5139_v49 = vadd.f32 %v5114_v0, %v11482_v18  ;;  %v4994_v21 = vadd.f32 %v4993_v8, %v4953_v27  ;;  %v5243_v32 = vsel %vm5194_vm4, %v5170_v25, %v5219_v6  ;;  %v4433_v39 = vadd.f32 %v12518_v2, %v4392_v1 }
 0x757   :  { %v11697_v47 = vmax.f32 %v5348_v28, %v5243_v32  ;;  %5313 = vrot.lane.b32.xlu2 %v5292_v52, %s6573_s23  ;;  %v5349_v37 = vmax.f32 %v5238_v57, %v5241_v61 }
 0x758   :  { %v5171_v26 = vadd.f32 %v11642_v13, %v5139_v49  ;;  %v5141_v62 = vadd.f32 %v4994_v21, %v4471_v3  ;;  %v4474_v50 = vadd.f32 %v12519_v56, %v4433_v39  ;;  %v5473_v56 = vld [vmem:[%s12046_s3 + $0x70] sm:$0xff] }
 0x759   :  { %5361 = vrot.lane.b32.xlu1 %v11697_v47, %s6577_s5 }
 0x75a   :  { %vm5195_vm0 = vcmp.gt.f32.partialorder %v5171_v26, 0.0  ;;  %v5220_v18 = vmul.f32 %v11460_v59, %v5171_v26  ;;  %v5173_v58 = vadd.f32 %v11607_v7, %v5141_v62 }
 0x75b   :  { %v5116_v36 = vpop.f32.mrf.mxu3  ;;  %v5037_v40 = vpop.f32.mrf.mxu1 }
 0x75c   :  { %vm5197_vm11 = vcmp.gt.f32.partialorder %v5173_v58, 0.0  ;;  %v5222_v63 = vmul.f32 %v11460_v59, %v5173_v58  ;;  %v5117_v11 = vadd.f32 %v5116_v36, %v5076_v33  ;;  %v5244_v20 = vsel %vm5195_vm0, %v5171_v26, %v5220_v18 }
 0x75d   :  { %v4996_v29 = vpop.f32.mrf.mxu0  ;;  %v5355_v22 = vmax.f32 %v5349_v37, %v5244_v20  ;;  %v5079_v12 = vadd.f32 %v11633_v10, %v5037_v40  ;;  %v5474_v40 = vld [vmem:[%s12046_s3 + $0x78] sm:$0xff] }
 0x75e   :  { %v5246_v52 = vsel %vm5197_vm11, %v5173_v58, %v5222_v63  ;;  %v5142_v54 = vadd.f32 %v5117_v11, %v11499_v35  ;;  %v4997_v42 = vadd.f32 %v4996_v29, %v4956_v30  ;;  %v6485_v63 = vld [vmem:[%s12046_s3 + $0x118] sm:$0xff]  ;;  %5553 = vmatpush.msra.mxu2 %v5474_v40 }
 0x75f   :  { %v5405_v28 = vmax.f32 %v5243_v32, %v5246_v52  ;;  %5363 = vrot.lane.b32.xlu2 %v5355_v22, %s6577_s5  ;;  %v6481_v37 = vld [vmem:[%s12046_s3 + $0xf8] sm:$0xff]  ;;  %5541 = vmatpush.msra.mxu1 %v6485_v63  ;;  %v6480_v52 = vld [vmem:[%s12046_s3 + $0xf0] sm:$0xff] }
 0x760   :  { %v5174_v55 = vadd.f32 %v11642_v13, %v5142_v54  ;;  %v5144_v51 = vadd.f32 %v4997_v42, %v4474_v50  ;;  %5554 = vmatpush.msra.mxu2 %v5473_v56  ;;  %v5471_v42 = vld [vmem:[%s12046_s3 + $0x60] sm:$0xff]  ;;  %v5639_v56 = vld [vmem:[%s12050_s7 + $0xd8] sm:$0xff] }
 0x761   :  { %5373 = vrot.lane.b32.xlu1 %v11697_v47, %s6573_s23 }
 0x762   :  { %vm5198_vm14 = vcmp.gt.f32.partialorder %v5174_v55, 0.0  ;;  %v5223_v38 = vmul.f32 %v11460_v59, %v5174_v55  ;;  %v5176_v57 = vadd.f32 %v11607_v7, %v5144_v51  ;;  %v6478_v51 = vld [vmem:[%s12046_s3 + $0xe0] sm:$0xff] }
 0x763   :  { %v5119_v44 = vpop.f32.mrf.mxu3  ;;  %v5040_v35 = vpop.f32.mrf.mxu1 }
 0x764   :  { %v5247_v31 = vsel %vm5198_vm14, %v5174_v55, %v5223_v38  ;;  %vm5200_vm2 = vcmp.gt.f32.partialorder %v5176_v57, 0.0  ;;  %v5225_v25 = vmul.f32 %v11460_v59, %v5176_v57  ;;  %v5120_v16 = vadd.f32 %v5119_v44, %v5079_v12  ;;  %v5469_v38 = vld [vmem:[%s12046_s3 + $0x50] sm:$0xff]  ;;  %v6477_v12 = vld [vmem:[%s12046_s3 + $0xd8] sm:$0xff] }
 0x765   :  { %v4999_v14 = vpop.f32.mrf.mxu0  ;;  %v5406_v48 = vmax.f32 %v5244_v20, %v5247_v31  ;;  %v5472_v20 = vld [vmem:[%s12046_s3 + $0x68] sm:$0xff] }
 0x766   :  { %v5145_v46 = vadd.f32 %v5120_v16, %v11514_v5  ;;  %v5249_v41 = vsel %vm5200_vm2, %v5176_v57, %v5225_v25  ;;  %v5297_v5 = vpop.permute.xlu0 %5296  ;;  %5555 = vmatpush.msra.mxu2 %v5472_v20  ;;  %vm5756_vm2 = vcmask 39936  }
 0x767   :  { %v11722_v27 = vmax.f32 %v5405_v28, %v5249_v41  ;;  %5375 = vrot.lane.b32.xlu2 %v5355_v22, %s6573_s23  ;;  %v5470_v22 = vld [vmem:[%s12046_s3 + $0x58] sm:$0xff]  ;;  %v6476_v41 = vld [vmem:[%s12046_s3 + $0xd0] sm:$0xff] }
 0x768   :  { %v5177_v6 = vadd.f32 %v11642_v13, %v5145_v46  ;;  %5556 = vmatpush.msra.mxu2 %v5471_v42  ;;  %v5627_v42 = vld [vmem:[%s12050_s7 + $0x78] sm:$0xff] }
 0x769   :  { %5418 = vrot.lane.b32.xlu1 %v11722_v27, %s6577_s5 }
 0x76a   :  { %vm5201_vm6 = vcmp.gt.f32.partialorder %v5177_v6, 0.0  ;;  %v5226_v7 = vmul.f32 %v11460_v59, %v5177_v6  ;;  %5557 = vmatpush.msra.mxu2 %v5470_v22  ;;  %v5636_v22 = vld [vmem:[%s12050_s7 + $0xc0] sm:$0xff] }
 0x76b   :  { %v5122_v10 = vpop.f32.mrf.mxu3 }
 0x76c   :  { %v5250_v0 = vsel %vm5201_vm6, %v5177_v6, %v5226_v7  ;;  %5558 = vmatpush.msra.mxu2 %v5469_v38  ;;  %v6474_v6 = vld [vmem:[%s12046_s3 + $0xc0] sm:$0xff]  ;;  %v6473_v10 = vld [vmem:[%s12046_s3 + $0xb8] sm:$0xff] }
 0x76d   :  { %v5412_v53 = vmax.f32 %v5406_v48, %v5250_v0  ;;  %v5467_v7 = vld [vmem:[%s12046_s3 + $0x40] sm:$0xff]  ;;  %v5466_v0 = vld [vmem:[%s12046_s3 + $0x38] sm:$0xff] }
 0x76e   :  { %v5310_v24 = vpop.permute.xlu0 %5309  ;;  %v5623_v38 = vld [vmem:[%s12050_s7 + $0x58] sm:$0xff] }
 0x76f   :  { %5420 = vrot.lane.b32.xlu2 %v5412_v53, %s6577_s5 }
 0x771   :  { %5430 = vrot.lane.b32.xlu1 %v11722_v27, %s6573_s23 }
 0x776   :  { %v5360_v8 = vpop.permute.xlu0 %5359 }
 0x777   :  { %5432 = vrot.lane.b32.xlu2 %v5412_v53, %s6573_s23  ;;  %v6472_v53 = vld [vmem:[%s12046_s3 + $0xb0] sm:$0xff] }
 0x77e   :  { %v5372_v60 = vpop.permute.xlu0 %5371 }
 0x786   :  { %v5417_v39 = vpop.permute.xlu0 %5416 }
 0x78e   :  { %v5429_v57 = vpop.permute.xlu0 %5428 }
 0x7a9   :  { %v5301_v13 = vpop.permute.xlu2 %5300 }
 0x7b1   :  { %v5314_v19 = vpop.permute.xlu2 %5313 }
 0x7b9   :  { %v5364_v21 = vpop.permute.xlu2 %5363 }
 0x7bb   :  { %v5299_v9 = vpop.permute.xlu1 %5298 }
 0x7bc   :  { %v5303_v3 = vsel %vm5302_vm3, %v5297_v5, %v5299_v9  ;;  %v5304_v30 = vsel %vm5302_vm3, %v5299_v9, %v5301_v13  ;;  %v6484_v5 = vld [vmem:[%s12046_s3 + $0x110] sm:$0xff]  ;;  %v6470_v9 = vld [vmem:[%s12046_s3 + $0xa0] sm:$0xff] }
 0x7bd   :  { %v5307_v59 = vmax.f32 %v11493_v43, %v5303_v3  ;;  %v5308_v50 = vmax.f32 %v11661_v17, %v5304_v30  ;;  %v6479_v17 = vld [vmem:[%s12046_s3 + $0xe8] sm:$0xff]  ;;  %v5465_v13 = vld [vmem:[%s12046_s3 + $0x30] sm:$0xff]  ;;  %5542 = vmatpush.msra.mxu1 %v6484_v5  ;;  %v5463_v3 = vld [vmem:[%s12046_s3 + $0x20] sm:$0xff] }
 0x7be   :  { %v5643_v30 = vld [vmem:[%s12050_s7 + $0xf8] sm:$0xff] }
 0x7bf   :  { %5644 = vmatpush.msra.mxu3 %v5643_v30  ;;  %5664 = vmatpush.msrb.mxu1 %v5627_v42 }
 0x7c1   :  { %v5376_v26 = vpop.permute.xlu2 %5375 }
 0x7c3   :  { %v5312_v23 = vpop.permute.xlu1 %5311 }
 0x7c4   :  { %v5316_v49 = vsel %vm5315_vm7, %v5310_v24, %v5312_v23  ;;  %v5317_v11 = vsel %vm5315_vm7, %v5312_v23, %v5314_v19  ;;  %v6471_v24 = vld [vmem:[%s12046_s3 + $0xa8] sm:$0xff]  ;;  %v6468_v23 = vld [vmem:[%s12046_s3 + $0x90] sm:$0xff] }
 0x7c5   :  { %v5320_v32 = vmax.f32 %v5307_v59, %v5316_v49  ;;  %v5321_v54 = vmax.f32 %v5308_v50, %v5317_v11  ;;  %v5464_v19 = vld [vmem:[%s12046_s3 + $0x28] sm:$0xff]  ;;  %v6469_v59 = vld [vmem:[%s12046_s3 + $0x98] sm:$0xff]  ;;  %v5461_v49 = vld [vmem:[%s12046_s3 + $0x10] sm:$0xff] }
 0x7c6   :  { %v5638_v50 = vld [vmem:[%s12050_s7 + $0xd0] sm:$0xff] }
 0x7c7   :  { %5323 = vst.msk [vmem:[#allocation5] sm:$0xff] %vm5322_vm8, %v5320_v32  ;;  %5326 = vrot.lane.b32.xlu0 %v5320_v32, %s6577_s5  ;;  %v5476_v32 = vld [vmem:[%s12046_s3 + $0x88] sm:$0xff] }
 0x7c9   :  { %v5421_v36 = vpop.permute.xlu2 %5420 }
 0x7cb   :  { %v5362_v15 = vpop.permute.xlu1 %5361 }
 0x7cc   :  { %v5365_v62 = vsel %vm5302_vm3, %v5360_v8, %v5362_v15  ;;  %v5366_v4 = vsel %vm5302_vm3, %v5362_v15, %v5364_v21  ;;  %v5462_v8 = vld [vmem:[%s12046_s3 + $0x18] sm:$0xff]  ;;  %v5460_v21 = vld [vmem:[%s12046_s3 + $0x8] sm:$0xff]  ;;  %v5459_v15 = vld [vmem:[%s12046_s3] sm:$0xff] }
 0x7cd   :  { %v5369_v43 = vmax.f32 %v11525_v34, %v5365_v62  ;;  %v5370_v1 = vmax.f32 %v11697_v47, %v5366_v4  ;;  %v6483_v34 = vld [vmem:[%s12046_s3 + $0x108] sm:$0xff]  ;;  %v6482_v47 = vld [vmem:[%s12046_s3 + $0x100] sm:$0xff] }
 0x7ce   :  { %5504 = vmatpush.msra.mxu0 %v6483_v34  ;;  %v5475_v62 = vld [vmem:[%s12046_s3 + $0x80] sm:$0xff]  ;;  %v5642_v34 = vld [vmem:[%s12050_s7 + $0xf0] sm:$0xff] }
 0x7cf   :  { %5645 = vmatpush.msra.mxu3 %v5642_v34 }
 0x7d0   :  { %5505 = vmatpush.msra.mxu0 %v6482_v47  ;;  %v5641_v47 = vld [vmem:[%s12050_s7 + $0xe8] sm:$0xff] }
 0x7d1   :  { %v5433_v44 = vpop.permute.xlu2 %5432  ;;  %5646 = vmatpush.msra.mxu3 %v5641_v47  ;;  %v5703_v47 = vld [vmem:[%s12052_s9 + $0x50] sm:$0xff] }
 0x7d2   :  { %5506 = vmatpush.msra.mxu0 %v6481_v37 }
 0x7d3   :  { %v5374_v61 = vpop.permute.xlu1 %5373 }
 0x7d4   :  { %v5377_v18 = vsel %vm5315_vm7, %v5372_v60, %v5374_v61  ;;  %v5378_v58 = vsel %vm5315_vm7, %v5374_v61, %v5376_v26  ;;  %5507 = vmatpush.msra.mxu0 %v6480_v52 }
 0x7d5   :  { %v5381_v33 = vmax.f32 %v5369_v43, %v5377_v18  ;;  %v5382_v2 = vmax.f32 %v5370_v1, %v5378_v58 }
 0x7d6   :  { %5508 = vmatpush.msra.mxu0 %v6479_v17  ;;  %v5626_v17 = vld [vmem:[%s12050_s7 + $0x70] sm:$0xff] }
 0x7d7   :  { %5383 = vst.msk [vmem:[#allocation5 + $0x10] sm:$0xff] %vm5322_vm8, %v5381_v33  ;;  %5388 = vrot.lane.b32.xlu1 %v5382_v2, %s6577_s5  ;;  %5386 = vrot.lane.b32.xlu0 %v5381_v33, %s6577_s5 }
 0x7d8   :  { %5509 = vmatpush.msra.mxu0 %v6478_v51  ;;  %5665 = vmatpush.msrb.mxu1 %v5626_v17  ;;  %v5635_v51 = vld [vmem:[%s12050_s7 + $0xb8] sm:$0xff] }
 0x7da   :  { %5510 = vmatpush.msra.mxu0 %v6477_v12  ;;  %v5622_v12 = vld [vmem:[%s12050_s7 + $0x50] sm:$0xff] }
 0x7db   :  { %v5419_v29 = vpop.permute.xlu1 %5418 }
 0x7dc   :  { %v5422_v28 = vsel %vm5302_vm3, %v5417_v39, %v5419_v29  ;;  %v5423_v55 = vsel %vm5302_vm3, %v5419_v29, %v5421_v36  ;;  %5511 = vmatpush.msra.mxu0 %v6476_v41  ;;  %v5640_v36 = vld [vmem:[%s12050_s7 + $0xe0] sm:$0xff]  ;;  %v5615_v41 = vld [vmem:[%s12050_s7 + $0x18] sm:$0xff] }
 0x7dd   :  { %v5426_v35 = vmax.f32 %v11547_v45, %v5422_v28  ;;  %v5427_v31 = vmax.f32 %v11722_v27, %v5423_v55  ;;  %v6475_v45 = vld [vmem:[%s12046_s3 + $0xc8] sm:$0xff]  ;;  %5647 = vmatpush.msra.mxu3 %v5640_v36  ;;  %v5624_v55 = vld [vmem:[%s12050_s7 + $0x60] sm:$0xff] }
 0x7de   :  { %v5468_v27 = vld [vmem:[%s12046_s3 + $0x48] sm:$0xff]  ;;  %5512 = vmatpush.msra.mxu0 %v6475_v45  ;;  %v5631_v45 = vld [vmem:[%s12050_s7 + $0x98] sm:$0xff] }
 0x7df   :  { %5328 = vrot.lane.b32.xlu1 %v5321_v54, %s6577_s5  ;;  %5559 = vmatpush.msra.mxu2 %v5468_v27  ;;  %v5625_v28 = vld [vmem:[%s12050_s7 + $0x68] sm:$0xff]  ;;  %v5614_v27 = vld [vmem:[%s12050_s7 + $0x10] sm:$0xff] }
 0x7e0   :  { %5513 = vmatpush.msra.mxu0 %v6474_v6  ;;  %5648 = vmatpush.msra.mxu3 %v5639_v56  ;;  %v5630_v6 = vld [vmem:[%s12050_s7 + $0x90] sm:$0xff]  ;;  %v5702_v36 = vld [vmem:[%s12052_s9 + $0x48] sm:$0xff]  ;;  %v5697_v56 = vld [vmem:[%s12052_s9 + $0x20] sm:$0xff] }
 0x7e1   :  { %5560 = vmatpush.msra.mxu2 %v5467_v7  ;;  %5666 = vmatpush.msrb.mxu1 %v5625_v28  ;;  %v5613_v7 = vld [vmem:[%s12050_s7 + $0x8] sm:$0xff] }
 0x7e2   :  { %5514 = vmatpush.msra.mxu0 %v6473_v10  ;;  %5649 = vmatpush.msra.mxu3 %v5638_v50  ;;  %v5612_v10 = vld [vmem:[%s12050_s7] sm:$0xff]  ;;  %v5696_v50 = vld [vmem:[%s12052_s9 + $0x18] sm:$0xff] }
 0x7e3   :  { %v5431_v25 = vpop.permute.xlu1 %5430  ;;  %5561 = vmatpush.msra.mxu2 %v5466_v0  ;;  %5667 = vmatpush.msrb.mxu1 %v5624_v55  ;;  %v5629_v0 = vld [vmem:[%s12050_s7 + $0x88] sm:$0xff] }
 0x7e4   :  { %v5434_v16 = vsel %vm5315_vm7, %v5429_v57, %v5431_v25  ;;  %v5435_v14 = vsel %vm5315_vm7, %v5431_v25, %v5433_v44  ;;  %5515 = vmatpush.msra.mxu0 %v6472_v53  ;;  %v5634_v57 = vld [vmem:[%s12050_s7 + $0xb0] sm:$0xff]  ;;  %v5621_v44 = vld [vmem:[%s12050_s7 + $0x48] sm:$0xff]  ;;  %v5619_v25 = vld [vmem:[%s12050_s7 + $0x38] sm:$0xff] }
 0x7e5   :  { %v5438_v48 = vmax.f32 %v5426_v35, %v5434_v16  ;;  %v5439_v46 = vmax.f32 %v5427_v31, %v5435_v14  ;;  %5562 = vmatpush.msra.mxu2 %v5465_v13  ;;  %5668 = vmatpush.msrb.mxu1 %v5623_v38  ;;  %v5620_v35 = vld [vmem:[%s12050_s7 + $0x40] sm:$0xff]  ;;  %v5633_v31 = vld [vmem:[%s12050_s7 + $0xa8] sm:$0xff]  ;;  %v5618_v16 = vld [vmem:[%s12050_s7 + $0x30] sm:$0xff] }
 0x7e6   :  { %5516 = vmatpush.msra.mxu0 %v6471_v24  ;;  %v5632_v14 = vld [vmem:[%s12050_s7 + $0xa0] sm:$0xff]  ;;  %v5708_v13 = vld [vmem:[%s12052_s9 + $0x78] sm:$0xff]  ;;  %v5707_v24 = vld [vmem:[%s12052_s9 + $0x70] sm:$0xff] }
 0x7e7   :  { %5440 = vst.msk [vmem:[#allocation5 + $0x20] sm:$0xff] %vm5322_vm8, %v5438_v48  ;;  %5334 = vrot.lane.b32.xlu1 %v5321_v54, %s6573_s23  ;;  %5445 = vrot.lane.b32.xlu0 %v5439_v46, %s6577_s5  ;;  %v5637_v54 = vld [vmem:[%s12050_s7 + $0xc8] sm:$0xff]  ;;  %v5628_v53 = vld [vmem:[%s12050_s7 + $0x80] sm:$0xff] }
 0x7e8   :  { %5443 = vrot.lane.b32.xlu2 %v5438_v48, %s6577_s5  ;;  %5563 = vmatpush.msra.mxu2 %v5464_v19  ;;  %v5617_v48 = vld [vmem:[%s12050_s7 + $0x28] sm:$0xff] }
 0x7e9   :  { %5517 = vmatpush.msra.mxu0 %v6470_v9  ;;  %5650 = vmatpush.msra.mxu3 %v5637_v54  ;;  %v5706_v19 = vld [vmem:[%s12052_s9 + $0x68] sm:$0xff]  ;;  %v5705_v9 = vld [vmem:[%s12052_s9 + $0x60] sm:$0xff] }
 0x7ea   :  { %5564 = vmatpush.msra.mxu2 %v5463_v3  ;;  %5669 = vmatpush.msrb.mxu1 %v5622_v12  ;;  %v5704_v3 = vld [vmem:[%s12052_s9 + $0x58] sm:$0xff]  ;;  %v6503_v54 = vld [vmem:[%s12051_s8] ss:$0 sm:$0xff] }
 0x7eb   :  { %5518 = vmatpush.msra.mxu0 %v6469_v59  ;;  %5651 = vmatpush.msra.mxu3 %v5636_v22 }
 0x7ec   :  { %5565 = vmatpush.msra.mxu2 %v5462_v8  ;;  %5670 = vmatpush.msrb.mxu1 %v5621_v44 }
 0x7ed   :  { %5519 = vmatpush.msra.mxu0 %v6468_v23  ;;  %5652 = vmatpush.msra.mxu3 %v5635_v51 }
 0x7ee   :  { %5566 = vmatpush.msra.mxu2 %v5461_v49  ;;  %5671 = vmatpush.msrb.mxu1 %v5620_v35 }
 0x7ef   :  { %5590 = vmatpush.msrb.mxu0 %v5476_v32  ;;  %5653 = vmatpush.msra.mxu3 %v5634_v57  ;;  %v6502_v32 = vld [vmem:[%s12049_s6] ss:$0 sm:$0xff] }
 0x7f0   :  { %5393 = vrot.lane.b32.xlu2 %v5382_v2, %s6573_s23  ;;  %5567 = vmatpush.msra.mxu2 %v5460_v21  ;;  %v6504_v57 = vld [vmem:[%s12053_s10] ss:$0 sm:$0xff] }
 0x7f1   :  { %5591 = vmatpush.msrb.mxu0 %v5475_v62  ;;  %5654 = vmatpush.msra.mxu3 %v5633_v31 }
 0x7f2   :  { %5568 = vmatpush.msra.mxu2 %v5459_v15  ;;  %5672 = vmatpush.msrb.mxu1 %v5619_v25 }
 0x7f3   :  { %5655 = vmatpush.msra.mxu3 %v5632_v14  ;;  %v5733_v14 = vlaneseq }
 0x7f4   :  { %5673 = vmatpush.msrb.mxu1 %v5618_v16  ;;  %5713 = vmatpush.msrb.mxu2 %v5708_v13 }
 0x7f5   :  { %5656 = vmatpush.msra.mxu3 %v5631_v45 }
 0x7f6   :  { %5674 = vmatpush.msrb.mxu1 %v5617_v48  ;;  %5714 = vmatpush.msrb.mxu2 %v5707_v24 }
 0x7f7   :  { %5657 = vmatpush.msra.mxu3 %v5630_v6 }
 0x7f8   :  { %5450 = vrot.lane.b32.xlu2 %v5439_v46, %s6573_s23  ;;  %v5616_v46 = vld [vmem:[%s12050_s7 + $0x20] sm:$0xff]  ;;  %5715 = vmatpush.msrb.mxu2 %v5706_v19  ;;  %s5765_s7 = sld [smem:[#allocation6 + $0x3]] }
 0x7f9   :  { %5675 = vmatpush.msrb.mxu1 %v5616_v46  ;;  %5658 = vmatpush.msra.mxu3 %v5629_v0 }
 0x7fa   :  { %5716 = vmatpush.msrb.mxu2 %v5705_v9 }
 0x7fb   :  { %5676 = vmatpush.msrb.mxu1 %v5615_v41  ;;  %5659 = vmatpush.msra.mxu3 %v5628_v53  ;;  %v5734_v41 = vand.u32 127, %v5733_v14 }
 0x7fc   :  { %5717 = vmatpush.msrb.mxu2 %v5704_v3 }
 0x7fd   :  { %5677 = vmatpush.msrb.mxu1 %v5614_v27  ;;  %vm5735_vm0 = vcmp.eq.s32.totalorder %v5734_v41, 0 }
 0x7fe   :  { %5718 = vmatpush.msrb.mxu2 %v5703_v47  ;;  %v5690_v28 = vstv %s5765_s7 }
 0x7ff   :  { %5678 = vmatpush.msrb.mxu1 %v5613_v7 }
 0x800   :  { %5719 = vmatpush.msrb.mxu2 %v5702_v36 }
 0x801   :  { %5679 = vmatpush.msrb.mxu1 %v5612_v10 }
 0x839   :  { %v5327_v60 = vpop.permute.xlu0 %5326 }
 0x842   :  { %v5444_v26 = vpop.permute.xlu2 %5443 }
 0x849   :  { %v5387_v4 = vpop.permute.xlu0 %5386  ;;  %v5389_v43 = vpop.permute.xlu1 %5388 }
 0x84a   :  { %v5394_v1 = vpop.permute.xlu2 %5393  ;;  %v5390_v61 = vsel %vm5302_vm3, %v5387_v4, %v5389_v43 }
 0x84b   :  { %5397 = vst.msk [vmem:[#allocation5 + $0x18] sm:$0xff] %vm5339_vm9, %v5394_v1 }
 0x84c   :  { %5392 = vst.msk [vmem:[#allocation5 + $0x10] sm:$0xff] %vm5332_vm10, %v5390_v61 }
 0x84d   :  { %5396 = vst.msk [vmem:[#allocation5 + $0x10] sm:$0xff] %vm5337_vm12, %v5394_v1 }
 0x851   :  { %v5329_v18 = vpop.permute.xlu1 %5328 }
 0x852   :  { %v5451_v58 = vpop.permute.xlu2 %5450  ;;  %v5330_v33 = vsel %vm5302_vm3, %v5327_v60, %v5329_v18  ;;  %v5458_v2 = vld [vmem:[#allocation5 + $0x18] sm:$0xff] }
 0x853   :  { %5454 = vst.msk [vmem:[#allocation5 + $0x28] sm:$0xff] %vm5339_vm9, %v5451_v58  ;;  %6486 = vmatmul.msk.f32.vlgmr.msra.gmra.mxu1 %vm5339_vm9, %v5458_v2 }
 0x854   :  { %5333 = vst.msk [vmem:[#allocation5] sm:$0xff] %vm5332_vm10, %v5330_v33  ;;  %v5457_v39 = vld [vmem:[#allocation5 + $0x10] sm:$0xff] }
 0x855   :  { %5520 = vmatmul.f32.vlgmr.msra.gmra.mxu0 %v5457_v39 }
 0x859   :  { %v5446_v40 = vpop.permute.xlu0 %5445  ;;  %v5335_v63 = vpop.permute.xlu1 %5334 }
 0x85a   :  { %v5447_v11 = vsel %vm5302_vm3, %v5444_v26, %v5446_v40  ;;  %5338 = vst.msk [vmem:[#allocation5] sm:$0xff] %vm5337_vm12, %v5335_v63  ;;  %v5478_v37 = vld [vmem:[#allocation5 + $0x28] sm:$0xff]  ;;  %v5607_v26 = vstv %s5764_s14  ;;  %v5701_v40 = vld [vmem:[%s12052_s9 + $0x40] sm:$0xff] }
 0x85b   :  { %5449 = vst.msk [vmem:[#allocation5 + $0x20] sm:$0xff] %vm5332_vm10, %v5447_v11  ;;  %6487 = vmatmul.msk.f32.gmra.mxu1 %vm5339_vm9, %v5478_v37  ;;  %5720 = vmatpush.msrb.mxu2 %v5701_v40  ;;  %v5699_v11 = vld [vmem:[%s12052_s9 + $0x30] sm:$0xff]  ;;  %v5698_v37 = vld [vmem:[%s12052_s9 + $0x28] sm:$0xff] }
 0x85c   :  { %5453 = vst.msk [vmem:[#allocation5 + $0x20] sm:$0xff] %vm5337_vm12, %v5451_v58 }
 0x85d   :  { %5340 = vst.msk [vmem:[#allocation5 + $0x8] sm:$0xff] %vm5339_vm9, %v5335_v63  ;;  %v5700_v63 = vld [vmem:[%s12052_s9 + $0x38] sm:$0xff] }
 0x85e   :  { %5721 = vmatpush.msrb.mxu2 %v5700_v63 }
 0x860   :  { %5722 = vmatpush.msrb.mxu2 %v5699_v11 }
 0x861   :  { %v5455_v29 = vld [vmem:[#allocation5] sm:$0xff] }
 0x862   :  { %5569 = vmatmul.f32.vlgmr.msra.gmra.mxu2 %v5455_v29  ;;  %v5695_v29 = vld [vmem:[%s12052_s9 + $0x10] sm:$0xff] }
 0x863   :  { %v5477_v20 = vld [vmem:[#allocation5 + $0x20] sm:$0xff]  ;;  %5723 = vmatpush.msrb.mxu2 %v5698_v37 }
 0x864   :  { %5523 = vmatmul.f32.gmra.mxu0 %v5477_v20  ;;  %v5456_v52 = vld [vmem:[#allocation5 + $0x8] sm:$0xff] }
 0x865   :  { %5724 = vmatpush.msrb.mxu2 %v5697_v56  ;;  %v5694_v20 = vld [vmem:[%s12052_s9 + $0x8] sm:$0xff] }
 0x867   :  { %5725 = vmatpush.msrb.mxu2 %v5696_v50 }
 0x869   :  { %5726 = vmatpush.msrb.mxu2 %v5695_v29 }
 0x86a   :  { %5572 = vmatmul.f32.gmra.mxu2 %v5457_v39 }
 0x86b   :  { %5727 = vmatpush.msrb.mxu2 %v5694_v20 }
 0x86c   :  { %6488 = vmatmul.msk.f32.vlgmr.msrb.gmra.mxu0 %vm5339_vm9, %v5456_v52  ;;  %v5693_v52 = vld [vmem:[%s12052_s9] sm:$0xff] }
 0x86d   :  { %5728 = vmatpush.msrb.mxu2 %v5693_v52 }
 0x874   :  { %6489 = vmatmul.msk.f32.gmra.mxu0 %vm5339_vm9, %v5458_v2 }
 0x8d0   :  { %v5544_v23 = vpop.f32.mrf.mxu1 }
 0x8d2   :  { %v5521_v5 = vpop.f32.mrf.mxu0 }
 0x8d3   :  { %v5545_v49 = vadd.f32 %v5544_v23, %v5521_v5 }
 0x8d8   :  { %v5547_v4 = vpop.f32.mrf.mxu1 }
 0x8e1   :  { %v5524_v59 = vpop.f32.mrf.mxu0 }
 0x8e2   :  { %v5548_v1 = vadd.f32 %v5547_v4, %v5524_v59 }
 0x8e5   :  { %v5570_v8 = vpop.f32.mrf.mxu2 }
 0x8e6   :  { %v5571_v21 = vadd.f32 %v5570_v8, %v5545_v49 }
 0x8e9   :  { %v5593_v15 = vpop.f32.mrf.mxu0 }
 0x8ea   :  { %v5594_v60 = vadd.f32 %v5593_v15, %v5571_v21 }
 0x8ec   :  { %v5603_v62 = vadd.f32 %v6502_v32, %v5594_v60 }
 0x8ed   :  { %v5573_v43 = vpop.f32.mrf.mxu2 }
 0x8ee   :  { %vm5605_vm13 = vcmp.gt.f32.partialorder %v5603_v62, 0.0  ;;  %v5608_v61 = vmul.f32 %v5607_v26, %v5603_v62  ;;  %v5574_v18 = vadd.f32 %v5573_v43, %v5548_v1 }
 0x8f0   :  { %v5610_v58 = vsel %vm5605_vm13, %v5603_v62, %v5608_v61 }
 0x8f1   :  { %v5596_v33 = vpop.f32.mrf.mxu0  ;;  %5680 = vmatmul.f32.vlgmr.msrb.gmra.mxu1 %v5610_v58 }
 0x8f2   :  { %v5597_v2 = vadd.f32 %v5596_v33, %v5574_v18 }
 0x8f4   :  { %v5604_v39 = vadd.f32 %v6502_v32, %v5597_v2 }
 0x8f6   :  { %vm5606_vm15 = vcmp.gt.f32.partialorder %v5604_v39, 0.0  ;;  %v5609_v30 = vmul.f32 %v5607_v26, %v5604_v39 }
 0x8f8   :  { %v5611_v34 = vsel %vm5606_vm15, %v5604_v39, %v5609_v30 }
 0x8f9   :  { %5660 = vmatmul.f32.vlgmr.msra.gmra.mxu3 %v5611_v34 }
 0x96e   :  { %v5681_v42 = vpop.f32.mrf.mxu1 }
 0x97c   :  { %v5661_v17 = vpop.f32.mrf.mxu3 }
 0x97d   :  { %v5682_v22 = vadd.f32 %v5681_v42, %v5661_v17 }
 0x97f   :  { %v5688_v55 = vadd.f32 %v6503_v54, %v5682_v22 }
 0x981   :  { %vm5689_vm1 = vcmp.gt.f32.partialorder %v5688_v55, 0.0  ;;  %v5691_v51 = vmul.f32 %v5690_v28, %v5688_v55 }
 0x983   :  { %v5692_v38 = vsel %vm5689_vm1, %v5688_v55, %v5691_v51 }
 0x984   :  { %5729 = vmatmul.f32.vlgmr.msrb.gmra.mxu2 %v5692_v38 }
 0xa07   :  { %v5730_v12 = vpop.f32.mrf.mxu2 }
 0xa08   :  { %v5731_v44 = vadd.f32 %v6504_v57, %v5730_v12 }
 0xa0a   :  { %v6490_v35 = vmul.f32 -1.442695, %v5731_v44 }
 0xa0c   :  { %6505 = vpow2.f32 %v6490_v35 }
 0xa12   :  { %v6506_v31 = vpop.eup %6505 }
 0xa13   :  { %v5739_v25 = vadd.f32 1.0, %v6506_v31 }
 0xa15   :  { %6507 = vrcp.f32 %v5739_v25  ;;  %v5751_v45 = vand.u32 2147483648, %v5739_v25  ;;  %v5749_v6 = vand.u32 2147483647, %v5739_v25  ;;  %vm5745_vm5 = vweird.f32 %v5739_v25 }
 0xa17   :  { %v5752_v10 = vor.u32 1.1754944e-38, %v5751_v45  ;;  %vm5750_vm14 = vcmp.eq.f32.partialorder %v5749_v6, 8.507059e+37 }
 0xa1b   :  { %v6508_v16 = vpop.eup %6507 }
 0xa1c   :  { %v5741_v48 = vmul.f32 %v6508_v16, %v5739_v25  ;;  %vm5746_vm4 = vweird.f32 %v6508_v16 }
 0xa1d   :  { %vm5747_vm11 = vmor %vm5745_vm5, %vm5746_vm4 }
 0xa1e   :  { %v5742_v46 = vsub.f32 1.0, %v5741_v48 }
 0xa20   :  { %v5743_v27 = vmul.f32 %v6508_v16, %v5742_v46 }
 0xa22   :  { %v5744_v7 = vadd.f32 %v6508_v16, %v5743_v27 }
 0xa24   :  { %v5748_v0 = vsel %vm5747_vm11, %v6508_v16, %v5744_v7 }
 0xa25   :  { %v5753_v53 = vsel %vm5750_vm14, %v5752_v10, %v5748_v0 }
 0xa26   :  { %v5755_v5 = vsel %vm5735_vm0, %v5753_v53, %v5731_v44 }
 0xa27   :  { %5757 = vst.msk [vmem:[%s12055_s12] sm:$0xff] %vm5756_vm2, %v5755_v5 }
 0xa28   :  { %5762 = vsyncpa [#allocation7], 1 }

</bundles_post_ra>
